<compile_context>
chip_gen: v5e
topology: v5e:2x2
jax: 0.10.0
libtpu: 0.0.40
codegen_flags: <defaults>
</compile_context>

<pallas_src>
import functools

import jax
import jax.numpy as jnp
from jax.experimental import pallas as pl
from jax.experimental.pallas import tpu as pltpu


def _round_up(x, m):
    return ((x + m - 1) // m) * m


# ---------------------------------------------------------------------------
# Pallas kernel: out = relu?(X @ W + b), single K step, M-tiled grid.
#   X block: (tm, Kp) bf16, W block: (Kp, Np) bf16 (resident across M steps),
#   b block: (1, Np) f32, out: (tm, Np) f32.
# ---------------------------------------------------------------------------
def _linear_kernel(x_ref, w_ref, b_ref, o_ref, *, apply_relu):
    acc = jnp.dot(x_ref[...], w_ref[...], preferred_element_type=jnp.float32)
    acc = acc + b_ref[...]
    if apply_relu:
        acc = jnp.maximum(acc, 0.0)
    o_ref[...] = acc


def pallas_linear(x, wp, bp, n_out, relu=False, tm_max=512):
    """x: (M, K) f32. wp: (Kp, Np) bf16 pre-padded weight. bp: (1, Np) f32.
    Returns (M, n_out) f32 = relu?(x @ w + b)."""
    M, K = x.shape
    Kp, Np = wp.shape
    assert K <= Kp and Np % 128 == 0

    tm = min(tm_max, _round_up(M, 16))
    Mp = _round_up(M, tm)

    # Only the (small) activation is padded/cast at runtime; weights/biases
    # were padded once in prepare_params (review: hoist weight padding).
    xp = jnp.zeros((Mp, Kp), jnp.bfloat16).at[:M, :K].set(x.astype(jnp.bfloat16))

    kernel = functools.partial(_linear_kernel, apply_relu=relu)
    out = pl.pallas_call(
        kernel,
        out_shape=jax.ShapeDtypeStruct((Mp, Np), jnp.float32),
        grid_spec=pltpu.PrefetchScalarGridSpec(
            num_scalar_prefetch=0,
            grid=(Mp // tm,),
            in_specs=[
                pl.BlockSpec((tm, Kp), lambda i: (i, 0)),   # activation tile
                pl.BlockSpec((Kp, Np), lambda i: (0, 0)),   # weight, VMEM-resident
                pl.BlockSpec((1, Np), lambda i: (0, 0)),    # bias, VMEM-resident
            ],
            out_specs=pl.BlockSpec((tm, Np), lambda i: (i, 0)),
        ),
        compiler_params=pltpu.CompilerParams(
            dimension_semantics=("parallel",),   # M blocks -> both v7x TCs
            vmem_limit_bytes=32 << 20,           # fc working set ~11 MB bf16
        ),
    )(xp, wp, bp)
    return out[:M, :n_out]


# ---------------------------------------------------------------------------
# Pallas kernel: fused predictor rollout.
#   Grid = (L,) "arbitrary". Recurrent state lives in VMEM scratch; all
#   predictor weights are full-extent resident blocks (~0.9 MB f32 total).
#   fc1 is split into a state part (rows 0..repr_dim-1) and an action part
#   (rows repr_dim.., zero-padded) so no in-kernel concatenation is needed
#   (mathematically identical to the concatenated matmul).
# ---------------------------------------------------------------------------
def _rollout_kernel(s0_ref, a_ref, wa_ref, ba_ref, w1s_ref, w1a_ref, b1_ref,
                    w2_ref, b2_ref, o_ref, s_scr):
    @pl.when(pl.program_id(0) == 0)
    def _():
        s_scr[...] = s0_ref[...]

    s = s_scr[...]                                   # (Bp, 128) f32
    a = a_ref[...]                                   # (Bp, 128) f32, cols >=2 are 0
    a_emb = jnp.dot(a, wa_ref[...], preferred_element_type=jnp.float32) + ba_ref[...]
    h = (jnp.dot(s, w1s_ref[...], preferred_element_type=jnp.float32)
         + jnp.dot(a_emb, w1a_ref[...], preferred_element_type=jnp.float32)
         + b1_ref[...])
    h = jnp.maximum(h, 0.0)
    s_new = jnp.dot(h, w2_ref[...], preferred_element_type=jnp.float32) + b2_ref[...]

    s_scr[...] = s_new
    o_ref[...] = s_new


def predictor_rollout(s0_p, a_p, pp, L, Bp):
    """s0_p: (Bp, 128) f32, a_p: (L*Bp, 128) f32 (action cols 0..1, rest 0).
    Returns (L*Bp, 128) f32: predicted states 1..L."""
    D, H = 128, 512
    return pl.pallas_call(
        _rollout_kernel,
        out_shape=jax.ShapeDtypeStruct((L * Bp, D), jnp.float32),
        grid_spec=pltpu.PrefetchScalarGridSpec(
            num_scalar_prefetch=0,
            grid=(L,),
            in_specs=[
                pl.BlockSpec((Bp, D), lambda i: (0, 0)),   # s0 (resident)
                pl.BlockSpec((Bp, D), lambda i: (i, 0)),   # action at step i
                pl.BlockSpec((D, D), lambda i: (0, 0)),    # act_fc_w (padded)
                pl.BlockSpec((1, D), lambda i: (0, 0)),    # act_fc_b (padded)
                pl.BlockSpec((D, H), lambda i: (0, 0)),    # fc1_w state rows
                pl.BlockSpec((D, H), lambda i: (0, 0)),    # fc1_w action rows (padded)
                pl.BlockSpec((1, H), lambda i: (0, 0)),    # fc1_b
                pl.BlockSpec((H, D), lambda i: (0, 0)),    # fc2_w
                pl.BlockSpec((1, D), lambda i: (0, 0)),    # fc2_b
            ],
            out_specs=pl.BlockSpec((Bp, D), lambda i: (i, 0)),
            scratch_shapes=[pltpu.VMEM((Bp, D), jnp.float32)],
        ),
        compiler_params=pltpu.CompilerParams(
            dimension_semantics=("arbitrary",),   # recurrent: must be sequential
        ),
    )(s0_p, a_p, pp["p_act_w"], pp["p_act_b"], pp["p_fc1_ws"],
      pp["p_fc1_wa"], pp["p_fc1_b"], pp["p_fc2_w"], pp["p_fc2_b"])


# ---------------------------------------------------------------------------
# im2col (XLA glue): NHWC input -> (B*Ho*Wo, C*k*k) patches, order (C, kh, kw)
# ---------------------------------------------------------------------------
def im2col(x, k=3, stride=2, pad=1):
    B, H, W, C = x.shape
    xp = jnp.pad(x, ((0, 0), (pad, pad), (pad, pad), (0, 0)))
    Ho = (H + 2 * pad - k) // stride + 1
    Wo = (W + 2 * pad - k) // stride + 1
    cols = []
    for kh in range(k):
        for kw in range(k):
            cols.append(
                xp[:, kh:kh + stride * (Ho - 1) + 1:stride,
                      kw:kw + stride * (Wo - 1) + 1:stride, :])
    patches = jnp.stack(cols, axis=3)                  # (B, Ho, Wo, k*k, C)
    patches = jnp.transpose(patches, (0, 1, 2, 4, 3))  # (B, Ho, Wo, C, k*k)
    return patches.reshape(B * Ho * Wo, C * k * k), Ho, Wo


# ---------------------------------------------------------------------------
# Model pieces
# ---------------------------------------------------------------------------
def encoder_forward(x, pp):
    """x: (M, 65, 65) f32 -> (M, 128) f32.  All frames batched into M."""
    M = x.shape[0]
    x = x[..., None]                                   # NHWC (M, 65, 65, 1)

    # conv1: K=9 padded to 128 (mostly-zero MXU columns; negligible at this
    # size and it stays inside the single batched call).
    p1, Ho1, Wo1 = im2col(x)                           # (M*33*33, 9)
    h1 = pallas_linear(p1, pp["conv1_w"], pp["conv1_b"], n_out=32, relu=True)
    h1 = h1.reshape(M, Ho1, Wo1, 32)

    p2, Ho2, Wo2 = im2col(h1)                          # (M*17*17, 288)
    h2 = pallas_linear(p2, pp["conv2_w"], pp["conv2_b"], n_out=64, relu=True)

    # NHWC flatten; fc_w rows were permuted at prep time to match PyTorch's
    # NCHW view(B, -1) — no per-call transpose.
    flat = h2.reshape(M, Ho2 * Wo2 * 64)
    return pallas_linear(flat, pp["fc_w"], pp["fc_b"], n_out=128, relu=False)


def jepa_forward(states, actions, pp, is_training=False):
    """states: (B, L+1, 1, 65, 65), actions: (B, L, 2)."""
    B, L, _ = actions.shape
    repr_dim = 128

    if is_training:
        # Batch all L+1 encoder calls into one pass (identical math per row).
        frames = states[:, :, 0, :, :].reshape(B * (L + 1), 65, 65)
        enc_all = encoder_forward(frames, pp).reshape(B, L + 1, repr_dim)
        s0 = enc_all[:, 0, :]
        encoded = enc_all[:, 1:, :]
    else:
        s0 = encoder_forward(states[:, 0, 0, :, :], pp)
        encoded = None

    # Fused L-step rollout (pad batch to a sublane multiple; padded rows are
    # sliced away afterwards).
    Bp = max(8, _round_up(B, 8))
    s0_p = jnp.zeros((Bp, repr_dim), jnp.float32).at[:B].set(s0)
    a_p = jnp.zeros((L, Bp, 128), jnp.float32).at[:, :B, :2].set(
        jnp.transpose(actions, (1, 0, 2))).reshape(L * Bp, 128)

    rolled = predictor_rollout(s0_p, a_p, pp, L, Bp)       # (L*Bp, 128)
    rolled = rolled.reshape(L, Bp, repr_dim)[:, :B, :]     # (L, B, 128)
    preds = jnp.transpose(rolled, (1, 0, 2))               # (B, L, 128)
    predicted = jnp.concatenate([s0[:, None, :], preds], axis=1)  # (B, L+1, 128)
    return predicted, encoded


# ---------------------------------------------------------------------------
# Parameter prep: pad / cast / permute once (hoisted out of the forward pass)
# ---------------------------------------------------------------------------
def prepare_params(params, repr_dim=128, action_dim=8):
    bf16 = jnp.bfloat16

    def pad2(w, kp, np_):
        k, n = w.shape
        return jnp.zeros((kp, np_), w.dtype).at[:k, :n].set(w)

    def pad_bias(b, np_):
        return jnp.zeros((1, np_), jnp.float32).at[0, :b.shape[0]].set(b)

    # Encoder conv weights: (out, in, kh, kw) -> (in*k*k, out), pad, bf16.
    w1 = params["conv1_w"].reshape(32, 1 * 9).T          # (9, 32)
    w2 = params["conv2_w"].reshape(64, 32 * 9).T         # (288, 64)

    # Encoder fc: permute rows from NCHW flatten order to NHWC flatten order.
    H = W = 17
    C = 64
    hh = jnp.arange(H)[:, None, None]
    ww = jnp.arange(W)[None, :, None]
    cc = jnp.arange(C)[None, None, :]
    perm = (cc * (H * W) + hh * W + ww).reshape(-1)       # NHWC pos -> NCHW row
    fc_w = params["fc_w"][perm]                           # (18496, 128)

    return {
        # Encoder (bf16 weights — bandwidth-bound layers).
        "conv1_w": pad2(w1, 128, 128).astype(bf16),
        "conv1_b": pad_bias(params["conv1_b"], 128),
        "conv2_w": pad2(w2, 384, 128).astype(bf16),
        "conv2_b": pad_bias(params["conv2_b"], 128),
        "fc_w":    pad2(fc_w, _round_up(fc_w.shape[0], 128), 128).astype(bf16),
        "fc_b":    pad_bias(params["fc_b"], 128),
        # Predictor (kept f32: tiny, VMEM-resident across the whole rollout,
        # avoids extra rounding in the recurrence).
        "p_act_w":  pad2(params["act_fc_w"], 128, 128),               # (128,128)
        "p_act_b":  pad_bias(params["act_fc_b"], 128),                # (1,128)
        "p_fc1_ws": params["fc1_w"][:repr_dim],                       # (128,512)
        "p_fc1_wa": pad2(params["fc1_w"][repr_dim:], 128, repr_dim * 4),  # (128,512)
        "p_fc1_b":  params["fc1_b"][None, :],                         # (1,512)
        "p_fc2_w":  params["fc2_w"],                                  # (512,128)
        "p_fc2_b":  params["fc2_b"][None, :],                         # (1,128)
    }


# ---------------------------------------------------------------------------
# Deterministic parameter init (PyTorch-style uniform(-1/sqrt(fan_in), +))
# ---------------------------------------------------------------------------
def init_params(key, repr_dim=128, action_dim=8):
    def unif(k, shape, fan_in):
        bound = 1.0 / jnp.sqrt(jnp.float32(fan_in))
        return jax.random.uniform(k, shape, jnp.float32, -bound, bound)

    ks = jax.random.split(key, 12)
    h = w = 17  # encoder output spatial after two stride-2 convs on 65x65
    return {
        "conv1_w": unif(ks[0], (32, 1, 3, 3), 1 * 9),
        "conv1_b": unif(ks[1], (32,), 1 * 9),
        "conv2_w": unif(ks[2], (64, 32, 3, 3), 32 * 9),
        "conv2_b": unif(ks[3], (64,), 32 * 9),
        "fc_w":    unif(ks[4], (h * w * 64, 128), h * w * 64),
        "fc_b":    unif(ks[5], (128,), h * w * 64),
        "act_fc_w": unif(ks[6], (2, action_dim), 2),
        "act_fc_b": unif(ks[7], (action_dim,), 2),
        "fc1_w":   unif(ks[8], (repr_dim + action_dim, repr_dim * 4),
                        repr_dim + action_dim),
        "fc1_b":   unif(ks[9], (repr_dim * 4,), repr_dim + action_dim),
        "fc2_w":   unif(ks[10], (repr_dim * 4, repr_dim), repr_dim * 4),
        "fc2_b":   unif(ks[11], (repr_dim,), repr_dim * 4),
    }


if __name__ == "__main__":
    B, L = 2, 3
    repr_dim, action_dim = 128, 8   # repr_dim must equal encoder embed_dim (128)

    key = jax.random.PRNGKey(0)
    k_params, k_states, k_actions = jax.random.split(key, 3)

    params = init_params(k_params, repr_dim=repr_dim, action_dim=action_dim)
    pp = prepare_params(params, repr_dim=repr_dim, action_dim=action_dim)  # once

    states = jax.random.normal(k_states, (B, L + 1, 1, 65, 65), jnp.float32)
    actions = jax.random.normal(k_actions, (B, L, 2), jnp.float32)

    fwd = jax.jit(functools.partial(jepa_forward, is_training=True))
    predicted_embed, encoded_embed = fwd(states, actions, pp)

    jax.block_until_ready(predicted_embed)
    jax.block_until_ready(encoded_embed)

    assert predicted_embed.shape == (B, L + 1, repr_dim)
    assert encoded_embed.shape == (B, L, repr_dim)
    print("KERNEL_OK")
</pallas_src>

<mosaic_0001>
module attributes {stable_mosaic.version = 11 : i64} {
  func.func @_linear_kernel(%arg0: i32, %arg1: memref<512x128xbf16, #tpu.memory_space<vmem>>, %arg2: memref<128x128xbf16, #tpu.memory_space<vmem>>, %arg3: memref<1x128xf32, #tpu.memory_space<vmem>>, %arg4: memref<512x128xf32, #tpu.memory_space<vmem>>) attributes {dimension_semantics = [#tpu.dimension_semantics<parallel>], iteration_bounds = array<i64: 18>, scalar_prefetch = 0 : i64, scratch_operands = 0 : i64, tpu.core_type = #tpu.core_type<tc>, window_params = [{transform_indices = @transform_0, window_bounds = array<i64: 512, 128>}, {pipeline_mode = #tpu.pipeline_mode<synchronous>, transform_indices = @transform_1, window_bounds = array<i64: 128, 128>}, {pipeline_mode = #tpu.pipeline_mode<synchronous>, transform_indices = @transform_2, window_bounds = array<i64: 1, 128>}, {transform_indices = @transform_3, window_bounds = array<i64: 512, 128>}]} {
    %c0 = arith.constant 0 : index
    %c0_0 = arith.constant 0 : index
    %0 = vector.load %arg1[%c0, %c0_0] : memref<512x128xbf16, #tpu.memory_space<vmem>>, vector<512x128xbf16>
    %c0_1 = arith.constant 0 : index
    %c0_2 = arith.constant 0 : index
    %1 = vector.load %arg2[%c0_1, %c0_2] : memref<128x128xbf16, #tpu.memory_space<vmem>>, vector<128x128xbf16>
    %cst = arith.constant dense<0.000000e+00> : vector<512x128xf32>
    %2 = tpu.matmul %0, %1, %cst {dimension_numbers = #tpu.dot_dimension_numbers<[1], [0], [0], [1], [0, 0, 1, 1], [], []>} : vector<512x128xbf16>, vector<128x128xbf16>, vector<512x128xf32> -> vector<512x128xf32>
    %c0_3 = arith.constant 0 : index
    %c0_4 = arith.constant 0 : index
    %3 = vector.load %arg3[%c0_3, %c0_4] : memref<1x128xf32, #tpu.memory_space<vmem>>, vector<1x128xf32>
    %4 = vector.broadcast %3 : vector<1x128xf32> to vector<512x128xf32>
    %5 = arith.addf %2, %4 : vector<512x128xf32>
    %cst_5 = arith.constant 0.000000e+00 : f32
    %6 = vector.broadcast %cst_5 : f32 to vector<512x128xf32>
    %7 = arith.maximumf %5, %6 : vector<512x128xf32>
    %c0_6 = arith.constant 0 : index
    %c0_7 = arith.constant 0 : index
    %8 = vector.load %arg4[%c0_6, %c0_7] : memref<512x128xf32, #tpu.memory_space<vmem>>, vector<512x128xf32>
    tpu.vector_store %arg4[%c0_6, %c0_7], %7 {strides = array<i32>} : memref<512x128xf32, #tpu.memory_space<vmem>>, vector<512x128xf32>,
    return
  }
  func.func @transform_0(%arg0: i32) -> (i32, i32) {
    %c0_i32 = arith.constant 0 : i32
    %c0_i32_0 = arith.constant 0 : i32
    return %arg0, %c0_i32 : i32, i32
  }
  func.func @transform_1(%arg0: i32) -> (i32, i32) {
    %c0_i32 = arith.constant 0 : i32
    %c0_i32_0 = arith.constant 0 : i32
    %c0_i32_1 = arith.constant 0 : i32
    return %c0_i32, %c0_i32_0 : i32, i32
  }
  func.func @transform_2(%arg0: i32) -> (i32, i32) {
    %c0_i32 = arith.constant 0 : i32
    %c0_i32_0 = arith.constant 0 : i32
    %c0_i32_1 = arith.constant 0 : i32
    return %c0_i32, %c0_i32_0 : i32, i32
  }
  func.func @transform_3(%arg0: i32) -> (i32, i32) {
    %c0_i32 = arith.constant 0 : i32
    %c0_i32_0 = arith.constant 0 : i32
    return %arg0, %c0_i32 : i32, i32
  }
}

module attributes {stable_mosaic.version = 11 : i64} {
  func.func @_linear_kernel(%arg0: i32, %arg1: memref<512x384xbf16, #tpu.memory_space<vmem>>, %arg2: memref<384x128xbf16, #tpu.memory_space<vmem>>, %arg3: memref<1x128xf32, #tpu.memory_space<vmem>>, %arg4: memref<512x128xf32, #tpu.memory_space<vmem>>) attributes {dimension_semantics = [#tpu.dimension_semantics<parallel>], iteration_bounds = array<i64: 5>, scalar_prefetch = 0 : i64, scratch_operands = 0 : i64, tpu.core_type = #tpu.core_type<tc>, window_params = [{transform_indices = @transform_0, window_bounds = array<i64: 512, 384>}, {pipeline_mode = #tpu.pipeline_mode<synchronous>, transform_indices = @transform_1, window_bounds = array<i64: 384, 128>}, {pipeline_mode = #tpu.pipeline_mode<synchronous>, transform_indices = @transform_2, window_bounds = array<i64: 1, 128>}, {transform_indices = @transform_3, window_bounds = array<i64: 512, 128>}]} {
    %c0 = arith.constant 0 : index
    %c0_0 = arith.constant 0 : index
    %0 = vector.load %arg1[%c0, %c0_0] : memref<512x384xbf16, #tpu.memory_space<vmem>>, vector<512x384xbf16>
    %c0_1 = arith.constant 0 : index
    %c0_2 = arith.constant 0 : index
    %1 = vector.load %arg2[%c0_1, %c0_2] : memref<384x128xbf16, #tpu.memory_space<vmem>>, vector<384x128xbf16>
    %cst = arith.constant dense<0.000000e+00> : vector<512x128xf32>
    %2 = tpu.matmul %0, %1, %cst {dimension_numbers = #tpu.dot_dimension_numbers<[1], [0], [0], [1], [0, 0, 1, 1], [], []>} : vector<512x384xbf16>, vector<384x128xbf16>, vector<512x128xf32> -> vector<512x128xf32>
    %c0_3 = arith.constant 0 : index
    %c0_4 = arith.constant 0 : index
    %3 = vector.load %arg3[%c0_3, %c0_4] : memref<1x128xf32, #tpu.memory_space<vmem>>, vector<1x128xf32>
    %4 = vector.broadcast %3 : vector<1x128xf32> to vector<512x128xf32>
    %5 = arith.addf %2, %4 : vector<512x128xf32>
    %cst_5 = arith.constant 0.000000e+00 : f32
    %6 = vector.broadcast %cst_5 : f32 to vector<512x128xf32>
    %7 = arith.maximumf %5, %6 : vector<512x128xf32>
    %c0_6 = arith.constant 0 : index
    %c0_7 = arith.constant 0 : index
    %8 = vector.load %arg4[%c0_6, %c0_7] : memref<512x128xf32, #tpu.memory_space<vmem>>, vector<512x128xf32>
    tpu.vector_store %arg4[%c0_6, %c0_7], %7 {strides = array<i32>} : memref<512x128xf32, #tpu.memory_space<vmem>>, vector<512x128xf32>,
    return
  }
  func.func @transform_0(%arg0: i32) -> (i32, i32) {
    %c0_i32 = arith.constant 0 : i32
    %c0_i32_0 = arith.constant 0 : i32
    return %arg0, %c0_i32 : i32, i32
  }
  func.func @transform_1(%arg0: i32) -> (i32, i32) {
    %c0_i32 = arith.constant 0 : i32
    %c0_i32_0 = arith.constant 0 : i32
    %c0_i32_1 = arith.constant 0 : i32
    return %c0_i32, %c0_i32_0 : i32, i32
  }
  func.func @transform_2(%arg0: i32) -> (i32, i32) {
    %c0_i32 = arith.constant 0 : i32
    %c0_i32_0 = arith.constant 0 : i32
    %c0_i32_1 = arith.constant 0 : i32
    return %c0_i32, %c0_i32_0 : i32, i32
  }
  func.func @transform_3(%arg0: i32) -> (i32, i32) {
    %c0_i32 = arith.constant 0 : i32
    %c0_i32_0 = arith.constant 0 : i32
    return %arg0, %c0_i32 : i32, i32
  }
}

module attributes {stable_mosaic.version = 11 : i64} {
  func.func @_linear_kernel(%arg0: i32, %arg1: memref<16x18560xbf16, #tpu.memory_space<vmem>>, %arg2: memref<18560x128xbf16, #tpu.memory_space<vmem>>, %arg3: memref<1x128xf32, #tpu.memory_space<vmem>>, %arg4: memref<16x128xf32, #tpu.memory_space<vmem>>) attributes {dimension_semantics = [#tpu.dimension_semantics<parallel>], iteration_bounds = array<i64: 1>, scalar_prefetch = 0 : i64, scratch_operands = 0 : i64, tpu.core_type = #tpu.core_type<tc>, window_params = [{transform_indices = @transform_0, window_bounds = array<i64: 16, 18560>}, {pipeline_mode = #tpu.pipeline_mode<synchronous>, transform_indices = @transform_1, window_bounds = array<i64: 18560, 128>}, {pipeline_mode = #tpu.pipeline_mode<synchronous>, transform_indices = @transform_2, window_bounds = array<i64: 1, 128>}, {transform_indices = @transform_3, window_bounds = array<i64: 16, 128>}]} {
    %c0 = arith.constant 0 : index
    %c0_0 = arith.constant 0 : index
    %0 = vector.load %arg1[%c0, %c0_0] : memref<16x18560xbf16, #tpu.memory_space<vmem>>, vector<16x18560xbf16>
    %c0_1 = arith.constant 0 : index
    %c0_2 = arith.constant 0 : index
    %1 = vector.load %arg2[%c0_1, %c0_2] : memref<18560x128xbf16, #tpu.memory_space<vmem>>, vector<18560x128xbf16>
    %cst = arith.constant dense<0.000000e+00> : vector<16x128xf32>
    %2 = tpu.matmul %0, %1, %cst {dimension_numbers = #tpu.dot_dimension_numbers<[1], [0], [0], [1], [0, 0, 1, 1], [], []>} : vector<16x18560xbf16>, vector<18560x128xbf16>, vector<16x128xf32> -> vector<16x128xf32>
    %c0_3 = arith.constant 0 : index
    %c0_4 = arith.constant 0 : index
    %3 = vector.load %arg3[%c0_3, %c0_4] : memref<1x128xf32, #tpu.memory_space<vmem>>, vector<1x128xf32>
    %4 = vector.broadcast %3 : vector<1x128xf32> to vector<16x128xf32>
    %5 = arith.addf %2, %4 : vector<16x128xf32>
    %c0_5 = arith.constant 0 : index
    %c0_6 = arith.constant 0 : index
    %6 = vector.load %arg4[%c0_5, %c0_6] : memref<16x128xf32, #tpu.memory_space<vmem>>, vector<16x128xf32>
    tpu.vector_store %arg4[%c0_5, %c0_6], %5 {strides = array<i32>} : memref<16x128xf32, #tpu.memory_space<vmem>>, vector<16x128xf32>,
    return
  }
  func.func @transform_0(%arg0: i32) -> (i32, i32) {
    %c0_i32 = arith.constant 0 : i32
    %c0_i32_0 = arith.constant 0 : i32
    return %arg0, %c0_i32 : i32, i32
  }
  func.func @transform_1(%arg0: i32) -> (i32, i32) {
    %c0_i32 = arith.constant 0 : i32
    %c0_i32_0 = arith.constant 0 : i32
    %c0_i32_1 = arith.constant 0 : i32
    return %c0_i32, %c0_i32_0 : i32, i32
  }
  func.func @transform_2(%arg0: i32) -> (i32, i32) {
    %c0_i32 = arith.constant 0 : i32
    %c0_i32_0 = arith.constant 0 : i32
    %c0_i32_1 = arith.constant 0 : i32
    return %c0_i32, %c0_i32_0 : i32, i32
  }
  func.func @transform_3(%arg0: i32) -> (i32, i32) {
    %c0_i32 = arith.constant 0 : i32
    %c0_i32_0 = arith.constant 0 : i32
    return %arg0, %c0_i32 : i32, i32
  }
}

module attributes {stable_mosaic.version = 11 : i64} {
  func.func @_rollout_kernel(%arg0: i32, %arg1: memref<8x128xf32, #tpu.memory_space<vmem>>, %arg2: memref<8x128xf32, #tpu.memory_space<vmem>>, %arg3: memref<128x128xf32, #tpu.memory_space<vmem>>, %arg4: memref<1x128xf32, #tpu.memory_space<vmem>>, %arg5: memref<128x512xf32, #tpu.memory_space<vmem>>, %arg6: memref<128x512xf32, #tpu.memory_space<vmem>>, %arg7: memref<1x512xf32, #tpu.memory_space<vmem>>, %arg8: memref<512x128xf32, #tpu.memory_space<vmem>>, %arg9: memref<1x128xf32, #tpu.memory_space<vmem>>, %arg10: memref<8x128xf32, #tpu.memory_space<vmem>>, %arg11: memref<8x128xf32, #tpu.memory_space<vmem>>) attributes {dimension_semantics = [#tpu.dimension_semantics<arbitrary>], iteration_bounds = array<i64: 3>, scalar_prefetch = 0 : i64, scratch_operands = 1 : i64, tpu.core_type = #tpu.core_type<tc>, window_params = [{pipeline_mode = #tpu.pipeline_mode<synchronous>, transform_indices = @transform_0, window_bounds = array<i64: 8, 128>}, {transform_indices = @transform_1, window_bounds = array<i64: 8, 128>}, {pipeline_mode = #tpu.pipeline_mode<synchronous>, transform_indices = @transform_2, window_bounds = array<i64: 128, 128>}, {pipeline_mode = #tpu.pipeline_mode<synchronous>, transform_indices = @transform_3, window_bounds = array<i64: 1, 128>}, {pipeline_mode = #tpu.pipeline_mode<synchronous>, transform_indices = @transform_4, window_bounds = array<i64: 128, 512>}, {pipeline_mode = #tpu.pipeline_mode<synchronous>, transform_indices = @transform_5, window_bounds = array<i64: 128, 512>}, {pipeline_mode = #tpu.pipeline_mode<synchronous>, transform_indices = @transform_6, window_bounds = array<i64: 1, 512>}, {pipeline_mode = #tpu.pipeline_mode<synchronous>, transform_indices = @transform_7, window_bounds = array<i64: 512, 128>}, {pipeline_mode = #tpu.pipeline_mode<synchronous>, transform_indices = @transform_8, window_bounds = array<i64: 1, 128>}, {transform_indices = @transform_9, window_bounds = array<i64: 8, 128>}]} {
    %c0_i32 = arith.constant 0 : i32
    %0 = arith.cmpi eq, %arg0, %c0_i32 : i32
    %1 = arith.extui %0 : i1 to i32
    %c0_i32_0 = arith.constant 0 : i32
    %2 = arith.cmpi ne, %1, %c0_i32_0 : i32
    scf.if %2 {
      %c0_26 = arith.constant 0 : index
      %c0_27 = arith.constant 0 : index
      %27 = vector.load %arg1[%c0_26, %c0_27] : memref<8x128xf32, #tpu.memory_space<vmem>>, vector<8x128xf32>
      %c0_28 = arith.constant 0 : index
      %c0_29 = arith.constant 0 : index
      %28 = vector.load %arg11[%c0_28, %c0_29] : memref<8x128xf32, #tpu.memory_space<vmem>>, vector<8x128xf32>
      tpu.vector_store %arg11[%c0_28, %c0_29], %27 {strides = array<i32>} : memref<8x128xf32, #tpu.memory_space<vmem>>, vector<8x128xf32>,
    } else {
    }
    %c0 = arith.constant 0 : index
    %c0_1 = arith.constant 0 : index
    %3 = vector.load %arg11[%c0, %c0_1] : memref<8x128xf32, #tpu.memory_space<vmem>>, vector<8x128xf32>
    %c0_2 = arith.constant 0 : index
    %c0_3 = arith.constant 0 : index
    %4 = vector.load %arg2[%c0_2, %c0_3] : memref<8x128xf32, #tpu.memory_space<vmem>>, vector<8x128xf32>
    %c0_4 = arith.constant 0 : index
    %c0_5 = arith.constant 0 : index
    %5 = vector.load %arg3[%c0_4, %c0_5] : memref<128x128xf32, #tpu.memory_space<vmem>>, vector<128x128xf32>
    %cst = arith.constant dense<0.000000e+00> : vector<8x128xf32>
    %6 = tpu.matmul %4, %5, %cst {dimension_numbers = #tpu.dot_dimension_numbers<[1], [0], [0], [1], [0, 0, 1, 1], [], []>} : vector<8x128xf32>, vector<128x128xf32>, vector<8x128xf32> -> vector<8x128xf32>
    %c0_6 = arith.constant 0 : index
    %c0_7 = arith.constant 0 : index
    %7 = vector.load %arg4[%c0_6, %c0_7] : memref<1x128xf32, #tpu.memory_space<vmem>>, vector<1x128xf32>
    %8 = vector.broadcast %7 : vector<1x128xf32> to vector<8x128xf32>
    %9 = arith.addf %6, %8 : vector<8x128xf32>
    %c0_8 = arith.constant 0 : index
    %c0_9 = arith.constant 0 : index
    %10 = vector.load %arg5[%c0_8, %c0_9] : memref<128x512xf32, #tpu.memory_space<vmem>>, vector<128x512xf32>
    %cst_10 = arith.constant dense<0.000000e+00> : vector<8x512xf32>
    %11 = tpu.matmul %3, %10, %cst_10 {dimension_numbers = #tpu.dot_dimension_numbers<[1], [0], [0], [1], [0, 0, 1, 1], [], []>} : vector<8x128xf32>, vector<128x512xf32>, vector<8x512xf32> -> vector<8x512xf32>
    %c0_11 = arith.constant 0 : index
    %c0_12 = arith.constant 0 : index
    %12 = vector.load %arg6[%c0_11, %c0_12] : memref<128x512xf32, #tpu.memory_space<vmem>>, vector<128x512xf32>
    %cst_13 = arith.constant dense<0.000000e+00> : vector<8x512xf32>
    %13 = tpu.matmul %9, %12, %cst_13 {dimension_numbers = #tpu.dot_dimension_numbers<[1], [0], [0], [1], [0, 0, 1, 1], [], []>} : vector<8x128xf32>, vector<128x512xf32>, vector<8x512xf32> -> vector<8x512xf32>
    %14 = arith.addf %11, %13 : vector<8x512xf32>
    %c0_14 = arith.constant 0 : index
    %c0_15 = arith.constant 0 : index
    %15 = vector.load %arg7[%c0_14, %c0_15] : memref<1x512xf32, #tpu.memory_space<vmem>>, vector<1x512xf32>
    %16 = vector.broadcast %15 : vector<1x512xf32> to vector<8x512xf32>
    %17 = arith.addf %14, %16 : vector<8x512xf32>
    %cst_16 = arith.constant 0.000000e+00 : f32
    %18 = vector.broadcast %cst_16 : f32 to vector<8x512xf32>
    %19 = arith.maximumf %17, %18 : vector<8x512xf32>
    %c0_17 = arith.constant 0 : index
    %c0_18 = arith.constant 0 : index
    %20 = vector.load %arg8[%c0_17, %c0_18] : memref<512x128xf32, #tpu.memory_space<vmem>>, vector<512x128xf32>
    %cst_19 = arith.constant dense<0.000000e+00> : vector<8x128xf32>
    %21 = tpu.matmul %19, %20, %cst_19 {dimension_numbers = #tpu.dot_dimension_numbers<[1], [0], [0], [1], [0, 0, 1, 1], [], []>} : vector<8x512xf32>, vector<512x128xf32>, vector<8x128xf32> -> vector<8x128xf32>
    %c0_20 = arith.constant 0 : index
    %c0_21 = arith.constant 0 : index
    %22 = vector.load %arg9[%c0_20, %c0_21] : memref<1x128xf32, #tpu.memory_space<vmem>>, vector<1x128xf32>
    %23 = vector.broadcast %22 : vector<1x128xf32> to vector<8x128xf32>
    %24 = arith.addf %21, %23 : vector<8x128xf32>
    %c0_22 = arith.constant 0 : index
    %c0_23 = arith.constant 0 : index
    %25 = vector.load %arg11[%c0_22, %c0_23] : memref<8x128xf32, #tpu.memory_space<vmem>>, vector<8x128xf32>
    tpu.vector_store %arg11[%c0_22, %c0_23], %24 {strides = array<i32>} : memref<8x128xf32, #tpu.memory_space<vmem>>, vector<8x128xf32>,
    %c0_24 = arith.constant 0 : index
    %c0_25 = arith.constant 0 : index
    %26 = vector.load %arg10[%c0_24, %c0_25] : memref<8x128xf32, #tpu.memory_space<vmem>>, vector<8x128xf32>
    tpu.vector_store %arg10[%c0_24, %c0_25], %24 {strides = array<i32>} : memref<8x128xf32, #tpu.memory_space<vmem>>, vector<8x128xf32>,
    return
  }
  func.func @transform_0(%arg0: i32) -> (i32, i32) {
    %c0_i32 = arith.constant 0 : i32
    %c0_i32_0 = arith.constant 0 : i32
    %c0_i32_1 = arith.constant 0 : i32
    return %c0_i32, %c0_i32_0 : i32, i32
  }
  func.func @transform_1(%arg0: i32) -> (i32, i32) {
    %c0_i32 = arith.constant 0 : i32
    %c0_i32_0 = arith.constant 0 : i32
    return %arg0, %c0_i32 : i32, i32
  }
  func.func @transform_2(%arg0: i32) -> (i32, i32) {
    %c0_i32 = arith.constant 0 : i32
    %c0_i32_0 = arith.constant 0 : i32
    %c0_i32_1 = arith.constant 0 : i32
    return %c0_i32, %c0_i32_0 : i32, i32
  }
  func.func @transform_3(%arg0: i32) -> (i32, i32) {
    %c0_i32 = arith.constant 0 : i32
    %c0_i32_0 = arith.constant 0 : i32
    %c0_i32_1 = arith.constant 0 : i32
    return %c0_i32, %c0_i32_0 : i32, i32
  }
  func.func @transform_4(%arg0: i32) -> (i32, i32) {
    %c0_i32 = arith.constant 0 : i32
    %c0_i32_0 = arith.constant 0 : i32
    %c0_i32_1 = arith.constant 0 : i32
    return %c0_i32, %c0_i32_0 : i32, i32
  }
  func.func @transform_5(%arg0: i32) -> (i32, i32) {
    %c0_i32 = arith.constant 0 : i32
    %c0_i32_0 = arith.constant 0 : i32
    %c0_i32_1 = arith.constant 0 : i32
    return %c0_i32, %c0_i32_0 : i32, i32
  }
  func.func @transform_6(%arg0: i32) -> (i32, i32) {
    %c0_i32 = arith.constant 0 : i32
    %c0_i32_0 = arith.constant 0 : i32
    %c0_i32_1 = arith.constant 0 : i32
    return %c0_i32, %c0_i32_0 : i32, i32
  }
  func.func @transform_7(%arg0: i32) -> (i32, i32) {
    %c0_i32 = arith.constant 0 : i32
    %c0_i32_0 = arith.constant 0 : i32
    %c0_i32_1 = arith.constant 0 : i32
    return %c0_i32, %c0_i32_0 : i32, i32
  }
  func.func @transform_8(%arg0: i32) -> (i32, i32) {
    %c0_i32 = arith.constant 0 : i32
    %c0_i32_0 = arith.constant 0 : i32
    %c0_i32_1 = arith.constant 0 : i32
    return %c0_i32, %c0_i32_0 : i32, i32
  }
  func.func @transform_9(%arg0: i32) -> (i32, i32) {
    %c0_i32 = arith.constant 0 : i32
    %c0_i32_0 = arith.constant 0 : i32
    return %arg0, %c0_i32 : i32, i32
  }
}

</mosaic_0001>

<bundles_post_ra>
// kernel: jepa_forward.4
= control target key start
LH: loop header
LB: loop body
LE: loop exit
PB: predicated region body
PF: predicated region fallthrough
CT: control target
= control target key end

     0   :  { %s1123_s12 = smov 0   ;;  %s1337_s0 = inlined_call_operand.vmem [shape: bf16[9216,128], index: 0, kind: input, shape index: {}]   ;;  %s1338_s1 = inlined_call_operand.vmem [shape: bf16[128,128], index: 1, kind: input, shape index: {}]   ;;  %s1339_s2 = inlined_call_operand.vmem [shape: f32[1,128], index: 2, kind: input, shape index: {}]   ;;  %s1340_s3 = inlined_call_operand.vmem [shape: f32[9216,128], index: 3, kind: output, shape index: {}]  }
   0x1 LB: > { %s851_s13 = sadd.s32 4294967295, %s1101_s12   ;;  %p855_p0 = scmp.ge.s32.totalorder %s1101_s12, 1  ;;  %s1101_s12 = sphi %s1123_s12, %s13_s12  }
   0x2   : > { %p138_p1 = scmp.lt.s32.totalorder %s1101_s12, 19 }
   0x4   : > { %p139_p2 = pnand %p855_p0, %p138_p1 }
   0x5   : > { %s856_s22 = sshll.u32 (!%p139_p2), %s851_s13, 6 }
   0x6   : > { %142 = sbr.rel (%p139_p2) target bundleno = 302 (0x12e), region = 32  ;;  %p163_p3 = scmp.lt.s32.totalorder (!%p139_p2), %s856_s22, 1151 }
   0xb   : > { %v1061_v0 = vld [vmem:[%s1338_s1 + $0x38] sm:$0xff]  ;;  %v1060_v1 = vld [vmem:[%s1338_s1 + $0x30] sm:$0xff]  ;;  %v1059_v2 = vld [vmem:[%s1338_s1 + $0x28] sm:$0xff]  ;;  %s1342_s22 = smov (!%p163_p3, %s856_s22), 1151 }
   0xc   : > { %498 = vmatpush.bf16.msra.mxu0 %v1061_v0  ;;  %1062 = vmatpush.bf16.msra.mxu1 %v1061_v0  ;;  %v1058_v3 = vld [vmem:[%s1338_s1 + $0x20] sm:$0xff]  ;;  %v1057_v4 = vld [vmem:[%s1338_s1 + $0x18] sm:$0xff]  ;;  %v1056_v5 = vld [vmem:[%s1338_s1 + $0x10] sm:$0xff]  ;;  %s857_s29 = sshll.u32 %s1342_s22, 2  ;;  %s859_s10 = sshll.u32 %s1342_s22, 3 }
   0xd   : > { %1063 = vmatpush.bf16.msra.mxu2 %v1061_v0  ;;  %1064 = vmatpush.bf16.msra.mxu3 %v1061_v0  ;;  %v1055_v6 = vld [vmem:[%s1338_s1 + $0x8] sm:$0xff]  ;;  %v1054_v7 = vld [vmem:[%s1338_s1] sm:$0xff]  ;;  %s1161_s7 = scalar_lea.vmem %s1337_s0, %s857_s29  ;;  %s1206_s14 = scalar_lea.vmem %s1340_s3, %s859_s10 }
   0xe   : > { %v1022_v8 = vld [vmem:[%s1161_s7] sm:$0xff]  ;;  %v1023_v12 = vld [vmem:[%s1161_s7 + $0x8] sm:$0xff]  ;;  %v1024_v16 = vld [vmem:[%s1161_s7 + $0x10] sm:$0xff] }
   0xf   : > { %v1030_v9 = vld [vmem:[%s1161_s7 + $0x40] sm:$0xff]  ;;  %v1031_v13 = vld [vmem:[%s1161_s7 + $0x48] sm:$0xff]  ;;  %v1032_v17 = vld [vmem:[%s1161_s7 + $0x50] sm:$0xff] }
  0x10   : > { %499 = vmatpush.bf16.msra.mxu0 %v1060_v1  ;;  %1065 = vmatpush.bf16.msra.mxu1 %v1060_v1  ;;  %v1038_v10 = vld [vmem:[%s1161_s7 + $0x80] sm:$0xff]  ;;  %v1039_v14 = vld [vmem:[%s1161_s7 + $0x88] sm:$0xff]  ;;  %v1040_v18 = vld [vmem:[%s1161_s7 + $0x90] sm:$0xff] }
  0x11   : > { %1066 = vmatpush.bf16.msra.mxu2 %v1060_v1  ;;  %1067 = vmatpush.bf16.msra.mxu3 %v1060_v1  ;;  %v1046_v11 = vld [vmem:[%s1161_s7 + $0xc0] sm:$0xff]  ;;  %v1047_v15 = vld [vmem:[%s1161_s7 + $0xc8] sm:$0xff]  ;;  %v1048_v19 = vld [vmem:[%s1161_s7 + $0xd0] sm:$0xff] }
  0x12   : > { %v1025_v20 = vld [vmem:[%s1161_s7 + $0x18] sm:$0xff]  ;;  %v1026_v24 = vld [vmem:[%s1161_s7 + $0x20] sm:$0xff]  ;;  %v1027_v28 = vld [vmem:[%s1161_s7 + $0x28] sm:$0xff] }
  0x13   : > { %v1033_v21 = vld [vmem:[%s1161_s7 + $0x58] sm:$0xff]  ;;  %v1034_v25 = vld [vmem:[%s1161_s7 + $0x60] sm:$0xff]  ;;  %v1035_v29 = vld [vmem:[%s1161_s7 + $0x68] sm:$0xff] }
  0x14   : > { %500 = vmatpush.bf16.msra.mxu0 %v1059_v2  ;;  %1068 = vmatpush.bf16.msra.mxu1 %v1059_v2  ;;  %v1041_v22 = vld [vmem:[%s1161_s7 + $0x98] sm:$0xff]  ;;  %v1042_v26 = vld [vmem:[%s1161_s7 + $0xa0] sm:$0xff]  ;;  %v1043_v30 = vld [vmem:[%s1161_s7 + $0xa8] sm:$0xff] }
  0x15   : > { %1069 = vmatpush.bf16.msra.mxu2 %v1059_v2  ;;  %1070 = vmatpush.bf16.msra.mxu3 %v1059_v2  ;;  %v1049_v23 = vld [vmem:[%s1161_s7 + $0xd8] sm:$0xff]  ;;  %v1050_v27 = vld [vmem:[%s1161_s7 + $0xe0] sm:$0xff]  ;;  %v1051_v31 = vld [vmem:[%s1161_s7 + $0xe8] sm:$0xff] }
  0x16   : > { %v1028_v32 = vld [vmem:[%s1161_s7 + $0x30] sm:$0xff]  ;;  %v1029_v36 = vld [vmem:[%s1161_s7 + $0x38] sm:$0xff]  ;;  %v1198_v40 = vld [vmem:[%s1339_s2] ss:$0 sm:$0xff] }
  0x17   : > { %v1036_v33 = vld [vmem:[%s1161_s7 + $0x70] sm:$0xff]  ;;  %v1037_v37 = vld [vmem:[%s1161_s7 + $0x78] sm:$0xff] }
  0x18   : > { %501 = vmatpush.bf16.msra.mxu0 %v1058_v3  ;;  %1071 = vmatpush.bf16.msra.mxu1 %v1058_v3  ;;  %v1044_v34 = vld [vmem:[%s1161_s7 + $0xb0] sm:$0xff]  ;;  %v1045_v38 = vld [vmem:[%s1161_s7 + $0xb8] sm:$0xff] }
  0x19   : > { %1072 = vmatpush.bf16.msra.mxu2 %v1058_v3  ;;  %1073 = vmatpush.bf16.msra.mxu3 %v1058_v3  ;;  %v1052_v35 = vld [vmem:[%s1161_s7 + $0xf0] sm:$0xff]  ;;  %v1053_v39 = vld [vmem:[%s1161_s7 + $0xf8] sm:$0xff] }
  0x1c   : > { %502 = vmatpush.bf16.msra.mxu0 %v1057_v4  ;;  %1074 = vmatpush.bf16.msra.mxu1 %v1057_v4 }
  0x1d   : > { %1075 = vmatpush.bf16.msra.mxu2 %v1057_v4  ;;  %1076 = vmatpush.bf16.msra.mxu3 %v1057_v4 }
  0x20   : > { %503 = vmatpush.bf16.msra.mxu0 %v1056_v5  ;;  %1077 = vmatpush.bf16.msra.mxu1 %v1056_v5 }
  0x21   : > { %1078 = vmatpush.bf16.msra.mxu2 %v1056_v5  ;;  %1079 = vmatpush.bf16.msra.mxu3 %v1056_v5 }
  0x24   : > { %504 = vmatpush.bf16.msra.mxu0 %v1055_v6  ;;  %1080 = vmatpush.bf16.msra.mxu1 %v1055_v6 }
  0x25   : > { %1081 = vmatpush.bf16.msra.mxu2 %v1055_v6  ;;  %1082 = vmatpush.bf16.msra.mxu3 %v1055_v6 }
  0x28   : > { %505 = vmatpush.bf16.msra.mxu0 %v1054_v7  ;;  %1083 = vmatpush.bf16.msra.mxu1 %v1054_v7 }
  0x29   : > { %1084 = vmatpush.bf16.msra.mxu2 %v1054_v7  ;;  %1085 = vmatpush.bf16.msra.mxu3 %v1054_v7 }
  0x2b   : > { %506 = vmatmul.bf16.vlgmr.msra.gmra.mxu0 %v1022_v8  ;;  %546 = vmatmul.bf16.vlgmr.msra.gmra.mxu1 %v1030_v9 }
  0x2c   : > { %586 = vmatmul.bf16.vlgmr.msra.gmra.mxu2 %v1038_v10  ;;  %626 = vmatmul.bf16.vlgmr.msra.gmra.mxu3 %v1046_v11 }
  0x3b   : > { %511 = vmatmul.bf16.gmra.mxu0 %v1023_v12  ;;  %551 = vmatmul.bf16.gmra.mxu1 %v1031_v13 }
  0x3c   : > { %591 = vmatmul.bf16.gmra.mxu2 %v1039_v14  ;;  %631 = vmatmul.bf16.gmra.mxu3 %v1047_v15 }
  0x4b   : > { %516 = vmatmul.bf16.gmra.mxu0 %v1024_v16  ;;  %556 = vmatmul.bf16.gmra.mxu1 %v1032_v17 }
  0x4c   : > { %596 = vmatmul.bf16.gmra.mxu2 %v1040_v18  ;;  %636 = vmatmul.bf16.gmra.mxu3 %v1048_v19 }
  0x5b   : > { %521 = vmatmul.bf16.gmra.mxu0 %v1025_v20  ;;  %561 = vmatmul.bf16.gmra.mxu1 %v1033_v21 }
  0x5c   : > { %601 = vmatmul.bf16.gmra.mxu2 %v1041_v22  ;;  %641 = vmatmul.bf16.gmra.mxu3 %v1049_v23 }
  0x6b   : > { %526 = vmatmul.bf16.gmra.mxu0 %v1026_v24  ;;  %566 = vmatmul.bf16.gmra.mxu1 %v1034_v25 }
  0x6c   : > { %606 = vmatmul.bf16.gmra.mxu2 %v1042_v26  ;;  %646 = vmatmul.bf16.gmra.mxu3 %v1050_v27 }
  0x7b   : > { %531 = vmatmul.bf16.gmra.mxu0 %v1027_v28  ;;  %571 = vmatmul.bf16.gmra.mxu1 %v1035_v29 }
  0x7c   : > { %611 = vmatmul.bf16.gmra.mxu2 %v1043_v30  ;;  %651 = vmatmul.bf16.gmra.mxu3 %v1051_v31 }
  0x8b   : > { %536 = vmatmul.bf16.gmra.mxu0 %v1028_v32  ;;  %576 = vmatmul.bf16.gmra.mxu1 %v1036_v33 }
  0x8c   : > { %616 = vmatmul.bf16.gmra.mxu2 %v1044_v34  ;;  %656 = vmatmul.bf16.gmra.mxu3 %v1052_v35 }
  0x9b   : > { %541 = vmatmul.bf16.gmra.mxu0 %v1029_v36  ;;  %581 = vmatmul.bf16.gmra.mxu1 %v1037_v37 }
  0x9c   : > { %621 = vmatmul.bf16.gmra.mxu2 %v1045_v38  ;;  %661 = vmatmul.bf16.gmra.mxu3 %v1053_v39 }
  0xa8   : > { %v507_v41 = vpop.f32.mrf.mxu0  ;;  %v547_v42 = vpop.f32.mrf.mxu1 }
  0xa9   : > { %v508_v43 = vadd.f32 %v1198_v40, %v507_v41  ;;  %v548_v44 = vadd.f32 %v1198_v40, %v547_v42 }
  0xab   : > { %v667_v45 = vmax.f32 %v508_v43, 0.0  ;;  %v683_v46 = vmax.f32 %v548_v44, 0.0 }
  0xad   : > { %731 = vst [vmem:[%s1206_s14] sm:$0xff] %v667_v45 }
  0xae   : > { %747 = vst [vmem:[%s1206_s14 + $0x80] sm:$0xff] %v683_v46 }
  0xaf   : > { %v587_v47 = vpop.f32.mrf.mxu2  ;;  %v627_v48 = vpop.f32.mrf.mxu3 }
  0xb0   : > { %v588_v49 = vadd.f32 %v1198_v40, %v587_v47  ;;  %v628_v50 = vadd.f32 %v1198_v40, %v627_v48  ;;  %v509_v51 = vpop.f32.mrf.mxu0  ;;  %v549_v52 = vpop.f32.mrf.mxu1 }
  0xb1   : > { %v510_v53 = vadd.f32 %v1198_v40, %v509_v51  ;;  %v550_v54 = vadd.f32 %v1198_v40, %v549_v52 }
  0xb2   : > { %v699_v55 = vmax.f32 %v588_v49, 0.0  ;;  %v715_v56 = vmax.f32 %v628_v50, 0.0 }
  0xb3   : > { %v668_v57 = vmax.f32 %v510_v53, 0.0  ;;  %v684_v58 = vmax.f32 %v550_v54, 0.0 }
  0xb4   : > { %763 = vst [vmem:[%s1206_s14 + $0x100] sm:$0xff] %v699_v55 }
  0xb5   : > { %779 = vst [vmem:[%s1206_s14 + $0x180] sm:$0xff] %v715_v56 }
  0xb6   : > { %732 = vst [vmem:[%s1206_s14 + $0x8] sm:$0xff] %v668_v57 }
  0xb7   : > { %748 = vst [vmem:[%s1206_s14 + $0x88] sm:$0xff] %v684_v58  ;;  %v589_v59 = vpop.f32.mrf.mxu2  ;;  %v629_v60 = vpop.f32.mrf.mxu3 }
  0xb8   : > { %v590_v61 = vadd.f32 %v1198_v40, %v589_v59  ;;  %v630_v62 = vadd.f32 %v1198_v40, %v629_v60  ;;  %v512_v63 = vpop.f32.mrf.mxu0  ;;  %v552_v0 = vpop.f32.mrf.mxu1 }
  0xb9   : > { %v513_v1 = vadd.f32 %v1198_v40, %v512_v63  ;;  %v553_v2 = vadd.f32 %v1198_v40, %v552_v0 }
  0xba   : > { %v700_v3 = vmax.f32 %v590_v61, 0.0  ;;  %v716_v4 = vmax.f32 %v630_v62, 0.0 }
  0xbb   : > { %v669_v5 = vmax.f32 %v513_v1, 0.0  ;;  %v685_v6 = vmax.f32 %v553_v2, 0.0 }
  0xbc   : > { %764 = vst [vmem:[%s1206_s14 + $0x108] sm:$0xff] %v700_v3 }
  0xbd   : > { %780 = vst [vmem:[%s1206_s14 + $0x188] sm:$0xff] %v716_v4 }
  0xbe   : > { %733 = vst [vmem:[%s1206_s14 + $0x10] sm:$0xff] %v669_v5 }
  0xbf   : > { %749 = vst [vmem:[%s1206_s14 + $0x90] sm:$0xff] %v685_v6  ;;  %v592_v7 = vpop.f32.mrf.mxu2  ;;  %v632_v8 = vpop.f32.mrf.mxu3 }
  0xc0   : > { %v593_v9 = vadd.f32 %v1198_v40, %v592_v7  ;;  %v633_v10 = vadd.f32 %v1198_v40, %v632_v8  ;;  %v514_v11 = vpop.f32.mrf.mxu0  ;;  %v554_v12 = vpop.f32.mrf.mxu1 }
  0xc1   : > { %v515_v13 = vadd.f32 %v1198_v40, %v514_v11  ;;  %v555_v14 = vadd.f32 %v1198_v40, %v554_v12 }
  0xc2   : > { %v701_v15 = vmax.f32 %v593_v9, 0.0  ;;  %v717_v16 = vmax.f32 %v633_v10, 0.0 }
  0xc3   : > { %v670_v17 = vmax.f32 %v515_v13, 0.0  ;;  %v686_v18 = vmax.f32 %v555_v14, 0.0 }
  0xc4   : > { %765 = vst [vmem:[%s1206_s14 + $0x110] sm:$0xff] %v701_v15 }
  0xc5   : > { %781 = vst [vmem:[%s1206_s14 + $0x190] sm:$0xff] %v717_v16 }
  0xc6   : > { %734 = vst [vmem:[%s1206_s14 + $0x18] sm:$0xff] %v670_v17 }
  0xc7   : > { %750 = vst [vmem:[%s1206_s14 + $0x98] sm:$0xff] %v686_v18  ;;  %v594_v19 = vpop.f32.mrf.mxu2  ;;  %v634_v20 = vpop.f32.mrf.mxu3 }
  0xc8   : > { %v595_v21 = vadd.f32 %v1198_v40, %v594_v19  ;;  %v635_v22 = vadd.f32 %v1198_v40, %v634_v20  ;;  %v517_v23 = vpop.f32.mrf.mxu0  ;;  %v557_v24 = vpop.f32.mrf.mxu1 }
  0xc9   : > { %v518_v25 = vadd.f32 %v1198_v40, %v517_v23  ;;  %v558_v26 = vadd.f32 %v1198_v40, %v557_v24 }
  0xca   : > { %v702_v27 = vmax.f32 %v595_v21, 0.0  ;;  %v718_v28 = vmax.f32 %v635_v22, 0.0 }
  0xcb   : > { %v671_v29 = vmax.f32 %v518_v25, 0.0  ;;  %v687_v30 = vmax.f32 %v558_v26, 0.0 }
  0xcc   : > { %766 = vst [vmem:[%s1206_s14 + $0x118] sm:$0xff] %v702_v27 }
  0xcd   : > { %782 = vst [vmem:[%s1206_s14 + $0x198] sm:$0xff] %v718_v28 }
  0xce   : > { %735 = vst [vmem:[%s1206_s14 + $0x20] sm:$0xff] %v671_v29 }
  0xcf   : > { %751 = vst [vmem:[%s1206_s14 + $0xa0] sm:$0xff] %v687_v30  ;;  %v597_v31 = vpop.f32.mrf.mxu2  ;;  %v637_v32 = vpop.f32.mrf.mxu3 }
  0xd0   : > { %v598_v33 = vadd.f32 %v1198_v40, %v597_v31  ;;  %v638_v34 = vadd.f32 %v1198_v40, %v637_v32  ;;  %v519_v35 = vpop.f32.mrf.mxu0  ;;  %v559_v36 = vpop.f32.mrf.mxu1 }
  0xd1   : > { %v520_v37 = vadd.f32 %v1198_v40, %v519_v35  ;;  %v560_v38 = vadd.f32 %v1198_v40, %v559_v36 }
  0xd2   : > { %v703_v39 = vmax.f32 %v598_v33, 0.0  ;;  %v719_v41 = vmax.f32 %v638_v34, 0.0 }
  0xd3   : > { %v672_v42 = vmax.f32 %v520_v37, 0.0  ;;  %v688_v43 = vmax.f32 %v560_v38, 0.0 }
  0xd4   : > { %767 = vst [vmem:[%s1206_s14 + $0x120] sm:$0xff] %v703_v39 }
  0xd5   : > { %783 = vst [vmem:[%s1206_s14 + $0x1a0] sm:$0xff] %v719_v41 }
  0xd6   : > { %736 = vst [vmem:[%s1206_s14 + $0x28] sm:$0xff] %v672_v42 }
  0xd7   : > { %752 = vst [vmem:[%s1206_s14 + $0xa8] sm:$0xff] %v688_v43  ;;  %v599_v44 = vpop.f32.mrf.mxu2  ;;  %v639_v45 = vpop.f32.mrf.mxu3 }
  0xd8   : > { %v600_v46 = vadd.f32 %v1198_v40, %v599_v44  ;;  %v640_v47 = vadd.f32 %v1198_v40, %v639_v45  ;;  %v522_v48 = vpop.f32.mrf.mxu0  ;;  %v562_v49 = vpop.f32.mrf.mxu1 }
  0xd9   : > { %v523_v50 = vadd.f32 %v1198_v40, %v522_v48  ;;  %v563_v51 = vadd.f32 %v1198_v40, %v562_v49 }
  0xda   : > { %v704_v52 = vmax.f32 %v600_v46, 0.0  ;;  %v720_v53 = vmax.f32 %v640_v47, 0.0 }
  0xdb   : > { %v673_v54 = vmax.f32 %v523_v50, 0.0  ;;  %v689_v55 = vmax.f32 %v563_v51, 0.0 }
  0xdc   : > { %768 = vst [vmem:[%s1206_s14 + $0x128] sm:$0xff] %v704_v52 }
  0xdd   : > { %784 = vst [vmem:[%s1206_s14 + $0x1a8] sm:$0xff] %v720_v53 }
  0xde   : > { %737 = vst [vmem:[%s1206_s14 + $0x30] sm:$0xff] %v673_v54 }
  0xdf   : > { %753 = vst [vmem:[%s1206_s14 + $0xb0] sm:$0xff] %v689_v55  ;;  %v602_v56 = vpop.f32.mrf.mxu2  ;;  %v642_v57 = vpop.f32.mrf.mxu3 }
  0xe0   : > { %v603_v58 = vadd.f32 %v1198_v40, %v602_v56  ;;  %v643_v59 = vadd.f32 %v1198_v40, %v642_v57  ;;  %v524_v60 = vpop.f32.mrf.mxu0  ;;  %v564_v61 = vpop.f32.mrf.mxu1 }
  0xe1   : > { %v525_v62 = vadd.f32 %v1198_v40, %v524_v60  ;;  %v565_v63 = vadd.f32 %v1198_v40, %v564_v61 }
  0xe2   : > { %v705_v0 = vmax.f32 %v603_v58, 0.0  ;;  %v721_v1 = vmax.f32 %v643_v59, 0.0 }
  0xe3   : > { %v674_v2 = vmax.f32 %v525_v62, 0.0  ;;  %v690_v3 = vmax.f32 %v565_v63, 0.0 }
  0xe4   : > { %769 = vst [vmem:[%s1206_s14 + $0x130] sm:$0xff] %v705_v0 }
  0xe5   : > { %785 = vst [vmem:[%s1206_s14 + $0x1b0] sm:$0xff] %v721_v1 }
  0xe6   : > { %738 = vst [vmem:[%s1206_s14 + $0x38] sm:$0xff] %v674_v2 }
  0xe7   : > { %754 = vst [vmem:[%s1206_s14 + $0xb8] sm:$0xff] %v690_v3  ;;  %v604_v4 = vpop.f32.mrf.mxu2  ;;  %v644_v5 = vpop.f32.mrf.mxu3 }
  0xe8   : > { %v605_v6 = vadd.f32 %v1198_v40, %v604_v4  ;;  %v645_v7 = vadd.f32 %v1198_v40, %v644_v5  ;;  %v527_v8 = vpop.f32.mrf.mxu0  ;;  %v567_v9 = vpop.f32.mrf.mxu1 }
  0xe9   : > { %v528_v10 = vadd.f32 %v1198_v40, %v527_v8  ;;  %v568_v11 = vadd.f32 %v1198_v40, %v567_v9 }
  0xea   : > { %v706_v12 = vmax.f32 %v605_v6, 0.0  ;;  %v722_v13 = vmax.f32 %v645_v7, 0.0 }
  0xeb   : > { %v675_v14 = vmax.f32 %v528_v10, 0.0  ;;  %v691_v15 = vmax.f32 %v568_v11, 0.0 }
  0xec   : > { %770 = vst [vmem:[%s1206_s14 + $0x138] sm:$0xff] %v706_v12 }
  0xed   : > { %786 = vst [vmem:[%s1206_s14 + $0x1b8] sm:$0xff] %v722_v13 }
  0xee   : > { %739 = vst [vmem:[%s1206_s14 + $0x40] sm:$0xff] %v675_v14 }
  0xef   : > { %755 = vst [vmem:[%s1206_s14 + $0xc0] sm:$0xff] %v691_v15  ;;  %v607_v16 = vpop.f32.mrf.mxu2  ;;  %v647_v17 = vpop.f32.mrf.mxu3 }
  0xf0   : > { %v608_v18 = vadd.f32 %v1198_v40, %v607_v16  ;;  %v648_v19 = vadd.f32 %v1198_v40, %v647_v17  ;;  %v529_v20 = vpop.f32.mrf.mxu0  ;;  %v569_v21 = vpop.f32.mrf.mxu1 }
  0xf1   : > { %v530_v22 = vadd.f32 %v1198_v40, %v529_v20  ;;  %v570_v23 = vadd.f32 %v1198_v40, %v569_v21 }
  0xf2   : > { %v707_v24 = vmax.f32 %v608_v18, 0.0  ;;  %v723_v25 = vmax.f32 %v648_v19, 0.0 }
  0xf3   : > { %v676_v26 = vmax.f32 %v530_v22, 0.0  ;;  %v692_v27 = vmax.f32 %v570_v23, 0.0 }
  0xf4   : > { %771 = vst [vmem:[%s1206_s14 + $0x140] sm:$0xff] %v707_v24 }
  0xf5   : > { %787 = vst [vmem:[%s1206_s14 + $0x1c0] sm:$0xff] %v723_v25 }
  0xf6   : > { %740 = vst [vmem:[%s1206_s14 + $0x48] sm:$0xff] %v676_v26 }
  0xf7   : > { %756 = vst [vmem:[%s1206_s14 + $0xc8] sm:$0xff] %v692_v27  ;;  %v609_v28 = vpop.f32.mrf.mxu2  ;;  %v649_v29 = vpop.f32.mrf.mxu3 }
  0xf8   : > { %v610_v30 = vadd.f32 %v1198_v40, %v609_v28  ;;  %v650_v31 = vadd.f32 %v1198_v40, %v649_v29  ;;  %v532_v32 = vpop.f32.mrf.mxu0  ;;  %v572_v33 = vpop.f32.mrf.mxu1 }
  0xf9   : > { %v533_v34 = vadd.f32 %v1198_v40, %v532_v32  ;;  %v573_v35 = vadd.f32 %v1198_v40, %v572_v33 }
  0xfa   : > { %v708_v36 = vmax.f32 %v610_v30, 0.0  ;;  %v724_v37 = vmax.f32 %v650_v31, 0.0 }
  0xfb   : > { %v677_v38 = vmax.f32 %v533_v34, 0.0  ;;  %v693_v39 = vmax.f32 %v573_v35, 0.0 }
  0xfc   : > { %772 = vst [vmem:[%s1206_s14 + $0x148] sm:$0xff] %v708_v36 }
  0xfd   : > { %788 = vst [vmem:[%s1206_s14 + $0x1c8] sm:$0xff] %v724_v37 }
  0xfe   : > { %741 = vst [vmem:[%s1206_s14 + $0x50] sm:$0xff] %v677_v38 }
  0xff   : > { %757 = vst [vmem:[%s1206_s14 + $0xd0] sm:$0xff] %v693_v39  ;;  %v612_v41 = vpop.f32.mrf.mxu2  ;;  %v652_v42 = vpop.f32.mrf.mxu3 }
 0x100   : > { %v613_v43 = vadd.f32 %v1198_v40, %v612_v41  ;;  %v653_v44 = vadd.f32 %v1198_v40, %v652_v42  ;;  %v534_v45 = vpop.f32.mrf.mxu0  ;;  %v574_v46 = vpop.f32.mrf.mxu1 }
 0x101   : > { %v535_v47 = vadd.f32 %v1198_v40, %v534_v45  ;;  %v575_v48 = vadd.f32 %v1198_v40, %v574_v46 }
 0x102   : > { %v709_v49 = vmax.f32 %v613_v43, 0.0  ;;  %v725_v50 = vmax.f32 %v653_v44, 0.0 }
 0x103   : > { %v678_v51 = vmax.f32 %v535_v47, 0.0  ;;  %v694_v52 = vmax.f32 %v575_v48, 0.0 }
 0x104   : > { %773 = vst [vmem:[%s1206_s14 + $0x150] sm:$0xff] %v709_v49 }
 0x105   : > { %789 = vst [vmem:[%s1206_s14 + $0x1d0] sm:$0xff] %v725_v50 }
 0x106   : > { %742 = vst [vmem:[%s1206_s14 + $0x58] sm:$0xff] %v678_v51 }
 0x107   : > { %758 = vst [vmem:[%s1206_s14 + $0xd8] sm:$0xff] %v694_v52  ;;  %v614_v53 = vpop.f32.mrf.mxu2  ;;  %v654_v54 = vpop.f32.mrf.mxu3 }
 0x108   : > { %v615_v55 = vadd.f32 %v1198_v40, %v614_v53  ;;  %v655_v56 = vadd.f32 %v1198_v40, %v654_v54  ;;  %v537_v57 = vpop.f32.mrf.mxu0  ;;  %v577_v58 = vpop.f32.mrf.mxu1 }
 0x109   : > { %v538_v59 = vadd.f32 %v1198_v40, %v537_v57  ;;  %v578_v60 = vadd.f32 %v1198_v40, %v577_v58 }
 0x10a   : > { %v710_v61 = vmax.f32 %v615_v55, 0.0  ;;  %v726_v62 = vmax.f32 %v655_v56, 0.0 }
 0x10b   : > { %v679_v63 = vmax.f32 %v538_v59, 0.0  ;;  %v695_v0 = vmax.f32 %v578_v60, 0.0 }
 0x10c   : > { %774 = vst [vmem:[%s1206_s14 + $0x158] sm:$0xff] %v710_v61 }
 0x10d   : > { %790 = vst [vmem:[%s1206_s14 + $0x1d8] sm:$0xff] %v726_v62 }
 0x10e   : > { %743 = vst [vmem:[%s1206_s14 + $0x60] sm:$0xff] %v679_v63 }
 0x10f   : > { %759 = vst [vmem:[%s1206_s14 + $0xe0] sm:$0xff] %v695_v0  ;;  %v617_v1 = vpop.f32.mrf.mxu2  ;;  %v657_v2 = vpop.f32.mrf.mxu3 }
 0x110   : > { %v618_v3 = vadd.f32 %v1198_v40, %v617_v1  ;;  %v658_v4 = vadd.f32 %v1198_v40, %v657_v2  ;;  %v539_v5 = vpop.f32.mrf.mxu0  ;;  %v579_v6 = vpop.f32.mrf.mxu1 }
 0x111   : > { %v540_v7 = vadd.f32 %v1198_v40, %v539_v5  ;;  %v580_v8 = vadd.f32 %v1198_v40, %v579_v6 }
 0x112   : > { %v711_v9 = vmax.f32 %v618_v3, 0.0  ;;  %v727_v10 = vmax.f32 %v658_v4, 0.0 }
 0x113   : > { %v680_v11 = vmax.f32 %v540_v7, 0.0  ;;  %v696_v12 = vmax.f32 %v580_v8, 0.0 }
 0x114   : > { %775 = vst [vmem:[%s1206_s14 + $0x160] sm:$0xff] %v711_v9 }
 0x115   : > { %791 = vst [vmem:[%s1206_s14 + $0x1e0] sm:$0xff] %v727_v10 }
 0x116   : > { %744 = vst [vmem:[%s1206_s14 + $0x68] sm:$0xff] %v680_v11 }
 0x117   : > { %760 = vst [vmem:[%s1206_s14 + $0xe8] sm:$0xff] %v696_v12  ;;  %v619_v13 = vpop.f32.mrf.mxu2  ;;  %v659_v14 = vpop.f32.mrf.mxu3 }
 0x118   : > { %v620_v15 = vadd.f32 %v1198_v40, %v619_v13  ;;  %v660_v16 = vadd.f32 %v1198_v40, %v659_v14  ;;  %v542_v17 = vpop.f32.mrf.mxu0  ;;  %v582_v18 = vpop.f32.mrf.mxu1 }
 0x119   : > { %v543_v19 = vadd.f32 %v1198_v40, %v542_v17  ;;  %v583_v20 = vadd.f32 %v1198_v40, %v582_v18 }
 0x11a   : > { %v712_v21 = vmax.f32 %v620_v15, 0.0  ;;  %v728_v22 = vmax.f32 %v660_v16, 0.0 }
 0x11b   : > { %v681_v23 = vmax.f32 %v543_v19, 0.0  ;;  %v697_v24 = vmax.f32 %v583_v20, 0.0 }
 0x11c   : > { %776 = vst [vmem:[%s1206_s14 + $0x168] sm:$0xff] %v712_v21 }
 0x11d   : > { %792 = vst [vmem:[%s1206_s14 + $0x1e8] sm:$0xff] %v728_v22 }
 0x11e   : > { %745 = vst [vmem:[%s1206_s14 + $0x70] sm:$0xff] %v681_v23 }
 0x11f   : > { %761 = vst [vmem:[%s1206_s14 + $0xf0] sm:$0xff] %v697_v24  ;;  %v622_v25 = vpop.f32.mrf.mxu2  ;;  %v662_v26 = vpop.f32.mrf.mxu3 }
 0x120   : > { %v623_v27 = vadd.f32 %v1198_v40, %v622_v25  ;;  %v663_v28 = vadd.f32 %v1198_v40, %v662_v26  ;;  %v544_v29 = vpop.f32.mrf.mxu0  ;;  %v584_v30 = vpop.f32.mrf.mxu1 }
 0x121   : > { %v545_v31 = vadd.f32 %v1198_v40, %v544_v29  ;;  %v585_v32 = vadd.f32 %v1198_v40, %v584_v30 }
 0x122   : > { %v713_v33 = vmax.f32 %v623_v27, 0.0  ;;  %v729_v34 = vmax.f32 %v663_v28, 0.0 }
 0x123   : > { %v682_v35 = vmax.f32 %v545_v31, 0.0  ;;  %v698_v36 = vmax.f32 %v585_v32, 0.0 }
 0x124   : > { %777 = vst [vmem:[%s1206_s14 + $0x170] sm:$0xff] %v713_v33 }
 0x125   : > { %793 = vst [vmem:[%s1206_s14 + $0x1f0] sm:$0xff] %v729_v34 }
 0x126   : > { %746 = vst [vmem:[%s1206_s14 + $0x78] sm:$0xff] %v682_v35 }
 0x127   : > { %762 = vst [vmem:[%s1206_s14 + $0xf8] sm:$0xff] %v698_v36  ;;  %v624_v37 = vpop.f32.mrf.mxu2  ;;  %v664_v38 = vpop.f32.mrf.mxu3 }
 0x128   : > { %v625_v39 = vadd.f32 %v1198_v40, %v624_v37  ;;  %v665_v41 = vadd.f32 %v1198_v40, %v664_v38 }
 0x12a   : > { %v714_v42 = vmax.f32 %v625_v39, 0.0  ;;  %v730_v43 = vmax.f32 %v665_v41, 0.0 }
 0x12c   : > { %778 = vst [vmem:[%s1206_s14 + $0x178] sm:$0xff] %v714_v42 }
 0x12d   : > { %794 = vst [vmem:[%s1206_s14 + $0x1f8] sm:$0xff] %v730_v43 }
 0x12e PF: > { %s13_s12 = sadd.s32 1, %s1101_s12  }
 0x12f   : > { %p10_p4 = scmp.ge.s32.totalorder %s13_s12, 20  }
 0x131   :  { %12 = sbr.rel (!%p10_p4) target bundleno = 1 (0x1), region = 62 }

// kernel: jepa_forward.5
= control target key start
LH: loop header
LB: loop body
LE: loop exit
PB: predicated region body
PF: predicated region fallthrough
CT: control target
= control target key end

     0   :  { %s2378_s12 = smov 0   ;;  %s2949_s0 = inlined_call_operand.vmem [shape: bf16[2560,384], index: 0, kind: input, shape index: {}]   ;;  %s2950_s1 = inlined_call_operand.vmem [shape: bf16[384,128], index: 1, kind: input, shape index: {}]   ;;  %s2951_s2 = inlined_call_operand.vmem [shape: f32[1,128], index: 2, kind: input, shape index: {}]   ;;  %s2952_s3 = inlined_call_operand.vmem [shape: f32[2560,128], index: 3, kind: output, shape index: {}]  }
   0x1 LB: > { %s1704_s13 = sadd.s32 4294967295, %s2356_s12   ;;  %p1708_p0 = scmp.ge.s32.totalorder %s2356_s12, 1  ;;  %s2356_s12 = sphi %s2378_s12, %s13_s12  }
   0x2   : > { %p139_p1 = scmp.lt.s32.totalorder %s2356_s12, 6 }
   0x4   : > { %p140_p2 = pnand %p1708_p0, %p139_p1 }
   0x5   : > { %s1709_s5 = sshll.u32 (!%p140_p2), %s1704_s13, 6 }
   0x6   : > { %143 = sbr.rel (%p140_p2) target bundleno = 558 (0x22e), region = 32  ;;  %p165_p3 = scmp.lt.s32.totalorder (!%p140_p2), %s1709_s5, 319 }
   0xb   : > { %v2298_v0 = vld [vmem:[%s2950_s1 + $0x38] sm:$0xff]  ;;  %v2297_v3 = vld [vmem:[%s2950_s1 + $0x30] sm:$0xff]  ;;  %v2296_v6 = vld [vmem:[%s2950_s1 + $0x28] sm:$0xff]  ;;  %s2954_s5 = smov (!%p165_p3, %s1709_s5), 319 }
   0xc   : > { %v2392_v1 = vld [vmem:[%s2950_s1 + $0x78] sm:$0xff]  ;;  %1013 = vmatpush.bf16.msra.mxu0 %v2298_v0  ;;  %2315 = vmatpush.bf16.msra.mxu3 %v2298_v0  ;;  %v2407_v4 = vld [vmem:[%s2950_s1 + $0x70] sm:$0xff]  ;;  %v2422_v7 = vld [vmem:[%s2950_s1 + $0x68] sm:$0xff]  ;;  %s2339_s21 = smul.u32 12, %s2954_s5  ;;  %s1712_s18 = sshll.u32 %s2954_s5, 3 }
   0xd   : > { %v2397_v2 = vld [vmem:[%s2950_s1 + $0xb8] sm:$0xff]  ;;  %1182 = vmatpush.bf16.msra.mxu1 %v2392_v1  ;;  %v2412_v5 = vld [vmem:[%s2950_s1 + $0xb0] sm:$0xff]  ;;  %v2427_v8 = vld [vmem:[%s2950_s1 + $0xa8] sm:$0xff] }
   0xe   : > { %1351 = vmatpush.bf16.msra.mxu2 %v2397_v2  ;;  %v2295_v9 = vld [vmem:[%s2950_s1 + $0x20] sm:$0xff]  ;;  %v2294_v12 = vld [vmem:[%s2950_s1 + $0x18] sm:$0xff]  ;;  %v2293_v15 = vld [vmem:[%s2950_s1 + $0x10] sm:$0xff]  ;;  %s2478_s30 = scalar_lea.vmem %s2949_s0, %s2339_s21  ;;  %s2598_s21 = scalar_lea.vmem %s2952_s3, %s1712_s18 }
   0xf   : > { %v2437_v10 = vld [vmem:[%s2950_s1 + $0x60] sm:$0xff]  ;;  %v2302_v13 = vld [vmem:[%s2950_s1 + $0x58] sm:$0xff]  ;;  %v2301_v16 = vld [vmem:[%s2950_s1 + $0x50] sm:$0xff] }
  0x10   : > { %1014 = vmatpush.bf16.msra.mxu0 %v2297_v3  ;;  %2316 = vmatpush.bf16.msra.mxu3 %v2297_v3  ;;  %v2442_v11 = vld [vmem:[%s2950_s1 + $0xa0] sm:$0xff]  ;;  %v2457_v14 = vld [vmem:[%s2950_s1 + $0x98] sm:$0xff]  ;;  %v2470_v17 = vld [vmem:[%s2950_s1 + $0x90] sm:$0xff] }
  0x11   : > { %1183 = vmatpush.bf16.msra.mxu1 %v2407_v4  ;;  %v2292_v18 = vld [vmem:[%s2950_s1 + $0x8] sm:$0xff]  ;;  %v2291_v21 = vld [vmem:[%s2950_s1] sm:$0xff]  ;;  %v1717_v29 = vld [vmem:[%s2478_s30 + $0xc] sm:$0xf0] }
  0x12   : > { %1352 = vmatpush.bf16.msra.mxu2 %v2412_v5  ;;  %v2300_v19 = vld [vmem:[%s2950_s1 + $0x48] sm:$0xff]  ;;  %v2299_v22 = vld [vmem:[%s2950_s1 + $0x40] sm:$0xff]  ;;  %v2197_v31 = vld [vmem:[%s2478_s30 + $0x10] sm:$0xf0] }
  0x13   : > { %v2487_v20 = vld [vmem:[%s2950_s1 + $0x88] sm:$0xff]  ;;  %v2498_v23 = vld [vmem:[%s2950_s1 + $0x80] sm:$0xff]  ;;  %v1727_v36 = vld [vmem:[%s2478_s30 + $0x18] sm:$0xf] }
  0x14   : > { %1015 = vmatpush.bf16.msra.mxu0 %v2296_v6  ;;  %2317 = vmatpush.bf16.msra.mxu3 %v2296_v6  ;;  %v1715_v24 = vld [vmem:[%s2478_s30] sm:$0xf]  ;;  %v2196_v25 = vld [vmem:[%s2478_s30 + $0x8] sm:$0xf0]  ;;  %v2195_v28 = vld [vmem:[%s2478_s30 + $0x4] sm:$0xf] }
  0x15   : > { %1184 = vmatpush.bf16.msra.mxu1 %v2422_v7  ;;  %v2003_v26 = vld [vmem:[%s2478_s30 + $0x240] sm:$0xf]  ;;  %v2268_v27 = vld [vmem:[%s2478_s30 + $0x248] sm:$0xf0]  ;;  %v1723_v30 = vld [vmem:[%s2478_s30 + $0x8] sm:$0xf]  ;;  %v1716_v32 = vor.u32 %v2196_v25, %v1715_v24  ;;  %v1720_v34 = vor.u32 %v2195_v28, %v1717_v29 }
  0x16   : > { %1353 = vmatpush.bf16.msra.mxu2 %v2427_v8  ;;  %v2004_v33 = vor.u32 %v2268_v27, %v2003_v26  ;;  %v1724_v35 = vor.u32 %v2197_v31, %v1723_v30  ;;  %v2199_v37 = vld [vmem:[%s2478_s30 + $0x20] sm:$0xf0]  ;;  %v2015_v38 = vld [vmem:[%s2478_s30 + $0x258] sm:$0xf]  ;;  %v2198_v40 = vld [vmem:[%s2478_s30 + $0x1c] sm:$0xf] }
  0x17   : > { %v2271_v39 = vld [vmem:[%s2478_s30 + $0x260] sm:$0xf0]  ;;  %v1729_v41 = vld [vmem:[%s2478_s30 + $0x24] sm:$0xf0]  ;;  %v1735_v42 = vld [vmem:[%s2478_s30 + $0x20] sm:$0xf]  ;;  %v1728_v44 = vor.u32 %v2199_v37, %v1727_v36 }
  0x18   : > { %1016 = vmatpush.bf16.msra.mxu0 %v2295_v9  ;;  %2318 = vmatpush.bf16.msra.mxu3 %v2295_v9  ;;  %v2200_v43 = vld [vmem:[%s2478_s30 + $0x28] sm:$0xf0]  ;;  %v2016_v45 = vor.u32 %v2271_v39, %v2015_v38  ;;  %v1732_v46 = vor.u32 %v2198_v40, %v1729_v41  ;;  %v1739_v48 = vld [vmem:[%s2478_s30 + $0x30] sm:$0xf]  ;;  %v2202_v49 = vld [vmem:[%s2478_s30 + $0x38] sm:$0xf0] }
  0x19   : > { %1185 = vmatpush.bf16.msra.mxu1 %v2437_v10  ;;  %v1736_v47 = vor.u32 %v2200_v43, %v1735_v42  ;;  %v2027_v50 = vld [vmem:[%s2478_s30 + $0x270] sm:$0xf]  ;;  %v2274_v51 = vld [vmem:[%s2478_s30 + $0x278] sm:$0xf0]  ;;  %v2201_v52 = vld [vmem:[%s2478_s30 + $0x34] sm:$0xf]  ;;  %v1740_v56 = vor.u32 %v2202_v49, %v1739_v48 }
  0x1a   : > { %1354 = vmatpush.bf16.msra.mxu2 %v2442_v11  ;;  %v1741_v53 = vld [vmem:[%s2478_s30 + $0x3c] sm:$0xf0]  ;;  %v1747_v54 = vld [vmem:[%s2478_s30 + $0x38] sm:$0xf]  ;;  %v2203_v55 = vld [vmem:[%s2478_s30 + $0x40] sm:$0xf0]  ;;  %v2028_v57 = vor.u32 %v2274_v51, %v2027_v50 }
  0x1b   : > { %v1744_v58 = vor.u32 %v2201_v52, %v1741_v53  ;;  %v1748_v59 = vor.u32 %v2203_v55, %v1747_v54  ;;  %v1751_v60 = vld [vmem:[%s2478_s30 + $0x48] sm:$0xf]  ;;  %v2205_v61 = vld [vmem:[%s2478_s30 + $0x50] sm:$0xf0]  ;;  %v2204_v0 = vld [vmem:[%s2478_s30 + $0x4c] sm:$0xf] }
  0x1c   : > { %1017 = vmatpush.bf16.msra.mxu0 %v2294_v12  ;;  %2319 = vmatpush.bf16.msra.mxu3 %v2294_v12  ;;  %v2039_v62 = vld [vmem:[%s2478_s30 + $0x288] sm:$0xf]  ;;  %v2277_v63 = vld [vmem:[%s2478_s30 + $0x290] sm:$0xf0]  ;;  %v2206_v3 = vld [vmem:[%s2478_s30 + $0x58] sm:$0xf0] }
  0x1d   : > { %1186 = vmatpush.bf16.msra.mxu1 %v2302_v13  ;;  %v2208_v9 = vld [vmem:[%s2478_s30 + $0x68] sm:$0xf0]  ;;  %v2207_v12 = vld [vmem:[%s2478_s30 + $0x64] sm:$0xf]  ;;  %v2210_v25 = vld [vmem:[%s2478_s30 + $0x7c] sm:$0xf] }
  0x1e   : > { %1355 = vmatpush.bf16.msra.mxu2 %v2457_v14  ;;  %v2283_v24 = vld [vmem:[%s2478_s30 + $0x2c0] sm:$0xf0]  ;;  %v1783_v26 = vld [vmem:[%s2478_s30 + $0x80] sm:$0xf]  ;;  %v2212_v27 = vld [vmem:[%s2478_s30 + $0x88] sm:$0xf0] }
  0x1f   : > { %v1784_v31 = vor.u32 %v2212_v27, %v1783_v26  ;;  %v2213_v36 = vld [vmem:[%s2478_s30 + $0x94] sm:$0xf]  ;;  %v1789_v37 = vld [vmem:[%s2478_s30 + $0x9c] sm:$0xf0]  ;;  %v1795_v38 = vld [vmem:[%s2478_s30 + $0x98] sm:$0xf] }
  0x20   : > { %1018 = vmatpush.bf16.msra.mxu0 %v2293_v15  ;;  %2320 = vmatpush.bf16.msra.mxu3 %v2293_v15  ;;  %v2209_v15 = vld [vmem:[%s2478_s30 + $0x70] sm:$0xf0]  ;;  %v2215_v39 = vld [vmem:[%s2478_s30 + $0xa0] sm:$0xf0]  ;;  %v1792_v42 = vor.u32 %v2213_v36, %v1789_v37  ;;  %v2216_v48 = vld [vmem:[%s2478_s30 + $0xac] sm:$0xf] }
  0x21   : > { %1187 = vmatpush.bf16.msra.mxu1 %v2301_v16  ;;  %v1796_v43 = vor.u32 %v2215_v39, %v1795_v38  ;;  %v1801_v49 = vld [vmem:[%s2478_s30 + $0xb4] sm:$0xf0]  ;;  %v1807_v50 = vld [vmem:[%s2478_s30 + $0xb0] sm:$0xf]  ;;  %v2218_v51 = vld [vmem:[%s2478_s30 + $0xb8] sm:$0xf0] }
  0x22   : > { %1356 = vmatpush.bf16.msra.mxu2 %v2470_v17  ;;  %v1804_v54 = vor.u32 %v2216_v48, %v1801_v49  ;;  %v1808_v55 = vor.u32 %v2218_v51, %v1807_v50  ;;  %v2029_v48 = vld [vmem:[%s2478_s30 + $0x27c] sm:$0xf0]  ;;  %v1843_v50 = vld [vmem:[%s2478_s30 + $0xf8] sm:$0xf]  ;;  %v2227_v51 = vld [vmem:[%s2478_s30 + $0x100] sm:$0xf0] }
  0x23   : > { %v1837_v49 = vld [vmem:[%s2478_s30 + $0xfc] sm:$0xf0] }
  0x24   : > { %1019 = vmatpush.bf16.msra.mxu0 %v2292_v18  ;;  %2321 = vmatpush.bf16.msra.mxu3 %v2292_v18 }
  0x25   : > { %1188 = vmatpush.bf16.msra.mxu1 %v2300_v19 }
  0x26   : > { %1357 = vmatpush.bf16.msra.mxu2 %v2487_v20 }
  0x28   : > { %1020 = vmatpush.bf16.msra.mxu0 %v2291_v21  ;;  %2322 = vmatpush.bf16.msra.mxu3 %v2291_v21  ;;  %v2211_v21 = vld [vmem:[%s2478_s30 + $0x80] sm:$0xf0] }
  0x29   : > { %1189 = vmatpush.bf16.msra.mxu1 %v2299_v22 }
  0x2a   : > { %1358 = vmatpush.bf16.msra.mxu2 %v2498_v23 }
  0x2b   : > { %1021 = vmatmul.bf16.vlgmr.msra.gmra.mxu0 %v1716_v32  ;;  %1141 = vmatmul.bf16.vlgmr.msra.gmra.mxu3 %v2004_v33  ;;  %v1787_v32 = vld [vmem:[%s2478_s30 + $0x90] sm:$0xf]  ;;  %v2214_v33 = vld [vmem:[%s2478_s30 + $0x98] sm:$0xf0] }
  0x2c   : > { %2323 = vmatpush.bf16.msrb.mxu3 %v2392_v1  ;;  %1190 = vmatmul.bf16.vlgmr.msra.gmra.mxu1 %v1720_v34  ;;  %v1753_v1 = vld [vmem:[%s2478_s30 + $0x54] sm:$0xf0]  ;;  %v2075_v34 = vld [vmem:[%s2478_s30 + $0x2d0] sm:$0xf]  ;;  %v1788_v40 = vor.u32 %v2214_v33, %v1787_v32 }
  0x2d   : > { %1359 = vmatmul.bf16.vlgmr.msra.gmra.mxu2 %v1724_v35  ;;  %v1756_v6 = vor.u32 %v2204_v0, %v1753_v1  ;;  %v2286_v35 = vld [vmem:[%s2478_s30 + $0x2d8] sm:$0xf0]  ;;  %v2221_v0 = vld [vmem:[%s2478_s30 + $0xd0] sm:$0xf0] }
  0x2e   : > { %v2076_v41 = vor.u32 %v2286_v35, %v2075_v34 }
  0x30   : > { %2324 = vmatpush.bf16.msrb.mxu3 %v2407_v4  ;;  %v1752_v4 = vor.u32 %v2205_v61, %v1751_v60  ;;  %v2267_v60 = vld [vmem:[%s2478_s30 + $0x244] sm:$0xf]  ;;  %v2005_v61 = vld [vmem:[%s2478_s30 + $0x24c] sm:$0xf0] }
  0x34   : > { %2325 = vmatpush.bf16.msrb.mxu3 %v2422_v7 }
  0x38   : > { %2326 = vmatpush.bf16.msrb.mxu3 %v2437_v10  ;;  %v2051_v10 = vld [vmem:[%s2478_s30 + $0x2a0] sm:$0xf] }
  0x3b   : > { %1026 = vmatmul.bf16.gmra.mxu0 %v1728_v44  ;;  %1146 = vmatmul.bf16.gmra.mxu3 %v2016_v45  ;;  %v1799_v44 = vld [vmem:[%s2478_s30 + $0xa8] sm:$0xf]  ;;  %v2217_v45 = vld [vmem:[%s2478_s30 + $0xb0] sm:$0xf0] }
  0x3c   : > { %2327 = vmatpush.bf16.msrb.mxu3 %v2302_v13  ;;  %1195 = vmatmul.bf16.gmra.mxu1 %v1732_v46  ;;  %v1765_v13 = vld [vmem:[%s2478_s30 + $0x6c] sm:$0xf0]  ;;  %v2087_v46 = vld [vmem:[%s2478_s30 + $0x2e8] sm:$0xf]  ;;  %v1800_v52 = vor.u32 %v2217_v45, %v1799_v44  ;;  %v2226_v45 = vld [vmem:[%s2478_s30 + $0xf8] sm:$0xf0] }
  0x3d   : > { %1364 = vmatmul.bf16.gmra.mxu2 %v1736_v47  ;;  %v1768_v18 = vor.u32 %v2207_v12, %v1765_v13  ;;  %v2289_v47 = vld [vmem:[%s2478_s30 + $0x2f0] sm:$0xf0]  ;;  %v1835_v44 = vld [vmem:[%s2478_s30 + $0xf0] sm:$0xf] }
  0x3e   : > { %v2088_v53 = vor.u32 %v2289_v47, %v2087_v46  ;;  %v2225_v46 = vld [vmem:[%s2478_s30 + $0xf4] sm:$0xf] }
  0x3f   : > { %v2273_v47 = vld [vmem:[%s2478_s30 + $0x274] sm:$0xf] }
  0x40   : > { %2328 = vmatpush.bf16.msrb.mxu3 %v2301_v16 }
  0x44   : > { %2329 = vmatpush.bf16.msrb.mxu3 %v2300_v19 }
  0x48   : > { %2330 = vmatpush.bf16.msrb.mxu3 %v2299_v22  ;;  %v2063_v22 = vld [vmem:[%s2478_s30 + $0x2b8] sm:$0xf] }
  0x49   : > { %v2064_v29 = vor.u32 %v2283_v24, %v2063_v22  ;;  %v1831_v22 = vld [vmem:[%s2478_s30 + $0xe0] sm:$0xf]  ;;  %v2224_v24 = vld [vmem:[%s2478_s30 + $0xe8] sm:$0xf0] }
  0x4a   : > { %v1832_v32 = vor.u32 %v2224_v24, %v1831_v22 }
  0x4b   : > { %1031 = vmatmul.bf16.gmra.mxu0 %v1740_v56  ;;  %1151 = vmatmul.bf16.gmra.mxu3 %v2028_v57  ;;  %v2581_v56 = vld [vmem:[%s2951_s2] ss:$0 sm:$0xff] }
  0x4c   : > { %2331 = vmatpush.bf16.msra.mxu3 %v2397_v2  ;;  %1200 = vmatmul.bf16.gmra.mxu1 %v1744_v58  ;;  %v1759_v2 = vld [vmem:[%s2478_s30 + $0x50] sm:$0xf]  ;;  %v1811_v57 = vld [vmem:[%s2478_s30 + $0xc0] sm:$0xf]  ;;  %v2220_v58 = vld [vmem:[%s2478_s30 + $0xc8] sm:$0xf0] }
  0x4d   : > { %1369 = vmatmul.bf16.gmra.mxu2 %v1748_v59  ;;  %v1760_v7 = vor.u32 %v2206_v3, %v1759_v2  ;;  %v2219_v59 = vld [vmem:[%s2478_s30 + $0xc4] sm:$0xf]  ;;  %v1812_v1 = vor.u32 %v2220_v58, %v1811_v57  ;;  %v2008_v2 = vor.u32 %v2267_v60, %v2005_v61  ;;  %v2032_v57 = vor.u32 %v2273_v47, %v2029_v48  ;;  %v2233_v47 = vld [vmem:[%s2478_s30 + $0x130] sm:$0xf0] }
  0x4e   : > { %v1840_v60 = vor.u32 %v2225_v46, %v1837_v49  ;;  %v1844_v61 = vor.u32 %v2227_v51, %v1843_v50  ;;  %v1867_v46 = vld [vmem:[%s2478_s30 + $0x128] sm:$0xf] }
  0x50   : > { %2332 = vmatpush.bf16.msra.mxu3 %v2412_v5  ;;  %v2040_v5 = vor.u32 %v2277_v63, %v2039_v62  ;;  %v1813_v62 = vld [vmem:[%s2478_s30 + $0xcc] sm:$0xf0]  ;;  %v1819_v63 = vld [vmem:[%s2478_s30 + $0xc8] sm:$0xf] }
  0x54   : > { %2333 = vmatpush.bf16.msra.mxu3 %v2427_v8  ;;  %v1763_v8 = vld [vmem:[%s2478_s30 + $0x60] sm:$0xf] }
  0x55   : > { %v1764_v16 = vor.u32 %v2208_v9, %v1763_v8 }
  0x58   : > { %2334 = vmatpush.bf16.msra.mxu3 %v2442_v11  ;;  %v2280_v11 = vld [vmem:[%s2478_s30 + $0x2a8] sm:$0xf0] }
  0x5b   : > { %1036 = vmatmul.bf16.gmra.mxu0 %v1752_v4  ;;  %1156 = vmatmul.bf16.gmra.mxu3 %v2040_v5  ;;  %v1816_v4 = vor.u32 %v2219_v59, %v1813_v62  ;;  %v1820_v5 = vor.u32 %v2221_v0, %v1819_v63 }
  0x5c   : > { %2335 = vmatpush.bf16.msra.mxu3 %v2457_v14  ;;  %1205 = vmatmul.bf16.gmra.mxu1 %v1756_v6  ;;  %v1771_v14 = vld [vmem:[%s2478_s30 + $0x68] sm:$0xf] }
  0x5d   : > { %1374 = vmatmul.bf16.gmra.mxu2 %v1760_v7  ;;  %v1772_v19 = vor.u32 %v2209_v15, %v1771_v14 }
  0x60   : > { %2336 = vmatpush.bf16.msra.mxu3 %v2470_v17  ;;  %v2052_v17 = vor.u32 %v2280_v11, %v2051_v10 }
  0x64   : > { %2337 = vmatpush.bf16.msra.mxu3 %v2487_v20  ;;  %v1775_v20 = vld [vmem:[%s2478_s30 + $0x78] sm:$0xf] }
  0x65   : > { %v1776_v28 = vor.u32 %v2211_v21, %v1775_v20  ;;  %v2017_v20 = vld [vmem:[%s2478_s30 + $0x264] sm:$0xf0] }
  0x66   : > { %v1825_v21 = vld [vmem:[%s2478_s30 + $0xe4] sm:$0xf0] }
  0x68   : > { %2338 = vmatpush.bf16.msra.mxu3 %v2498_v23  ;;  %v1777_v23 = vld [vmem:[%s2478_s30 + $0x84] sm:$0xf0] }
  0x69   : > { %v1780_v30 = vor.u32 %v2210_v25, %v1777_v23 }
  0x6b   : > { %1041 = vmatmul.bf16.gmra.mxu0 %v1764_v16  ;;  %1161 = vmatmul.bf16.gmra.mxu3 %v2052_v17  ;;  %v1823_v16 = vld [vmem:[%s2478_s30 + $0xd8] sm:$0xf]  ;;  %v2223_v17 = vld [vmem:[%s2478_s30 + $0xe0] sm:$0xf0] }
  0x6c   : > { %1210 = vmatmul.bf16.gmra.mxu1 %v1768_v18  ;;  %v2222_v18 = vld [vmem:[%s2478_s30 + $0xdc] sm:$0xf]  ;;  %v1824_v27 = vor.u32 %v2223_v17, %v1823_v16  ;;  %v1855_v16 = vld [vmem:[%s2478_s30 + $0x110] sm:$0xf] }
  0x6d   : > { %1379 = vmatmul.bf16.gmra.mxu2 %v1772_v19  ;;  %v2270_v19 = vld [vmem:[%s2478_s30 + $0x25c] sm:$0xf] }
  0x6e   : > { %v2230_v17 = vld [vmem:[%s2478_s30 + $0x118] sm:$0xf0] }
  0x7b   : > { %1046 = vmatmul.bf16.gmra.mxu0 %v1776_v28  ;;  %1166 = vmatmul.bf16.gmra.mxu3 %v2064_v29  ;;  %v2020_v28 = vor.u32 %v2270_v19, %v2017_v20 }
  0x7c   : > { %1215 = vmatmul.bf16.gmra.mxu1 %v1780_v30 }
  0x7d   : > { %1384 = vmatmul.bf16.gmra.mxu2 %v1784_v31  ;;  %v1828_v31 = vor.u32 %v2222_v18, %v1825_v21 }
  0x8b   : > { %1051 = vmatmul.bf16.gmra.mxu0 %v1788_v40  ;;  %1171 = vmatmul.bf16.gmra.mxu3 %v2076_v41 }
  0x8c   : > { %1220 = vmatmul.bf16.gmra.mxu1 %v1792_v42 }
  0x8d   : > { %1389 = vmatmul.bf16.gmra.mxu2 %v1796_v43 }
  0x9b   : > { %1056 = vmatmul.bf16.gmra.mxu0 %v1800_v52  ;;  %1176 = vmatmul.bf16.gmra.mxu3 %v2088_v53 }
  0x9c   : > { %1225 = vmatmul.bf16.gmra.mxu1 %v1804_v54 }
  0x9d   : > { %1394 = vmatmul.bf16.gmra.mxu2 %v1808_v55  ;;  %v1836_v55 = vor.u32 %v2226_v45, %v1835_v44  ;;  %v2053_v44 = vld [vmem:[%s2478_s30 + $0x2ac] sm:$0xf0] }
  0x9e   : > { %v1861_v45 = vld [vmem:[%s2478_s30 + $0x12c] sm:$0xf0] }
  0xa8   : > { %v1022_v3 = vpop.f32.mrf.mxu0 }
  0xa9   : > { %v1023_v6 = vadd.f32 %v2581_v56, %v1022_v3  ;;  %v1191_v7 = vpop.f32.mrf.mxu1 }
  0xab   : > { %1061 = vmatmul.bf16.gmra.mxu0 %v1812_v1  ;;  %1310 = vmatmul.bf16.vlgmr.msrb.gmra.mxu3 %v2008_v2  ;;  %v1192_v8 = vadd.f32 %v1191_v7, %v1023_v6 }
  0xac   : > { %1230 = vmatmul.bf16.gmra.mxu1 %v1816_v4 }
  0xad   : > { %1399 = vmatmul.bf16.gmra.mxu2 %v1820_v5 }
  0xae   : > { %v2592_v9 = vpop.f32.mrf.mxu3 }
  0xb0   : > { %v1360_v10 = vpop.f32.mrf.mxu2  ;;  %v1024_v12 = vpop.f32.mrf.mxu0 }
  0xb1   : > { %v1361_v11 = vadd.f32 %v1360_v10, %v1192_v8  ;;  %v1193_v13 = vpop.f32.mrf.mxu1  ;;  %v1025_v15 = vadd.f32 %v2581_v56, %v1024_v12  ;;  %v1847_v10 = vld [vmem:[%s2478_s30 + $0x108] sm:$0xf]  ;;  %v2228_v12 = vld [vmem:[%s2478_s30 + $0x10c] sm:$0xf] }
  0xb3   : > { %v1520_v14 = vmax.f32 %v1361_v11, 0.0  ;;  %v1194_v25 = vadd.f32 %v1193_v13, %v1025_v15  ;;  %v2229_v11 = vld [vmem:[%s2478_s30 + $0x110] sm:$0xf0]  ;;  %v2276_v13 = vld [vmem:[%s2478_s30 + $0x28c] sm:$0xf] }
  0xb4   : > { %v1849_v15 = vld [vmem:[%s2478_s30 + $0x114] sm:$0xf0]  ;;  %v1848_v21 = vor.u32 %v2229_v11, %v1847_v10  ;;  %v2234_v10 = vld [vmem:[%s2478_s30 + $0x13c] sm:$0xf] }
  0xb5   : > { %1584 = vst [vmem:[%s2598_s21] sm:$0xff] %v1520_v14  ;;  %v2041_v14 = vld [vmem:[%s2478_s30 + $0x294] sm:$0xf0]  ;;  %v2282_v11 = vld [vmem:[%s2478_s30 + $0x2bc] sm:$0xf] }
  0xb6   : > { %v2610_v23 = vpop.f32.mrf.mxu3  ;;  %v2044_v22 = vor.u32 %v2276_v13, %v2041_v14  ;;  %v1873_v13 = vld [vmem:[%s2478_s30 + $0x144] sm:$0xf0]  ;;  %v1879_v14 = vld [vmem:[%s2478_s30 + $0x140] sm:$0xf] }
  0xb8   : > { %v1362_v26 = vpop.f32.mrf.mxu2  ;;  %v1027_v30 = vpop.f32.mrf.mxu0 }
  0xb9   : > { %v1363_v29 = vadd.f32 %v1362_v26, %v1194_v25  ;;  %v1028_v33 = vadd.f32 %v2581_v56, %v1027_v30  ;;  %v1196_v34 = vpop.f32.mrf.mxu1  ;;  %v1852_v26 = vor.u32 %v2228_v12, %v1849_v15  ;;  %v2065_v12 = vld [vmem:[%s2478_s30 + $0x2c4] sm:$0xf0]  ;;  %v2236_v15 = vld [vmem:[%s2478_s30 + $0x148] sm:$0xf0] }
  0xbb   : > { %v1521_v35 = vmax.f32 %v1363_v29, 0.0  ;;  %1066 = vmatmul.bf16.gmra.mxu0 %v1824_v27  ;;  %1315 = vmatmul.bf16.gmra.mxu3 %v2020_v28  ;;  %v1197_v36 = vadd.f32 %v1196_v34, %v1028_v33  ;;  %v1856_v27 = vor.u32 %v2230_v17, %v1855_v16 }
  0xbc   : > { %1235 = vmatmul.bf16.gmra.mxu1 %v1828_v31 }
  0xbd   : > { %1585 = vst [vmem:[%s2598_s21 + $0x8] sm:$0xff] %v1521_v35  ;;  %1404 = vmatmul.bf16.gmra.mxu2 %v1832_v32 }
  0xbe   : > { %v2614_v37 = vpop.f32.mrf.mxu3 }
  0xc0   : > { %v1365_v38 = vpop.f32.mrf.mxu2  ;;  %v1029_v40 = vpop.f32.mrf.mxu0 }
  0xc1   : > { %v1366_v39 = vadd.f32 %v1365_v38, %v1197_v36  ;;  %v1198_v41 = vpop.f32.mrf.mxu1  ;;  %v1030_v43 = vadd.f32 %v2581_v56, %v1029_v40  ;;  %v1859_v40 = vld [vmem:[%s2478_s30 + $0x120] sm:$0xf] }
  0xc3   : > { %v1522_v42 = vmax.f32 %v1366_v39, 0.0  ;;  %v1199_v52 = vadd.f32 %v1198_v41, %v1030_v43  ;;  %v2232_v41 = vld [vmem:[%s2478_s30 + $0x128] sm:$0xf0]  ;;  %v2279_v43 = vld [vmem:[%s2478_s30 + $0x2a4] sm:$0xf] }
  0xc4   : > { %v1860_v51 = vor.u32 %v2232_v41, %v1859_v40  ;;  %v1883_v40 = vld [vmem:[%s2478_s30 + $0x150] sm:$0xf]  ;;  %v2238_v41 = vld [vmem:[%s2478_s30 + $0x158] sm:$0xf0] }
  0xc5   : > { %1586 = vst [vmem:[%s2598_s21 + $0x10] sm:$0xff] %v1522_v42  ;;  %v2231_v42 = vld [vmem:[%s2478_s30 + $0x124] sm:$0xf] }
  0xc6   : > { %v2626_v53 = vpop.f32.mrf.mxu3 }
  0xc8   : > { %v1367_v54 = vpop.f32.mrf.mxu2  ;;  %v1032_v59 = vpop.f32.mrf.mxu0 }
  0xc9   : > { %v1368_v58 = vadd.f32 %v1367_v54, %v1199_v52  ;;  %v1033_v62 = vadd.f32 %v2581_v56, %v1032_v59  ;;  %v1201_v63 = vpop.f32.mrf.mxu1  ;;  %v2056_v52 = vor.u32 %v2279_v43, %v2053_v44  ;;  %v2285_v43 = vld [vmem:[%s2478_s30 + $0x2d4] sm:$0xf]  ;;  %v2077_v44 = vld [vmem:[%s2478_s30 + $0x2dc] sm:$0xf0] }
  0xcb   : > { %v1523_v0 = vmax.f32 %v1368_v58, 0.0  ;;  %1071 = vmatmul.bf16.gmra.mxu0 %v1836_v55  ;;  %1320 = vmatmul.bf16.gmra.mxu3 %v2032_v57  ;;  %v1202_v1 = vadd.f32 %v1201_v63, %v1033_v62  ;;  %v1864_v57 = vor.u32 %v2231_v42, %v1861_v45  ;;  %v1868_v58 = vor.u32 %v2233_v47, %v1867_v46  ;;  %v2237_v42 = vld [vmem:[%s2478_s30 + $0x154] sm:$0xf]  ;;  %v1885_v45 = vld [vmem:[%s2478_s30 + $0x15c] sm:$0xf0] }
  0xcc   : > { %1240 = vmatmul.bf16.gmra.mxu1 %v1840_v60  ;;  %v1891_v46 = vld [vmem:[%s2478_s30 + $0x158] sm:$0xf]  ;;  %v2239_v47 = vld [vmem:[%s2478_s30 + $0x160] sm:$0xf0] }
  0xcd   : > { %1587 = vst [vmem:[%s2598_s21 + $0x18] sm:$0xff] %v1523_v0  ;;  %1409 = vmatmul.bf16.gmra.mxu2 %v1844_v61 }
  0xce   : > { %v2630_v2 = vpop.f32.mrf.mxu3 }
  0xd0   : > { %v1370_v3 = vpop.f32.mrf.mxu2  ;;  %v1034_v5 = vpop.f32.mrf.mxu0 }
  0xd1   : > { %v1371_v4 = vadd.f32 %v1370_v3, %v1202_v1  ;;  %v1203_v6 = vpop.f32.mrf.mxu1  ;;  %v1035_v8 = vadd.f32 %v2581_v56, %v1034_v5 }
  0xd3   : > { %v1524_v7 = vmax.f32 %v1371_v4, 0.0  ;;  %v1204_v18 = vadd.f32 %v1203_v6, %v1035_v8  ;;  %v2235_v8 = vld [vmem:[%s2478_s30 + $0x140] sm:$0xf0] }
  0xd5   : > { %1588 = vst [vmem:[%s2598_s21 + $0x20] sm:$0xff] %v1524_v7  ;;  %v1871_v7 = vld [vmem:[%s2478_s30 + $0x138] sm:$0xf] }
  0xd6   : > { %v2642_v19 = vpop.f32.mrf.mxu3 }
  0xd8   : > { %v1372_v20 = vpop.f32.mrf.mxu2  ;;  %v1037_v25 = vpop.f32.mrf.mxu0 }
  0xd9   : > { %v1373_v24 = vadd.f32 %v1372_v20, %v1204_v18  ;;  %v1038_v28 = vadd.f32 %v2581_v56, %v1037_v25  ;;  %v1206_v29 = vpop.f32.mrf.mxu1  ;;  %v1872_v20 = vor.u32 %v2235_v8, %v1871_v7  ;;  %v1876_v25 = vor.u32 %v2234_v10, %v1873_v13  ;;  %v1895_v10 = vld [vmem:[%s2478_s30 + $0x168] sm:$0xf]  ;;  %v2288_v13 = vld [vmem:[%s2478_s30 + $0x2ec] sm:$0xf] }
  0xdb   : > { %v1525_v30 = vmax.f32 %v1373_v24, 0.0  ;;  %1076 = vmatmul.bf16.gmra.mxu0 %v1848_v21  ;;  %1325 = vmatmul.bf16.gmra.mxu3 %v2044_v22  ;;  %v1207_v31 = vadd.f32 %v1206_v29, %v1038_v28  ;;  %v2068_v21 = vor.u32 %v2282_v11, %v2065_v12  ;;  %v2241_v11 = vld [vmem:[%s2478_s30 + $0x170] sm:$0xf0]  ;;  %v2240_v12 = vld [vmem:[%s2478_s30 + $0x16c] sm:$0xf] }
  0xdc   : > { %1245 = vmatmul.bf16.gmra.mxu1 %v1852_v26  ;;  %v1880_v26 = vor.u32 %v2236_v15, %v1879_v14  ;;  %v2089_v14 = vld [vmem:[%s2478_s30 + $0x2f4] sm:$0xf0] }
  0xdd   : > { %1589 = vst [vmem:[%s2598_s21 + $0x28] sm:$0xff] %v1525_v30  ;;  %1414 = vmatmul.bf16.gmra.mxu2 %v1856_v27  ;;  %v1897_v15 = vld [vmem:[%s2478_s30 + $0x174] sm:$0xf0] }
  0xde   : > { %v2646_v32 = vpop.f32.mrf.mxu3 }
  0xe0   : > { %v1375_v33 = vpop.f32.mrf.mxu2  ;;  %v1039_v35 = vpop.f32.mrf.mxu0 }
  0xe1   : > { %v1376_v34 = vadd.f32 %v1375_v33, %v1207_v31  ;;  %v1208_v36 = vpop.f32.mrf.mxu1  ;;  %v1040_v39 = vadd.f32 %v2581_v56, %v1039_v35 }
  0xe3   : > { %v1526_v38 = vmax.f32 %v1376_v34, 0.0  ;;  %v1209_v48 = vadd.f32 %v1208_v36, %v1040_v39 }
  0xe5   : > { %1590 = vst [vmem:[%s2598_s21 + $0x30] sm:$0xff] %v1526_v38 }
  0xe6   : > { %v2658_v49 = vpop.f32.mrf.mxu3 }
  0xe8   : > { %v1377_v50 = vpop.f32.mrf.mxu2  ;;  %v1042_v55 = vpop.f32.mrf.mxu0 }
  0xe9   : > { %v1378_v54 = vadd.f32 %v1377_v50, %v1209_v48  ;;  %v1043_v59 = vadd.f32 %v2581_v56, %v1042_v55  ;;  %v1211_v60 = vpop.f32.mrf.mxu1 }
  0xeb   : > { %v1527_v61 = vmax.f32 %v1378_v54, 0.0  ;;  %1081 = vmatmul.bf16.gmra.mxu0 %v1860_v51  ;;  %1330 = vmatmul.bf16.gmra.mxu3 %v2056_v52  ;;  %v1212_v62 = vadd.f32 %v1211_v60, %v1043_v59  ;;  %v1884_v52 = vor.u32 %v2238_v41, %v1883_v40  ;;  %v2080_v54 = vor.u32 %v2285_v43, %v2077_v44  ;;  %v1907_v44 = vld [vmem:[%s2478_s30 + $0x180] sm:$0xf] }
  0xec   : > { %1250 = vmatmul.bf16.gmra.mxu1 %v1864_v57  ;;  %v1892_v59 = vor.u32 %v2239_v47, %v1891_v46  ;;  %v2243_v46 = vld [vmem:[%s2478_s30 + $0x184] sm:$0xf]  ;;  %v2011_v47 = vld [vmem:[%s2478_s30 + $0x248] sm:$0xf] }
  0xed   : > { %1591 = vst [vmem:[%s2598_s21 + $0x38] sm:$0xff] %v1527_v61  ;;  %1419 = vmatmul.bf16.gmra.mxu2 %v1868_v58  ;;  %v1888_v58 = vor.u32 %v2237_v42, %v1885_v45  ;;  %v2244_v45 = vld [vmem:[%s2478_s30 + $0x188] sm:$0xf0] }
  0xee   : > { %v2662_v63 = vpop.f32.mrf.mxu3 }
  0xf0   : > { %v1380_v0 = vpop.f32.mrf.mxu2  ;;  %v1044_v3 = vpop.f32.mrf.mxu0 }
  0xf1   : > { %v1381_v1 = vadd.f32 %v1380_v0, %v1212_v62  ;;  %v1213_v4 = vpop.f32.mrf.mxu1  ;;  %v1045_v6 = vadd.f32 %v2581_v56, %v1044_v3 }
  0xf3   : > { %v1528_v5 = vmax.f32 %v1381_v1, 0.0  ;;  %v1214_v16 = vadd.f32 %v1213_v4, %v1045_v6 }
  0xf5   : > { %1592 = vst [vmem:[%s2598_s21 + $0x40] sm:$0xff] %v1528_v5 }
  0xf6   : > { %v2674_v17 = vpop.f32.mrf.mxu3 }
  0xf8   : > { %v1382_v18 = vpop.f32.mrf.mxu2  ;;  %v1047_v24 = vpop.f32.mrf.mxu0 }
  0xf9   : > { %v1383_v22 = vadd.f32 %v1382_v18, %v1214_v16  ;;  %v1048_v27 = vadd.f32 %v2581_v56, %v1047_v24  ;;  %v1216_v28 = vpop.f32.mrf.mxu1  ;;  %v1903_v16 = vld [vmem:[%s2478_s30 + $0x170] sm:$0xf]  ;;  %v2242_v18 = vld [vmem:[%s2478_s30 + $0x178] sm:$0xf0]  ;;  %v1896_v24 = vor.u32 %v2241_v11, %v1895_v10 }
  0xfb   : > { %v1529_v29 = vmax.f32 %v1383_v22, 0.0  ;;  %1086 = vmatmul.bf16.gmra.mxu0 %v1872_v20  ;;  %1335 = vmatmul.bf16.gmra.mxu3 %v2068_v21  ;;  %v1217_v30 = vadd.f32 %v1216_v28, %v1048_v27  ;;  %v1900_v28 = vor.u32 %v2240_v12, %v1897_v15 }
  0xfc   : > { %1255 = vmatmul.bf16.gmra.mxu1 %v1876_v25  ;;  %v2092_v25 = vor.u32 %v2288_v13, %v2089_v14 }
  0xfd   : > { %1593 = vst [vmem:[%s2598_s21 + $0x48] sm:$0xff] %v1529_v29  ;;  %1424 = vmatmul.bf16.gmra.mxu2 %v1880_v26  ;;  %v1904_v29 = vor.u32 %v2242_v18, %v1903_v16 }
  0xfe   : > { %v2678_v31 = vpop.f32.mrf.mxu3 }
 0x100   : > { %v1385_v33 = vpop.f32.mrf.mxu2  ;;  %v1049_v35 = vpop.f32.mrf.mxu0 }
 0x101   : > { %v1386_v34 = vadd.f32 %v1385_v33, %v1217_v30  ;;  %v1218_v36 = vpop.f32.mrf.mxu1  ;;  %v1050_v39 = vadd.f32 %v2581_v56, %v1049_v35 }
 0x103   : > { %v1530_v38 = vmax.f32 %v1386_v34, 0.0  ;;  %v1219_v48 = vadd.f32 %v1218_v36, %v1050_v39 }
 0x105   : > { %1594 = vst [vmem:[%s2598_s21 + $0x50] sm:$0xff] %v1530_v38 }
 0x106   : > { %v2690_v50 = vpop.f32.mrf.mxu3 }
 0x108   : > { %v1387_v51 = vpop.f32.mrf.mxu2  ;;  %v1052_v57 = vpop.f32.mrf.mxu0 }
 0x109   : > { %v1388_v55 = vadd.f32 %v1387_v51, %v1219_v48  ;;  %v1053_v60 = vadd.f32 %v2581_v56, %v1052_v57  ;;  %v1221_v61 = vpop.f32.mrf.mxu1  ;;  %v2269_v48 = vld [vmem:[%s2478_s30 + $0x250] sm:$0xf0]  ;;  %v1909_v51 = vld [vmem:[%s2478_s30 + $0x18c] sm:$0xf0] }
 0x10b   : > { %v1531_v62 = vmax.f32 %v1388_v55, 0.0  ;;  %1091 = vmatmul.bf16.gmra.mxu0 %v1884_v52  ;;  %1340 = vmatmul.bf16.gmra.mxu3 %v2080_v54  ;;  %v1222_v0 = vadd.f32 %v1221_v61, %v1053_v60  ;;  %v1915_v52 = vld [vmem:[%s2478_s30 + $0x188] sm:$0xf]  ;;  %v2245_v54 = vld [vmem:[%s2478_s30 + $0x190] sm:$0xf0]  ;;  %v2012_v60 = vor.u32 %v2269_v48, %v2011_v47  ;;  %v1148_v47 = vadd.f32 %v2581_v56, %v2614_v37 }
 0x10c   : > { %1260 = vmatmul.bf16.gmra.mxu1 %v1888_v58  ;;  %v1150_v37 = vadd.f32 %v2581_v56, %v2626_v53 }
 0x10d   : > { %1595 = vst [vmem:[%s2598_s21 + $0x58] sm:$0xff] %v1531_v62  ;;  %1429 = vmatmul.bf16.gmra.mxu2 %v1892_v59  ;;  %v1908_v59 = vor.u32 %v2244_v45, %v1907_v44 }
 0x10e   : > { %v2694_v1 = vpop.f32.mrf.mxu3 }
 0x110   : > { %v1390_v3 = vpop.f32.mrf.mxu2  ;;  %v1054_v5 = vpop.f32.mrf.mxu0 }
 0x111   : > { %v1391_v4 = vadd.f32 %v1390_v3, %v1222_v0  ;;  %v1223_v6 = vpop.f32.mrf.mxu1  ;;  %v1055_v8 = vadd.f32 %v2581_v56, %v1054_v5  ;;  %v1912_v0 = vor.u32 %v2243_v46, %v1909_v51  ;;  %v1916_v3 = vor.u32 %v2245_v54, %v1915_v52 }
 0x113   : > { %v1532_v7 = vmax.f32 %v1391_v4, 0.0  ;;  %v1224_v20 = vadd.f32 %v1223_v6, %v1055_v8  ;;  %v1143_v8 = vadd.f32 %v2581_v56, %v2592_v9  ;;  %v1145_v9 = vadd.f32 %v2581_v56, %v2610_v23 }
 0x115   : > { %1596 = vst [vmem:[%s2598_s21 + $0x60] sm:$0xff] %v1532_v7 }
 0x116   : > { %v2706_v21 = vpop.f32.mrf.mxu3 }
 0x118   : > { %v1392_v22 = vpop.f32.mrf.mxu2  ;;  %v1057_v27 = vpop.f32.mrf.mxu0 }
 0x119   : > { %v1393_v26 = vadd.f32 %v1392_v22, %v1224_v20  ;;  %v1058_v30 = vadd.f32 %v2581_v56, %v1057_v27  ;;  %v1226_v33 = vpop.f32.mrf.mxu1  ;;  %v1919_v20 = vld [vmem:[%s2478_s30 + $0x198] sm:$0xf]  ;;  %v2247_v22 = vld [vmem:[%s2478_s30 + $0x1a0] sm:$0xf0]  ;;  %v1921_v27 = vld [vmem:[%s2478_s30 + $0x1a4] sm:$0xf0] }
 0x11b   : > { %v1533_v34 = vmax.f32 %v1393_v26, 0.0  ;;  %1096 = vmatmul.bf16.gmra.mxu0 %v1896_v24  ;;  %1345 = vmatmul.bf16.gmra.mxu3 %v2092_v25  ;;  %v1227_v35 = vadd.f32 %v1226_v33, %v1058_v30  ;;  %v2246_v24 = vld [vmem:[%s2478_s30 + $0x19c] sm:$0xf]  ;;  %v2023_v25 = vld [vmem:[%s2478_s30 + $0x260] sm:$0xf] }
 0x11c   : > { %1265 = vmatmul.bf16.gmra.mxu1 %v1900_v28  ;;  %v2272_v26 = vld [vmem:[%s2478_s30 + $0x268] sm:$0xf0]  ;;  %v1927_v28 = vld [vmem:[%s2478_s30 + $0x1a0] sm:$0xf] }
 0x11d   : > { %1597 = vst [vmem:[%s2598_s21 + $0x68] sm:$0xff] %v1533_v34  ;;  %1434 = vmatmul.bf16.gmra.mxu2 %v1904_v29  ;;  %v2248_v29 = vld [vmem:[%s2478_s30 + $0x1a8] sm:$0xf0] }
 0x11e   : > { %v2710_v36 = vpop.f32.mrf.mxu3 }
 0x120   : > { %v1395_v38 = vpop.f32.mrf.mxu2  ;;  %v1059_v40 = vpop.f32.mrf.mxu0 }
 0x121   : > { %v1396_v39 = vadd.f32 %v1395_v38, %v1227_v35  ;;  %v1228_v41 = vpop.f32.mrf.mxu1  ;;  %v1060_v43 = vadd.f32 %v2581_v56, %v1059_v40  ;;  %v1920_v38 = vor.u32 %v2247_v22, %v1919_v20 }
 0x123   : > { %v1534_v42 = vmax.f32 %v1396_v39, 0.0  ;;  %v1229_v55 = vadd.f32 %v1228_v41, %v1060_v43  ;;  %v2024_v39 = vor.u32 %v2272_v26, %v2023_v25  ;;  %v1928_v43 = vor.u32 %v2248_v29, %v1927_v28 }
 0x125   : > { %1598 = vst [vmem:[%s2598_s21 + $0x70] sm:$0xff] %v1534_v42  ;;  %v1924_v42 = vor.u32 %v2246_v24, %v1921_v27 }
 0x126   : > { %v2722_v57 = vpop.f32.mrf.mxu3 }
 0x128   : > { %v1397_v58 = vpop.f32.mrf.mxu2  ;;  %v1062_v62 = vpop.f32.mrf.mxu0 }
 0x129   : > { %v1398_v61 = vadd.f32 %v1397_v58, %v1229_v55  ;;  %v1063_v4 = vadd.f32 %v2581_v56, %v1062_v62  ;;  %v1231_v5 = vpop.f32.mrf.mxu1  ;;  %v2250_v62 = vld [vmem:[%s2478_s30 + $0x1b8] sm:$0xf0] }
 0x12b   : > { %v1535_v6 = vmax.f32 %v1398_v61, 0.0  ;;  %1101 = vmatmul.bf16.gmra.mxu0 %v1908_v59  ;;  %1479 = vmatmul.bf16.vlgmr.msra.gmra.mxu3 %v2012_v60  ;;  %v1232_v7 = vadd.f32 %v1231_v5, %v1063_v4  ;;  %v1931_v61 = vld [vmem:[%s2478_s30 + $0x1b0] sm:$0xf]  ;;  %v2275_v4 = vld [vmem:[%s2478_s30 + $0x280] sm:$0xf0] }
 0x12c   : > { %1270 = vmatmul.bf16.gmra.mxu1 %v1912_v0  ;;  %v2249_v0 = vld [vmem:[%s2478_s30 + $0x1b4] sm:$0xf]  ;;  %v1933_v5 = vld [vmem:[%s2478_s30 + $0x1bc] sm:$0xf0] }
 0x12d   : > { %1599 = vst [vmem:[%s2598_s21 + $0x78] sm:$0xff] %v1535_v6  ;;  %1439 = vmatmul.bf16.gmra.mxu2 %v1916_v3  ;;  %v2035_v3 = vld [vmem:[%s2478_s30 + $0x278] sm:$0xf]  ;;  %v1936_v20 = vor.u32 %v2249_v0, %v1933_v5 }
 0x12e   : > { %v1311_v10 = vpop.f32.mrf.mxu3  ;;  %v1939_v6 = vld [vmem:[%s2478_s30 + $0x1b8] sm:$0xf] }
 0x12f   : > { %v2728_v11 = vadd.f32 %v1311_v10, %v1143_v8 }
 0x130   : > { %v1400_v12 = vpop.f32.mrf.mxu2  ;;  %v1064_v14 = vpop.f32.mrf.mxu0 }
 0x131   : > { %v1401_v13 = vadd.f32 %v1400_v12, %v1232_v7  ;;  %v1233_v15 = vpop.f32.mrf.mxu1  ;;  %v1065_v18 = vadd.f32 %v2581_v56, %v1064_v14  ;;  %v2251_v7 = vld [vmem:[%s2478_s30 + $0x1c0] sm:$0xf0]  ;;  %v1932_v14 = vor.u32 %v2250_v62, %v1931_v61 }
 0x132   : > { %v1940_v22 = vor.u32 %v2251_v7, %v1939_v6 }
 0x133   : > { %v1536_v16 = vmax.f32 %v1401_v13, 0.0  ;;  %v1234_v30 = vadd.f32 %v1233_v15, %v1065_v18  ;;  %v2036_v15 = vor.u32 %v2275_v4, %v2035_v3 }
 0x135   : > { %1600 = vst [vmem:[%s2598_s21 + $0x80] sm:$0xff] %v1536_v16 }
 0x136   : > { %v1313_v33 = vpop.f32.mrf.mxu3 }
 0x137   : > { %v2742_v34 = vadd.f32 %v1313_v33, %v1145_v9  ;;  %v1153_v9 = vadd.f32 %v2581_v56, %v2630_v2  ;;  %v1155_v2 = vadd.f32 %v2581_v56, %v2642_v19 }
 0x138   : > { %v1402_v35 = vpop.f32.mrf.mxu2  ;;  %v1067_v41 = vpop.f32.mrf.mxu0 }
 0x139   : > { %v1403_v40 = vadd.f32 %v1402_v35, %v1234_v30  ;;  %v1068_v44 = vadd.f32 %v2581_v56, %v1067_v41  ;;  %v1236_v45 = vpop.f32.mrf.mxu1  ;;  %v2253_v41 = vld [vmem:[%s2478_s30 + $0x1d0] sm:$0xf0] }
 0x13b   : > { %v1537_v46 = vmax.f32 %v1403_v40, 0.0  ;;  %1106 = vmatmul.bf16.gmra.mxu0 %v1920_v38  ;;  %1484 = vmatmul.bf16.gmra.mxu3 %v2024_v39  ;;  %v1237_v23 = vadd.f32 %v1236_v45, %v1068_v44  ;;  %v1943_v40 = vld [vmem:[%s2478_s30 + $0x1c8] sm:$0xf]  ;;  %v2278_v44 = vld [vmem:[%s2478_s30 + $0x298] sm:$0xf0] }
 0x13c   : > { %1275 = vmatmul.bf16.gmra.mxu1 %v1924_v42  ;;  %v2252_v42 = vld [vmem:[%s2478_s30 + $0x1cc] sm:$0xf]  ;;  %v1945_v45 = vld [vmem:[%s2478_s30 + $0x1d4] sm:$0xf0] }
 0x13d   : > { %1601 = vst [vmem:[%s2598_s21 + $0x88] sm:$0xff] %v1537_v46  ;;  %1444 = vmatmul.bf16.gmra.mxu2 %v1928_v43  ;;  %v2047_v43 = vld [vmem:[%s2478_s30 + $0x290] sm:$0xf]  ;;  %v1948_v61 = vor.u32 %v2252_v42, %v1945_v45 }
 0x13e   : > { %v1316_v48 = vpop.f32.mrf.mxu3  ;;  %v1951_v46 = vld [vmem:[%s2478_s30 + $0x1d0] sm:$0xf] }
 0x13f   : > { %v2748_v51 = vadd.f32 %v1316_v48, %v1148_v47 }
 0x140   : > { %v1405_v52 = vpop.f32.mrf.mxu2  ;;  %v1069_v55 = vpop.f32.mrf.mxu0 }
 0x141   : > { %v1406_v54 = vadd.f32 %v1405_v52, %v1237_v23  ;;  %v1238_v58 = vpop.f32.mrf.mxu1  ;;  %v1070_v60 = vadd.f32 %v2581_v56, %v1069_v55  ;;  %v2254_v23 = vld [vmem:[%s2478_s30 + $0x1d8] sm:$0xf0]  ;;  %v1944_v55 = vor.u32 %v2253_v41, %v1943_v40 }
 0x142   : > { %v1952_v62 = vor.u32 %v2254_v23, %v1951_v46 }
 0x143   : > { %v1538_v59 = vmax.f32 %v1406_v54, 0.0  ;;  %v1239_v8 = vadd.f32 %v1238_v58, %v1070_v60  ;;  %v2048_v58 = vor.u32 %v2278_v44, %v2047_v43 }
 0x145   : > { %1602 = vst [vmem:[%s2598_s21 + $0x90] sm:$0xff] %v1538_v59 }
 0x146   : > { %v1318_v10 = vpop.f32.mrf.mxu3 }
 0x147   : > { %v2762_v12 = vadd.f32 %v1318_v10, %v1150_v37  ;;  %v1158_v37 = vadd.f32 %v2581_v56, %v2646_v32  ;;  %v1160_v32 = vadd.f32 %v2581_v56, %v2658_v49 }
 0x148   : > { %v1407_v13 = vpop.f32.mrf.mxu2  ;;  %v1072_v18 = vpop.f32.mrf.mxu0 }
 0x149   : > { %v1408_v16 = vadd.f32 %v1407_v13, %v1239_v8  ;;  %v1073_v24 = vadd.f32 %v2581_v56, %v1072_v18  ;;  %v1241_v25 = vpop.f32.mrf.mxu1  ;;  %v2256_v18 = vld [vmem:[%s2478_s30 + $0x1e8] sm:$0xf0] }
 0x14b   : > { %v1539_v26 = vmax.f32 %v1408_v16, 0.0  ;;  %1111 = vmatmul.bf16.gmra.mxu0 %v1932_v14  ;;  %1489 = vmatmul.bf16.gmra.mxu3 %v2036_v15  ;;  %v1242_v53 = vadd.f32 %v1241_v25, %v1073_v24  ;;  %v1955_v16 = vld [vmem:[%s2478_s30 + $0x1e0] sm:$0xf]  ;;  %v2281_v24 = vld [vmem:[%s2478_s30 + $0x2b0] sm:$0xf0] }
 0x14c   : > { %1280 = vmatmul.bf16.gmra.mxu1 %v1936_v20  ;;  %v2255_v20 = vld [vmem:[%s2478_s30 + $0x1e4] sm:$0xf]  ;;  %v1957_v25 = vld [vmem:[%s2478_s30 + $0x1ec] sm:$0xf0] }
 0x14d   : > { %1603 = vst [vmem:[%s2598_s21 + $0x98] sm:$0xff] %v1539_v26  ;;  %1449 = vmatmul.bf16.gmra.mxu2 %v1940_v22  ;;  %v2059_v22 = vld [vmem:[%s2478_s30 + $0x2a8] sm:$0xf]  ;;  %v1960_v40 = vor.u32 %v2255_v20, %v1957_v25 }
 0x14e   : > { %v1321_v27 = vpop.f32.mrf.mxu3  ;;  %v1963_v26 = vld [vmem:[%s2478_s30 + $0x1e8] sm:$0xf] }
 0x14f   : > { %v2768_v28 = vadd.f32 %v1321_v27, %v1153_v9 }
 0x150   : > { %v1410_v29 = vpop.f32.mrf.mxu2  ;;  %v1074_v33 = vpop.f32.mrf.mxu0 }
 0x151   : > { %v1411_v30 = vadd.f32 %v1410_v29, %v1242_v53  ;;  %v1243_v35 = vpop.f32.mrf.mxu1  ;;  %v1075_v39 = vadd.f32 %v2581_v56, %v1074_v33  ;;  %v2257_v53 = vld [vmem:[%s2478_s30 + $0x1f0] sm:$0xf0]  ;;  %v1956_v33 = vor.u32 %v2256_v18, %v1955_v16 }
 0x152   : > { %v1964_v41 = vor.u32 %v2257_v53, %v1963_v26 }
 0x153   : > { %v1540_v38 = vmax.f32 %v1411_v30, 0.0  ;;  %v1244_v47 = vadd.f32 %v1243_v35, %v1075_v39  ;;  %v2060_v35 = vor.u32 %v2281_v24, %v2059_v22 }
 0x155   : > { %1604 = vst [vmem:[%s2598_s21 + $0xa0] sm:$0xff] %v1540_v38 }
 0x156   : > { %v1323_v48 = vpop.f32.mrf.mxu3 }
 0x157   : > { %v2782_v52 = vadd.f32 %v1323_v48, %v1155_v2  ;;  %v1163_v2 = vadd.f32 %v2581_v56, %v2662_v63  ;;  %v1165_v63 = vadd.f32 %v2581_v56, %v2674_v17 }
 0x158   : > { %v1412_v54 = vpop.f32.mrf.mxu2  ;;  %v1077_v60 = vpop.f32.mrf.mxu0 }
 0x159   : > { %v1413_v59 = vadd.f32 %v1412_v54, %v1244_v47  ;;  %v1078_v0 = vadd.f32 %v2581_v56, %v1077_v60  ;;  %v1246_v3 = vpop.f32.mrf.mxu1  ;;  %v2259_v60 = vld [vmem:[%s2478_s30 + $0x200] sm:$0xf0] }
 0x15b   : > { %v1541_v4 = vmax.f32 %v1413_v59, 0.0  ;;  %1116 = vmatmul.bf16.gmra.mxu0 %v1944_v55  ;;  %1494 = vmatmul.bf16.gmra.mxu3 %v2048_v58  ;;  %v1247_v19 = vadd.f32 %v1246_v3, %v1078_v0  ;;  %v1967_v59 = vld [vmem:[%s2478_s30 + $0x1f8] sm:$0xf]  ;;  %v2284_v0 = vld [vmem:[%s2478_s30 + $0x2c8] sm:$0xf0] }
 0x15c   : > { %1285 = vmatmul.bf16.gmra.mxu1 %v1948_v61  ;;  %v2258_v61 = vld [vmem:[%s2478_s30 + $0x1fc] sm:$0xf]  ;;  %v1969_v3 = vld [vmem:[%s2478_s30 + $0x204] sm:$0xf0] }
 0x15d   : > { %1605 = vst [vmem:[%s2598_s21 + $0xa8] sm:$0xff] %v1541_v4  ;;  %1454 = vmatmul.bf16.gmra.mxu2 %v1952_v62  ;;  %v2071_v62 = vld [vmem:[%s2478_s30 + $0x2c0] sm:$0xf]  ;;  %v1972_v16 = vor.u32 %v2258_v61, %v1969_v3 }
 0x15e   : > { %v1326_v5 = vpop.f32.mrf.mxu3  ;;  %v1975_v4 = vld [vmem:[%s2478_s30 + $0x200] sm:$0xf] }
 0x15f   : > { %v2788_v6 = vadd.f32 %v1326_v5, %v1158_v37  ;;  %v2847_v61 = vld [vmem:[%s2951_s2] ss:$0 sm:$0xff] }
 0x160   : > { %v1415_v7 = vpop.f32.mrf.mxu2  ;;  %v1079_v10 = vpop.f32.mrf.mxu0 }
 0x161   : > { %v1416_v8 = vadd.f32 %v1415_v7, %v1247_v19  ;;  %v1248_v13 = vpop.f32.mrf.mxu1  ;;  %v1080_v15 = vadd.f32 %v2581_v56, %v1079_v10  ;;  %v2260_v19 = vld [vmem:[%s2478_s30 + $0x208] sm:$0xf0]  ;;  %v1968_v10 = vor.u32 %v2259_v60, %v1967_v59 }
 0x162   : > { %v1976_v18 = vor.u32 %v2260_v19, %v1975_v4 }
 0x163   : > { %v1542_v14 = vmax.f32 %v1416_v8, 0.0  ;;  %v1249_v9 = vadd.f32 %v1248_v13, %v1080_v15  ;;  %v2072_v13 = vor.u32 %v2284_v0, %v2071_v62 }
 0x165   : > { %1606 = vst [vmem:[%s2598_s21 + $0xb0] sm:$0xff] %v1542_v14 }
 0x166   : > { %v1328_v27 = vpop.f32.mrf.mxu3 }
 0x167   : > { %v2802_v29 = vadd.f32 %v1328_v27, %v1160_v32  ;;  %v1168_v32 = vadd.f32 %v2581_v56, %v2678_v31  ;;  %v1170_v31 = vadd.f32 %v2581_v56, %v2690_v50 }
 0x168   : > { %v1417_v30 = vpop.f32.mrf.mxu2  ;;  %v1082_v39 = vpop.f32.mrf.mxu0 }
 0x169   : > { %v1418_v38 = vadd.f32 %v1417_v30, %v1249_v9  ;;  %v1083_v42 = vadd.f32 %v2581_v56, %v1082_v39  ;;  %v1251_v43 = vpop.f32.mrf.mxu1  ;;  %v2262_v39 = vld [vmem:[%s2478_s30 + $0x218] sm:$0xf0] }
 0x16b   : > { %v1543_v44 = vmax.f32 %v1418_v38, 0.0  ;;  %1121 = vmatmul.bf16.gmra.mxu0 %v1956_v33  ;;  %1499 = vmatmul.bf16.gmra.mxu3 %v2060_v35  ;;  %v1252_v49 = vadd.f32 %v1251_v43, %v1083_v42  ;;  %v1979_v38 = vld [vmem:[%s2478_s30 + $0x210] sm:$0xf]  ;;  %v2287_v42 = vld [vmem:[%s2478_s30 + $0x2e0] sm:$0xf0] }
 0x16c   : > { %1290 = vmatmul.bf16.gmra.mxu1 %v1960_v40  ;;  %v2261_v40 = vld [vmem:[%s2478_s30 + $0x214] sm:$0xf]  ;;  %v1981_v43 = vld [vmem:[%s2478_s30 + $0x21c] sm:$0xf0] }
 0x16d   : > { %1607 = vst [vmem:[%s2598_s21 + $0xb8] sm:$0xff] %v1543_v44  ;;  %1459 = vmatmul.bf16.gmra.mxu2 %v1964_v41  ;;  %v2083_v41 = vld [vmem:[%s2478_s30 + $0x2d8] sm:$0xf]  ;;  %v1984_v59 = vor.u32 %v2261_v40, %v1981_v43 }
 0x16e   : > { %v1331_v45 = vpop.f32.mrf.mxu3  ;;  %v1987_v44 = vld [vmem:[%s2478_s30 + $0x218] sm:$0xf] }
 0x16f   : > { %v2808_v46 = vadd.f32 %v1331_v45, %v1163_v2 }
 0x170   : > { %v1420_v23 = vpop.f32.mrf.mxu2  ;;  %v1084_v48 = vpop.f32.mrf.mxu0 }
 0x171   : > { %v1421_v47 = vadd.f32 %v1420_v23, %v1252_v49  ;;  %v1253_v54 = vpop.f32.mrf.mxu1  ;;  %v1085_v58 = vadd.f32 %v2581_v56, %v1084_v48  ;;  %v2263_v49 = vld [vmem:[%s2478_s30 + $0x220] sm:$0xf0]  ;;  %v1980_v48 = vor.u32 %v2262_v39, %v1979_v38 }
 0x172   : > { %v1988_v60 = vor.u32 %v2263_v49, %v1987_v44 }
 0x173   : > { %v1544_v55 = vmax.f32 %v1421_v47, 0.0  ;;  %v1254_v37 = vadd.f32 %v1253_v54, %v1085_v58  ;;  %v2084_v54 = vor.u32 %v2287_v42, %v2083_v41 }
 0x175   : > { %1608 = vst [vmem:[%s2598_s21 + $0xc0] sm:$0xff] %v1544_v55 }
 0x176   : > { %v1333_v5 = vpop.f32.mrf.mxu3 }
 0x177   : > { %v2822_v7 = vadd.f32 %v1333_v5, %v1165_v63  ;;  %v1173_v63 = vadd.f32 %v2847_v61, %v2694_v1  ;;  %v1175_v1 = vadd.f32 %v2847_v61, %v2706_v21 }
 0x178   : > { %v1422_v8 = vpop.f32.mrf.mxu2  ;;  %v1087_v15 = vpop.f32.mrf.mxu0 }
 0x179   : > { %v1423_v14 = vadd.f32 %v1422_v8, %v1254_v37  ;;  %v1088_v20 = vadd.f32 %v2581_v56, %v1087_v15  ;;  %v1256_v22 = vpop.f32.mrf.mxu1  ;;  %v2265_v15 = vld [vmem:[%s2478_s30 + $0x230] sm:$0xf0] }
 0x17b   : > { %v1545_v24 = vmax.f32 %v1423_v14, 0.0  ;;  %1126 = vmatmul.bf16.gmra.mxu0 %v1968_v10  ;;  %1504 = vmatmul.bf16.gmra.mxu3 %v2072_v13  ;;  %v1257_v17 = vadd.f32 %v1256_v22, %v1088_v20  ;;  %v1991_v14 = vld [vmem:[%s2478_s30 + $0x228] sm:$0xf]  ;;  %v2290_v20 = vld [vmem:[%s2478_s30 + $0x2f8] sm:$0xf0] }
 0x17c   : > { %1295 = vmatmul.bf16.gmra.mxu1 %v1972_v16  ;;  %v2264_v16 = vld [vmem:[%s2478_s30 + $0x22c] sm:$0xf]  ;;  %v1993_v22 = vld [vmem:[%s2478_s30 + $0x234] sm:$0xf0] }
 0x17d   : > { %1609 = vst [vmem:[%s2598_s21 + $0xc8] sm:$0xff] %v1545_v24  ;;  %1464 = vmatmul.bf16.gmra.mxu2 %v1976_v18  ;;  %v2095_v18 = vld [vmem:[%s2478_s30 + $0x2f0] sm:$0xf]  ;;  %v1996_v38 = vor.u32 %v2264_v16, %v1993_v22 }
 0x17e   : > { %v1336_v25 = vpop.f32.mrf.mxu3  ;;  %v1999_v24 = vld [vmem:[%s2478_s30 + $0x230] sm:$0xf] }
 0x17f   : > { %v2828_v26 = vadd.f32 %v1336_v25, %v1168_v32 }
 0x180   : > { %v1425_v53 = vpop.f32.mrf.mxu2  ;;  %v1089_v27 = vpop.f32.mrf.mxu0 }
 0x181   : > { %v1426_v9 = vadd.f32 %v1425_v53, %v1257_v17  ;;  %v1258_v30 = vpop.f32.mrf.mxu1  ;;  %v1090_v35 = vadd.f32 %v2581_v56, %v1089_v27  ;;  %v2266_v17 = vld [vmem:[%s2478_s30 + $0x238] sm:$0xf0]  ;;  %v1992_v27 = vor.u32 %v2265_v15, %v1991_v14 }
 0x182   : > { %v2000_v39 = vor.u32 %v2266_v17, %v1999_v24 }
 0x183   : > { %v1546_v33 = vmax.f32 %v1426_v9, 0.0  ;;  %v1259_v2 = vadd.f32 %v1258_v30, %v1090_v35  ;;  %v2096_v30 = vor.u32 %v2290_v20, %v2095_v18 }
 0x185   : > { %1610 = vst [vmem:[%s2598_s21 + $0xd0] sm:$0xff] %v1546_v33 }
 0x186   : > { %v1338_v45 = vpop.f32.mrf.mxu3 }
 0x187   : > { %v2842_v23 = vadd.f32 %v1338_v45, %v1170_v31  ;;  %v1178_v31 = vadd.f32 %v2847_v61, %v2710_v36 }
 0x188   : > { %v1427_v47 = vpop.f32.mrf.mxu2  ;;  %v1092_v58 = vpop.f32.mrf.mxu0 }
 0x189   : > { %v1428_v55 = vadd.f32 %v1427_v47, %v1259_v2  ;;  %v1093_v56 = vadd.f32 %v2847_v61, %v1092_v58  ;;  %v1261_v50 = vpop.f32.mrf.mxu1 }
 0x18b   : > { %v1547_v62 = vmax.f32 %v1428_v55, 0.0  ;;  %1131 = vmatmul.bf16.gmra.mxu0 %v1980_v48  ;;  %1509 = vmatmul.bf16.gmra.mxu3 %v2084_v54  ;;  %v1262_v0 = vadd.f32 %v1261_v50, %v1093_v56  ;;  %v1180_v55 = vadd.f32 %v2847_v61, %v2722_v57 }
 0x18c   : > { %1300 = vmatmul.bf16.gmra.mxu1 %v1984_v59 }
 0x18d   : > { %1611 = vst [vmem:[%s2598_s21 + $0xd8] sm:$0xff] %v1547_v62  ;;  %1469 = vmatmul.bf16.gmra.mxu2 %v1988_v60 }
 0x18e   : > { %v1341_v3 = vpop.f32.mrf.mxu3 }
 0x18f   : > { %v2853_v4 = vadd.f32 %v1341_v3, %v1173_v63 }
 0x190   : > { %v1430_v19 = vpop.f32.mrf.mxu2  ;;  %v1094_v5 = vpop.f32.mrf.mxu0 }
 0x191   : > { %v1431_v37 = vadd.f32 %v1430_v19, %v1262_v0  ;;  %v1263_v8 = vpop.f32.mrf.mxu1  ;;  %v1095_v13 = vadd.f32 %v2847_v61, %v1094_v5 }
 0x193   : > { %v1548_v10 = vmax.f32 %v1431_v37, 0.0  ;;  %v1264_v32 = vadd.f32 %v1263_v8, %v1095_v13 }
 0x195   : > { %1612 = vst [vmem:[%s2598_s21 + $0xe0] sm:$0xff] %v1548_v10 }
 0x196   : > { %v1343_v25 = vpop.f32.mrf.mxu3 }
 0x197   : > { %v2867_v53 = vadd.f32 %v1343_v25, %v1175_v1 }
 0x198   : > { %v1432_v9 = vpop.f32.mrf.mxu2  ;;  %v1097_v35 = vpop.f32.mrf.mxu0 }
 0x199   : > { %v1433_v33 = vadd.f32 %v1432_v9, %v1264_v32  ;;  %v1098_v40 = vadd.f32 %v2847_v61, %v1097_v35  ;;  %v1266_v41 = vpop.f32.mrf.mxu1 }
 0x19b   : > { %v1549_v42 = vmax.f32 %v1433_v33, 0.0  ;;  %1136 = vmatmul.bf16.gmra.mxu0 %v1992_v27  ;;  %1514 = vmatmul.bf16.gmra.mxu3 %v2096_v30  ;;  %v1267_v21 = vadd.f32 %v1266_v41, %v1098_v40 }
 0x19c   : > { %1305 = vmatmul.bf16.gmra.mxu1 %v1996_v38 }
 0x19d   : > { %1613 = vst [vmem:[%s2598_s21 + $0xe8] sm:$0xff] %v1549_v42  ;;  %1474 = vmatmul.bf16.gmra.mxu2 %v2000_v39 }
 0x19e   : > { %v1346_v43 = vpop.f32.mrf.mxu3 }
 0x19f   : > { %v2873_v44 = vadd.f32 %v1346_v43, %v1178_v31 }
 0x1a0   : > { %v1435_v49 = vpop.f32.mrf.mxu2  ;;  %v1099_v45 = vpop.f32.mrf.mxu0 }
 0x1a1   : > { %v1436_v2 = vadd.f32 %v1435_v49, %v1267_v21  ;;  %v1268_v47 = vpop.f32.mrf.mxu1  ;;  %v1100_v54 = vadd.f32 %v2847_v61, %v1099_v45 }
 0x1a3   : > { %v1550_v48 = vmax.f32 %v1436_v2, 0.0  ;;  %v1269_v58 = vadd.f32 %v1268_v47, %v1100_v54 }
 0x1a5   : > { %1614 = vst [vmem:[%s2598_s21 + $0xf0] sm:$0xff] %v1550_v48 }
 0x1a6   : > { %v1348_v59 = vpop.f32.mrf.mxu3 }
 0x1a7   : > { %v2879_v60 = vadd.f32 %v1348_v59, %v1180_v55 }
 0x1a8   : > { %v1437_v36 = vpop.f32.mrf.mxu2  ;;  %v1102_v50 = vpop.f32.mrf.mxu0 }
 0x1a9   : > { %v1438_v56 = vadd.f32 %v1437_v36, %v1269_v58  ;;  %v1103_v62 = vadd.f32 %v2847_v61, %v1102_v50  ;;  %v1271_v0 = vpop.f32.mrf.mxu1 }
 0x1ab   : > { %v1551_v63 = vmax.f32 %v1438_v56, 0.0  ;;  %v1272_v3 = vadd.f32 %v1271_v0, %v1103_v62 }
 0x1ad   : > { %1615 = vst [vmem:[%s2598_s21 + $0xf8] sm:$0xff] %v1551_v63 }
 0x1ae   : > { %v1480_v19 = vpop.f32.mrf.mxu3 }
 0x1af   : > { %v1481_v5 = vadd.f32 %v1480_v19, %v2728_v11 }
 0x1b0   : > { %v1440_v37 = vpop.f32.mrf.mxu2  ;;  %v1104_v8 = vpop.f32.mrf.mxu0 }
 0x1b1   : > { %v1441_v57 = vadd.f32 %v1440_v37, %v1272_v3  ;;  %v1568_v10 = vmax.f32 %v1481_v5, 0.0  ;;  %v1273_v13 = vpop.f32.mrf.mxu1  ;;  %v1105_v15 = vadd.f32 %v2847_v61, %v1104_v8 }
 0x1b3   : > { %v1552_v14 = vmax.f32 %v1441_v57, 0.0  ;;  %1632 = vst [vmem:[%s2598_s21 + $0x180] sm:$0xff] %v1568_v10  ;;  %v1274_v16 = vadd.f32 %v1273_v13, %v1105_v15 }
 0x1b5   : > { %1616 = vst [vmem:[%s2598_s21 + $0x100] sm:$0xff] %v1552_v14 }
 0x1b6   : > { %v1482_v18 = vpop.f32.mrf.mxu3 }
 0x1b7   : > { %v1483_v1 = vadd.f32 %v1482_v18, %v2742_v34 }
 0x1b8   : > { %v1442_v20 = vpop.f32.mrf.mxu2  ;;  %v1107_v24 = vpop.f32.mrf.mxu0 }
 0x1b9   : > { %v1443_v22 = vadd.f32 %v1442_v20, %v1274_v16  ;;  %v1569_v17 = vmax.f32 %v1483_v1, 0.0  ;;  %v1108_v11 = vadd.f32 %v2847_v61, %v1107_v24  ;;  %v1276_v32 = vpop.f32.mrf.mxu1 }
 0x1bb   : > { %v1553_v25 = vmax.f32 %v1443_v22, 0.0  ;;  %1633 = vst [vmem:[%s2598_s21 + $0x188] sm:$0xff] %v1569_v17  ;;  %v1277_v9 = vadd.f32 %v1276_v32, %v1108_v11 }
 0x1bd   : > { %1617 = vst [vmem:[%s2598_s21 + $0x108] sm:$0xff] %v1553_v25 }
 0x1be   : > { %v1485_v27 = vpop.f32.mrf.mxu3 }
 0x1bf   : > { %v1486_v33 = vadd.f32 %v1485_v27, %v2748_v51 }
 0x1c0   : > { %v1445_v30 = vpop.f32.mrf.mxu2  ;;  %v1109_v38 = vpop.f32.mrf.mxu0 }
 0x1c1   : > { %v1446_v35 = vadd.f32 %v1445_v30, %v1277_v9  ;;  %v1570_v39 = vmax.f32 %v1486_v33, 0.0  ;;  %v1278_v34 = vpop.f32.mrf.mxu1  ;;  %v1110_v41 = vadd.f32 %v2847_v61, %v1109_v38 }
 0x1c3   : > { %v1554_v40 = vmax.f32 %v1446_v35, 0.0  ;;  %1634 = vst [vmem:[%s2598_s21 + $0x190] sm:$0xff] %v1570_v39  ;;  %v1279_v42 = vadd.f32 %v1278_v34, %v1110_v41 }
 0x1c5   : > { %1618 = vst [vmem:[%s2598_s21 + $0x110] sm:$0xff] %v1554_v40 }
 0x1c6   : > { %v1487_v21 = vpop.f32.mrf.mxu3 }
 0x1c7   : > { %v1488_v43 = vadd.f32 %v1487_v21, %v2762_v12 }
 0x1c8   : > { %v1447_v31 = vpop.f32.mrf.mxu2  ;;  %v1112_v2 = vpop.f32.mrf.mxu0 }
 0x1c9   : > { %v1448_v49 = vadd.f32 %v1447_v31, %v1279_v42  ;;  %v1571_v45 = vmax.f32 %v1488_v43, 0.0  ;;  %v1113_v51 = vadd.f32 %v2847_v61, %v1112_v2  ;;  %v1281_v47 = vpop.f32.mrf.mxu1 }
 0x1cb   : > { %v1555_v48 = vmax.f32 %v1448_v49, 0.0  ;;  %1635 = vst [vmem:[%s2598_s21 + $0x198] sm:$0xff] %v1571_v45  ;;  %v1282_v54 = vadd.f32 %v1281_v47, %v1113_v51 }
 0x1cd   : > { %1619 = vst [vmem:[%s2598_s21 + $0x118] sm:$0xff] %v1555_v48 }
 0x1ce   : > { %v1490_v55 = vpop.f32.mrf.mxu3 }
 0x1cf   : > { %v1491_v59 = vadd.f32 %v1490_v55, %v2768_v28 }
 0x1d0   : > { %v1450_v58 = vpop.f32.mrf.mxu2  ;;  %v1114_v56 = vpop.f32.mrf.mxu0 }
 0x1d1   : > { %v1451_v36 = vadd.f32 %v1450_v58, %v1282_v54  ;;  %v1572_v50 = vmax.f32 %v1491_v59, 0.0  ;;  %v1283_v12 = vpop.f32.mrf.mxu1  ;;  %v1115_v0 = vadd.f32 %v2847_v61, %v1114_v56 }
 0x1d3   : > { %v1556_v62 = vmax.f32 %v1451_v36, 0.0  ;;  %1636 = vst [vmem:[%s2598_s21 + $0x1a0] sm:$0xff] %v1572_v50  ;;  %v1284_v63 = vadd.f32 %v1283_v12, %v1115_v0 }
 0x1d5   : > { %1620 = vst [vmem:[%s2598_s21 + $0x120] sm:$0xff] %v1556_v62 }
 0x1d6   : > { %v1492_v3 = vpop.f32.mrf.mxu3 }
 0x1d7   : > { %v1493_v37 = vadd.f32 %v1492_v3, %v2782_v52 }
 0x1d8   : > { %v1452_v19 = vpop.f32.mrf.mxu2  ;;  %v1117_v57 = vpop.f32.mrf.mxu0 }
 0x1d9   : > { %v1453_v5 = vadd.f32 %v1452_v19, %v1284_v63  ;;  %v1573_v8 = vmax.f32 %v1493_v37, 0.0  ;;  %v1118_v28 = vadd.f32 %v2847_v61, %v1117_v57  ;;  %v1286_v10 = vpop.f32.mrf.mxu1 }
 0x1db   : > { %v1557_v13 = vmax.f32 %v1453_v5, 0.0  ;;  %1637 = vst [vmem:[%s2598_s21 + $0x1a8] sm:$0xff] %v1573_v8  ;;  %v1287_v14 = vadd.f32 %v1286_v10, %v1118_v28 }
 0x1dd   : > { %1621 = vst [vmem:[%s2598_s21 + $0x128] sm:$0xff] %v1557_v13 }
 0x1de   : > { %v1495_v15 = vpop.f32.mrf.mxu3 }
 0x1df   : > { %v1496_v18 = vadd.f32 %v1495_v15, %v2788_v6 }
 0x1e0   : > { %v1455_v16 = vpop.f32.mrf.mxu2  ;;  %v1119_v1 = vpop.f32.mrf.mxu0 }
 0x1e1   : > { %v1456_v20 = vadd.f32 %v1455_v16, %v1287_v14  ;;  %v1574_v22 = vmax.f32 %v1496_v18, 0.0  ;;  %v1288_v52 = vpop.f32.mrf.mxu1  ;;  %v1120_v17 = vadd.f32 %v2847_v61, %v1119_v1 }
 0x1e3   : > { %v1558_v24 = vmax.f32 %v1456_v20, 0.0  ;;  %1638 = vst [vmem:[%s2598_s21 + $0x1b0] sm:$0xff] %v1574_v22  ;;  %v1289_v11 = vadd.f32 %v1288_v52, %v1120_v17 }
 0x1e5   : > { %1622 = vst [vmem:[%s2598_s21 + $0x130] sm:$0xff] %v1558_v24 }
 0x1e6   : > { %v1497_v32 = vpop.f32.mrf.mxu3 }
 0x1e7   : > { %v1498_v9 = vadd.f32 %v1497_v32, %v2802_v29 }
 0x1e8   : > { %v1457_v25 = vpop.f32.mrf.mxu2  ;;  %v1122_v30 = vpop.f32.mrf.mxu0 }
 0x1e9   : > { %v1458_v27 = vadd.f32 %v1457_v25, %v1289_v11  ;;  %v1575_v33 = vmax.f32 %v1498_v9, 0.0  ;;  %v1123_v6 = vadd.f32 %v2847_v61, %v1122_v30  ;;  %v1291_v35 = vpop.f32.mrf.mxu1 }
 0x1eb   : > { %v1559_v38 = vmax.f32 %v1458_v27, 0.0  ;;  %1639 = vst [vmem:[%s2598_s21 + $0x1b8] sm:$0xff] %v1575_v33  ;;  %v1292_v39 = vadd.f32 %v1291_v35, %v1123_v6 }
 0x1ed   : > { %1623 = vst [vmem:[%s2598_s21 + $0x138] sm:$0xff] %v1559_v38 }
 0x1ee   : > { %v1500_v34 = vpop.f32.mrf.mxu3 }
 0x1ef   : > { %v1501_v41 = vadd.f32 %v1500_v34, %v2808_v46 }
 0x1f0   : > { %v1460_v40 = vpop.f32.mrf.mxu2  ;;  %v1124_v21 = vpop.f32.mrf.mxu0 }
 0x1f1   : > { %v1461_v42 = vadd.f32 %v1460_v40, %v1292_v39  ;;  %v1576_v31 = vmax.f32 %v1501_v41, 0.0  ;;  %v1293_v29 = vpop.f32.mrf.mxu1  ;;  %v1125_v49 = vadd.f32 %v2847_v61, %v1124_v21 }
 0x1f3   : > { %v1560_v43 = vmax.f32 %v1461_v42, 0.0  ;;  %1640 = vst [vmem:[%s2598_s21 + $0x1c0] sm:$0xff] %v1576_v31  ;;  %v1294_v2 = vadd.f32 %v1293_v29, %v1125_v49 }
 0x1f5   : > { %1624 = vst [vmem:[%s2598_s21 + $0x140] sm:$0xff] %v1560_v43 }
 0x1f6   : > { %v1502_v45 = vpop.f32.mrf.mxu3 }
 0x1f7   : > { %v1503_v47 = vadd.f32 %v1502_v45, %v2822_v7 }
 0x1f8   : > { %v1462_v51 = vpop.f32.mrf.mxu2  ;;  %v1127_v54 = vpop.f32.mrf.mxu0 }
 0x1f9   : > { %v1463_v48 = vadd.f32 %v1462_v51, %v1294_v2  ;;  %v1577_v55 = vmax.f32 %v1503_v47, 0.0  ;;  %v1128_v46 = vadd.f32 %v2847_v61, %v1127_v54  ;;  %v1296_v58 = vpop.f32.mrf.mxu1 }
 0x1fb   : > { %v1561_v59 = vmax.f32 %v1463_v48, 0.0  ;;  %1641 = vst [vmem:[%s2598_s21 + $0x1c8] sm:$0xff] %v1577_v55  ;;  %v1297_v36 = vadd.f32 %v1296_v58, %v1128_v46 }
 0x1fd   : > { %1625 = vst [vmem:[%s2598_s21 + $0x148] sm:$0xff] %v1561_v59 }
 0x1fe   : > { %v1505_v56 = vpop.f32.mrf.mxu3 }
 0x1ff   : > { %v1506_v12 = vadd.f32 %v1505_v56, %v2828_v26 }
 0x200   : > { %v1465_v50 = vpop.f32.mrf.mxu2  ;;  %v1129_v0 = vpop.f32.mrf.mxu0 }
 0x201   : > { %v1466_v62 = vadd.f32 %v1465_v50, %v1297_v36  ;;  %v1578_v63 = vmax.f32 %v1506_v12, 0.0  ;;  %v1298_v7 = vpop.f32.mrf.mxu1  ;;  %v1130_v19 = vadd.f32 %v2847_v61, %v1129_v0 }
 0x203   : > { %v1562_v3 = vmax.f32 %v1466_v62, 0.0  ;;  %1642 = vst [vmem:[%s2598_s21 + $0x1d0] sm:$0xff] %v1578_v63  ;;  %v1299_v37 = vadd.f32 %v1298_v7, %v1130_v19 }
 0x205   : > { %1626 = vst [vmem:[%s2598_s21 + $0x150] sm:$0xff] %v1562_v3 }
 0x206   : > { %v1507_v5 = vpop.f32.mrf.mxu3 }
 0x207   : > { %v1508_v8 = vadd.f32 %v1507_v5, %v2842_v23 }
 0x208   : > { %v1467_v57 = vpop.f32.mrf.mxu2  ;;  %v1132_v10 = vpop.f32.mrf.mxu0 }
 0x209   : > { %v1468_v28 = vadd.f32 %v1467_v57, %v1299_v37  ;;  %v1579_v13 = vmax.f32 %v1508_v8, 0.0  ;;  %v1133_v26 = vadd.f32 %v2847_v61, %v1132_v10  ;;  %v1301_v14 = vpop.f32.mrf.mxu1 }
 0x20b   : > { %v1563_v15 = vmax.f32 %v1468_v28, 0.0  ;;  %1643 = vst [vmem:[%s2598_s21 + $0x1d8] sm:$0xff] %v1579_v13  ;;  %v1302_v16 = vadd.f32 %v1301_v14, %v1133_v26 }
 0x20d   : > { %1627 = vst [vmem:[%s2598_s21 + $0x158] sm:$0xff] %v1563_v15 }
 0x20e   : > { %v1510_v18 = vpop.f32.mrf.mxu3 }
 0x20f   : > { %v1511_v1 = vadd.f32 %v1510_v18, %v2853_v4 }
 0x210   : > { %v1470_v20 = vpop.f32.mrf.mxu2  ;;  %v1134_v52 = vpop.f32.mrf.mxu0 }
 0x211   : > { %v1471_v22 = vadd.f32 %v1470_v20, %v1302_v16  ;;  %v1580_v23 = vmax.f32 %v1511_v1, 0.0  ;;  %v1303_v24 = vpop.f32.mrf.mxu1  ;;  %v1135_v11 = vadd.f32 %v2847_v61, %v1134_v52 }
 0x213   : > { %v1564_v17 = vmax.f32 %v1471_v22, 0.0  ;;  %1644 = vst [vmem:[%s2598_s21 + $0x1e0] sm:$0xff] %v1580_v23  ;;  %v1304_v32 = vadd.f32 %v1303_v24, %v1135_v11 }
 0x215   : > { %1628 = vst [vmem:[%s2598_s21 + $0x160] sm:$0xff] %v1564_v17 }
 0x216   : > { %v1512_v25 = vpop.f32.mrf.mxu3 }
 0x217   : > { %v1513_v27 = vadd.f32 %v1512_v25, %v2867_v53 }
 0x218   : > { %v1472_v9 = vpop.f32.mrf.mxu2  ;;  %v1137_v33 = vpop.f32.mrf.mxu0 }
 0x219   : > { %v1473_v30 = vadd.f32 %v1472_v9, %v1304_v32  ;;  %v1581_v4 = vmax.f32 %v1513_v27, 0.0  ;;  %v1138_v6 = vadd.f32 %v2847_v61, %v1137_v33  ;;  %v1306_v38 = vpop.f32.mrf.mxu1 }
 0x21b   : > { %v1565_v35 = vmax.f32 %v1473_v30, 0.0  ;;  %1645 = vst [vmem:[%s2598_s21 + $0x1e8] sm:$0xff] %v1581_v4  ;;  %v1307_v39 = vadd.f32 %v1306_v38, %v1138_v6 }
 0x21d   : > { %1629 = vst [vmem:[%s2598_s21 + $0x168] sm:$0xff] %v1565_v35 }
 0x21e   : > { %v1515_v34 = vpop.f32.mrf.mxu3 }
 0x21f   : > { %v1516_v41 = vadd.f32 %v1515_v34, %v2873_v44 }
 0x220   : > { %v1475_v40 = vpop.f32.mrf.mxu2  ;;  %v1139_v53 = vpop.f32.mrf.mxu0 }
 0x221   : > { %v1476_v42 = vadd.f32 %v1475_v40, %v1307_v39  ;;  %v1582_v21 = vmax.f32 %v1516_v41, 0.0  ;;  %v1140_v29 = vadd.f32 %v2847_v61, %v1139_v53  ;;  %v1308_v43 = vpop.f32.mrf.mxu1 }
 0x223   : > { %v1566_v31 = vmax.f32 %v1476_v42, 0.0  ;;  %1646 = vst [vmem:[%s2598_s21 + $0x1f0] sm:$0xff] %v1582_v21  ;;  %v1309_v49 = vadd.f32 %v1308_v43, %v1140_v29 }
 0x225   : > { %1630 = vst [vmem:[%s2598_s21 + $0x170] sm:$0xff] %v1566_v31 }
 0x226   : > { %v1517_v2 = vpop.f32.mrf.mxu3 }
 0x227   : > { %v1518_v51 = vadd.f32 %v1517_v2, %v2879_v60 }
 0x228   : > { %v1477_v45 = vpop.f32.mrf.mxu2 }
 0x229   : > { %v1478_v47 = vadd.f32 %v1477_v45, %v1309_v49  ;;  %v1583_v48 = vmax.f32 %v1518_v51, 0.0 }
 0x22b   : > { %v1567_v54 = vmax.f32 %v1478_v47, 0.0  ;;  %1647 = vst [vmem:[%s2598_s21 + $0x1f8] sm:$0xff] %v1583_v48 }
 0x22d   : > { %1631 = vst [vmem:[%s2598_s21 + $0x178] sm:$0xff] %v1567_v54 }
 0x22e PF: > { %s13_s12 = sadd.s32 1, %s2356_s12  }
 0x22f   : > { %p10_p4 = scmp.ge.s32.totalorder %s13_s12, 7  }
 0x231   :  { %12 = sbr.rel (!%p10_p4) target bundleno = 1 (0x1), region = 62 }

// kernel: jepa_forward.7
= control target key start
LH: loop header
LB: loop body
LE: loop exit
PB: predicated region body
PF: predicated region fallthrough
CT: control target
= control target key end

     0   :  { %s963_s30 = smov 0   ;;  %s1622_s0 = inlined_call_operand.vmem [shape: f32[8,128], index: 0, kind: input, shape index: {}]   ;;  %s1623_s1 = inlined_call_operand.vmem [shape: f32[24,128], index: 1, kind: input, shape index: {}]   ;;  %s1624_s2 = inlined_call_operand.vmem [shape: f32[128,128], index: 2, kind: input, shape index: {}]   ;;  %s1625_s3 = inlined_call_operand.vmem [shape: f32[1,128], index: 3, kind: input, shape index: {}]   ;;  %s1626_s4 = inlined_call_operand.vmem [shape: f32[128,512], index: 4, kind: input, shape index: {}]   ;;  %s1627_s5 = inlined_call_operand.vmem [shape: f32[128,512], index: 5, kind: input, shape index: {}]   ;;  %s1628_s6 = inlined_call_operand.vmem [shape: f32[1,512], index: 6, kind: input, shape index: {}]   ;;  %s1629_s7 = inlined_call_operand.vmem [shape: f32[512,128], index: 7, kind: input, shape index: {}]   ;;  %s1630_s8 = inlined_call_operand.vmem [shape: f32[1,128], index: 8, kind: input, shape index: {}]   ;;  %s1631_s9 = inlined_call_operand.vmem [shape: f32[24,128], index: 9, kind: output, shape index: {}]  }
   0x1 LB: > { %s885_s10 = sadd.s32 4294967295, %s911_s30   ;;  %p889_p0 = scmp.ge.s32.totalorder %s911_s30, 1  ;;  %s911_s30 = sphi %s963_s30, %s19_s30  }
   0x2   : > { %p286_p1 = scmp.lt.s32.totalorder %s911_s30, 4 }
   0x4   : > { %p287_p2 = pnand %p889_p0, %p286_p1 }
   0x5   : > { %p320_p3 = scmp.lt.s32.totalorder (!%p287_p2), %s885_s10, 2  ;;  %p892_p4 = scmp.ne.s32.totalorder (!%p287_p2), %s885_s10, 0 }
   0x6   : > { %290 = sbr.rel (%p287_p2) target bundleno = 465 (0x1d1), region = 56 }
   0xb   : > { %s321_s11 = scalar_select %p320_p3, %s885_s10, 2 }
   0xc   : > { %331 = sbr.rel (%p892_p4) target bundleno = 19 (0x13), region = 60 }
   0xd   : > { %s890_s12 = sshll.u32 %s321_s11, 3 }
   0xe   : > { %s974_s15 = scalar_lea.vmem %s1623_s1, %s890_s12  ;;  %s979_s18 = scalar_lea.vmem %s1631_s9, %s890_s12 }
  0x11   : > { %v332_v0 = vld [vmem:[%s1622_s0] sm:$0xff] }
  0x12   : > { %333 = vst [vmem:[#allocation2] sm:$0xff] %v332_v0 }
  0x13 PF: > { %v351_v1 = vld [vmem:[%s1624_s2 + $0x78] sm:$0xff]  ;;  %v350_v2 = vld [vmem:[%s1624_s2 + $0x70] sm:$0xff]  ;;  %v349_v3 = vld [vmem:[%s1624_s2 + $0x68] sm:$0xff] }
  0x14   : > { %356 = vmatpush.msra.mxu0 %v351_v1  ;;  %v348_v4 = vld [vmem:[%s1624_s2 + $0x60] sm:$0xff]  ;;  %v347_v6 = vld [vmem:[%s1624_s2 + $0x58] sm:$0xff]  ;;  %v501_v7 = vld [vmem:[%s1627_s5 + $0x1e8] sm:$0xff] }
  0x15   : > { %v500_v5 = vld [vmem:[%s1627_s5 + $0x1e0] sm:$0xff]  ;;  %v502_v8 = vld [vmem:[%s1627_s5 + $0x1f0] sm:$0xff]  ;;  %524 = vmatpush.msra.mxu2 %v501_v7  ;;  %v497_v10 = vld [vmem:[%s1627_s5 + $0x1c8] sm:$0xff] }
  0x16   : > { %357 = vmatpush.msra.mxu0 %v350_v2  ;;  %504 = vmatpush.msra.mxu1 %v500_v5  ;;  %v496_v9 = vld [vmem:[%s1627_s5 + $0x1c0] sm:$0xff]  ;;  %v498_v11 = vld [vmem:[%s1627_s5 + $0x1d0] sm:$0xff]  ;;  %v493_v14 = vld [vmem:[%s1627_s5 + $0x1a8] sm:$0xff] }
  0x17   : > { %v346_v12 = vld [vmem:[%s1624_s2 + $0x50] sm:$0xff]  ;;  %544 = vmatpush.msra.mxu3 %v502_v8  ;;  %v492_v13 = vld [vmem:[%s1627_s5 + $0x1a0] sm:$0xff]  ;;  %525 = vmatpush.msra.mxu2 %v497_v10  ;;  %v345_v17 = vld [vmem:[%s1624_s2 + $0x48] sm:$0xff] }
  0x18   : > { %358 = vmatpush.msra.mxu0 %v349_v3  ;;  %505 = vmatpush.msra.mxu1 %v496_v9  ;;  %v494_v15 = vld [vmem:[%s1627_s5 + $0x1b0] sm:$0xff]  ;;  %v488_v16 = vld [vmem:[%s1627_s5 + $0x180] sm:$0xff]  ;;  %v489_v18 = vld [vmem:[%s1627_s5 + $0x188] sm:$0xff] }
  0x19   : > { %545 = vmatpush.msra.mxu3 %v498_v11  ;;  %526 = vmatpush.msra.mxu2 %v493_v14  ;;  %v490_v19 = vld [vmem:[%s1627_s5 + $0x190] sm:$0xff]  ;;  %v484_v20 = vld [vmem:[%s1627_s5 + $0x160] sm:$0xff]  ;;  %v485_v22 = vld [vmem:[%s1627_s5 + $0x168] sm:$0xff] }
  0x1a   : > { %359 = vmatpush.msra.mxu0 %v348_v4  ;;  %506 = vmatpush.msra.mxu1 %v492_v13  ;;  %v344_v21 = vld [vmem:[%s1624_s2 + $0x40] sm:$0xff]  ;;  %v486_v23 = vld [vmem:[%s1627_s5 + $0x170] sm:$0xff]  ;;  %v343_v25 = vld [vmem:[%s1624_s2 + $0x38] sm:$0xff] }
  0x1b   : > { %546 = vmatpush.msra.mxu3 %v494_v15  ;;  %527 = vmatpush.msra.mxu2 %v489_v18  ;;  %v480_v24 = vld [vmem:[%s1627_s5 + $0x140] sm:$0xff]  ;;  %v481_v26 = vld [vmem:[%s1627_s5 + $0x148] sm:$0xff]  ;;  %v482_v27 = vld [vmem:[%s1627_s5 + $0x150] sm:$0xff] }
  0x1c   : > { %360 = vmatpush.msra.mxu0 %v347_v6  ;;  %507 = vmatpush.msra.mxu1 %v488_v16  ;;  %v476_v28 = vld [vmem:[%s1627_s5 + $0x120] sm:$0xff]  ;;  %v342_v29 = vld [vmem:[%s1624_s2 + $0x30] sm:$0xff]  ;;  %v477_v30 = vld [vmem:[%s1627_s5 + $0x128] sm:$0xff] }
  0x1d   : > { %547 = vmatpush.msra.mxu3 %v490_v19  ;;  %528 = vmatpush.msra.mxu2 %v485_v22  ;;  %v478_v31 = vld [vmem:[%s1627_s5 + $0x130] sm:$0xff]  ;;  %v472_v32 = vld [vmem:[%s1627_s5 + $0x100] sm:$0xff]  ;;  %v341_v33 = vld [vmem:[%s1624_s2 + $0x28] sm:$0xff] }
  0x1e   : > { %361 = vmatpush.msra.mxu0 %v346_v12  ;;  %508 = vmatpush.msra.mxu1 %v484_v20  ;;  %v473_v34 = vld [vmem:[%s1627_s5 + $0x108] sm:$0xff]  ;;  %v340_v35 = vld [vmem:[%s1624_s2 + $0x20] sm:$0xff]  ;;  %v474_v36 = vld [vmem:[%s1627_s5 + $0x110] sm:$0xff] }
  0x1f   : > { %548 = vmatpush.msra.mxu3 %v486_v23  ;;  %529 = vmatpush.msra.mxu2 %v481_v26  ;;  %v468_v37 = vld [vmem:[%s1627_s5 + $0xe0] sm:$0xff]  ;;  %v469_v38 = vld [vmem:[%s1627_s5 + $0xe8] sm:$0xff]  ;;  %v470_v39 = vld [vmem:[%s1627_s5 + $0xf0] sm:$0xff] }
  0x20   : > { %362 = vmatpush.msra.mxu0 %v345_v17  ;;  %509 = vmatpush.msra.mxu1 %v480_v24  ;;  %v464_v40 = vld [vmem:[%s1627_s5 + $0xc0] sm:$0xff]  ;;  %v339_v41 = vld [vmem:[%s1624_s2 + $0x18] sm:$0xff]  ;;  %v465_v42 = vld [vmem:[%s1627_s5 + $0xc8] sm:$0xff] }
  0x21   : > { %549 = vmatpush.msra.mxu3 %v482_v27  ;;  %530 = vmatpush.msra.mxu2 %v477_v30  ;;  %v466_v43 = vld [vmem:[%s1627_s5 + $0xd0] sm:$0xff]  ;;  %v460_v44 = vld [vmem:[%s1627_s5 + $0xa0] sm:$0xff]  ;;  %v461_v46 = vld [vmem:[%s1627_s5 + $0xa8] sm:$0xff] }
  0x22   : > { %363 = vmatpush.msra.mxu0 %v344_v21  ;;  %510 = vmatpush.msra.mxu1 %v476_v28  ;;  %v338_v45 = vld [vmem:[%s1624_s2 + $0x10] sm:$0xff]  ;;  %v456_v48 = vld [vmem:[%s1627_s5 + $0x80] sm:$0xff]  ;;  %v337_v49 = vld [vmem:[%s1624_s2 + $0x8] sm:$0xff] }
  0x23   : > { %550 = vmatpush.msra.mxu3 %v478_v31  ;;  %531 = vmatpush.msra.mxu2 %v473_v34  ;;  %v462_v47 = vld [vmem:[%s1627_s5 + $0xb0] sm:$0xff]  ;;  %v457_v50 = vld [vmem:[%s1627_s5 + $0x88] sm:$0xff]  ;;  %v452_v52 = vld [vmem:[%s1627_s5 + $0x60] sm:$0xff] }
  0x24   : > { %364 = vmatpush.msra.mxu0 %v343_v25  ;;  %511 = vmatpush.msra.mxu1 %v472_v32  ;;  %v458_v51 = vld [vmem:[%s1627_s5 + $0x90] sm:$0xff]  ;;  %v336_v53 = vld [vmem:[%s1624_s2] sm:$0xff]  ;;  %v453_v54 = vld [vmem:[%s1627_s5 + $0x68] sm:$0xff] }
  0x25   : > { %551 = vmatpush.msra.mxu3 %v474_v36  ;;  %532 = vmatpush.msra.mxu2 %v469_v38  ;;  %v335_v55 = vld [vmem:[%s974_s15] sm:$0xff]  ;;  %v454_v56 = vld [vmem:[%s1627_s5 + $0x70] sm:$0xff]  ;;  %v503_v57 = vld [vmem:[%s1627_s5 + $0x1f8] sm:$0xff] }
  0x26   : > { %365 = vmatpush.msra.mxu0 %v342_v29  ;;  %512 = vmatpush.msra.mxu1 %v468_v37  ;;  %v448_v58 = vld [vmem:[%s1627_s5 + $0x40] sm:$0xff]  ;;  %v449_v59 = vld [vmem:[%s1627_s5 + $0x48] sm:$0xff]  ;;  %v450_v60 = vld [vmem:[%s1627_s5 + $0x50] sm:$0xff] }
  0x27   : > { %552 = vmatpush.msra.mxu3 %v470_v39  ;;  %533 = vmatpush.msra.mxu2 %v465_v42  ;;  %v499_v61 = vld [vmem:[%s1627_s5 + $0x1d8] sm:$0xff]  ;;  %v444_v62 = vld [vmem:[%s1627_s5 + $0x20] sm:$0xff]  ;;  %v445_v63 = vld [vmem:[%s1627_s5 + $0x28] sm:$0xff] }
  0x28   : > { %366 = vmatpush.msra.mxu0 %v341_v33  ;;  %513 = vmatpush.msra.mxu1 %v464_v40  ;;  %v446_v0 = vld [vmem:[%s1627_s5 + $0x30] sm:$0xff]  ;;  %v495_v1 = vld [vmem:[%s1627_s5 + $0x1b8] sm:$0xff]  ;;  %v440_v2 = vld [vmem:[%s1627_s5] sm:$0xff] }
  0x29   : > { %553 = vmatpush.msra.mxu3 %v466_v43  ;;  %534 = vmatpush.msra.mxu2 %v461_v46  ;;  %v441_v3 = vld [vmem:[%s1627_s5 + $0x8] sm:$0xff]  ;;  %v442_v4 = vld [vmem:[%s1627_s5 + $0x10] sm:$0xff]  ;;  %v491_v5 = vld [vmem:[%s1627_s5 + $0x198] sm:$0xff] }
  0x2a   : > { %367 = vmatpush.msra.mxu0 %v340_v35  ;;  %514 = vmatpush.msra.mxu1 %v460_v44  ;;  %v436_v6 = vld [vmem:[%s1626_s4 + $0x1e0] sm:$0xff]  ;;  %v437_v7 = vld [vmem:[%s1626_s4 + $0x1e8] sm:$0xff]  ;;  %v438_v8 = vld [vmem:[%s1626_s4 + $0x1f0] sm:$0xff] }
  0x2b   : > { %554 = vmatpush.msra.mxu3 %v462_v47  ;;  %535 = vmatpush.msra.mxu2 %v457_v50  ;;  %v487_v9 = vld [vmem:[%s1627_s5 + $0x178] sm:$0xff]  ;;  %v432_v10 = vld [vmem:[%s1626_s4 + $0x1c0] sm:$0xff]  ;;  %v433_v11 = vld [vmem:[%s1626_s4 + $0x1c8] sm:$0xff] }
  0x2c   : > { %368 = vmatpush.msra.mxu0 %v339_v41  ;;  %515 = vmatpush.msra.mxu1 %v456_v48  ;;  %v434_v12 = vld [vmem:[%s1626_s4 + $0x1d0] sm:$0xff]  ;;  %v483_v13 = vld [vmem:[%s1627_s5 + $0x158] sm:$0xff]  ;;  %v428_v14 = vld [vmem:[%s1626_s4 + $0x1a0] sm:$0xff] }
  0x2d   : > { %555 = vmatpush.msra.mxu3 %v458_v51  ;;  %536 = vmatpush.msra.mxu2 %v453_v54  ;;  %v429_v15 = vld [vmem:[%s1626_s4 + $0x1a8] sm:$0xff]  ;;  %v430_v16 = vld [vmem:[%s1626_s4 + $0x1b0] sm:$0xff]  ;;  %v479_v17 = vld [vmem:[%s1627_s5 + $0x138] sm:$0xff] }
  0x2e   : > { %369 = vmatpush.msra.mxu0 %v338_v45  ;;  %516 = vmatpush.msra.mxu1 %v452_v52  ;;  %v424_v18 = vld [vmem:[%s1626_s4 + $0x180] sm:$0xff]  ;;  %v425_v19 = vld [vmem:[%s1626_s4 + $0x188] sm:$0xff]  ;;  %v426_v20 = vld [vmem:[%s1626_s4 + $0x190] sm:$0xff] }
  0x2f   : > { %556 = vmatpush.msra.mxu3 %v454_v56  ;;  %537 = vmatpush.msra.mxu2 %v449_v59  ;;  %v475_v21 = vld [vmem:[%s1627_s5 + $0x118] sm:$0xff]  ;;  %v420_v22 = vld [vmem:[%s1626_s4 + $0x160] sm:$0xff]  ;;  %v421_v23 = vld [vmem:[%s1626_s4 + $0x168] sm:$0xff] }
  0x30   : > { %370 = vmatpush.msra.mxu0 %v337_v49  ;;  %517 = vmatpush.msra.mxu1 %v448_v58  ;;  %v422_v24 = vld [vmem:[%s1626_s4 + $0x170] sm:$0xff]  ;;  %v471_v25 = vld [vmem:[%s1627_s5 + $0xf8] sm:$0xff]  ;;  %v416_v26 = vld [vmem:[%s1626_s4 + $0x140] sm:$0xff] }
  0x31   : > { %557 = vmatpush.msra.mxu3 %v450_v60  ;;  %538 = vmatpush.msra.mxu2 %v445_v63  ;;  %v417_v27 = vld [vmem:[%s1626_s4 + $0x148] sm:$0xff]  ;;  %v418_v28 = vld [vmem:[%s1626_s4 + $0x150] sm:$0xff]  ;;  %v467_v29 = vld [vmem:[%s1627_s5 + $0xd8] sm:$0xff] }
  0x32   : > { %371 = vmatpush.msra.mxu0 %v336_v53  ;;  %518 = vmatpush.msra.mxu1 %v444_v62  ;;  %v412_v30 = vld [vmem:[%s1626_s4 + $0x120] sm:$0xff]  ;;  %v413_v31 = vld [vmem:[%s1626_s4 + $0x128] sm:$0xff]  ;;  %v414_v32 = vld [vmem:[%s1626_s4 + $0x130] sm:$0xff] }
  0x33   : > { %372 = vmatmul.f32.vlgmr.msra.gmra.mxu0 %v335_v55  ;;  %558 = vmatpush.msra.mxu3 %v446_v0  ;;  %v463_v33 = vld [vmem:[%s1627_s5 + $0xb8] sm:$0xff]  ;;  %v408_v34 = vld [vmem:[%s1626_s4 + $0x100] sm:$0xff]  ;;  %v409_v35 = vld [vmem:[%s1626_s4 + $0x108] sm:$0xff] }
  0x34   : > { %564 = vmatpush.msrb.mxu0 %v503_v57  ;;  %519 = vmatpush.msra.mxu1 %v440_v2  ;;  %v410_v36 = vld [vmem:[%s1626_s4 + $0x110] sm:$0xff]  ;;  %v459_v37 = vld [vmem:[%s1627_s5 + $0x98] sm:$0xff]  ;;  %v404_v38 = vld [vmem:[%s1626_s4 + $0xe0] sm:$0xff] }
  0x35   : > { %539 = vmatpush.msra.mxu2 %v441_v3  ;;  %559 = vmatpush.msra.mxu3 %v442_v4  ;;  %v405_v39 = vld [vmem:[%s1626_s4 + $0xe8] sm:$0xff]  ;;  %v406_v40 = vld [vmem:[%s1626_s4 + $0xf0] sm:$0xff]  ;;  %v455_v41 = vld [vmem:[%s1627_s5 + $0x78] sm:$0xff] }
  0x36   : > { %565 = vmatpush.msrb.mxu0 %v499_v61  ;;  %584 = vmatpush.msrb.mxu1 %v436_v6  ;;  %v400_v42 = vld [vmem:[%s1626_s4 + $0xc0] sm:$0xff]  ;;  %v401_v43 = vld [vmem:[%s1626_s4 + $0xc8] sm:$0xff]  ;;  %v402_v44 = vld [vmem:[%s1626_s4 + $0xd0] sm:$0xff] }
  0x37   : > { %604 = vmatpush.msrb.mxu2 %v437_v7  ;;  %624 = vmatpush.msrb.mxu3 %v438_v8  ;;  %v451_v45 = vld [vmem:[%s1627_s5 + $0x58] sm:$0xff]  ;;  %v396_v58 = vld [vmem:[%s1626_s4 + $0xa0] sm:$0xff]  ;;  %v397_v59 = vld [vmem:[%s1626_s4 + $0xa8] sm:$0xff] }
  0x38   : > { %566 = vmatpush.msrb.mxu0 %v495_v1  ;;  %585 = vmatpush.msrb.mxu1 %v432_v10  ;;  %v447_v46 = vld [vmem:[%s1627_s5 + $0x38] sm:$0xff]  ;;  %v398_v60 = vld [vmem:[%s1626_s4 + $0xb0] sm:$0xff]  ;;  %v392_v62 = vld [vmem:[%s1626_s4 + $0x80] sm:$0xff] }
  0x39   : > { %605 = vmatpush.msrb.mxu2 %v433_v11  ;;  %625 = vmatpush.msrb.mxu3 %v434_v12  ;;  %v443_v47 = vld [vmem:[%s1627_s5 + $0x18] sm:$0xff]  ;;  %v393_v63 = vld [vmem:[%s1626_s4 + $0x88] sm:$0xff]  ;;  %v394_v0 = vld [vmem:[%s1626_s4 + $0x90] sm:$0xff] }
  0x3a   : > { %567 = vmatpush.msrb.mxu0 %v491_v5  ;;  %586 = vmatpush.msrb.mxu1 %v428_v14  ;;  %v439_v48 = vld [vmem:[%s1626_s4 + $0x1f8] sm:$0xff]  ;;  %v388_v2 = vld [vmem:[%s1626_s4 + $0x60] sm:$0xff]  ;;  %v389_v3 = vld [vmem:[%s1626_s4 + $0x68] sm:$0xff] }
  0x3b   : > { %606 = vmatpush.msrb.mxu2 %v429_v15  ;;  %626 = vmatpush.msrb.mxu3 %v430_v16  ;;  %v435_v49 = vld [vmem:[%s1626_s4 + $0x1d8] sm:$0xff]  ;;  %v390_v4 = vld [vmem:[%s1626_s4 + $0x70] sm:$0xff]  ;;  %v384_v6 = vld [vmem:[%s1626_s4 + $0x40] sm:$0xff] }
  0x3c   : > { %568 = vmatpush.msrb.mxu0 %v487_v9  ;;  %587 = vmatpush.msrb.mxu1 %v424_v18  ;;  %v431_v50 = vld [vmem:[%s1626_s4 + $0x1b8] sm:$0xff]  ;;  %v385_v7 = vld [vmem:[%s1626_s4 + $0x48] sm:$0xff]  ;;  %v386_v8 = vld [vmem:[%s1626_s4 + $0x50] sm:$0xff] }
  0x3d   : > { %607 = vmatpush.msrb.mxu2 %v425_v19  ;;  %627 = vmatpush.msrb.mxu3 %v426_v20  ;;  %v427_v51 = vld [vmem:[%s1626_s4 + $0x198] sm:$0xff]  ;;  %v380_v10 = vld [vmem:[%s1626_s4 + $0x20] sm:$0xff]  ;;  %v381_v11 = vld [vmem:[%s1626_s4 + $0x28] sm:$0xff] }
  0x3e   : > { %569 = vmatpush.msrb.mxu0 %v483_v13  ;;  %588 = vmatpush.msrb.mxu1 %v420_v22  ;;  %v423_v52 = vld [vmem:[%s1626_s4 + $0x178] sm:$0xff]  ;;  %v382_v12 = vld [vmem:[%s1626_s4 + $0x30] sm:$0xff]  ;;  %v376_v14 = vld [vmem:[%s1626_s4] sm:$0xff] }
  0x3f   : > { %608 = vmatpush.msrb.mxu2 %v421_v23  ;;  %628 = vmatpush.msrb.mxu3 %v422_v24  ;;  %v419_v53 = vld [vmem:[%s1626_s4 + $0x158] sm:$0xff]  ;;  %v377_v15 = vld [vmem:[%s1626_s4 + $0x8] sm:$0xff]  ;;  %v378_v16 = vld [vmem:[%s1626_s4 + $0x10] sm:$0xff] }
  0x40   : > { %570 = vmatpush.msrb.mxu0 %v479_v17  ;;  %589 = vmatpush.msrb.mxu1 %v416_v26  ;;  %v415_v54 = vld [vmem:[%s1626_s4 + $0x138] sm:$0xff]  ;;  %v903_v18 = vld [vmem:[%s1625_s3] ss:$0 sm:$0xff]  ;;  %v744_v26 = vld [vmem:[%s1629_s7 + $0x1f0] sm:$0xff] }
  0x41   : > { %609 = vmatpush.msrb.mxu2 %v417_v27  ;;  %629 = vmatpush.msrb.mxu3 %v418_v28  ;;  %v411_v55 = vld [vmem:[%s1626_s4 + $0x118] sm:$0xff]  ;;  %v712_v27 = vld [vmem:[%s1629_s7 + $0xf0] sm:$0xff] }
  0x42   : > { %571 = vmatpush.msrb.mxu0 %v475_v21  ;;  %590 = vmatpush.msrb.mxu1 %v412_v30  ;;  %v407_v56 = vld [vmem:[%s1626_s4 + $0xf8] sm:$0xff]  ;;  %v728_v28 = vld [vmem:[%s1629_s7 + $0x170] sm:$0xff]  ;;  %v743_v30 = vld [vmem:[%s1629_s7 + $0x1e8] sm:$0xff] }
  0x43   : > { %610 = vmatpush.msrb.mxu2 %v413_v31  ;;  %630 = vmatpush.msrb.mxu3 %v414_v32  ;;  %v403_v57 = vld [vmem:[%s1626_s4 + $0xd8] sm:$0xff]  ;;  %v711_v31 = vld [vmem:[%s1629_s7 + $0xe8] sm:$0xff] }
  0x44   : > { %572 = vmatpush.msrb.mxu0 %v471_v25  ;;  %591 = vmatpush.msrb.mxu1 %v408_v34  ;;  %v399_v61 = vld [vmem:[%s1626_s4 + $0xb8] sm:$0xff]  ;;  %v696_v25 = vld [vmem:[%s1629_s7 + $0x70] sm:$0xff]  ;;  %v727_v32 = vld [vmem:[%s1629_s7 + $0x168] sm:$0xff] }
  0x45   : > { %611 = vmatpush.msrb.mxu2 %v409_v35  ;;  %631 = vmatpush.msrb.mxu3 %v410_v36  ;;  %v395_v1 = vld [vmem:[%s1626_s4 + $0x98] sm:$0xff]  ;;  %v694_v34 = vld [vmem:[%s1629_s7 + $0x60] sm:$0xff] }
  0x46   : > { %573 = vmatpush.msrb.mxu0 %v467_v29  ;;  %592 = vmatpush.msrb.mxu1 %v404_v38  ;;  %v391_v5 = vld [vmem:[%s1626_s4 + $0x78] sm:$0xff]  ;;  %v695_v29 = vld [vmem:[%s1629_s7 + $0x68] sm:$0xff]  ;;  %v742_v35 = vld [vmem:[%s1629_s7 + $0x1e0] sm:$0xff] }
  0x47   : > { %612 = vmatpush.msrb.mxu2 %v405_v39  ;;  %632 = vmatpush.msrb.mxu3 %v406_v40  ;;  %v387_v9 = vld [vmem:[%s1626_s4 + $0x58] sm:$0xff]  ;;  %v710_v36 = vld [vmem:[%s1629_s7 + $0xe0] sm:$0xff] }
  0x48   : > { %574 = vmatpush.msrb.mxu0 %v463_v33  ;;  %593 = vmatpush.msrb.mxu1 %v400_v42  ;;  %v383_v13 = vld [vmem:[%s1626_s4 + $0x38] sm:$0xff]  ;;  %v334_v33 = vld [vmem:[#allocation2] sm:$0xff]  ;;  %v692_v42 = vld [vmem:[%s1629_s7 + $0x50] sm:$0xff] }
  0x49   : > { %613 = vmatpush.msrb.mxu2 %v401_v43  ;;  %633 = vmatpush.msrb.mxu3 %v402_v44  ;;  %v379_v17 = vld [vmem:[%s1626_s4 + $0x18] sm:$0xff]  ;;  %v740_v43 = vld [vmem:[%s1629_s7 + $0x1d0] sm:$0xff]  ;;  %v691_v44 = vld [vmem:[%s1629_s7 + $0x48] sm:$0xff] }
  0x4a   : > { %575 = vmatpush.msrb.mxu0 %v459_v37  ;;  %594 = vmatpush.msrb.mxu1 %v396_v58  ;;  %v697_v21 = vld [vmem:[%s1629_s7 + $0x78] sm:$0xff]  ;;  %v726_v37 = vld [vmem:[%s1629_s7 + $0x160] sm:$0xff] }
  0x4b   : > { %614 = vmatpush.msrb.mxu2 %v397_v59  ;;  %634 = vmatpush.msrb.mxu3 %v398_v60  ;;  %v745_v22 = vld [vmem:[%s1629_s7 + $0x1f8] sm:$0xff]  ;;  %v722_v58 = vld [vmem:[%s1629_s7 + $0x140] sm:$0xff]  ;;  %v735_v59 = vld [vmem:[%s1629_s7 + $0x1a8] sm:$0xff] }
  0x4c   : > { %576 = vmatpush.msrb.mxu0 %v455_v41  ;;  %595 = vmatpush.msrb.mxu1 %v392_v62  ;;  %v713_v23 = vld [vmem:[%s1629_s7 + $0xf8] sm:$0xff]  ;;  %v686_v60 = vld [vmem:[%s1629_s7 + $0x20] sm:$0xff] }
  0x4d   : > { %615 = vmatpush.msrb.mxu2 %v393_v63  ;;  %635 = vmatpush.msrb.mxu3 %v394_v0  ;;  %v729_v24 = vld [vmem:[%s1629_s7 + $0x178] sm:$0xff]  ;;  %v734_v63 = vld [vmem:[%s1629_s7 + $0x1a0] sm:$0xff] }
  0x4e   : > { %577 = vmatpush.msrb.mxu0 %v451_v45  ;;  %596 = vmatpush.msrb.mxu1 %v388_v2  ;;  %v693_v38 = vld [vmem:[%s1629_s7 + $0x58] sm:$0xff]  ;;  %v739_v45 = vld [vmem:[%s1629_s7 + $0x1c8] sm:$0xff]  ;;  %v720_v2 = vld [vmem:[%s1629_s7 + $0x130] sm:$0xff] }
  0x4f   : > { %616 = vmatpush.msrb.mxu2 %v389_v3  ;;  %636 = vmatpush.msrb.mxu3 %v390_v4  ;;  %v741_v39 = vld [vmem:[%s1629_s7 + $0x1d8] sm:$0xff]  ;;  %v684_v4 = vld [vmem:[%s1629_s7 + $0x10] sm:$0xff] }
  0x50   : > { %578 = vmatpush.msrb.mxu0 %v447_v46  ;;  %597 = vmatpush.msrb.mxu1 %v384_v6  ;;  %v709_v40 = vld [vmem:[%s1629_s7 + $0xd8] sm:$0xff]  ;;  %v690_v46 = vld [vmem:[%s1629_s7 + $0x40] sm:$0xff]  ;;  %v719_v6 = vld [vmem:[%s1629_s7 + $0x128] sm:$0xff] }
  0x51   : > { %617 = vmatpush.msrb.mxu2 %v385_v7  ;;  %637 = vmatpush.msrb.mxu3 %v386_v8  ;;  %v725_v41 = vld [vmem:[%s1629_s7 + $0x158] sm:$0xff]  ;;  %v732_v7 = vld [vmem:[%s1629_s7 + $0x190] sm:$0xff]  ;;  %v683_v8 = vld [vmem:[%s1629_s7 + $0x8] sm:$0xff] }
  0x52   : > { %579 = vmatpush.msrb.mxu0 %v443_v47  ;;  %598 = vmatpush.msrb.mxu1 %v380_v10  ;;  %v738_v47 = vld [vmem:[%s1629_s7 + $0x1c0] sm:$0xff]  ;;  %v721_v62 = vld [vmem:[%s1629_s7 + $0x138] sm:$0xff] }
  0x53   : > { %618 = vmatpush.msrb.mxu2 %v381_v11  ;;  %638 = vmatpush.msrb.mxu3 %v382_v12  ;;  %v685_v0 = vld [vmem:[%s1629_s7 + $0x18] sm:$0xff]  ;;  %v718_v10 = vld [vmem:[%s1629_s7 + $0x120] sm:$0xff]  ;;  %v731_v11 = vld [vmem:[%s1629_s7 + $0x188] sm:$0xff] }
  0x54   : > { %644 = vmatpush.msra.mxu0 %v439_v48  ;;  %599 = vmatpush.msrb.mxu1 %v376_v14  ;;  %v689_v48 = vld [vmem:[%s1629_s7 + $0x38] sm:$0xff]  ;;  %v682_v12 = vld [vmem:[%s1629_s7] sm:$0xff] }
  0x55   : > { %619 = vmatpush.msrb.mxu2 %v377_v15  ;;  %639 = vmatpush.msrb.mxu3 %v378_v16  ;;  %v733_v3 = vld [vmem:[%s1629_s7 + $0x198] sm:$0xff]  ;;  %v730_v15 = vld [vmem:[%s1629_s7 + $0x180] sm:$0xff]  ;;  %v700_v16 = vld [vmem:[%s1629_s7 + $0x90] sm:$0xff] }
  0x56   : > { %645 = vmatpush.msra.mxu0 %v435_v49  ;;  %v708_v49 = vld [vmem:[%s1629_s7 + $0xd0] sm:$0xff]  ;;  %v717_v14 = vld [vmem:[%s1629_s7 + $0x118] sm:$0xff] }
  0x58   : > { %646 = vmatpush.msra.mxu0 %v431_v50  ;;  %v724_v50 = vld [vmem:[%s1629_s7 + $0x150] sm:$0xff] }
  0x5a   : > { %647 = vmatpush.msra.mxu0 %v427_v51  ;;  %v737_v51 = vld [vmem:[%s1629_s7 + $0x1b8] sm:$0xff] }
  0x5c   : > { %648 = vmatpush.msra.mxu0 %v423_v52  ;;  %v688_v52 = vld [vmem:[%s1629_s7 + $0x30] sm:$0xff] }
  0x5e   : > { %649 = vmatpush.msra.mxu0 %v419_v53  ;;  %v707_v53 = vld [vmem:[%s1629_s7 + $0xc8] sm:$0xff] }
  0x60   : > { %650 = vmatpush.msra.mxu0 %v415_v54  ;;  %v723_v54 = vld [vmem:[%s1629_s7 + $0x148] sm:$0xff] }
  0x62   : > { %651 = vmatpush.msra.mxu0 %v411_v55  ;;  %v736_v55 = vld [vmem:[%s1629_s7 + $0x1b0] sm:$0xff] }
  0x64   : > { %652 = vmatpush.msra.mxu0 %v407_v56  ;;  %v687_v56 = vld [vmem:[%s1629_s7 + $0x28] sm:$0xff] }
  0x66   : > { %653 = vmatpush.msra.mxu0 %v403_v57  ;;  %v706_v57 = vld [vmem:[%s1629_s7 + $0xc0] sm:$0xff] }
  0x68   : > { %654 = vmatpush.msra.mxu0 %v399_v61  ;;  %v705_v61 = vld [vmem:[%s1629_s7 + $0xb8] sm:$0xff] }
  0x6a   : > { %655 = vmatpush.msra.mxu0 %v395_v1  ;;  %v704_v1 = vld [vmem:[%s1629_s7 + $0xb0] sm:$0xff] }
  0x6c   : > { %656 = vmatpush.msra.mxu0 %v391_v5  ;;  %v703_v5 = vld [vmem:[%s1629_s7 + $0xa8] sm:$0xff] }
  0x6e   : > { %657 = vmatpush.msra.mxu0 %v387_v9  ;;  %v702_v9 = vld [vmem:[%s1629_s7 + $0xa0] sm:$0xff] }
  0x70   : > { %658 = vmatpush.msra.mxu0 %v383_v13  ;;  %v701_v13 = vld [vmem:[%s1629_s7 + $0x98] sm:$0xff] }
  0x72   : > { %659 = vmatpush.msra.mxu0 %v379_v17  ;;  %v716_v17 = vld [vmem:[%s1629_s7 + $0x110] sm:$0xff] }
  0xb0   : > { %v373_v19 = vpop.f32.mrf.mxu0 }
  0xb1   : > { %v374_v20 = vadd.f32 %v903_v18, %v373_v19  ;;  %v699_v18 = vld [vmem:[%s1629_s7 + $0x88] sm:$0xff] }
  0xb2   : > { %v715_v19 = vld [vmem:[%s1629_s7 + $0x108] sm:$0xff] }
  0xb3   : > { %520 = vmatmul.f32.vlgmr.msra.gmra.mxu1 %v374_v20  ;;  %540 = vmatmul.f32.vlgmr.msra.gmra.mxu2 %v374_v20 }
  0xb4   : > { %560 = vmatmul.f32.vlgmr.msra.gmra.mxu3 %v374_v20  ;;  %580 = vmatmul.f32.vlgmr.msrb.gmra.mxu0 %v374_v20  ;;  %v698_v20 = vld [vmem:[%s1629_s7 + $0x80] sm:$0xff] }
  0xb5   : > { %750 = vmatpush.msra.mxu1 %v697_v21  ;;  %810 = vmatpush.msrb.mxu0 %v745_v22  ;;  %v714_v21 = vld [vmem:[%s1629_s7 + $0x100] sm:$0xff] }
  0xb6   : > { %770 = vmatpush.msra.mxu2 %v713_v23  ;;  %790 = vmatpush.msra.mxu3 %v729_v24  ;;  %v664_v24 = vld [vmem:[%s1628_s6] sm:$0xf] }
  0xb7   : > { %751 = vmatpush.msra.mxu1 %v696_v25  ;;  %811 = vmatpush.msrb.mxu0 %v744_v26 }
  0xb8   : > { %771 = vmatpush.msra.mxu2 %v712_v27  ;;  %791 = vmatpush.msra.mxu3 %v728_v28  ;;  %v666_v27 = vperm.slane %v664_v24, 0 }
  0xb9   : > { %752 = vmatpush.msra.mxu1 %v695_v29  ;;  %812 = vmatpush.msrb.mxu0 %v743_v30  ;;  %v669_v29 = vperm.slane %v664_v24, 3 }
  0xba   : > { %772 = vmatpush.msra.mxu2 %v711_v31  ;;  %792 = vmatpush.msra.mxu3 %v727_v32 }
  0xbb   : > { %600 = vmatmul.f32.vlgmr.msrb.gmra.mxu1 %v334_v33  ;;  %620 = vmatmul.f32.vlgmr.msrb.gmra.mxu2 %v334_v33 }
  0xbc   : > { %640 = vmatmul.f32.vlgmr.msrb.gmra.mxu3 %v334_v33  ;;  %660 = vmatmul.f32.vlgmr.msra.gmra.mxu0 %v334_v33 }
  0xbd   : > { %753 = vmatpush.msra.mxu1 %v694_v34  ;;  %813 = vmatpush.msrb.mxu0 %v742_v35 }
  0xbe   : > { %773 = vmatpush.msra.mxu2 %v710_v36  ;;  %793 = vmatpush.msra.mxu3 %v726_v37  ;;  %v667_v36 = vperm.slane %v664_v24, 1 }
  0xbf   : > { %754 = vmatpush.msra.mxu1 %v693_v38  ;;  %814 = vmatpush.msrb.mxu0 %v741_v39  ;;  %v668_v39 = vperm.slane %v664_v24, 2 }
  0xc0   : > { %774 = vmatpush.msra.mxu2 %v709_v40  ;;  %794 = vmatpush.msra.mxu3 %v725_v41 }
  0xc1   : > { %755 = vmatpush.msra.mxu1 %v692_v42  ;;  %815 = vmatpush.msrb.mxu0 %v740_v43 }
  0xc2   : > { %775 = vmatpush.msra.mxu2 %v708_v49  ;;  %795 = vmatpush.msra.mxu3 %v724_v50 }
  0xc3   : > { %756 = vmatpush.msra.mxu1 %v691_v44  ;;  %816 = vmatpush.msrb.mxu0 %v739_v45 }
  0xc4   : > { %776 = vmatpush.msra.mxu2 %v707_v53  ;;  %796 = vmatpush.msra.mxu3 %v723_v54 }
  0xc5   : > { %757 = vmatpush.msra.mxu1 %v690_v46  ;;  %817 = vmatpush.msrb.mxu0 %v738_v47  ;;  %v904_v47 = vld [vmem:[%s1630_s8] ss:$0 sm:$0xff] }
  0xc6   : > { %777 = vmatpush.msra.mxu2 %v706_v57  ;;  %797 = vmatpush.msra.mxu3 %v722_v58 }
  0xc7   : > { %758 = vmatpush.msra.mxu1 %v689_v48  ;;  %818 = vmatpush.msrb.mxu0 %v737_v51 }
  0xc8   : > { %778 = vmatpush.msra.mxu2 %v705_v61  ;;  %798 = vmatpush.msra.mxu3 %v721_v62 }
  0xc9   : > { %759 = vmatpush.msra.mxu1 %v688_v52  ;;  %819 = vmatpush.msrb.mxu0 %v736_v55 }
  0xca   : > { %779 = vmatpush.msra.mxu2 %v704_v1  ;;  %799 = vmatpush.msra.mxu3 %v720_v2 }
  0xcb   : > { %760 = vmatpush.msra.mxu1 %v687_v56  ;;  %820 = vmatpush.msrb.mxu0 %v735_v59 }
  0xcc   : > { %780 = vmatpush.msra.mxu2 %v703_v5  ;;  %800 = vmatpush.msra.mxu3 %v719_v6 }
  0xcd   : > { %761 = vmatpush.msra.mxu1 %v686_v60  ;;  %821 = vmatpush.msrb.mxu0 %v734_v63 }
  0xce   : > { %781 = vmatpush.msra.mxu2 %v702_v9  ;;  %801 = vmatpush.msra.mxu3 %v718_v10 }
  0xcf   : > { %762 = vmatpush.msra.mxu1 %v685_v0  ;;  %822 = vmatpush.msrb.mxu0 %v733_v3 }
  0xd0   : > { %782 = vmatpush.msra.mxu2 %v701_v13  ;;  %802 = vmatpush.msra.mxu3 %v717_v14 }
  0xd1   : > { %763 = vmatpush.msra.mxu1 %v684_v4  ;;  %823 = vmatpush.msrb.mxu0 %v732_v7 }
  0xd2   : > { %783 = vmatpush.msra.mxu2 %v700_v16  ;;  %803 = vmatpush.msra.mxu3 %v716_v17 }
  0xd3   : > { %764 = vmatpush.msra.mxu1 %v683_v8  ;;  %824 = vmatpush.msrb.mxu0 %v731_v11 }
  0xd4   : > { %784 = vmatpush.msra.mxu2 %v699_v18  ;;  %804 = vmatpush.msra.mxu3 %v715_v19 }
  0xd5   : > { %765 = vmatpush.msra.mxu1 %v682_v12  ;;  %825 = vmatpush.msrb.mxu0 %v730_v15 }
  0xd6   : > { %785 = vmatpush.msra.mxu2 %v698_v20  ;;  %805 = vmatpush.msra.mxu3 %v714_v21 }
 0x130   : > { %v521_v22 = vpop.f32.mrf.mxu1 }
 0x131   : > { %v581_v23 = vpop.f32.mrf.mxu0 }
 0x136   : > { %v541_v25 = vpop.f32.mrf.mxu2 }
 0x137   : > { %v561_v26 = vpop.f32.mrf.mxu3 }
 0x138   : > { %v601_v28 = vpop.f32.mrf.mxu1 }
 0x139   : > { %v602_v30 = vadd.f32 %v601_v28, %v521_v22  ;;  %v661_v31 = vpop.f32.mrf.mxu0 }
 0x13a   : > { %v662_v32 = vadd.f32 %v661_v31, %v581_v23 }
 0x13b   : > { %v674_v33 = vadd.f32 %v666_v27, %v602_v30 }
 0x13c   : > { %v677_v34 = vadd.f32 %v669_v29, %v662_v32 }
 0x13d   : > { %v678_v35 = vmax.f32 %v674_v33, 0.0 }
 0x13e   : > { %v681_v37 = vmax.f32 %v677_v34, 0.0  ;;  %v621_v38 = vpop.f32.mrf.mxu2 }
 0x13f   : > { %v622_v40 = vadd.f32 %v621_v38, %v541_v25  ;;  %v641_v41 = vpop.f32.mrf.mxu3  ;;  %766 = vmatmul.f32.vlgmr.msra.gmra.mxu1 %v678_v35 }
 0x140   : > { %v642_v42 = vadd.f32 %v641_v41, %v561_v26  ;;  %826 = vmatmul.f32.vlgmr.msrb.gmra.mxu0 %v681_v37 }
 0x141   : > { %v675_v43 = vadd.f32 %v667_v36, %v622_v40 }
 0x142   : > { %v676_v44 = vadd.f32 %v668_v39, %v642_v42 }
 0x143   : > { %v679_v45 = vmax.f32 %v675_v43, 0.0 }
 0x144   : > { %v680_v46 = vmax.f32 %v676_v44, 0.0 }
 0x145   : > { %786 = vmatmul.f32.vlgmr.msra.gmra.mxu2 %v679_v45 }
 0x146   : > { %806 = vmatmul.f32.vlgmr.msra.gmra.mxu3 %v680_v46 }
 0x1bc   : > { %v767_v48 = vpop.f32.mrf.mxu1 }
 0x1bd   : > { %v768_v49 = vadd.f32 %v904_v47, %v767_v48  ;;  %v827_v54 = vpop.f32.mrf.mxu0 }
 0x1c8   : > { %v787_v50 = vpop.f32.mrf.mxu2 }
 0x1c9   : > { %v788_v51 = vadd.f32 %v787_v50, %v768_v49  ;;  %v807_v52 = vpop.f32.mrf.mxu3 }
 0x1cb   : > { %v808_v53 = vadd.f32 %v807_v52, %v788_v51 }
 0x1cd   : > { %v828_v55 = vadd.f32 %v827_v54, %v808_v53 }
 0x1cf   : > { %830 = vst [vmem:[#allocation2] sm:$0xff] %v828_v55 }
 0x1d0   : > { %831 = vst [vmem:[%s979_s18] sm:$0xff] %v828_v55 }
 0x1d1 PF: > { %s19_s30 = sadd.s32 1, %s911_s30  }
 0x1d2   : > { %p16_p5 = scmp.ge.s32.totalorder %s19_s30, 5  }
 0x1d4   :  { %18 = sbr.rel (!%p16_p5) target bundleno = 1 (0x1), region = 90 }

// kernel: jepa_forward.6
= control target key start
LH: loop header
LB: loop body
LE: loop exit
PB: predicated region body
PF: predicated region fallthrough
CT: control target
= control target key end

     0   :  { %s23493_s1 = inlined_call_operand.vmem [shape: bf16[18560,128], index: 1, kind: input, shape index: {}]   ;;  %s23494_s0 = inlined_call_operand.vmem [shape: bf16[16,18560], index: 0, kind: input, shape index: {}]   ;;  %s23495_s2 = inlined_call_operand.vmem [shape: f32[1,128], index: 2, kind: input, shape index: {}]   ;;  %s23496_s3 = inlined_call_operand.vmem [shape: f32[16,128], index: 3, kind: output, shape index: {}]  }
   0x1   :  { %v17578_v0 = vld [vmem:[%s23493_s1 + $0x38] sm:$0xff]  ;;  %v17577_v4 = vld [vmem:[%s23493_s1 + $0x30] sm:$0xff]  ;;  %v17576_v8 = vld [vmem:[%s23493_s1 + $0x28] sm:$0xff] }
   0x2   :  { %v17594_v1 = vld [vmem:[%s23493_s1 + $0xb8] sm:$0xff]  ;;  %10170 = vmatpush.bf16.msra.mxu0 %v17578_v0  ;;  %v17593_v5 = vld [vmem:[%s23493_s1 + $0xb0] sm:$0xff]  ;;  %v17592_v9 = vld [vmem:[%s23493_s1 + $0xa8] sm:$0xff] }
   0x3   :  { %v17586_v2 = vld [vmem:[%s23493_s1 + $0x78] sm:$0xff]  ;;  %10198 = vmatpush.bf16.msra.mxu2 %v17594_v1  ;;  %v17585_v6 = vld [vmem:[%s23493_s1 + $0x70] sm:$0xff]  ;;  %v17584_v10 = vld [vmem:[%s23493_s1 + $0x68] sm:$0xff] }
   0x4   :  { %v17602_v3 = vld [vmem:[%s23493_s1 + $0xf8] sm:$0xff]  ;;  %10184 = vmatpush.bf16.msra.mxu1 %v17586_v2  ;;  %v17601_v7 = vld [vmem:[%s23493_s1 + $0xf0] sm:$0xff]  ;;  %v17600_v11 = vld [vmem:[%s23493_s1 + $0xe8] sm:$0xff] }
   0x5   :  { %10212 = vmatpush.bf16.msra.mxu3 %v17602_v3  ;;  %v17575_v12 = vld [vmem:[%s23493_s1 + $0x20] sm:$0xff]  ;;  %v17574_v16 = vld [vmem:[%s23493_s1 + $0x18] sm:$0xff]  ;;  %v17573_v20 = vld [vmem:[%s23493_s1 + $0x10] sm:$0xff] }
   0x6   :  { %10171 = vmatpush.bf16.msra.mxu0 %v17577_v4  ;;  %v17591_v13 = vld [vmem:[%s23493_s1 + $0xa0] sm:$0xff]  ;;  %v17590_v17 = vld [vmem:[%s23493_s1 + $0x98] sm:$0xff]  ;;  %v17589_v21 = vld [vmem:[%s23493_s1 + $0x90] sm:$0xff] }
   0x7   :  { %10199 = vmatpush.bf16.msra.mxu2 %v17593_v5  ;;  %v17583_v14 = vld [vmem:[%s23493_s1 + $0x60] sm:$0xff]  ;;  %v17582_v18 = vld [vmem:[%s23493_s1 + $0x58] sm:$0xff]  ;;  %v17581_v22 = vld [vmem:[%s23493_s1 + $0x50] sm:$0xff] }
   0x8   :  { %10185 = vmatpush.bf16.msra.mxu1 %v17585_v6  ;;  %v17599_v15 = vld [vmem:[%s23493_s1 + $0xe0] sm:$0xff]  ;;  %v17598_v19 = vld [vmem:[%s23493_s1 + $0xd8] sm:$0xff]  ;;  %v17597_v23 = vld [vmem:[%s23493_s1 + $0xd0] sm:$0xff] }
   0x9   :  { %10213 = vmatpush.bf16.msra.mxu3 %v17601_v7  ;;  %v17572_v24 = vld [vmem:[%s23493_s1 + $0x8] sm:$0xff]  ;;  %v17571_v28 = vld [vmem:[%s23493_s1] sm:$0xff]  ;;  %v17610_v30 = vld [vmem:[%s23493_s1 + $0x138] sm:$0xff] }
   0xa   :  { %10172 = vmatpush.bf16.msra.mxu0 %v17576_v8  ;;  %v17588_v25 = vld [vmem:[%s23493_s1 + $0x88] sm:$0xff]  ;;  %v17587_v29 = vld [vmem:[%s23493_s1 + $0x80] sm:$0xff]  ;;  %v17626_v31 = vld [vmem:[%s23493_s1 + $0x1b8] sm:$0xff] }
   0xb   :  { %10200 = vmatpush.bf16.msra.mxu2 %v17592_v9  ;;  %v17580_v26 = vld [vmem:[%s23493_s1 + $0x48] sm:$0xff]  ;;  %v17579_v32 = vld [vmem:[%s23493_s1 + $0x40] sm:$0xff]  ;;  %v17618_v38 = vld [vmem:[%s23493_s1 + $0x178] sm:$0xff] }
   0xc   :  { %10186 = vmatpush.bf16.msra.mxu1 %v17584_v10  ;;  %v17596_v27 = vld [vmem:[%s23493_s1 + $0xc8] sm:$0xff]  ;;  %v17595_v33 = vld [vmem:[%s23493_s1 + $0xc0] sm:$0xff]  ;;  %v17634_v39 = vld [vmem:[%s23493_s1 + $0x1f8] sm:$0xff] }
   0xd   :  { %10214 = vmatpush.bf16.msra.mxu3 %v17600_v11  ;;  %v12208_v34 = vld [vmem:[%s23494_s0] sm:$0xf]  ;;  %v17498_v35 = vld [vmem:[%s23494_s0 + $0x240] sm:$0xf0]  ;;  %v12216_v36 = vld [vmem:[%s23494_s0 + $0x8] sm:$0xf] }
   0xe   :  { %10173 = vmatpush.bf16.msra.mxu0 %v17575_v12  ;;  %v17499_v37 = vld [vmem:[%s23494_s0 + $0x248] sm:$0xf0]  ;;  %v17426_v40 = vld [vmem:[%s23494_s0 + $0x4] sm:$0xf]  ;;  %v12210_v41 = vld [vmem:[%s23494_s0 + $0x244] sm:$0xf0]  ;;  %v12209_v44 = vor.u32 %v17498_v35, %v12208_v34 }
   0xf   :  { %10201 = vmatpush.bf16.msra.mxu2 %v17591_v13  ;;  %v17427_v42 = vld [vmem:[%s23494_s0 + $0xc] sm:$0xf]  ;;  %v12218_v43 = vld [vmem:[%s23494_s0 + $0x24c] sm:$0xf0]  ;;  %v12217_v45 = vor.u32 %v17499_v37, %v12216_v36  ;;  %v12213_v48 = vor.u32 %v17426_v40, %v12210_v41  ;;  %v17607_v56 = vld [vmem:[%s23493_s1 + $0x120] sm:$0xff] }
  0x10   :  { %10187 = vmatpush.bf16.msra.mxu1 %v17583_v14  ;;  %v17609_v46 = vld [vmem:[%s23493_s1 + $0x130] sm:$0xff]  ;;  %v12221_v49 = vor.u32 %v17427_v42, %v12218_v43  ;;  %v17608_v52 = vld [vmem:[%s23493_s1 + $0x128] sm:$0xff]  ;;  %v17623_v57 = vld [vmem:[%s23493_s1 + $0x1a0] sm:$0xff] }
  0x11   :  { %10215 = vmatpush.bf16.msra.mxu3 %v17599_v15  ;;  %v17625_v47 = vld [vmem:[%s23493_s1 + $0x1b0] sm:$0xff]  ;;  %v17624_v53 = vld [vmem:[%s23493_s1 + $0x1a8] sm:$0xff]  ;;  %v17615_v58 = vld [vmem:[%s23493_s1 + $0x160] sm:$0xff] }
  0x12   :  { %10174 = vmatpush.bf16.msra.mxu0 %v17574_v16  ;;  %v17617_v50 = vld [vmem:[%s23493_s1 + $0x170] sm:$0xff]  ;;  %v17616_v54 = vld [vmem:[%s23493_s1 + $0x168] sm:$0xff]  ;;  %v17631_v59 = vld [vmem:[%s23493_s1 + $0x1e0] sm:$0xff] }
  0x13   :  { %10202 = vmatpush.bf16.msra.mxu2 %v17590_v17  ;;  %v17633_v51 = vld [vmem:[%s23493_s1 + $0x1f0] sm:$0xff]  ;;  %v17632_v55 = vld [vmem:[%s23493_s1 + $0x1e8] sm:$0xff]  ;;  %v17606_v60 = vld [vmem:[%s23493_s1 + $0x118] sm:$0xff] }
  0x14   :  { %10188 = vmatpush.bf16.msra.mxu1 %v17582_v18  ;;  %v17622_v61 = vld [vmem:[%s23493_s1 + $0x198] sm:$0xff]  ;;  %v17605_v0 = vld [vmem:[%s23493_s1 + $0x110] sm:$0xff]  ;;  %v17604_v4 = vld [vmem:[%s23493_s1 + $0x108] sm:$0xff] }
  0x15   :  { %10216 = vmatpush.bf16.msra.mxu3 %v17598_v19  ;;  %v17614_v62 = vld [vmem:[%s23493_s1 + $0x158] sm:$0xff]  ;;  %v17621_v1 = vld [vmem:[%s23493_s1 + $0x190] sm:$0xff]  ;;  %v17620_v5 = vld [vmem:[%s23493_s1 + $0x188] sm:$0xff] }
  0x16   :  { %10175 = vmatpush.bf16.msra.mxu0 %v17573_v20  ;;  %v17630_v63 = vld [vmem:[%s23493_s1 + $0x1d8] sm:$0xff]  ;;  %v17613_v2 = vld [vmem:[%s23493_s1 + $0x150] sm:$0xff]  ;;  %v17612_v6 = vld [vmem:[%s23493_s1 + $0x148] sm:$0xff] }
  0x17   :  { %10203 = vmatpush.bf16.msra.mxu2 %v17589_v21  ;;  %v17629_v3 = vld [vmem:[%s23493_s1 + $0x1d0] sm:$0xff]  ;;  %v17628_v7 = vld [vmem:[%s23493_s1 + $0x1c8] sm:$0xff]  ;;  %v17603_v8 = vld [vmem:[%s23493_s1 + $0x100] sm:$0xff] }
  0x18   :  { %10189 = vmatpush.bf16.msra.mxu1 %v17581_v22  ;;  %v17619_v9 = vld [vmem:[%s23493_s1 + $0x180] sm:$0xff]  ;;  %v17642_v10 = vld [vmem:[%s23493_s1 + $0x238] sm:$0xff]  ;;  %v12224_v12 = vld [vmem:[%s23494_s0 + $0x10] sm:$0xf] }
  0x19   :  { %10217 = vmatpush.bf16.msra.mxu3 %v17597_v23  ;;  %v17658_v11 = vld [vmem:[%s23493_s1 + $0x2b8] sm:$0xff]  ;;  %v17500_v13 = vld [vmem:[%s23494_s0 + $0x250] sm:$0xf0]  ;;  %v17611_v16 = vld [vmem:[%s23493_s1 + $0x140] sm:$0xff] }
  0x1a   :  { %10176 = vmatpush.bf16.msra.mxu0 %v17572_v24  ;;  %v12232_v14 = vld [vmem:[%s23494_s0 + $0x18] sm:$0xf]  ;;  %v17501_v15 = vld [vmem:[%s23494_s0 + $0x258] sm:$0xf0]  ;;  %v17627_v17 = vld [vmem:[%s23493_s1 + $0x1c0] sm:$0xff]  ;;  %v12225_v22 = vor.u32 %v17500_v13, %v12224_v12 }
  0x1b   :  { %10204 = vmatpush.bf16.msra.mxu2 %v17588_v25  ;;  %v17428_v18 = vld [vmem:[%s23494_s0 + $0x14] sm:$0xf]  ;;  %v12226_v19 = vld [vmem:[%s23494_s0 + $0x254] sm:$0xf0]  ;;  %v17429_v20 = vld [vmem:[%s23494_s0 + $0x1c] sm:$0xf]  ;;  %v12233_v23 = vor.u32 %v17501_v15, %v12232_v14 }
  0x1c   :  { %10190 = vmatpush.bf16.msra.mxu1 %v17580_v26  ;;  %v12234_v21 = vld [vmem:[%s23494_s0 + $0x25c] sm:$0xf0]  ;;  %v17650_v24 = vld [vmem:[%s23493_s1 + $0x278] sm:$0xff]  ;;  %v12229_v26 = vor.u32 %v17428_v18, %v12226_v19  ;;  %v17648_v34 = vld [vmem:[%s23493_s1 + $0x268] sm:$0xff] }
  0x1d   :  { %10218 = vmatpush.bf16.msra.mxu3 %v17596_v27  ;;  %v17666_v25 = vld [vmem:[%s23493_s1 + $0x2f8] sm:$0xff]  ;;  %v12237_v27 = vor.u32 %v17429_v20, %v12234_v21  ;;  %v17664_v35 = vld [vmem:[%s23493_s1 + $0x2e8] sm:$0xff]  ;;  %v17639_v36 = vld [vmem:[%s23493_s1 + $0x220] sm:$0xff] }
  0x1e   :  { %10177 = vmatpush.bf16.msra.mxu0 %v17571_v28  ;;  %v17641_v28 = vld [vmem:[%s23493_s1 + $0x230] sm:$0xff]  ;;  %v17655_v37 = vld [vmem:[%s23493_s1 + $0x2a0] sm:$0xff]  ;;  %v17638_v40 = vld [vmem:[%s23493_s1 + $0x218] sm:$0xff] }
  0x1f   :  { %10205 = vmatpush.bf16.msra.mxu2 %v17587_v29  ;;  %v17657_v29 = vld [vmem:[%s23493_s1 + $0x2b0] sm:$0xff]  ;;  %v17654_v41 = vld [vmem:[%s23493_s1 + $0x298] sm:$0xff]  ;;  %v17672_v12 = vld [vmem:[%s23493_s1 + $0x328] sm:$0xff] }
  0x20   :  { %10191 = vmatpush.bf16.msra.mxu1 %v17579_v32  ;;  %v17640_v32 = vld [vmem:[%s23493_s1 + $0x228] sm:$0xff]  ;;  %v17646_v42 = vld [vmem:[%s23493_s1 + $0x258] sm:$0xff]  ;;  %v17679_v18 = vld [vmem:[%s23493_s1 + $0x360] sm:$0xff] }
  0x21   :  { %10219 = vmatpush.bf16.msra.mxu3 %v17595_v33  ;;  %10178 = vmatmul.bf16.vlgmr.msra.gmra.mxu0 %v12209_v44  ;;  %v17656_v33 = vld [vmem:[%s23493_s1 + $0x2a8] sm:$0xff]  ;;  %v17662_v43 = vld [vmem:[%s23493_s1 + $0x2d8] sm:$0xff]  ;;  %v17637_v44 = vld [vmem:[%s23493_s1 + $0x210] sm:$0xff] }
  0x22   :  { %10226 = vmatpush.bf16.msrb.mxu0 %v17610_v30  ;;  %10206 = vmatmul.bf16.vlgmr.msra.gmra.mxu2 %v12217_v45  ;;  %v17649_v30 = vld [vmem:[%s23493_s1 + $0x270] sm:$0xff]  ;;  %v17688_v13 = vld [vmem:[%s23493_s1 + $0x3a8] sm:$0xff]  ;;  %v17695_v19 = vld [vmem:[%s23493_s1 + $0x3e0] sm:$0xff] }
  0x23   :  { %10254 = vmatpush.bf16.msrb.mxu2 %v17626_v31  ;;  %10192 = vmatmul.bf16.vlgmr.msra.gmra.mxu1 %v12213_v48  ;;  %v17665_v31 = vld [vmem:[%s23493_s1 + $0x2f0] sm:$0xff]  ;;  %v17636_v48 = vld [vmem:[%s23493_s1 + $0x208] sm:$0xff]  ;;  %v17670_v20 = vld [vmem:[%s23493_s1 + $0x318] sm:$0xff] }
  0x24   :  { %10240 = vmatpush.bf16.msrb.mxu1 %v17618_v38  ;;  %10220 = vmatmul.bf16.vlgmr.msra.gmra.mxu3 %v12221_v49  ;;  %v17647_v38 = vld [vmem:[%s23493_s1 + $0x260] sm:$0xff]  ;;  %v17653_v45 = vld [vmem:[%s23493_s1 + $0x290] sm:$0xff]  ;;  %v17652_v49 = vld [vmem:[%s23493_s1 + $0x288] sm:$0xff] }
  0x25   :  { %10268 = vmatpush.bf16.msrb.mxu3 %v17634_v39  ;;  %v17663_v39 = vld [vmem:[%s23493_s1 + $0x2e0] sm:$0xff]  ;;  %v17680_v14 = vld [vmem:[%s23493_s1 + $0x368] sm:$0xff]  ;;  %v17686_v21 = vld [vmem:[%s23493_s1 + $0x398] sm:$0xff] }
  0x26   :  { %10227 = vmatpush.bf16.msrb.mxu0 %v17609_v46  ;;  %v17645_v46 = vld [vmem:[%s23493_s1 + $0x250] sm:$0xff]  ;;  %v17696_v15 = vld [vmem:[%s23493_s1 + $0x3e8] sm:$0xff] }
  0x27   :  { %10255 = vmatpush.bf16.msrb.mxu2 %v17625_v47  ;;  %v17661_v47 = vld [vmem:[%s23493_s1 + $0x2d0] sm:$0xff] }
  0x28   :  { %10241 = vmatpush.bf16.msrb.mxu1 %v17617_v50  ;;  %v17644_v50 = vld [vmem:[%s23493_s1 + $0x248] sm:$0xff] }
  0x29   :  { %10269 = vmatpush.bf16.msrb.mxu3 %v17633_v51  ;;  %v17660_v51 = vld [vmem:[%s23493_s1 + $0x2c8] sm:$0xff] }
  0x2a   :  { %10228 = vmatpush.bf16.msrb.mxu0 %v17608_v52  ;;  %v17635_v52 = vld [vmem:[%s23493_s1 + $0x200] sm:$0xff] }
  0x2b   :  { %10256 = vmatpush.bf16.msrb.mxu2 %v17624_v53  ;;  %v17651_v53 = vld [vmem:[%s23493_s1 + $0x280] sm:$0xff] }
  0x2c   :  { %10242 = vmatpush.bf16.msrb.mxu1 %v17616_v54  ;;  %v17674_v54 = vld [vmem:[%s23493_s1 + $0x338] sm:$0xff] }
  0x2d   :  { %10270 = vmatpush.bf16.msrb.mxu3 %v17632_v55  ;;  %v17690_v55 = vld [vmem:[%s23493_s1 + $0x3b8] sm:$0xff] }
  0x2e   :  { %10229 = vmatpush.bf16.msrb.mxu0 %v17607_v56  ;;  %v12240_v56 = vld [vmem:[%s23494_s0 + $0x20] sm:$0xf] }
  0x2f   :  { %10257 = vmatpush.bf16.msrb.mxu2 %v17623_v57  ;;  %v17502_v57 = vld [vmem:[%s23494_s0 + $0x260] sm:$0xf0] }
  0x30   :  { %10243 = vmatpush.bf16.msrb.mxu1 %v17615_v58  ;;  %v12248_v58 = vld [vmem:[%s23494_s0 + $0x28] sm:$0xf] }
  0x31   :  { %10271 = vmatpush.bf16.msrb.mxu3 %v17631_v59  ;;  %v17503_v59 = vld [vmem:[%s23494_s0 + $0x268] sm:$0xf0] }
  0x32   :  { %10230 = vmatpush.bf16.msrb.mxu0 %v17606_v60  ;;  %v17643_v60 = vld [vmem:[%s23493_s1 + $0x240] sm:$0xff] }
  0x33   :  { %10258 = vmatpush.bf16.msrb.mxu2 %v17622_v61  ;;  %v17659_v61 = vld [vmem:[%s23493_s1 + $0x2c0] sm:$0xff] }
  0x34   :  { %10244 = vmatpush.bf16.msrb.mxu1 %v17614_v62  ;;  %v17430_v62 = vld [vmem:[%s23494_s0 + $0x24] sm:$0xf] }
  0x35   :  { %10272 = vmatpush.bf16.msrb.mxu3 %v17630_v63  ;;  %v12242_v63 = vld [vmem:[%s23494_s0 + $0x264] sm:$0xf0] }
  0x36   :  { %10231 = vmatpush.bf16.msrb.mxu0 %v17605_v0  ;;  %v17431_v0 = vld [vmem:[%s23494_s0 + $0x2c] sm:$0xf] }
  0x37   :  { %10259 = vmatpush.bf16.msrb.mxu2 %v17621_v1  ;;  %v12250_v1 = vld [vmem:[%s23494_s0 + $0x26c] sm:$0xf0] }
  0x38   :  { %10245 = vmatpush.bf16.msrb.mxu1 %v17613_v2  ;;  %v12241_v2 = vor.u32 %v17502_v57, %v12240_v56  ;;  %v17704_v56 = vld [vmem:[%s23493_s1 + $0x428] sm:$0xff] }
  0x39   :  { %10273 = vmatpush.bf16.msrb.mxu3 %v17629_v3  ;;  %v12249_v3 = vor.u32 %v17503_v59, %v12248_v58  ;;  %v17720_v57 = vld [vmem:[%s23493_s1 + $0x4a8] sm:$0xff] }
  0x3a   :  { %10232 = vmatpush.bf16.msrb.mxu0 %v17604_v4  ;;  %v17682_v4 = vld [vmem:[%s23493_s1 + $0x378] sm:$0xff]  ;;  %v17712_v58 = vld [vmem:[%s23493_s1 + $0x468] sm:$0xff] }
  0x3b   :  { %10260 = vmatpush.bf16.msrb.mxu2 %v17620_v5  ;;  %v17698_v5 = vld [vmem:[%s23493_s1 + $0x3f8] sm:$0xff]  ;;  %v17728_v59 = vld [vmem:[%s23493_s1 + $0x4e8] sm:$0xff] }
  0x3c   :  { %10246 = vmatpush.bf16.msrb.mxu1 %v17612_v6  ;;  %v12245_v6 = vor.u32 %v17430_v62, %v12242_v63  ;;  %v17711_v62 = vld [vmem:[%s23493_s1 + $0x460] sm:$0xff] }
  0x3d   :  { %10274 = vmatpush.bf16.msrb.mxu3 %v17628_v7  ;;  %v12253_v7 = vor.u32 %v17431_v0, %v12250_v1  ;;  %v17727_v63 = vld [vmem:[%s23493_s1 + $0x4e0] sm:$0xff]  ;;  %v17702_v0 = vld [vmem:[%s23493_s1 + $0x418] sm:$0xff] }
  0x3e   :  { %10233 = vmatpush.bf16.msrb.mxu0 %v17603_v8  ;;  %v17673_v8 = vld [vmem:[%s23493_s1 + $0x330] sm:$0xff]  ;;  %v17718_v1 = vld [vmem:[%s23493_s1 + $0x498] sm:$0xff] }
  0x3f   :  { %10261 = vmatpush.bf16.msrb.mxu2 %v17619_v9  ;;  %v17689_v9 = vld [vmem:[%s23493_s1 + $0x3b0] sm:$0xff] }
  0x40   :  { %10247 = vmatpush.bf16.msrb.mxu1 %v17611_v16  ;;  %v17671_v16 = vld [vmem:[%s23493_s1 + $0x320] sm:$0xff] }
  0x41   :  { %10275 = vmatpush.bf16.msrb.mxu3 %v17627_v17  ;;  %10234 = vmatmul.bf16.vlgmr.msrb.gmra.mxu0 %v12225_v22  ;;  %v17687_v17 = vld [vmem:[%s23493_s1 + $0x3a0] sm:$0xff]  ;;  %v17678_v22 = vld [vmem:[%s23493_s1 + $0x358] sm:$0xff] }
  0x42   :  { %10282 = vmatpush.bf16.msra.mxu0 %v17642_v10  ;;  %10262 = vmatmul.bf16.vlgmr.msrb.gmra.mxu2 %v12233_v23  ;;  %v17681_v10 = vld [vmem:[%s23493_s1 + $0x370] sm:$0xff]  ;;  %v17694_v23 = vld [vmem:[%s23493_s1 + $0x3d8] sm:$0xff] }
  0x43   :  { %10310 = vmatpush.bf16.msra.mxu2 %v17658_v11  ;;  %10248 = vmatmul.bf16.vlgmr.msrb.gmra.mxu1 %v12229_v26  ;;  %v17697_v11 = vld [vmem:[%s23493_s1 + $0x3f0] sm:$0xff] }
  0x44   :  { %10296 = vmatpush.bf16.msra.mxu1 %v17650_v24  ;;  %10276 = vmatmul.bf16.vlgmr.msrb.gmra.mxu3 %v12237_v27  ;;  %v17669_v24 = vld [vmem:[%s23493_s1 + $0x310] sm:$0xff] }
  0x45   :  { %10324 = vmatpush.bf16.msra.mxu3 %v17666_v25  ;;  %v17685_v25 = vld [vmem:[%s23493_s1 + $0x390] sm:$0xff] }
  0x46   :  { %10283 = vmatpush.bf16.msra.mxu0 %v17641_v28  ;;  %v17677_v26 = vld [vmem:[%s23493_s1 + $0x350] sm:$0xff]  ;;  %v17668_v28 = vld [vmem:[%s23493_s1 + $0x308] sm:$0xff] }
  0x47   :  { %10311 = vmatpush.bf16.msra.mxu2 %v17657_v29  ;;  %v17693_v27 = vld [vmem:[%s23493_s1 + $0x3d0] sm:$0xff]  ;;  %v17684_v29 = vld [vmem:[%s23493_s1 + $0x388] sm:$0xff] }
  0x48   :  { %10297 = vmatpush.bf16.msra.mxu1 %v17649_v30  ;;  %v17676_v30 = vld [vmem:[%s23493_s1 + $0x348] sm:$0xff] }
  0x49   :  { %10325 = vmatpush.bf16.msra.mxu3 %v17665_v31  ;;  %v17692_v31 = vld [vmem:[%s23493_s1 + $0x3c8] sm:$0xff] }
  0x4a   :  { %10284 = vmatpush.bf16.msra.mxu0 %v17640_v32  ;;  %v17667_v32 = vld [vmem:[%s23493_s1 + $0x300] sm:$0xff] }
  0x4b   :  { %10312 = vmatpush.bf16.msra.mxu2 %v17656_v33  ;;  %v17683_v33 = vld [vmem:[%s23493_s1 + $0x380] sm:$0xff] }
  0x4c   :  { %10298 = vmatpush.bf16.msra.mxu1 %v17648_v34  ;;  %v17706_v34 = vld [vmem:[%s23493_s1 + $0x438] sm:$0xff] }
  0x4d   :  { %10326 = vmatpush.bf16.msra.mxu3 %v17664_v35  ;;  %v17722_v35 = vld [vmem:[%s23493_s1 + $0x4b8] sm:$0xff] }
  0x4e   :  { %10285 = vmatpush.bf16.msra.mxu0 %v17639_v36  ;;  %v12256_v36 = vld [vmem:[%s23494_s0 + $0x30] sm:$0xf] }
  0x4f   :  { %10313 = vmatpush.bf16.msra.mxu2 %v17655_v37  ;;  %v17504_v37 = vld [vmem:[%s23494_s0 + $0x270] sm:$0xf0] }
  0x50   :  { %10299 = vmatpush.bf16.msra.mxu1 %v17647_v38  ;;  %v12264_v38 = vld [vmem:[%s23494_s0 + $0x38] sm:$0xf] }
  0x51   :  { %10327 = vmatpush.bf16.msra.mxu3 %v17663_v39  ;;  %v17505_v39 = vld [vmem:[%s23494_s0 + $0x278] sm:$0xf0] }
  0x52   :  { %10286 = vmatpush.bf16.msra.mxu0 %v17638_v40  ;;  %v17675_v40 = vld [vmem:[%s23493_s1 + $0x340] sm:$0xff] }
  0x53   :  { %10314 = vmatpush.bf16.msra.mxu2 %v17654_v41  ;;  %v17691_v41 = vld [vmem:[%s23493_s1 + $0x3c0] sm:$0xff] }
  0x54   :  { %10300 = vmatpush.bf16.msra.mxu1 %v17646_v42  ;;  %v17432_v42 = vld [vmem:[%s23494_s0 + $0x34] sm:$0xf] }
  0x55   :  { %10328 = vmatpush.bf16.msra.mxu3 %v17662_v43  ;;  %v12258_v43 = vld [vmem:[%s23494_s0 + $0x274] sm:$0xf0] }
  0x56   :  { %10287 = vmatpush.bf16.msra.mxu0 %v17637_v44  ;;  %v17433_v44 = vld [vmem:[%s23494_s0 + $0x3c] sm:$0xf] }
  0x57   :  { %10315 = vmatpush.bf16.msra.mxu2 %v17653_v45  ;;  %v12266_v45 = vld [vmem:[%s23494_s0 + $0x27c] sm:$0xf0] }
  0x58   :  { %10301 = vmatpush.bf16.msra.mxu1 %v17645_v46  ;;  %v12257_v46 = vor.u32 %v17504_v37, %v12256_v36  ;;  %v17736_v36 = vld [vmem:[%s23493_s1 + $0x528] sm:$0xff] }
  0x59   :  { %10329 = vmatpush.bf16.msra.mxu3 %v17661_v47  ;;  %v12265_v47 = vor.u32 %v17505_v39, %v12264_v38  ;;  %v17752_v37 = vld [vmem:[%s23493_s1 + $0x5a8] sm:$0xff]  ;;  %v18731_v38 = vld [vmem:[%s23495_s2] ss:$0 sm:$0xff] }
  0x5a   :  { %10288 = vmatpush.bf16.msra.mxu0 %v17636_v48  ;;  %v17714_v48 = vld [vmem:[%s23493_s1 + $0x478] sm:$0xff]  ;;  %v17744_v39 = vld [vmem:[%s23493_s1 + $0x568] sm:$0xff] }
  0x5b   :  { %10316 = vmatpush.bf16.msra.mxu2 %v17652_v49  ;;  %v17730_v49 = vld [vmem:[%s23493_s1 + $0x4f8] sm:$0xff] }
  0x5c   :  { %10302 = vmatpush.bf16.msra.mxu1 %v17644_v50  ;;  %v12261_v50 = vor.u32 %v17432_v42, %v12258_v43  ;;  %v17751_v42 = vld [vmem:[%s23493_s1 + $0x5a0] sm:$0xff] }
  0x5d   :  { %10330 = vmatpush.bf16.msra.mxu3 %v17660_v51  ;;  %v12269_v51 = vor.u32 %v17433_v44, %v12266_v45  ;;  %v17743_v45 = vld [vmem:[%s23493_s1 + $0x560] sm:$0xff] }
  0x5e   :  { %10289 = vmatpush.bf16.msra.mxu0 %v17635_v52  ;;  %v17705_v52 = vld [vmem:[%s23493_s1 + $0x430] sm:$0xff] }
  0x5f   :  { %10317 = vmatpush.bf16.msra.mxu2 %v17651_v53  ;;  %v17721_v53 = vld [vmem:[%s23493_s1 + $0x4b0] sm:$0xff] }
  0x60   :  { %10303 = vmatpush.bf16.msra.mxu1 %v17643_v60  ;;  %v17703_v60 = vld [vmem:[%s23493_s1 + $0x420] sm:$0xff] }
  0x61   :  { %10331 = vmatpush.bf16.msra.mxu3 %v17659_v61  ;;  %10290 = vmatmul.bf16.vlgmr.msra.gmra.mxu0 %v12241_v2  ;;  %v17719_v61 = vld [vmem:[%s23493_s1 + $0x4a0] sm:$0xff]  ;;  %v17710_v2 = vld [vmem:[%s23493_s1 + $0x458] sm:$0xff] }
  0x62   :  { %10338 = vmatpush.bf16.msrb.mxu0 %v17674_v54  ;;  %10318 = vmatmul.bf16.vlgmr.msra.gmra.mxu2 %v12249_v3  ;;  %v17713_v54 = vld [vmem:[%s23493_s1 + $0x470] sm:$0xff]  ;;  %v17726_v3 = vld [vmem:[%s23493_s1 + $0x4d8] sm:$0xff] }
  0x63   :  { %10366 = vmatpush.bf16.msrb.mxu2 %v17690_v55  ;;  %10304 = vmatmul.bf16.vlgmr.msra.gmra.mxu1 %v12245_v6  ;;  %v17729_v55 = vld [vmem:[%s23493_s1 + $0x4f0] sm:$0xff] }
  0x64   :  { %10352 = vmatpush.bf16.msrb.mxu1 %v17682_v4  ;;  %10332 = vmatmul.bf16.vlgmr.msra.gmra.mxu3 %v12253_v7  ;;  %v17701_v4 = vld [vmem:[%s23493_s1 + $0x410] sm:$0xff] }
  0x65   :  { %10380 = vmatpush.bf16.msrb.mxu3 %v17698_v5  ;;  %v17717_v5 = vld [vmem:[%s23493_s1 + $0x490] sm:$0xff] }
  0x66   :  { %10339 = vmatpush.bf16.msrb.mxu0 %v17673_v8  ;;  %v17709_v6 = vld [vmem:[%s23493_s1 + $0x450] sm:$0xff]  ;;  %v17700_v8 = vld [vmem:[%s23493_s1 + $0x408] sm:$0xff] }
  0x67   :  { %10367 = vmatpush.bf16.msrb.mxu2 %v17689_v9  ;;  %v17725_v7 = vld [vmem:[%s23493_s1 + $0x4d0] sm:$0xff]  ;;  %v17716_v9 = vld [vmem:[%s23493_s1 + $0x488] sm:$0xff] }
  0x68   :  { %10353 = vmatpush.bf16.msrb.mxu1 %v17681_v10  ;;  %v17708_v10 = vld [vmem:[%s23493_s1 + $0x448] sm:$0xff] }
  0x69   :  { %10381 = vmatpush.bf16.msrb.mxu3 %v17697_v11  ;;  %v17724_v11 = vld [vmem:[%s23493_s1 + $0x4c8] sm:$0xff] }
  0x6a   :  { %10340 = vmatpush.bf16.msrb.mxu0 %v17672_v12  ;;  %v17699_v12 = vld [vmem:[%s23493_s1 + $0x400] sm:$0xff] }
  0x6b   :  { %10368 = vmatpush.bf16.msrb.mxu2 %v17688_v13  ;;  %v17715_v13 = vld [vmem:[%s23493_s1 + $0x480] sm:$0xff] }
  0x6c   :  { %10354 = vmatpush.bf16.msrb.mxu1 %v17680_v14  ;;  %v17738_v14 = vld [vmem:[%s23493_s1 + $0x538] sm:$0xff] }
  0x6d   :  { %10382 = vmatpush.bf16.msrb.mxu3 %v17696_v15  ;;  %v17754_v15 = vld [vmem:[%s23493_s1 + $0x5b8] sm:$0xff] }
  0x6e   :  { %10341 = vmatpush.bf16.msrb.mxu0 %v17671_v16  ;;  %v12272_v16 = vld [vmem:[%s23494_s0 + $0x40] sm:$0xf] }
  0x6f   :  { %10369 = vmatpush.bf16.msrb.mxu2 %v17687_v17  ;;  %v17506_v17 = vld [vmem:[%s23494_s0 + $0x280] sm:$0xf0] }
  0x70   :  { %10355 = vmatpush.bf16.msrb.mxu1 %v17679_v18  ;;  %v12280_v18 = vld [vmem:[%s23494_s0 + $0x48] sm:$0xf] }
  0x71   :  { %10383 = vmatpush.bf16.msrb.mxu3 %v17695_v19  ;;  %v17507_v19 = vld [vmem:[%s23494_s0 + $0x288] sm:$0xf0] }
  0x72   :  { %10342 = vmatpush.bf16.msrb.mxu0 %v17670_v20  ;;  %v17707_v20 = vld [vmem:[%s23493_s1 + $0x440] sm:$0xff] }
  0x73   :  { %10370 = vmatpush.bf16.msrb.mxu2 %v17686_v21  ;;  %v17723_v21 = vld [vmem:[%s23493_s1 + $0x4c0] sm:$0xff] }
  0x74   :  { %10356 = vmatpush.bf16.msrb.mxu1 %v17678_v22  ;;  %v17434_v22 = vld [vmem:[%s23494_s0 + $0x44] sm:$0xf] }
  0x75   :  { %10384 = vmatpush.bf16.msrb.mxu3 %v17694_v23  ;;  %v12274_v23 = vld [vmem:[%s23494_s0 + $0x284] sm:$0xf0] }
  0x76   :  { %10343 = vmatpush.bf16.msrb.mxu0 %v17669_v24  ;;  %v17435_v24 = vld [vmem:[%s23494_s0 + $0x4c] sm:$0xf] }
  0x77   :  { %10371 = vmatpush.bf16.msrb.mxu2 %v17685_v25  ;;  %v12282_v25 = vld [vmem:[%s23494_s0 + $0x28c] sm:$0xf0] }
  0x78   :  { %10357 = vmatpush.bf16.msrb.mxu1 %v17677_v26  ;;  %v12273_v26 = vor.u32 %v17506_v17, %v12272_v16 }
  0x79   :  { %10385 = vmatpush.bf16.msrb.mxu3 %v17693_v27  ;;  %v12281_v27 = vor.u32 %v17507_v19, %v12280_v18  ;;  %v17778_v18 = vld [vmem:[%s23493_s1 + $0x678] sm:$0xff] }
  0x7a   :  { %10344 = vmatpush.bf16.msrb.mxu0 %v17668_v28  ;;  %v17746_v28 = vld [vmem:[%s23493_s1 + $0x578] sm:$0xff] }
  0x7b   :  { %10372 = vmatpush.bf16.msrb.mxu2 %v17684_v29  ;;  %v17762_v29 = vld [vmem:[%s23493_s1 + $0x5f8] sm:$0xff] }
  0x7c   :  { %10358 = vmatpush.bf16.msrb.mxu1 %v17676_v30  ;;  %v12277_v30 = vor.u32 %v17434_v22, %v12274_v23  ;;  %v17794_v19 = vld [vmem:[%s23493_s1 + $0x6f8] sm:$0xff]  ;;  %v17769_v23 = vld [vmem:[%s23493_s1 + $0x630] sm:$0xff] }
  0x7d   :  { %10386 = vmatpush.bf16.msrb.mxu3 %v17692_v31  ;;  %v12285_v31 = vor.u32 %v17435_v24, %v12282_v25  ;;  %v17785_v24 = vld [vmem:[%s23493_s1 + $0x6b0] sm:$0xff] }
  0x7e   :  { %10345 = vmatpush.bf16.msrb.mxu0 %v17667_v32  ;;  %v17737_v32 = vld [vmem:[%s23493_s1 + $0x530] sm:$0xff] }
  0x7f   :  { %10373 = vmatpush.bf16.msrb.mxu2 %v17683_v33  ;;  %v17753_v33 = vld [vmem:[%s23493_s1 + $0x5b0] sm:$0xff] }
  0x80   :  { %10359 = vmatpush.bf16.msrb.mxu1 %v17675_v40  ;;  %v17760_v40 = vld [vmem:[%s23493_s1 + $0x5e8] sm:$0xff]  ;;  %v17777_v25 = vld [vmem:[%s23493_s1 + $0x670] sm:$0xff] }
  0x81   :  { %10387 = vmatpush.bf16.msrb.mxu3 %v17691_v41  ;;  %10346 = vmatmul.bf16.vlgmr.msrb.gmra.mxu0 %v12257_v46  ;;  %v17735_v41 = vld [vmem:[%s23493_s1 + $0x520] sm:$0xff] }
  0x82   :  { %10394 = vmatpush.bf16.msra.mxu0 %v17706_v34  ;;  %10374 = vmatmul.bf16.vlgmr.msrb.gmra.mxu2 %v12265_v47  ;;  %v17745_v34 = vld [vmem:[%s23493_s1 + $0x570] sm:$0xff]  ;;  %v17759_v46 = vld [vmem:[%s23493_s1 + $0x5e0] sm:$0xff] }
  0x83   :  { %10422 = vmatpush.bf16.msra.mxu2 %v17722_v35  ;;  %10360 = vmatmul.bf16.vlgmr.msrb.gmra.mxu1 %v12261_v50  ;;  %v17761_v35 = vld [vmem:[%s23493_s1 + $0x5f0] sm:$0xff]  ;;  %v17750_v50 = vld [vmem:[%s23493_s1 + $0x598] sm:$0xff] }
  0x84   :  { %10408 = vmatpush.bf16.msra.mxu1 %v17714_v48  ;;  %10388 = vmatmul.bf16.vlgmr.msrb.gmra.mxu3 %v12269_v51  ;;  %v17742_v51 = vld [vmem:[%s23493_s1 + $0x558] sm:$0xff] }
  0x85   :  { %10436 = vmatpush.bf16.msra.mxu3 %v17730_v49  ;;  %v17734_v49 = vld [vmem:[%s23493_s1 + $0x518] sm:$0xff] }
  0x86   :  { %10395 = vmatpush.bf16.msra.mxu0 %v17705_v52  ;;  %v17758_v52 = vld [vmem:[%s23493_s1 + $0x5d8] sm:$0xff] }
  0x87   :  { %10423 = vmatpush.bf16.msra.mxu2 %v17721_v53 }
  0x88   :  { %10409 = vmatpush.bf16.msra.mxu1 %v17713_v54 }
  0x89   :  { %10437 = vmatpush.bf16.msra.mxu3 %v17729_v55  ;;  %v17733_v55 = vld [vmem:[%s23493_s1 + $0x510] sm:$0xff] }
  0x8a   :  { %10396 = vmatpush.bf16.msra.mxu0 %v17704_v56  ;;  %v17749_v56 = vld [vmem:[%s23493_s1 + $0x590] sm:$0xff] }
  0x8b   :  { %10424 = vmatpush.bf16.msra.mxu2 %v17720_v57 }
  0x8c   :  { %10410 = vmatpush.bf16.msra.mxu1 %v17712_v58 }
  0x8d   :  { %10438 = vmatpush.bf16.msra.mxu3 %v17728_v59  ;;  %v17741_v59 = vld [vmem:[%s23493_s1 + $0x550] sm:$0xff] }
  0x8e   :  { %10397 = vmatpush.bf16.msra.mxu0 %v17703_v60  ;;  %v17757_v60 = vld [vmem:[%s23493_s1 + $0x5d0] sm:$0xff] }
  0x8f   :  { %10425 = vmatpush.bf16.msra.mxu2 %v17719_v61  ;;  %v17732_v61 = vld [vmem:[%s23493_s1 + $0x508] sm:$0xff] }
  0x90   :  { %10411 = vmatpush.bf16.msra.mxu1 %v17711_v62  ;;  %v17748_v62 = vld [vmem:[%s23493_s1 + $0x588] sm:$0xff] }
  0x91   :  { %10439 = vmatpush.bf16.msra.mxu3 %v17727_v63  ;;  %v17740_v63 = vld [vmem:[%s23493_s1 + $0x548] sm:$0xff] }
  0x92   :  { %10398 = vmatpush.bf16.msra.mxu0 %v17702_v0  ;;  %v17756_v0 = vld [vmem:[%s23493_s1 + $0x5c8] sm:$0xff] }
  0x93   :  { %10426 = vmatpush.bf16.msra.mxu2 %v17718_v1  ;;  %v17731_v1 = vld [vmem:[%s23493_s1 + $0x500] sm:$0xff] }
  0x94   :  { %10412 = vmatpush.bf16.msra.mxu1 %v17710_v2  ;;  %v17747_v2 = vld [vmem:[%s23493_s1 + $0x580] sm:$0xff] }
  0x95   :  { %10440 = vmatpush.bf16.msra.mxu3 %v17726_v3  ;;  %v17770_v3 = vld [vmem:[%s23493_s1 + $0x638] sm:$0xff] }
  0x96   :  { %10399 = vmatpush.bf16.msra.mxu0 %v17701_v4  ;;  %v17786_v4 = vld [vmem:[%s23493_s1 + $0x6b8] sm:$0xff] }
  0x97   :  { %10427 = vmatpush.bf16.msra.mxu2 %v17717_v5  ;;  %v12288_v5 = vld [vmem:[%s23494_s0 + $0x50] sm:$0xf] }
  0x98   :  { %10413 = vmatpush.bf16.msra.mxu1 %v17709_v6  ;;  %v17508_v6 = vld [vmem:[%s23494_s0 + $0x290] sm:$0xf0] }
  0x99   :  { %10441 = vmatpush.bf16.msra.mxu3 %v17725_v7  ;;  %v12296_v7 = vld [vmem:[%s23494_s0 + $0x58] sm:$0xf]  ;;  %v12289_v16 = vor.u32 %v17508_v6, %v12288_v5  ;;  %v17439_v5 = vld [vmem:[%s23494_s0 + $0x6c] sm:$0xf]  ;;  %v12314_v6 = vld [vmem:[%s23494_s0 + $0x2ac] sm:$0xf0] }
  0x9a   :  { %10400 = vmatpush.bf16.msra.mxu0 %v17700_v8  ;;  %v17509_v8 = vld [vmem:[%s23494_s0 + $0x298] sm:$0xf0] }
  0x9b   :  { %10428 = vmatpush.bf16.msra.mxu2 %v17716_v9  ;;  %v17739_v9 = vld [vmem:[%s23493_s1 + $0x540] sm:$0xff]  ;;  %v12297_v17 = vor.u32 %v17509_v8, %v12296_v7 }
  0x9c   :  { %10414 = vmatpush.bf16.msra.mxu1 %v17708_v10  ;;  %v17755_v10 = vld [vmem:[%s23493_s1 + $0x5c0] sm:$0xff] }
  0x9d   :  { %10442 = vmatpush.bf16.msra.mxu3 %v17724_v11  ;;  %v17436_v11 = vld [vmem:[%s23494_s0 + $0x54] sm:$0xf] }
  0x9e   :  { %10401 = vmatpush.bf16.msra.mxu0 %v17699_v12  ;;  %v10179_v43 = vpop.f32.mrf.mxu0 }
  0x9f   :  { %10429 = vmatpush.bf16.msra.mxu2 %v17715_v13  ;;  %v10180_v44 = vadd.f32 %v18731_v38, %v10179_v43  ;;  %v12290_v13 = vld [vmem:[%s23494_s0 + $0x294] sm:$0xf0] }
  0xa0   :  { %10415 = vmatpush.bf16.msra.mxu1 %v17707_v20  ;;  %v10193_v47 = vpop.f32.mrf.mxu1 }
  0xa1   :  { %10443 = vmatpush.bf16.msra.mxu3 %v17723_v21  ;;  %10402 = vmatmul.bf16.vlgmr.msra.gmra.mxu0 %v12273_v26  ;;  %v10194_v48 = vadd.f32 %v10193_v47, %v10180_v44  ;;  %v12293_v21 = vor.u32 %v17436_v11, %v12290_v13  ;;  %v17793_v26 = vld [vmem:[%s23493_s1 + $0x6f0] sm:$0xff]  ;;  %v17826_v11 = vld [vmem:[%s23493_s1 + $0x7f8] sm:$0xff] }
  0xa2   :  { %10450 = vmatpush.bf16.msrb.mxu0 %v17738_v14  ;;  %10430 = vmatmul.bf16.vlgmr.msra.gmra.mxu2 %v12281_v27  ;;  %v17437_v14 = vld [vmem:[%s23494_s0 + $0x5c] sm:$0xf] }
  0xa3   :  { %10478 = vmatpush.bf16.msrb.mxu2 %v17754_v15  ;;  %10416 = vmatmul.bf16.vlgmr.msra.gmra.mxu1 %v12277_v30  ;;  %v12298_v15 = vld [vmem:[%s23494_s0 + $0x29c] sm:$0xf0] }
  0xa4   :  { %10464 = vmatpush.bf16.msrb.mxu1 %v17746_v28  ;;  %10444 = vmatmul.bf16.vlgmr.msra.gmra.mxu3 %v12285_v31  ;;  %v12301_v22 = vor.u32 %v17437_v14, %v12298_v15  ;;  %v17768_v28 = vld [vmem:[%s23493_s1 + $0x628] sm:$0xff]  ;;  %v12317_v14 = vor.u32 %v17439_v5, %v12314_v6  ;;  %v17842_v6 = vld [vmem:[%s23493_s1 + $0x878] sm:$0xff] }
  0xa5   :  { %10492 = vmatpush.bf16.msrb.mxu3 %v17762_v29  ;;  %v10207_v53 = vpop.f32.mrf.mxu2  ;;  %v17784_v29 = vld [vmem:[%s23493_s1 + $0x6a8] sm:$0xff] }
  0xa6   :  { %10451 = vmatpush.bf16.msrb.mxu0 %v17737_v32  ;;  %v10208_v54 = vadd.f32 %v10207_v53, %v10194_v48  ;;  %v19475_v12 = vpop.f32.mrf.mxu0  ;;  %v17776_v31 = vld [vmem:[%s23493_s1 + $0x668] sm:$0xff] }
  0xa7   :  { %10479 = vmatpush.bf16.msrb.mxu2 %v17753_v33  ;;  %v10221_v57 = vpop.f32.mrf.mxu3  ;;  %v17792_v32 = vld [vmem:[%s23493_s1 + $0x6e8] sm:$0xff] }
  0xa8   :  { %10465 = vmatpush.bf16.msrb.mxu1 %v17745_v34  ;;  %v19422_v58 = vadd.f32 %v10221_v57, %v10208_v54  ;;  %v19492_v20 = vpop.f32.mrf.mxu1  ;;  %v17764_v53 = vld [vmem:[%s23493_s1 + $0x608] sm:$0xff]  ;;  %v17763_v57 = vld [vmem:[%s23493_s1 + $0x600] sm:$0xff] }
  0xa9   :  { %10493 = vmatpush.bf16.msrb.mxu3 %v17761_v35  ;;  %v17767_v35 = vld [vmem:[%s23493_s1 + $0x620] sm:$0xff]  ;;  %v17780_v54 = vld [vmem:[%s23493_s1 + $0x688] sm:$0xff] }
  0xaa   :  { %10452 = vmatpush.bf16.msrb.mxu0 %v17736_v36  ;;  %v17783_v36 = vld [vmem:[%s23493_s1 + $0x6a0] sm:$0xff] }
  0xab   :  { %10480 = vmatpush.bf16.msrb.mxu2 %v17752_v37 }
  0xac   :  { %10466 = vmatpush.bf16.msrb.mxu1 %v17744_v39  ;;  %v17775_v39 = vld [vmem:[%s23493_s1 + $0x660] sm:$0xff] }
  0xad   :  { %10494 = vmatpush.bf16.msrb.mxu3 %v17760_v40  ;;  %v19506_v27 = vpop.f32.mrf.mxu2  ;;  %v17791_v40 = vld [vmem:[%s23493_s1 + $0x6e0] sm:$0xff] }
  0xae   :  { %10453 = vmatpush.bf16.msrb.mxu0 %v17735_v41  ;;  %v17766_v41 = vld [vmem:[%s23493_s1 + $0x618] sm:$0xff] }
  0xaf   :  { %10481 = vmatpush.bf16.msrb.mxu2 %v17751_v42  ;;  %v19514_v30 = vpop.f32.mrf.mxu3  ;;  %v17782_v42 = vld [vmem:[%s23493_s1 + $0x698] sm:$0xff] }
  0xb0   :  { %10467 = vmatpush.bf16.msrb.mxu1 %v17743_v45  ;;  %v17774_v45 = vld [vmem:[%s23493_s1 + $0x658] sm:$0xff] }
  0xb1   :  { %10495 = vmatpush.bf16.msrb.mxu3 %v17759_v46  ;;  %v17790_v46 = vld [vmem:[%s23493_s1 + $0x6d8] sm:$0xff] }
  0xb2   :  { %10454 = vmatpush.bf16.msrb.mxu0 %v17734_v49  ;;  %v17765_v49 = vld [vmem:[%s23493_s1 + $0x610] sm:$0xff] }
  0xb3   :  { %10482 = vmatpush.bf16.msrb.mxu2 %v17750_v50  ;;  %v17781_v50 = vld [vmem:[%s23493_s1 + $0x690] sm:$0xff] }
  0xb4   :  { %10468 = vmatpush.bf16.msrb.mxu1 %v17742_v51  ;;  %v17773_v51 = vld [vmem:[%s23493_s1 + $0x650] sm:$0xff] }
  0xb5   :  { %10496 = vmatpush.bf16.msrb.mxu3 %v17758_v52  ;;  %v17789_v52 = vld [vmem:[%s23493_s1 + $0x6d0] sm:$0xff] }
  0xb6   :  { %10455 = vmatpush.bf16.msrb.mxu0 %v17733_v55  ;;  %v17772_v55 = vld [vmem:[%s23493_s1 + $0x648] sm:$0xff] }
  0xb7   :  { %10483 = vmatpush.bf16.msrb.mxu2 %v17749_v56  ;;  %v17788_v56 = vld [vmem:[%s23493_s1 + $0x6c8] sm:$0xff] }
  0xb8   :  { %10469 = vmatpush.bf16.msrb.mxu1 %v17741_v59  ;;  %v17802_v59 = vld [vmem:[%s23493_s1 + $0x738] sm:$0xff] }
  0xb9   :  { %10497 = vmatpush.bf16.msrb.mxu3 %v17757_v60  ;;  %v17818_v60 = vld [vmem:[%s23493_s1 + $0x7b8] sm:$0xff] }
  0xba   :  { %10456 = vmatpush.bf16.msrb.mxu0 %v17732_v61  ;;  %v12304_v61 = vld [vmem:[%s23494_s0 + $0x60] sm:$0xf] }
  0xbb   :  { %10484 = vmatpush.bf16.msrb.mxu2 %v17748_v62  ;;  %v17510_v62 = vld [vmem:[%s23494_s0 + $0x2a0] sm:$0xf0] }
  0xbc   :  { %10470 = vmatpush.bf16.msrb.mxu1 %v17740_v63  ;;  %v12312_v63 = vld [vmem:[%s23494_s0 + $0x68] sm:$0xf]  ;;  %v12305_v7 = vor.u32 %v17510_v62, %v12304_v61  ;;  %v17803_v61 = vld [vmem:[%s23493_s1 + $0x740] sm:$0xff] }
  0xbd   :  { %10498 = vmatpush.bf16.msrb.mxu3 %v17756_v0  ;;  %v17511_v0 = vld [vmem:[%s23494_s0 + $0x2a8] sm:$0xf0]  ;;  %v17819_v62 = vld [vmem:[%s23493_s1 + $0x7c0] sm:$0xff] }
  0xbe   :  { %10457 = vmatpush.bf16.msrb.mxu0 %v17731_v1  ;;  %v10235_v33 = vpop.f32.mrf.mxu0  ;;  %v17771_v1 = vld [vmem:[%s23493_s1 + $0x640] sm:$0xff]  ;;  %v12313_v8 = vor.u32 %v17511_v0, %v12312_v63  ;;  %v17440_v63 = vld [vmem:[%s23494_s0 + $0x74] sm:$0xf]  ;;  %v12322_v0 = vld [vmem:[%s23494_s0 + $0x2b4] sm:$0xf0] }
  0xbf   :  { %10485 = vmatpush.bf16.msrb.mxu2 %v17747_v2  ;;  %v10236_v34 = vadd.f32 %v10235_v33, %v19422_v58  ;;  %v17779_v58 = vld [vmem:[%s23493_s1 + $0x680] sm:$0xff] }
  0xc0   :  { %10471 = vmatpush.bf16.msrb.mxu1 %v17739_v9  ;;  %v10249_v37 = vpop.f32.mrf.mxu1  ;;  %v17787_v2 = vld [vmem:[%s23493_s1 + $0x6c0] sm:$0xff] }
  0xc1   :  { %10499 = vmatpush.bf16.msrb.mxu3 %v17755_v10  ;;  %10458 = vmatmul.bf16.vlgmr.msrb.gmra.mxu0 %v12289_v16  ;;  %v10250_v38 = vadd.f32 %v10249_v37, %v10236_v34  ;;  %v17810_v10 = vld [vmem:[%s23493_s1 + $0x778] sm:$0xff]  ;;  %v17801_v16 = vld [vmem:[%s23493_s1 + $0x730] sm:$0xff] }
  0xc2   :  { %10506 = vmatpush.bf16.msra.mxu0 %v17770_v3  ;;  %10486 = vmatmul.bf16.vlgmr.msrb.gmra.mxu2 %v12297_v17  ;;  %v17438_v3 = vld [vmem:[%s23494_s0 + $0x64] sm:$0xf]  ;;  %v17817_v17 = vld [vmem:[%s23493_s1 + $0x7b0] sm:$0xff]  ;;  %v17798_v37 = vld [vmem:[%s23493_s1 + $0x718] sm:$0xff] }
  0xc3   :  { %10534 = vmatpush.bf16.msra.mxu2 %v17786_v4  ;;  %10472 = vmatmul.bf16.vlgmr.msrb.gmra.mxu1 %v12293_v21  ;;  %v12306_v4 = vld [vmem:[%s23494_s0 + $0x2a4] sm:$0xf0] }
  0xc4   :  { %10520 = vmatpush.bf16.msra.mxu1 %v17778_v18  ;;  %10500 = vmatmul.bf16.vlgmr.msrb.gmra.mxu3 %v12301_v22  ;;  %v12309_v13 = vor.u32 %v17438_v3, %v12306_v4  ;;  %v17809_v18 = vld [vmem:[%s23493_s1 + $0x770] sm:$0xff]  ;;  %v17800_v22 = vld [vmem:[%s23493_s1 + $0x728] sm:$0xff] }
  0xc5   :  { %10548 = vmatpush.bf16.msra.mxu3 %v17794_v19  ;;  %v10263_v43 = vpop.f32.mrf.mxu2  ;;  %v17825_v19 = vld [vmem:[%s23493_s1 + $0x7f0] sm:$0xff] }
  0xc6   :  { %10507 = vmatpush.bf16.msra.mxu0 %v17769_v23  ;;  %v10264_v44 = vadd.f32 %v10263_v43, %v10250_v38  ;;  %v19615_v9 = vpop.f32.mrf.mxu0  ;;  %v17816_v23 = vld [vmem:[%s23493_s1 + $0x7a8] sm:$0xff]  ;;  %v17814_v38 = vld [vmem:[%s23493_s1 + $0x798] sm:$0xff] }
  0xc7   :  { %10535 = vmatpush.bf16.msra.mxu2 %v17785_v24  ;;  %v10277_v47 = vpop.f32.mrf.mxu3 }
  0xc8   :  { %10521 = vmatpush.bf16.msra.mxu1 %v17777_v25  ;;  %v19547_v48 = vadd.f32 %v10277_v47, %v10264_v44  ;;  %v19623_v15 = vpop.f32.mrf.mxu1  ;;  %v17808_v25 = vld [vmem:[%s23493_s1 + $0x768] sm:$0xff]  ;;  %v17805_v47 = vld [vmem:[%s23493_s1 + $0x750] sm:$0xff] }
  0xc9   :  { %10549 = vmatpush.bf16.msra.mxu3 %v17793_v26  ;;  %v17824_v26 = vld [vmem:[%s23493_s1 + $0x7e8] sm:$0xff] }
  0xca   :  { %10508 = vmatpush.bf16.msra.mxu0 %v17768_v28 }
  0xcb   :  { %10536 = vmatpush.bf16.msra.mxu2 %v17784_v29 }
  0xcc   :  { %10522 = vmatpush.bf16.msra.mxu1 %v17776_v31  ;;  %v17799_v31 = vld [vmem:[%s23493_s1 + $0x720] sm:$0xff] }
  0xcd   :  { %10550 = vmatpush.bf16.msra.mxu3 %v17792_v32  ;;  %v19637_v21 = vpop.f32.mrf.mxu2  ;;  %v17815_v32 = vld [vmem:[%s23493_s1 + $0x7a0] sm:$0xff] }
  0xce   :  { %10509 = vmatpush.bf16.msra.mxu0 %v17767_v35  ;;  %v17807_v35 = vld [vmem:[%s23493_s1 + $0x760] sm:$0xff] }
  0xcf   :  { %10537 = vmatpush.bf16.msra.mxu2 %v17783_v36  ;;  %v19645_v24 = vpop.f32.mrf.mxu3  ;;  %v17823_v36 = vld [vmem:[%s23493_s1 + $0x7e0] sm:$0xff] }
  0xd0   :  { %10523 = vmatpush.bf16.msra.mxu1 %v17775_v39 }
  0xd1   :  { %10551 = vmatpush.bf16.msra.mxu3 %v17791_v40 }
  0xd2   :  { %10510 = vmatpush.bf16.msra.mxu0 %v17766_v41  ;;  %v17806_v41 = vld [vmem:[%s23493_s1 + $0x758] sm:$0xff] }
  0xd3   :  { %10538 = vmatpush.bf16.msra.mxu2 %v17782_v42  ;;  %v17822_v42 = vld [vmem:[%s23493_s1 + $0x7d8] sm:$0xff] }
  0xd4   :  { %10524 = vmatpush.bf16.msra.mxu1 %v17774_v45  ;;  %v17797_v45 = vld [vmem:[%s23493_s1 + $0x710] sm:$0xff] }
  0xd5   :  { %10552 = vmatpush.bf16.msra.mxu3 %v17790_v46  ;;  %v17813_v46 = vld [vmem:[%s23493_s1 + $0x790] sm:$0xff] }
  0xd6   :  { %10511 = vmatpush.bf16.msra.mxu0 %v17765_v49  ;;  %v17796_v49 = vld [vmem:[%s23493_s1 + $0x708] sm:$0xff] }
  0xd7   :  { %10539 = vmatpush.bf16.msra.mxu2 %v17781_v50  ;;  %v17812_v50 = vld [vmem:[%s23493_s1 + $0x788] sm:$0xff] }
  0xd8   :  { %10525 = vmatpush.bf16.msra.mxu1 %v17773_v51  ;;  %v17804_v51 = vld [vmem:[%s23493_s1 + $0x748] sm:$0xff] }
  0xd9   :  { %10553 = vmatpush.bf16.msra.mxu3 %v17789_v52  ;;  %v17820_v52 = vld [vmem:[%s23493_s1 + $0x7c8] sm:$0xff] }
  0xda   :  { %10512 = vmatpush.bf16.msra.mxu0 %v17764_v53  ;;  %v17795_v53 = vld [vmem:[%s23493_s1 + $0x700] sm:$0xff] }
  0xdb   :  { %10540 = vmatpush.bf16.msra.mxu2 %v17780_v54  ;;  %v17811_v54 = vld [vmem:[%s23493_s1 + $0x780] sm:$0xff] }
  0xdc   :  { %10526 = vmatpush.bf16.msra.mxu1 %v17772_v55  ;;  %v17834_v55 = vld [vmem:[%s23493_s1 + $0x838] sm:$0xff] }
  0xdd   :  { %10554 = vmatpush.bf16.msra.mxu3 %v17788_v56  ;;  %v17850_v56 = vld [vmem:[%s23493_s1 + $0x8b8] sm:$0xff] }
  0xde   :  { %10513 = vmatpush.bf16.msra.mxu0 %v17763_v57  ;;  %v10291_v28 = vpop.f32.mrf.mxu0  ;;  %v12320_v57 = vld [vmem:[%s23494_s0 + $0x70] sm:$0xf] }
  0xdf   :  { %10541 = vmatpush.bf16.msra.mxu2 %v17779_v58  ;;  %v10292_v29 = vadd.f32 %v10291_v28, %v19547_v48  ;;  %v17821_v48 = vld [vmem:[%s23493_s1 + $0x7d0] sm:$0xff] }
  0xe0   :  { %10527 = vmatpush.bf16.msra.mxu1 %v17771_v1  ;;  %v10305_v33 = vpop.f32.mrf.mxu1  ;;  %v17512_v58 = vld [vmem:[%s23494_s0 + $0x2b0] sm:$0xf0]  ;;  %v17441_v1 = vld [vmem:[%s23494_s0 + $0x7c] sm:$0xf] }
  0xe1   :  { %10555 = vmatpush.bf16.msra.mxu3 %v17787_v2  ;;  %10514 = vmatmul.bf16.vlgmr.msra.gmra.mxu0 %v12305_v7  ;;  %v10306_v34 = vadd.f32 %v10305_v33, %v10292_v29  ;;  %v12330_v2 = vld [vmem:[%s23494_s0 + $0x2bc] sm:$0xf0]  ;;  %v12321_v3 = vor.u32 %v17512_v58, %v12320_v57  ;;  %v17858_v7 = vld [vmem:[%s23493_s1 + $0x8f8] sm:$0xff]  ;;  %v17514_v58 = vld [vmem:[%s23494_s0 + $0x2c0] sm:$0xf0] }
  0xe2   :  { %10562 = vmatpush.bf16.msrb.mxu0 %v17802_v59  ;;  %10542 = vmatmul.bf16.vlgmr.msra.gmra.mxu2 %v12313_v8  ;;  %v12328_v59 = vld [vmem:[%s23494_s0 + $0x78] sm:$0xf]  ;;  %v12325_v8 = vor.u32 %v17440_v63, %v12322_v0  ;;  %v12336_v57 = vld [vmem:[%s23494_s0 + $0x80] sm:$0xf]  ;;  %v17442_v63 = vld [vmem:[%s23494_s0 + $0x84] sm:$0xf] }
  0xe3   :  { %10590 = vmatpush.bf16.msrb.mxu2 %v17818_v60  ;;  %10528 = vmatmul.bf16.vlgmr.msra.gmra.mxu1 %v12309_v13  ;;  %v17513_v60 = vld [vmem:[%s23494_s0 + $0x2b8] sm:$0xf0]  ;;  %v17833_v13 = vld [vmem:[%s23493_s1 + $0x830] sm:$0xff]  ;;  %v12338_v0 = vld [vmem:[%s23494_s0 + $0x2c4] sm:$0xf0] }
  0xe4   :  { %10576 = vmatpush.bf16.msrb.mxu1 %v17810_v10  ;;  %10556 = vmatmul.bf16.vlgmr.msra.gmra.mxu3 %v12317_v14  ;;  %v12329_v4 = vor.u32 %v17513_v60, %v12328_v59  ;;  %v12333_v10 = vor.u32 %v17441_v1, %v12330_v2  ;;  %v17849_v14 = vld [vmem:[%s23493_s1 + $0x8b0] sm:$0xff]  ;;  %v12344_v59 = vld [vmem:[%s23494_s0 + $0x88] sm:$0xf]  ;;  %v17515_v60 = vld [vmem:[%s23494_s0 + $0x2c8] sm:$0xf0] }
  0xe5   :  { %10604 = vmatpush.bf16.msrb.mxu3 %v17826_v11  ;;  %v10319_v39 = vpop.f32.mrf.mxu2  ;;  %v17443_v1 = vld [vmem:[%s23494_s0 + $0x8c] sm:$0xf]  ;;  %v12346_v2 = vld [vmem:[%s23494_s0 + $0x2cc] sm:$0xf0] }
  0xe6   :  { %10563 = vmatpush.bf16.msrb.mxu0 %v17801_v16  ;;  %v10320_v40 = vadd.f32 %v10319_v39, %v10306_v34  ;;  %v19746_v5 = vpop.f32.mrf.mxu0  ;;  %v17841_v16 = vld [vmem:[%s23493_s1 + $0x870] sm:$0xff] }
  0xe7   :  { %10591 = vmatpush.bf16.msrb.mxu2 %v17817_v17  ;;  %v10333_v43 = vpop.f32.mrf.mxu3  ;;  %v17857_v17 = vld [vmem:[%s23493_s1 + $0x8f0] sm:$0xff] }
  0xe8   :  { %10577 = vmatpush.bf16.msrb.mxu1 %v17809_v18  ;;  %v19678_v44 = vadd.f32 %v10333_v43, %v10320_v40  ;;  %v19754_v11 = vpop.f32.mrf.mxu1 }
  0xe9   :  { %10605 = vmatpush.bf16.msrb.mxu3 %v17825_v19  ;;  %v17832_v19 = vld [vmem:[%s23493_s1 + $0x828] sm:$0xff] }
  0xea   :  { %10564 = vmatpush.bf16.msrb.mxu0 %v17800_v22  ;;  %v17848_v22 = vld [vmem:[%s23493_s1 + $0x8a8] sm:$0xff] }
  0xeb   :  { %10592 = vmatpush.bf16.msrb.mxu2 %v17816_v23 }
  0xec   :  { %10578 = vmatpush.bf16.msrb.mxu1 %v17808_v25  ;;  %v17840_v25 = vld [vmem:[%s23493_s1 + $0x868] sm:$0xff] }
  0xed   :  { %10606 = vmatpush.bf16.msrb.mxu3 %v17824_v26  ;;  %v19768_v18 = vpop.f32.mrf.mxu2  ;;  %v17856_v26 = vld [vmem:[%s23493_s1 + $0x8e8] sm:$0xff] }
  0xee   :  { %10565 = vmatpush.bf16.msrb.mxu0 %v17799_v31  ;;  %v17831_v31 = vld [vmem:[%s23493_s1 + $0x820] sm:$0xff] }
  0xef   :  { %10593 = vmatpush.bf16.msrb.mxu2 %v17815_v32  ;;  %v19776_v23 = vpop.f32.mrf.mxu3  ;;  %v17847_v32 = vld [vmem:[%s23493_s1 + $0x8a0] sm:$0xff] }
  0xf0   :  { %10579 = vmatpush.bf16.msrb.mxu1 %v17807_v35  ;;  %v17839_v35 = vld [vmem:[%s23493_s1 + $0x860] sm:$0xff] }
  0xf1   :  { %10607 = vmatpush.bf16.msrb.mxu3 %v17823_v36  ;;  %v17855_v36 = vld [vmem:[%s23493_s1 + $0x8e0] sm:$0xff] }
  0xf2   :  { %10566 = vmatpush.bf16.msrb.mxu0 %v17798_v37  ;;  %v17830_v37 = vld [vmem:[%s23493_s1 + $0x818] sm:$0xff] }
  0xf3   :  { %10594 = vmatpush.bf16.msrb.mxu2 %v17814_v38  ;;  %v17846_v38 = vld [vmem:[%s23493_s1 + $0x898] sm:$0xff] }
  0xf4   :  { %10580 = vmatpush.bf16.msrb.mxu1 %v17806_v41  ;;  %v17838_v41 = vld [vmem:[%s23493_s1 + $0x858] sm:$0xff] }
  0xf5   :  { %10608 = vmatpush.bf16.msrb.mxu3 %v17822_v42  ;;  %v17854_v42 = vld [vmem:[%s23493_s1 + $0x8d8] sm:$0xff] }
  0xf6   :  { %10567 = vmatpush.bf16.msrb.mxu0 %v17797_v45  ;;  %v17829_v45 = vld [vmem:[%s23493_s1 + $0x810] sm:$0xff] }
  0xf7   :  { %10595 = vmatpush.bf16.msrb.mxu2 %v17813_v46  ;;  %v17845_v46 = vld [vmem:[%s23493_s1 + $0x890] sm:$0xff] }
  0xf8   :  { %10581 = vmatpush.bf16.msrb.mxu1 %v17805_v47  ;;  %v17837_v47 = vld [vmem:[%s23493_s1 + $0x850] sm:$0xff] }
  0xf9   :  { %10609 = vmatpush.bf16.msrb.mxu3 %v17821_v48  ;;  %v17853_v48 = vld [vmem:[%s23493_s1 + $0x8d0] sm:$0xff] }
  0xfa   :  { %10568 = vmatpush.bf16.msrb.mxu0 %v17796_v49  ;;  %v17828_v49 = vld [vmem:[%s23493_s1 + $0x808] sm:$0xff] }
  0xfb   :  { %10596 = vmatpush.bf16.msrb.mxu2 %v17812_v50  ;;  %v17844_v50 = vld [vmem:[%s23493_s1 + $0x888] sm:$0xff] }
  0xfc   :  { %10582 = vmatpush.bf16.msrb.mxu1 %v17804_v51  ;;  %v17836_v51 = vld [vmem:[%s23493_s1 + $0x848] sm:$0xff] }
  0xfd   :  { %10610 = vmatpush.bf16.msrb.mxu3 %v17820_v52  ;;  %v17852_v52 = vld [vmem:[%s23493_s1 + $0x8c8] sm:$0xff] }
  0xfe   :  { %10569 = vmatpush.bf16.msrb.mxu0 %v17795_v53  ;;  %v10347_v28 = vpop.f32.mrf.mxu0  ;;  %v17827_v53 = vld [vmem:[%s23493_s1 + $0x800] sm:$0xff] }
  0xff   :  { %10597 = vmatpush.bf16.msrb.mxu2 %v17811_v54  ;;  %v10348_v29 = vadd.f32 %v10347_v28, %v19678_v44  ;;  %v17843_v54 = vld [vmem:[%s23493_s1 + $0x880] sm:$0xff]  ;;  %v17880_v28 = vld [vmem:[%s23493_s1 + $0x9a8] sm:$0xff] }
 0x100   :  { %10583 = vmatpush.bf16.msrb.mxu1 %v17803_v61  ;;  %v10361_v33 = vpop.f32.mrf.mxu1  ;;  %v17835_v61 = vld [vmem:[%s23493_s1 + $0x840] sm:$0xff] }
 0x101   :  { %10611 = vmatpush.bf16.msrb.mxu3 %v17819_v62  ;;  %10570 = vmatmul.bf16.vlgmr.msrb.gmra.mxu0 %v12321_v3  ;;  %v10362_v34 = vadd.f32 %v10361_v33, %v10348_v29  ;;  %v17851_v62 = vld [vmem:[%s23493_s1 + $0x8c0] sm:$0xff]  ;;  %v12337_v3 = vor.u32 %v17514_v58, %v12336_v57 }
 0x102   :  { %10618 = vmatpush.bf16.msra.mxu0 %v17834_v55  ;;  %10598 = vmatmul.bf16.vlgmr.msrb.gmra.mxu2 %v12329_v4  ;;  %v17866_v55 = vld [vmem:[%s23493_s1 + $0x938] sm:$0xff]  ;;  %v12345_v4 = vor.u32 %v17515_v60, %v12344_v59  ;;  %v17859_v57 = vld [vmem:[%s23493_s1 + $0x900] sm:$0xff] }
 0x103   :  { %10646 = vmatpush.bf16.msra.mxu2 %v17850_v56  ;;  %10584 = vmatmul.bf16.vlgmr.msrb.gmra.mxu1 %v12325_v8  ;;  %v17882_v56 = vld [vmem:[%s23493_s1 + $0x9b8] sm:$0xff]  ;;  %v17875_v58 = vld [vmem:[%s23493_s1 + $0x980] sm:$0xff] }
 0x104   :  { %10632 = vmatpush.bf16.msra.mxu1 %v17842_v6  ;;  %10612 = vmatmul.bf16.vlgmr.msrb.gmra.mxu3 %v12333_v10  ;;  %v17890_v8 = vld [vmem:[%s23493_s1 + $0x9f8] sm:$0xff]  ;;  %v12341_v10 = vor.u32 %v17442_v63, %v12338_v0 }
 0x105   :  { %10660 = vmatpush.bf16.msra.mxu3 %v17858_v7  ;;  %v10375_v39 = vpop.f32.mrf.mxu2  ;;  %v17874_v7 = vld [vmem:[%s23493_s1 + $0x978] sm:$0xff] }
 0x106   :  { %10619 = vmatpush.bf16.msra.mxu0 %v17833_v13  ;;  %v10376_v40 = vadd.f32 %v10375_v39, %v10362_v34  ;;  %v19877_v6 = vpop.f32.mrf.mxu0  ;;  %v12349_v13 = vor.u32 %v17443_v1, %v12346_v2  ;;  %v17871_v39 = vld [vmem:[%s23493_s1 + $0x960] sm:$0xff]  ;;  %v17898_v59 = vld [vmem:[%s23493_s1 + $0xa38] sm:$0xff] }
 0x107   :  { %10647 = vmatpush.bf16.msra.mxu2 %v17849_v14  ;;  %v10389_v43 = vpop.f32.mrf.mxu3  ;;  %v17914_v60 = vld [vmem:[%s23493_s1 + $0xab8] sm:$0xff]  ;;  %v17867_v1 = vld [vmem:[%s23493_s1 + $0x940] sm:$0xff] }
 0x108   :  { %10633 = vmatpush.bf16.msra.mxu1 %v17841_v16  ;;  %v19809_v44 = vadd.f32 %v10389_v43, %v10376_v40  ;;  %v19885_v14 = vpop.f32.mrf.mxu1  ;;  %v17865_v16 = vld [vmem:[%s23493_s1 + $0x930] sm:$0xff]  ;;  %v17887_v40 = vld [vmem:[%s23493_s1 + $0x9e0] sm:$0xff]  ;;  %v12360_v63 = vld [vmem:[%s23494_s0 + $0x98] sm:$0xf] }
 0x109   :  { %10661 = vmatpush.bf16.msra.mxu3 %v17857_v17  ;;  %v17881_v17 = vld [vmem:[%s23493_s1 + $0x9b0] sm:$0xff]  ;;  %v17517_v0 = vld [vmem:[%s23494_s0 + $0x2d8] sm:$0xf0]  ;;  %v17883_v2 = vld [vmem:[%s23493_s1 + $0x9c0] sm:$0xff] }
 0x10a   :  { %10620 = vmatpush.bf16.msra.mxu0 %v17832_v19  ;;  %v17873_v19 = vld [vmem:[%s23493_s1 + $0x970] sm:$0xff] }
 0x10b   :  { %10648 = vmatpush.bf16.msra.mxu2 %v17848_v22  ;;  %v17889_v22 = vld [vmem:[%s23493_s1 + $0x9f0] sm:$0xff] }
 0x10c   :  { %10634 = vmatpush.bf16.msra.mxu1 %v17840_v25 }
 0x10d   :  { %10662 = vmatpush.bf16.msra.mxu3 %v17856_v26  ;;  %v19899_v25 = vpop.f32.mrf.mxu2  ;;  %v17864_v26 = vld [vmem:[%s23493_s1 + $0x928] sm:$0xff] }
 0x10e   :  { %10621 = vmatpush.bf16.msra.mxu0 %v17831_v31  ;;  %v17872_v31 = vld [vmem:[%s23493_s1 + $0x968] sm:$0xff] }
 0x10f   :  { %10649 = vmatpush.bf16.msra.mxu2 %v17847_v32  ;;  %v19907_v29 = vpop.f32.mrf.mxu3  ;;  %v17888_v32 = vld [vmem:[%s23493_s1 + $0x9e8] sm:$0xff] }
 0x110   :  { %10635 = vmatpush.bf16.msra.mxu1 %v17839_v35  ;;  %v17863_v35 = vld [vmem:[%s23493_s1 + $0x920] sm:$0xff] }
 0x111   :  { %10663 = vmatpush.bf16.msra.mxu3 %v17855_v36  ;;  %v17879_v36 = vld [vmem:[%s23493_s1 + $0x9a0] sm:$0xff] }
 0x112   :  { %10622 = vmatpush.bf16.msra.mxu0 %v17830_v37 }
 0x113   :  { %10650 = vmatpush.bf16.msra.mxu2 %v17846_v38 }
 0x114   :  { %10636 = vmatpush.bf16.msra.mxu1 %v17838_v41  ;;  %v17862_v41 = vld [vmem:[%s23493_s1 + $0x918] sm:$0xff] }
 0x115   :  { %10664 = vmatpush.bf16.msra.mxu3 %v17854_v42  ;;  %v17878_v42 = vld [vmem:[%s23493_s1 + $0x998] sm:$0xff] }
 0x116   :  { %10623 = vmatpush.bf16.msra.mxu0 %v17829_v45  ;;  %v17870_v45 = vld [vmem:[%s23493_s1 + $0x958] sm:$0xff] }
 0x117   :  { %10651 = vmatpush.bf16.msra.mxu2 %v17845_v46  ;;  %v17886_v46 = vld [vmem:[%s23493_s1 + $0x9d8] sm:$0xff] }
 0x118   :  { %10637 = vmatpush.bf16.msra.mxu1 %v17837_v47 }
 0x119   :  { %10665 = vmatpush.bf16.msra.mxu3 %v17853_v48 }
 0x11a   :  { %10624 = vmatpush.bf16.msra.mxu0 %v17828_v49  ;;  %v17861_v49 = vld [vmem:[%s23493_s1 + $0x910] sm:$0xff] }
 0x11b   :  { %10652 = vmatpush.bf16.msra.mxu2 %v17844_v50  ;;  %v17877_v50 = vld [vmem:[%s23493_s1 + $0x990] sm:$0xff] }
 0x11c   :  { %10638 = vmatpush.bf16.msra.mxu1 %v17836_v51  ;;  %v17869_v51 = vld [vmem:[%s23493_s1 + $0x950] sm:$0xff] }
 0x11d   :  { %10666 = vmatpush.bf16.msra.mxu3 %v17852_v52  ;;  %v17885_v52 = vld [vmem:[%s23493_s1 + $0x9d0] sm:$0xff] }
 0x11e   :  { %10625 = vmatpush.bf16.msra.mxu0 %v17827_v53  ;;  %v10403_v33 = vpop.f32.mrf.mxu0  ;;  %v17860_v53 = vld [vmem:[%s23493_s1 + $0x908] sm:$0xff] }
 0x11f   :  { %10653 = vmatpush.bf16.msra.mxu2 %v17843_v54  ;;  %v10404_v34 = vadd.f32 %v10403_v33, %v19809_v44  ;;  %v17876_v54 = vld [vmem:[%s23493_s1 + $0x988] sm:$0xff]  ;;  %v17905_v33 = vld [vmem:[%s23493_s1 + $0xa70] sm:$0xff] }
 0x120   :  { %10639 = vmatpush.bf16.msra.mxu1 %v17835_v61  ;;  %v10417_v37 = vpop.f32.mrf.mxu1  ;;  %v12352_v61 = vld [vmem:[%s23494_s0 + $0x90] sm:$0xf] }
 0x121   :  { %10667 = vmatpush.bf16.msra.mxu3 %v17851_v62  ;;  %10626 = vmatmul.bf16.vlgmr.msra.gmra.mxu0 %v12337_v3  ;;  %v10418_v38 = vadd.f32 %v10417_v37, %v10404_v34  ;;  %v17516_v62 = vld [vmem:[%s23494_s0 + $0x2d0] sm:$0xf0]  ;;  %v17912_v37 = vld [vmem:[%s23493_s1 + $0xaa8] sm:$0xff] }
 0x122   :  { %10674 = vmatpush.bf16.msrb.mxu0 %v17866_v55  ;;  %10654 = vmatmul.bf16.vlgmr.msra.gmra.mxu2 %v12345_v4  ;;  %v17868_v55 = vld [vmem:[%s23493_s1 + $0x948] sm:$0xff]  ;;  %v17444_v3 = vld [vmem:[%s23494_s0 + $0x94] sm:$0xf]  ;;  %v12354_v4 = vld [vmem:[%s23494_s0 + $0x2d4] sm:$0xf0] }
 0x123   :  { %10702 = vmatpush.bf16.msrb.mxu2 %v17882_v56  ;;  %10640 = vmatmul.bf16.vlgmr.msra.gmra.mxu1 %v12341_v10  ;;  %v17884_v56 = vld [vmem:[%s23493_s1 + $0x9c8] sm:$0xff]  ;;  %v12353_v10 = vor.u32 %v17516_v62, %v12352_v61  ;;  %v17921_v34 = vld [vmem:[%s23493_s1 + $0xaf0] sm:$0xff] }
 0x124   :  { %10688 = vmatpush.bf16.msrb.mxu1 %v17874_v7  ;;  %10668 = vmatmul.bf16.vlgmr.msra.gmra.mxu3 %v12349_v13  ;;  %v17445_v7 = vld [vmem:[%s23494_s0 + $0x9c] sm:$0xf]  ;;  %v12361_v13 = vor.u32 %v17517_v0, %v12360_v63  ;;  %v17892_v61 = vld [vmem:[%s23493_s1 + $0xa08] sm:$0xff] }
 0x125   :  { %10716 = vmatpush.bf16.msrb.mxu3 %v17890_v8  ;;  %v10431_v43 = vpop.f32.mrf.mxu2  ;;  %v12362_v8 = vld [vmem:[%s23494_s0 + $0x2dc] sm:$0xf0]  ;;  %v17908_v62 = vld [vmem:[%s23493_s1 + $0xa88] sm:$0xff] }
 0x126   :  { %10675 = vmatpush.bf16.msrb.mxu0 %v17865_v16  ;;  %v10432_v44 = vadd.f32 %v10431_v43, %v10418_v38  ;;  %v20008_v16 = vpop.f32.mrf.mxu0  ;;  %v17895_v43 = vld [vmem:[%s23493_s1 + $0xa20] sm:$0xff]  ;;  %v17900_v63 = vld [vmem:[%s23493_s1 + $0xa48] sm:$0xff] }
 0x127   :  { %10703 = vmatpush.bf16.msrb.mxu2 %v17881_v17  ;;  %v10445_v47 = vpop.f32.mrf.mxu3  ;;  %v17906_v17 = vld [vmem:[%s23493_s1 + $0xa78] sm:$0xff]  ;;  %v17916_v0 = vld [vmem:[%s23493_s1 + $0xac8] sm:$0xff] }
 0x128   :  { %10689 = vmatpush.bf16.msrb.mxu1 %v17873_v19  ;;  %v19940_v48 = vadd.f32 %v10445_v47, %v10432_v44  ;;  %v17922_v19 = vld [vmem:[%s23493_s1 + $0xaf8] sm:$0xff]  ;;  %v17911_v44 = vld [vmem:[%s23493_s1 + $0xaa0] sm:$0xff] }
 0x129   :  { %10717 = vmatpush.bf16.msrb.mxu3 %v17889_v22  ;;  %v12357_v22 = vor.u32 %v17444_v3, %v12354_v4  ;;  %v17903_v47 = vld [vmem:[%s23493_s1 + $0xa60] sm:$0xff]  ;;  %v17930_v3 = vld [vmem:[%s23493_s1 + $0xb38] sm:$0xff] }
 0x12a   :  { %10676 = vmatpush.bf16.msrb.mxu0 %v17864_v26  ;;  %v12365_v26 = vor.u32 %v17445_v7, %v12362_v8  ;;  %v17946_v4 = vld [vmem:[%s23493_s1 + $0xbb8] sm:$0xff]  ;;  %v12368_v7 = vld [vmem:[%s23494_s0 + $0xa0] sm:$0xf]  ;;  %v17518_v8 = vld [vmem:[%s23494_s0 + $0x2e0] sm:$0xf0] }
 0x12b   :  { %10704 = vmatpush.bf16.msrb.mxu2 %v17880_v28  ;;  %v20016_v28 = vpop.f32.mrf.mxu1 }
 0x12c   :  { %10690 = vmatpush.bf16.msrb.mxu1 %v17872_v31  ;;  %v17897_v31 = vld [vmem:[%s23493_s1 + $0xa30] sm:$0xff] }
 0x12d   :  { %10718 = vmatpush.bf16.msrb.mxu3 %v17888_v32  ;;  %v17913_v32 = vld [vmem:[%s23493_s1 + $0xab0] sm:$0xff] }
 0x12e   :  { %10677 = vmatpush.bf16.msrb.mxu0 %v17863_v35  ;;  %v20030_v35 = vpop.f32.mrf.mxu2 }
 0x12f   :  { %10705 = vmatpush.bf16.msrb.mxu2 %v17879_v36  ;;  %v17896_v36 = vld [vmem:[%s23493_s1 + $0xa28] sm:$0xff]  ;;  %v20038_v38 = vpop.f32.mrf.mxu3 }
 0x130   :  { %10691 = vmatpush.bf16.msrb.mxu1 %v17871_v39  ;;  %v17904_v39 = vld [vmem:[%s23493_s1 + $0xa68] sm:$0xff] }
 0x131   :  { %10719 = vmatpush.bf16.msrb.mxu3 %v17887_v40  ;;  %v17920_v40 = vld [vmem:[%s23493_s1 + $0xae8] sm:$0xff] }
 0x132   :  { %10678 = vmatpush.bf16.msrb.mxu0 %v17862_v41 }
 0x133   :  { %10706 = vmatpush.bf16.msrb.mxu2 %v17878_v42 }
 0x134   :  { %10692 = vmatpush.bf16.msrb.mxu1 %v17870_v45 }
 0x135   :  { %10720 = vmatpush.bf16.msrb.mxu3 %v17886_v46 }
 0x136   :  { %10679 = vmatpush.bf16.msrb.mxu0 %v17861_v49  ;;  %v17894_v49 = vld [vmem:[%s23493_s1 + $0xa18] sm:$0xff] }
 0x137   :  { %10707 = vmatpush.bf16.msrb.mxu2 %v17877_v50  ;;  %v17910_v50 = vld [vmem:[%s23493_s1 + $0xa98] sm:$0xff] }
 0x138   :  { %10693 = vmatpush.bf16.msrb.mxu1 %v17869_v51 }
 0x139   :  { %10721 = vmatpush.bf16.msrb.mxu3 %v17885_v52 }
 0x13a   :  { %10680 = vmatpush.bf16.msrb.mxu0 %v17860_v53  ;;  %v17902_v53 = vld [vmem:[%s23493_s1 + $0xa58] sm:$0xff] }
 0x13b   :  { %10708 = vmatpush.bf16.msrb.mxu2 %v17876_v54  ;;  %v17918_v54 = vld [vmem:[%s23493_s1 + $0xad8] sm:$0xff] }
 0x13c   :  { %10694 = vmatpush.bf16.msrb.mxu1 %v17868_v55 }
 0x13d   :  { %10722 = vmatpush.bf16.msrb.mxu3 %v17884_v56 }
 0x13e   :  { %10681 = vmatpush.bf16.msrb.mxu0 %v17859_v57  ;;  %v10459_v41 = vpop.f32.mrf.mxu0  ;;  %v17893_v57 = vld [vmem:[%s23493_s1 + $0xa10] sm:$0xff] }
 0x13f   :  { %10709 = vmatpush.bf16.msrb.mxu2 %v17875_v58  ;;  %v10460_v42 = vadd.f32 %v10459_v41, %v19940_v48  ;;  %v17919_v48 = vld [vmem:[%s23493_s1 + $0xae0] sm:$0xff]  ;;  %v17909_v58 = vld [vmem:[%s23493_s1 + $0xa90] sm:$0xff] }
 0x140   :  { %10695 = vmatpush.bf16.msrb.mxu1 %v17867_v1  ;;  %v10473_v45 = vpop.f32.mrf.mxu1  ;;  %v17891_v1 = vld [vmem:[%s23493_s1 + $0xa00] sm:$0xff] }
 0x141   :  { %10723 = vmatpush.bf16.msrb.mxu3 %v17883_v2  ;;  %10682 = vmatmul.bf16.vlgmr.msrb.gmra.mxu0 %v12353_v10  ;;  %v10474_v46 = vadd.f32 %v10473_v45, %v10460_v42  ;;  %v17907_v2 = vld [vmem:[%s23493_s1 + $0xa80] sm:$0xff]  ;;  %v12376_v10 = vld [vmem:[%s23494_s0 + $0xa8] sm:$0xf]  ;;  %v17937_v45 = vld [vmem:[%s23493_s1 + $0xb70] sm:$0xff] }
 0x142   :  { %10730 = vmatpush.bf16.msra.mxu0 %v17898_v59  ;;  %10710 = vmatmul.bf16.vlgmr.msrb.gmra.mxu2 %v12361_v13  ;;  %v17901_v59 = vld [vmem:[%s23493_s1 + $0xa50] sm:$0xff]  ;;  %v17519_v13 = vld [vmem:[%s23494_s0 + $0x2e8] sm:$0xf0] }
 0x143   :  { %10758 = vmatpush.bf16.msra.mxu2 %v17914_v60  ;;  %10696 = vmatmul.bf16.vlgmr.msrb.gmra.mxu1 %v12357_v22  ;;  %v17917_v60 = vld [vmem:[%s23493_s1 + $0xad0] sm:$0xff]  ;;  %v17446_v22 = vld [vmem:[%s23494_s0 + $0xa4] sm:$0xf] }
 0x144   :  { %10744 = vmatpush.bf16.msra.mxu1 %v17906_v17  ;;  %10724 = vmatmul.bf16.vlgmr.msrb.gmra.mxu3 %v12365_v26  ;;  %v17899_v17 = vld [vmem:[%s23493_s1 + $0xa40] sm:$0xff]  ;;  %v12370_v26 = vld [vmem:[%s23494_s0 + $0x2e4] sm:$0xf0] }
 0x145   :  { %10772 = vmatpush.bf16.msra.mxu3 %v17922_v19  ;;  %v10487_v51 = vpop.f32.mrf.mxu2  ;;  %v17915_v19 = vld [vmem:[%s23493_s1 + $0xac0] sm:$0xff] }
 0x146   :  { %10731 = vmatpush.bf16.msra.mxu0 %v17897_v31  ;;  %v10488_v52 = vadd.f32 %v10487_v51, %v10474_v46  ;;  %v17447_v31 = vld [vmem:[%s23494_s0 + $0xac] sm:$0xf]  ;;  %v17953_v46 = vld [vmem:[%s23493_s1 + $0xbf0] sm:$0xff] }
 0x147   :  { %10759 = vmatpush.bf16.msra.mxu2 %v17913_v32  ;;  %v10501_v55 = vpop.f32.mrf.mxu3  ;;  %v12378_v32 = vld [vmem:[%s23494_s0 + $0x2ec] sm:$0xf0]  ;;  %v17936_v51 = vld [vmem:[%s23493_s1 + $0xb68] sm:$0xff] }
 0x148   :  { %10745 = vmatpush.bf16.msra.mxu1 %v17905_v33  ;;  %v20071_v56 = vadd.f32 %v10501_v55, %v10488_v52  ;;  %v12369_v33 = vor.u32 %v17518_v8, %v12368_v7  ;;  %v12381_v41 = vor.u32 %v17447_v31, %v12378_v32  ;;  %v20147_v42 = vpop.f32.mrf.mxu1  ;;  %v17952_v52 = vld [vmem:[%s23493_s1 + $0xbe8] sm:$0xff]  ;;  %v17927_v55 = vld [vmem:[%s23493_s1 + $0xb20] sm:$0xff]  ;;  %v17925_v7 = vld [vmem:[%s23493_s1 + $0xb10] sm:$0xff] }
 0x149   :  { %10773 = vmatpush.bf16.msra.mxu3 %v17921_v34  ;;  %v12377_v34 = vor.u32 %v17519_v13, %v12376_v10  ;;  %v17941_v8 = vld [vmem:[%s23493_s1 + $0xb90] sm:$0xff]  ;;  %v17923_v31 = vld [vmem:[%s23493_s1 + $0xb00] sm:$0xff] }
 0x14a   :  { %10732 = vmatpush.bf16.msra.mxu0 %v17896_v36  ;;  %v20139_v36 = vpop.f32.mrf.mxu0  ;;  %v17933_v10 = vld [vmem:[%s23493_s1 + $0xb50] sm:$0xff]  ;;  %v17939_v32 = vld [vmem:[%s23493_s1 + $0xb80] sm:$0xff] }
 0x14b   :  { %10760 = vmatpush.bf16.msra.mxu2 %v17912_v37  ;;  %v17938_v37 = vld [vmem:[%s23493_s1 + $0xb78] sm:$0xff]  ;;  %v17949_v13 = vld [vmem:[%s23493_s1 + $0xbd0] sm:$0xff] }
 0x14c   :  { %10746 = vmatpush.bf16.msra.mxu1 %v17904_v39  ;;  %v17954_v39 = vld [vmem:[%s23493_s1 + $0xbf8] sm:$0xff] }
 0x14d   :  { %10774 = vmatpush.bf16.msra.mxu3 %v17920_v40  ;;  %v12373_v40 = vor.u32 %v17446_v22, %v12370_v26  ;;  %v17932_v22 = vld [vmem:[%s23493_s1 + $0xb48] sm:$0xff] }
 0x14e   :  { %10733 = vmatpush.bf16.msra.mxu0 %v17895_v43  ;;  %v17929_v43 = vld [vmem:[%s23493_s1 + $0xb30] sm:$0xff]  ;;  %v17948_v26 = vld [vmem:[%s23493_s1 + $0xbc8] sm:$0xff] }
 0x14f   :  { %10761 = vmatpush.bf16.msra.mxu2 %v17911_v44  ;;  %v17945_v44 = vld [vmem:[%s23493_s1 + $0xbb0] sm:$0xff] }
 0x150   :  { %10747 = vmatpush.bf16.msra.mxu1 %v17903_v47  ;;  %v20161_v47 = vpop.f32.mrf.mxu2 }
 0x151   :  { %10775 = vmatpush.bf16.msra.mxu3 %v17919_v48  ;;  %v17928_v48 = vld [vmem:[%s23493_s1 + $0xb28] sm:$0xff] }
 0x152   :  { %10734 = vmatpush.bf16.msra.mxu0 %v17894_v49  ;;  %v17944_v49 = vld [vmem:[%s23493_s1 + $0xba8] sm:$0xff] }
 0x153   :  { %10762 = vmatpush.bf16.msra.mxu2 %v17910_v50  ;;  %v20169_v50 = vpop.f32.mrf.mxu3 }
 0x154   :  { %10748 = vmatpush.bf16.msra.mxu1 %v17902_v53 }
 0x155   :  { %10776 = vmatpush.bf16.msra.mxu3 %v17918_v54 }
 0x156   :  { %10735 = vmatpush.bf16.msra.mxu0 %v17893_v57  ;;  %v17943_v57 = vld [vmem:[%s23493_s1 + $0xba0] sm:$0xff] }
 0x157   :  { %10763 = vmatpush.bf16.msra.mxu2 %v17909_v58 }
 0x158   :  { %10749 = vmatpush.bf16.msra.mxu1 %v17901_v59 }
 0x159   :  { %10777 = vmatpush.bf16.msra.mxu3 %v17917_v60  ;;  %v17935_v60 = vld [vmem:[%s23493_s1 + $0xb60] sm:$0xff] }
 0x15a   :  { %10736 = vmatpush.bf16.msra.mxu0 %v17892_v61  ;;  %v17926_v61 = vld [vmem:[%s23493_s1 + $0xb18] sm:$0xff] }
 0x15b   :  { %10764 = vmatpush.bf16.msra.mxu2 %v17908_v62  ;;  %v17942_v62 = vld [vmem:[%s23493_s1 + $0xb98] sm:$0xff] }
 0x15c   :  { %10750 = vmatpush.bf16.msra.mxu1 %v17900_v63 }
 0x15d   :  { %10778 = vmatpush.bf16.msra.mxu3 %v17916_v0 }
 0x15e   :  { %10737 = vmatpush.bf16.msra.mxu0 %v17891_v1  ;;  %v10515_v53 = vpop.f32.mrf.mxu0  ;;  %v17934_v1 = vld [vmem:[%s23493_s1 + $0xb58] sm:$0xff] }
 0x15f   :  { %10765 = vmatpush.bf16.msra.mxu2 %v17907_v2  ;;  %v10516_v54 = vadd.f32 %v10515_v53, %v20071_v56  ;;  %v17951_v56 = vld [vmem:[%s23493_s1 + $0xbe0] sm:$0xff]  ;;  %v17950_v2 = vld [vmem:[%s23493_s1 + $0xbd8] sm:$0xff] }
 0x160   :  { %10751 = vmatpush.bf16.msra.mxu1 %v17899_v17  ;;  %v10529_v58 = vpop.f32.mrf.mxu1  ;;  %v17924_v17 = vld [vmem:[%s23493_s1 + $0xb08] sm:$0xff] }
 0x161   :  { %10779 = vmatpush.bf16.msra.mxu3 %v17915_v19  ;;  %10738 = vmatmul.bf16.vlgmr.msra.gmra.mxu0 %v12369_v33  ;;  %v10530_v59 = vadd.f32 %v10529_v58, %v10516_v54  ;;  %v17940_v19 = vld [vmem:[%s23493_s1 + $0xb88] sm:$0xff]  ;;  %v17962_v33 = vld [vmem:[%s23493_s1 + $0xc38] sm:$0xff] }
 0x162   :  { %10786 = vmatpush.bf16.msrb.mxu0 %v17930_v3  ;;  %10766 = vmatmul.bf16.vlgmr.msra.gmra.mxu2 %v12377_v34  ;;  %v17978_v34 = vld [vmem:[%s23493_s1 + $0xcb8] sm:$0xff] }
 0x163   :  { %10814 = vmatpush.bf16.msrb.mxu2 %v17946_v4  ;;  %10752 = vmatmul.bf16.vlgmr.msra.gmra.mxu1 %v12373_v40  ;;  %v12392_v40 = vld [vmem:[%s23494_s0 + $0xb8] sm:$0xf] }
 0x164   :  { %10800 = vmatpush.bf16.msrb.mxu1 %v17938_v37  ;;  %10780 = vmatmul.bf16.vlgmr.msra.gmra.mxu3 %v12381_v41  ;;  %v12384_v37 = vld [vmem:[%s23494_s0 + $0xb0] sm:$0xf]  ;;  %v17521_v41 = vld [vmem:[%s23494_s0 + $0x2f8] sm:$0xf0] }
 0x165   :  { %10828 = vmatpush.bf16.msrb.mxu3 %v17954_v39  ;;  %v10543_v63 = vpop.f32.mrf.mxu2  ;;  %v17520_v39 = vld [vmem:[%s23494_s0 + $0x2f0] sm:$0xf0]  ;;  %v17970_v54 = vld [vmem:[%s23493_s1 + $0xc78] sm:$0xff] }
 0x166   :  { %10787 = vmatpush.bf16.msrb.mxu0 %v17929_v43  ;;  %v10544_v0 = vadd.f32 %v10543_v63, %v10530_v59  ;;  %v17931_v43 = vld [vmem:[%s23493_s1 + $0xb40] sm:$0xff]  ;;  %v20270_v53 = vpop.f32.mrf.mxu0 }
 0x167   :  { %10815 = vmatpush.bf16.msrb.mxu2 %v17945_v44  ;;  %v10557_v3 = vpop.f32.mrf.mxu3  ;;  %v17947_v44 = vld [vmem:[%s23493_s1 + $0xbc0] sm:$0xff] }
 0x168   :  { %10801 = vmatpush.bf16.msrb.mxu1 %v17937_v45  ;;  %v20202_v4 = vadd.f32 %v10557_v3, %v10544_v0  ;;  %v17448_v45 = vld [vmem:[%s23494_s0 + $0xb4] sm:$0xf]  ;;  %v20278_v59 = vpop.f32.mrf.mxu1  ;;  %v17960_v0 = vld [vmem:[%s23493_s1 + $0xc28] sm:$0xff] }
 0x169   :  { %10829 = vmatpush.bf16.msrb.mxu3 %v17953_v46  ;;  %v12386_v46 = vld [vmem:[%s23494_s0 + $0x2f4] sm:$0xf0]  ;;  %v17968_v3 = vld [vmem:[%s23493_s1 + $0xc68] sm:$0xff] }
 0x16a   :  { %10788 = vmatpush.bf16.msrb.mxu0 %v17928_v48  ;;  %v17449_v48 = vld [vmem:[%s23494_s0 + $0xbc] sm:$0xf] }
 0x16b   :  { %10816 = vmatpush.bf16.msrb.mxu2 %v17944_v49  ;;  %v12394_v49 = vld [vmem:[%s23494_s0 + $0x2fc] sm:$0xf0] }
 0x16c   :  { %10802 = vmatpush.bf16.msrb.mxu1 %v17936_v51  ;;  %v12385_v51 = vor.u32 %v17520_v39, %v12384_v37  ;;  %v12397_v58 = vor.u32 %v17449_v48, %v12394_v49  ;;  %v17966_v37 = vld [vmem:[%s23493_s1 + $0xc58] sm:$0xff]  ;;  %v17956_v48 = vld [vmem:[%s23493_s1 + $0xc08] sm:$0xff] }
 0x16d   :  { %10830 = vmatpush.bf16.msrb.mxu3 %v17952_v52  ;;  %v12393_v52 = vor.u32 %v17521_v41, %v12392_v40  ;;  %v20292_v63 = vpop.f32.mrf.mxu2  ;;  %v17982_v39 = vld [vmem:[%s23493_s1 + $0xcd8] sm:$0xff]  ;;  %v17972_v49 = vld [vmem:[%s23493_s1 + $0xc88] sm:$0xff] }
 0x16e   :  { %10789 = vmatpush.bf16.msrb.mxu0 %v17927_v55  ;;  %v17986_v55 = vld [vmem:[%s23493_s1 + $0xcf8] sm:$0xff] }
 0x16f   :  { %10817 = vmatpush.bf16.msrb.mxu2 %v17943_v57  ;;  %v12389_v57 = vor.u32 %v17448_v45, %v12386_v46  ;;  %v17965_v45 = vld [vmem:[%s23493_s1 + $0xc50] sm:$0xff] }
 0x170   :  { %10803 = vmatpush.bf16.msrb.mxu1 %v17935_v60  ;;  %v17961_v60 = vld [vmem:[%s23493_s1 + $0xc30] sm:$0xff] }
 0x171   :  { %10831 = vmatpush.bf16.msrb.mxu3 %v17951_v56  ;;  %v17977_v56 = vld [vmem:[%s23493_s1 + $0xcb0] sm:$0xff] }
 0x172   :  { %10790 = vmatpush.bf16.msrb.mxu0 %v17926_v61  ;;  %v17969_v61 = vld [vmem:[%s23493_s1 + $0xc70] sm:$0xff] }
 0x173   :  { %10818 = vmatpush.bf16.msrb.mxu2 %v17942_v62  ;;  %v17985_v62 = vld [vmem:[%s23493_s1 + $0xcf0] sm:$0xff] }
 0x174   :  { %10804 = vmatpush.bf16.msrb.mxu1 %v17934_v1  ;;  %v17976_v1 = vld [vmem:[%s23493_s1 + $0xca8] sm:$0xff]  ;;  %v17981_v46 = vld [vmem:[%s23493_s1 + $0xcd0] sm:$0xff] }
 0x175   :  { %10832 = vmatpush.bf16.msrb.mxu3 %v17950_v2  ;;  %v20300_v2 = vpop.f32.mrf.mxu3 }
 0x176   :  { %10791 = vmatpush.bf16.msrb.mxu0 %v17925_v7  ;;  %v17984_v7 = vld [vmem:[%s23493_s1 + $0xce8] sm:$0xff] }
 0x177   :  { %10819 = vmatpush.bf16.msrb.mxu2 %v17941_v8 }
 0x178   :  { %10805 = vmatpush.bf16.msrb.mxu1 %v17933_v10 }
 0x179   :  { %10833 = vmatpush.bf16.msrb.mxu3 %v17949_v13  ;;  %v17959_v13 = vld [vmem:[%s23493_s1 + $0xc20] sm:$0xff] }
 0x17a   :  { %10792 = vmatpush.bf16.msrb.mxu0 %v17924_v17  ;;  %v17975_v17 = vld [vmem:[%s23493_s1 + $0xca0] sm:$0xff] }
 0x17b   :  { %10820 = vmatpush.bf16.msrb.mxu2 %v17940_v19 }
 0x17c   :  { %10806 = vmatpush.bf16.msrb.mxu1 %v17932_v22 }
 0x17d   :  { %10834 = vmatpush.bf16.msrb.mxu3 %v17948_v26  ;;  %v17967_v26 = vld [vmem:[%s23493_s1 + $0xc60] sm:$0xff] }
 0x17e   :  { %10793 = vmatpush.bf16.msrb.mxu0 %v17923_v31  ;;  %v10571_v8 = vpop.f32.mrf.mxu0  ;;  %v17958_v31 = vld [vmem:[%s23493_s1 + $0xc18] sm:$0xff] }
 0x17f   :  { %10821 = vmatpush.bf16.msrb.mxu2 %v17939_v32  ;;  %v10572_v10 = vadd.f32 %v10571_v8, %v20202_v4  ;;  %v17983_v4 = vld [vmem:[%s23493_s1 + $0xce0] sm:$0xff]  ;;  %v17974_v32 = vld [vmem:[%s23493_s1 + $0xc98] sm:$0xff]  ;;  %v17451_v8 = vld [vmem:[%s23494_s0 + $0xcc] sm:$0xf] }
 0x180   :  { %10807 = vmatpush.bf16.msrb.mxu1 %v17931_v43  ;;  %v10585_v19 = vpop.f32.mrf.mxu1  ;;  %v17957_v43 = vld [vmem:[%s23493_s1 + $0xc10] sm:$0xff] }
 0x181   :  { %10835 = vmatpush.bf16.msrb.mxu3 %v17947_v44  ;;  %10794 = vmatmul.bf16.vlgmr.msrb.gmra.mxu0 %v12385_v51  ;;  %v10586_v22 = vadd.f32 %v10585_v19, %v10572_v10  ;;  %v17973_v44 = vld [vmem:[%s23493_s1 + $0xc90] sm:$0xff]  ;;  %v17964_v51 = vld [vmem:[%s23493_s1 + $0xc48] sm:$0xff] }
 0x182   :  { %10842 = vmatpush.bf16.msra.mxu0 %v17962_v33  ;;  %10822 = vmatmul.bf16.vlgmr.msrb.gmra.mxu2 %v12393_v52  ;;  %v17980_v52 = vld [vmem:[%s23493_s1 + $0xcc8] sm:$0xff]  ;;  %v12410_v10 = vld [vmem:[%s23494_s0 + $0x30c] sm:$0xf0] }
 0x183   :  { %10870 = vmatpush.bf16.msra.mxu2 %v17978_v34  ;;  %10808 = vmatmul.bf16.vlgmr.msrb.gmra.mxu1 %v12389_v57  ;;  %v17994_v57 = vld [vmem:[%s23493_s1 + $0xd38] sm:$0xff] }
 0x184   :  { %10856 = vmatpush.bf16.msra.mxu1 %v17970_v54  ;;  %10836 = vmatmul.bf16.vlgmr.msrb.gmra.mxu3 %v12397_v58  ;;  %v17955_v54 = vld [vmem:[%s23493_s1 + $0xc00] sm:$0xff]  ;;  %v18010_v58 = vld [vmem:[%s23493_s1 + $0xdb8] sm:$0xff] }
 0x185   :  { %10884 = vmatpush.bf16.msra.mxu3 %v17986_v55  ;;  %v10599_v33 = vpop.f32.mrf.mxu2  ;;  %v17971_v55 = vld [vmem:[%s23493_s1 + $0xc80] sm:$0xff] }
 0x186   :  { %10843 = vmatpush.bf16.msra.mxu0 %v17961_v60  ;;  %v10600_v34 = vadd.f32 %v10599_v33, %v10586_v22  ;;  %v12400_v60 = vld [vmem:[%s23494_s0 + $0xc0] sm:$0xf]  ;;  %v20401_v19 = vpop.f32.mrf.mxu0  ;;  %v18002_v22 = vld [vmem:[%s23493_s1 + $0xd78] sm:$0xff]  ;;  %v17993_v33 = vld [vmem:[%s23493_s1 + $0xd30] sm:$0xff] }
 0x187   :  { %10871 = vmatpush.bf16.msra.mxu2 %v17977_v56  ;;  %v10613_v40 = vpop.f32.mrf.mxu3  ;;  %v17522_v56 = vld [vmem:[%s23494_s0 + $0x300] sm:$0xf0] }
 0x188   :  { %10857 = vmatpush.bf16.msra.mxu1 %v17969_v61  ;;  %v20333_v41 = vadd.f32 %v10613_v40, %v10600_v34  ;;  %v12408_v61 = vld [vmem:[%s23494_s0 + $0xc8] sm:$0xf]  ;;  %v18009_v34 = vld [vmem:[%s23493_s1 + $0xdb0] sm:$0xff] }
 0x189   :  { %10885 = vmatpush.bf16.msra.mxu3 %v17985_v62  ;;  %v17523_v62 = vld [vmem:[%s23494_s0 + $0x308] sm:$0xf0] }
 0x18a   :  { %10844 = vmatpush.bf16.msra.mxu0 %v17960_v0  ;;  %v17963_v0 = vld [vmem:[%s23493_s1 + $0xc40] sm:$0xff] }
 0x18b   :  { %10872 = vmatpush.bf16.msra.mxu2 %v17976_v1  ;;  %v17979_v1 = vld [vmem:[%s23493_s1 + $0xcc0] sm:$0xff] }
 0x18c   :  { %10858 = vmatpush.bf16.msra.mxu1 %v17968_v3  ;;  %v17450_v3 = vld [vmem:[%s23494_s0 + $0xc4] sm:$0xf] }
 0x18d   :  { %10886 = vmatpush.bf16.msra.mxu3 %v17984_v7  ;;  %v12402_v7 = vld [vmem:[%s23494_s0 + $0x304] sm:$0xf0]  ;;  %v20423_v40 = vpop.f32.mrf.mxu2 }
 0x18e   :  { %10845 = vmatpush.bf16.msra.mxu0 %v17959_v13  ;;  %v12401_v13 = vor.u32 %v17522_v56, %v12400_v60  ;;  %v17990_v60 = vld [vmem:[%s23493_s1 + $0xd18] sm:$0xff] }
 0x18f   :  { %10873 = vmatpush.bf16.msra.mxu2 %v17975_v17  ;;  %v12409_v17 = vor.u32 %v17523_v62, %v12408_v61  ;;  %v18006_v56 = vld [vmem:[%s23493_s1 + $0xd98] sm:$0xff] }
 0x190   :  { %10859 = vmatpush.bf16.msra.mxu1 %v17967_v26  ;;  %v18018_v26 = vld [vmem:[%s23493_s1 + $0xdf8] sm:$0xff] }
 0x191   :  { %10887 = vmatpush.bf16.msra.mxu3 %v17983_v4  ;;  %v12405_v4 = vor.u32 %v17450_v3, %v12402_v7 }
 0x192   :  { %10846 = vmatpush.bf16.msra.mxu0 %v17958_v31  ;;  %v12413_v31 = vor.u32 %v17451_v8, %v12410_v10  ;;  %v17989_v8 = vld [vmem:[%s23493_s1 + $0xd10] sm:$0xff] }
 0x193   :  { %10874 = vmatpush.bf16.msra.mxu2 %v17974_v32  ;;  %v20409_v32 = vpop.f32.mrf.mxu1  ;;  %v18005_v10 = vld [vmem:[%s23493_s1 + $0xd90] sm:$0xff] }
 0x194   :  { %10860 = vmatpush.bf16.msra.mxu1 %v17966_v37  ;;  %v18001_v37 = vld [vmem:[%s23493_s1 + $0xd70] sm:$0xff] }
 0x195   :  { %10888 = vmatpush.bf16.msra.mxu3 %v17982_v39  ;;  %v18017_v39 = vld [vmem:[%s23493_s1 + $0xdf0] sm:$0xff] }
 0x196   :  { %10847 = vmatpush.bf16.msra.mxu0 %v17957_v43  ;;  %v17992_v43 = vld [vmem:[%s23493_s1 + $0xd28] sm:$0xff] }
 0x197   :  { %10875 = vmatpush.bf16.msra.mxu2 %v17973_v44  ;;  %v18008_v44 = vld [vmem:[%s23493_s1 + $0xda8] sm:$0xff] }
 0x198   :  { %10861 = vmatpush.bf16.msra.mxu1 %v17965_v45  ;;  %v20431_v45 = vpop.f32.mrf.mxu3 }
 0x199   :  { %10889 = vmatpush.bf16.msra.mxu3 %v17981_v46  ;;  %v18000_v46 = vld [vmem:[%s23493_s1 + $0xd68] sm:$0xff] }
 0x19a   :  { %10848 = vmatpush.bf16.msra.mxu0 %v17956_v48  ;;  %v18016_v48 = vld [vmem:[%s23493_s1 + $0xde8] sm:$0xff] }
 0x19b   :  { %10876 = vmatpush.bf16.msra.mxu2 %v17972_v49 }
 0x19c   :  { %10862 = vmatpush.bf16.msra.mxu1 %v17964_v51 }
 0x19d   :  { %10890 = vmatpush.bf16.msra.mxu3 %v17980_v52  ;;  %v17991_v52 = vld [vmem:[%s23493_s1 + $0xd20] sm:$0xff] }
 0x19e   :  { %10849 = vmatpush.bf16.msra.mxu0 %v17955_v54  ;;  %v10627_v49 = vpop.f32.mrf.mxu0  ;;  %v18007_v54 = vld [vmem:[%s23493_s1 + $0xda0] sm:$0xff] }
 0x19f   :  { %10877 = vmatpush.bf16.msra.mxu2 %v17971_v55  ;;  %v10628_v51 = vadd.f32 %v10627_v49, %v20333_v41  ;;  %v18015_v41 = vld [vmem:[%s23493_s1 + $0xde0] sm:$0xff] }
 0x1a0   :  { %10863 = vmatpush.bf16.msra.mxu1 %v17963_v0  ;;  %v10641_v55 = vpop.f32.mrf.mxu1  ;;  %v17998_v0 = vld [vmem:[%s23493_s1 + $0xd58] sm:$0xff]  ;;  %v17995_v49 = vld [vmem:[%s23493_s1 + $0xd40] sm:$0xff] }
 0x1a1   :  { %10891 = vmatpush.bf16.msra.mxu3 %v17979_v1  ;;  %10850 = vmatmul.bf16.vlgmr.msra.gmra.mxu0 %v12401_v13  ;;  %v18014_v1 = vld [vmem:[%s23493_s1 + $0xdd8] sm:$0xff]  ;;  %v17997_v13 = vld [vmem:[%s23493_s1 + $0xd50] sm:$0xff] }
 0x1a2   :  { %10898 = vmatpush.bf16.msrb.mxu0 %v17994_v57  ;;  %10878 = vmatmul.bf16.vlgmr.msra.gmra.mxu2 %v12409_v17  ;;  %v10642_v57 = vadd.f32 %v10641_v55, %v10628_v51  ;;  %v18013_v17 = vld [vmem:[%s23493_s1 + $0xdd0] sm:$0xff]  ;;  %v18011_v51 = vld [vmem:[%s23493_s1 + $0xdc0] sm:$0xff]  ;;  %v17453_v55 = vld [vmem:[%s23494_s0 + $0xdc] sm:$0xf] }
 0x1a3   :  { %10926 = vmatpush.bf16.msrb.mxu2 %v18010_v58  ;;  %10864 = vmatmul.bf16.vlgmr.msra.gmra.mxu1 %v12405_v4  ;;  %v17999_v58 = vld [vmem:[%s23493_s1 + $0xd60] sm:$0xff]  ;;  %v17996_v4 = vld [vmem:[%s23493_s1 + $0xd48] sm:$0xff] }
 0x1a4   :  { %10912 = vmatpush.bf16.msrb.mxu1 %v18002_v22  ;;  %10892 = vmatmul.bf16.vlgmr.msra.gmra.mxu3 %v12413_v31  ;;  %v17988_v22 = vld [vmem:[%s23493_s1 + $0xd08] sm:$0xff] }
 0x1a5   :  { %10940 = vmatpush.bf16.msrb.mxu3 %v18018_v26  ;;  %v10655_v61 = vpop.f32.mrf.mxu2  ;;  %v18004_v26 = vld [vmem:[%s23493_s1 + $0xd88] sm:$0xff] }
 0x1a6   :  { %10899 = vmatpush.bf16.msrb.mxu0 %v17993_v33  ;;  %v10656_v62 = vadd.f32 %v10655_v61, %v10642_v57  ;;  %v18012_v31 = vld [vmem:[%s23493_s1 + $0xdc8] sm:$0xff]  ;;  %v17987_v33 = vld [vmem:[%s23493_s1 + $0xd00] sm:$0xff]  ;;  %v18050_v61 = vld [vmem:[%s23493_s1 + $0xef8] sm:$0xff] }
 0x1a7   :  { %10927 = vmatpush.bf16.msrb.mxu2 %v18009_v34  ;;  %v10669_v3 = vpop.f32.mrf.mxu3  ;;  %v18003_v34 = vld [vmem:[%s23493_s1 + $0xd80] sm:$0xff] }
 0x1a8   :  { %10913 = vmatpush.bf16.msrb.mxu1 %v18001_v37  ;;  %v20464_v7 = vadd.f32 %v10669_v3, %v10656_v62  ;;  %v18026_v37 = vld [vmem:[%s23493_s1 + $0xe38] sm:$0xff]  ;;  %v12426_v57 = vld [vmem:[%s23494_s0 + $0x31c] sm:$0xf0]  ;;  %v18025_v3 = vld [vmem:[%s23493_s1 + $0xe30] sm:$0xff] }
 0x1a9   :  { %10941 = vmatpush.bf16.msrb.mxu3 %v18017_v39  ;;  %v18042_v39 = vld [vmem:[%s23493_s1 + $0xeb8] sm:$0xff] }
 0x1aa   :  { %10900 = vmatpush.bf16.msrb.mxu0 %v17992_v43  ;;  %v12416_v43 = vld [vmem:[%s23494_s0 + $0xd0] sm:$0xf] }
 0x1ab   :  { %10928 = vmatpush.bf16.msrb.mxu2 %v18008_v44  ;;  %v17524_v44 = vld [vmem:[%s23494_s0 + $0x310] sm:$0xf0] }
 0x1ac   :  { %10914 = vmatpush.bf16.msrb.mxu1 %v18000_v46  ;;  %v12424_v46 = vld [vmem:[%s23494_s0 + $0xd8] sm:$0xf] }
 0x1ad   :  { %10942 = vmatpush.bf16.msrb.mxu3 %v18016_v48  ;;  %v17525_v48 = vld [vmem:[%s23494_s0 + $0x318] sm:$0xf0] }
 0x1ae   :  { %10901 = vmatpush.bf16.msrb.mxu0 %v17991_v52  ;;  %v17452_v52 = vld [vmem:[%s23494_s0 + $0xd4] sm:$0xf] }
 0x1af   :  { %10929 = vmatpush.bf16.msrb.mxu2 %v18007_v54  ;;  %v12418_v54 = vld [vmem:[%s23494_s0 + $0x314] sm:$0xf0] }
 0x1b0   :  { %10915 = vmatpush.bf16.msrb.mxu1 %v17999_v58  ;;  %v12417_v58 = vor.u32 %v17524_v44, %v12416_v43  ;;  %v12421_v62 = vor.u32 %v17452_v52, %v12418_v54  ;;  %v18039_v43 = vld [vmem:[%s23493_s1 + $0xea0] sm:$0xff] }
 0x1b1   :  { %10943 = vmatpush.bf16.msrb.mxu3 %v18015_v41  ;;  %v12425_v41 = vor.u32 %v17525_v48, %v12424_v46  ;;  %v18031_v48 = vld [vmem:[%s23493_s1 + $0xe60] sm:$0xff] }
 0x1b2   :  { %10902 = vmatpush.bf16.msrb.mxu0 %v17990_v60  ;;  %v20532_v60 = vpop.f32.mrf.mxu0 }
 0x1b3   :  { %10930 = vmatpush.bf16.msrb.mxu2 %v18006_v56  ;;  %v18034_v56 = vld [vmem:[%s23493_s1 + $0xe78] sm:$0xff] }
 0x1b4   :  { %10916 = vmatpush.bf16.msrb.mxu1 %v17998_v0  ;;  %v12429_v0 = vor.u32 %v17453_v55, %v12426_v57  ;;  %v18030_v55 = vld [vmem:[%s23493_s1 + $0xe58] sm:$0xff] }
 0x1b5   :  { %10944 = vmatpush.bf16.msrb.mxu3 %v18014_v1  ;;  %v20540_v1 = vpop.f32.mrf.mxu1  ;;  %v18046_v57 = vld [vmem:[%s23493_s1 + $0xed8] sm:$0xff] }
 0x1b6   :  { %10903 = vmatpush.bf16.msrb.mxu0 %v17989_v8  ;;  %v18041_v8 = vld [vmem:[%s23493_s1 + $0xeb0] sm:$0xff] }
 0x1b7   :  { %10931 = vmatpush.bf16.msrb.mxu2 %v18005_v10  ;;  %v18033_v10 = vld [vmem:[%s23493_s1 + $0xe70] sm:$0xff] }
 0x1b8   :  { %10917 = vmatpush.bf16.msrb.mxu1 %v17997_v13  ;;  %v18049_v13 = vld [vmem:[%s23493_s1 + $0xef0] sm:$0xff] }
 0x1b9   :  { %10945 = vmatpush.bf16.msrb.mxu3 %v18013_v17  ;;  %v20554_v17 = vpop.f32.mrf.mxu2 }
 0x1ba   :  { %10904 = vmatpush.bf16.msrb.mxu0 %v17988_v22  ;;  %v18024_v22 = vld [vmem:[%s23493_s1 + $0xe28] sm:$0xff] }
 0x1bb   :  { %10932 = vmatpush.bf16.msrb.mxu2 %v18004_v26  ;;  %v18040_v26 = vld [vmem:[%s23493_s1 + $0xea8] sm:$0xff] }
 0x1bc   :  { %10918 = vmatpush.bf16.msrb.mxu1 %v17996_v4  ;;  %v20562_v4 = vpop.f32.mrf.mxu3 }
 0x1bd   :  { %10946 = vmatpush.bf16.msrb.mxu3 %v18012_v31  ;;  %v18032_v31 = vld [vmem:[%s23493_s1 + $0xe68] sm:$0xff] }
 0x1be   :  { %10905 = vmatpush.bf16.msrb.mxu0 %v17987_v33  ;;  %v18048_v33 = vld [vmem:[%s23493_s1 + $0xee8] sm:$0xff] }
 0x1bf   :  { %10933 = vmatpush.bf16.msrb.mxu2 %v18003_v34  ;;  %v10683_v34 = vpop.f32.mrf.mxu0 }
 0x1c0   :  { %10919 = vmatpush.bf16.msrb.mxu1 %v17995_v49  ;;  %v10697_v44 = vpop.f32.mrf.mxu1  ;;  %v18022_v49 = vld [vmem:[%s23493_s1 + $0xe18] sm:$0xff] }
 0x1c1   :  { %10947 = vmatpush.bf16.msrb.mxu3 %v18011_v51  ;;  %10906 = vmatmul.bf16.vlgmr.msrb.gmra.mxu0 %v12417_v58  ;;  %v18038_v51 = vld [vmem:[%s23493_s1 + $0xe98] sm:$0xff] }
 0x1c2   :  { %10954 = vmatpush.bf16.msra.mxu0 %v18026_v37  ;;  %10934 = vmatmul.bf16.vlgmr.msrb.gmra.mxu2 %v12425_v41  ;;  %v10684_v37 = vadd.f32 %v10683_v34, %v20464_v7  ;;  %v18047_v7 = vld [vmem:[%s23493_s1 + $0xee0] sm:$0xff] }
 0x1c3   :  { %10982 = vmatpush.bf16.msra.mxu2 %v18042_v39  ;;  %10920 = vmatmul.bf16.vlgmr.msrb.gmra.mxu1 %v12421_v62  ;;  %v18023_v39 = vld [vmem:[%s23493_s1 + $0xe20] sm:$0xff]  ;;  %v18029_v62 = vld [vmem:[%s23493_s1 + $0xe50] sm:$0xff] }
 0x1c4   :  { %10968 = vmatpush.bf16.msra.mxu1 %v18034_v56  ;;  %10948 = vmatmul.bf16.vlgmr.msrb.gmra.mxu3 %v12429_v0  ;;  %v10698_v46 = vadd.f32 %v10697_v44, %v10684_v37  ;;  %v18021_v56 = vld [vmem:[%s23493_s1 + $0xe10] sm:$0xff]  ;;  %v12432_v34 = vld [vmem:[%s23494_s0 + $0xe0] sm:$0xf]  ;;  %v17526_v37 = vld [vmem:[%s23494_s0 + $0x320] sm:$0xf0] }
 0x1c5   :  { %10996 = vmatpush.bf16.msra.mxu3 %v18050_v61  ;;  %v10711_v52 = vpop.f32.mrf.mxu2  ;;  %v18037_v61 = vld [vmem:[%s23493_s1 + $0xe90] sm:$0xff]  ;;  %v18027_v44 = vld [vmem:[%s23493_s1 + $0xe40] sm:$0xff] }
 0x1c6   :  { %10955 = vmatpush.bf16.msra.mxu0 %v18025_v3  ;;  %v10712_v54 = vadd.f32 %v10711_v52, %v10698_v46  ;;  %v18045_v0 = vld [vmem:[%s23493_s1 + $0xed0] sm:$0xff]  ;;  %v18020_v3 = vld [vmem:[%s23493_s1 + $0xe08] sm:$0xff]  ;;  %v18043_v46 = vld [vmem:[%s23493_s1 + $0xec0] sm:$0xff]  ;;  %v12433_v52 = vor.u32 %v17526_v37, %v12432_v34 }
 0x1c7   :  { %10983 = vmatpush.bf16.msra.mxu2 %v18041_v8  ;;  %v10725_v58 = vpop.f32.mrf.mxu3  ;;  %v18036_v8 = vld [vmem:[%s23493_s1 + $0xe88] sm:$0xff] }
 0x1c8   :  { %10969 = vmatpush.bf16.msra.mxu1 %v18033_v10  ;;  %v20595_v41 = vadd.f32 %v10725_v58, %v10712_v54  ;;  %v18028_v10 = vld [vmem:[%s23493_s1 + $0xe48] sm:$0xff]  ;;  %v18082_v58 = vld [vmem:[%s23493_s1 + $0xff8] sm:$0xff] }
 0x1c9   :  { %10997 = vmatpush.bf16.msra.mxu3 %v18049_v13  ;;  %v18044_v13 = vld [vmem:[%s23493_s1 + $0xec8] sm:$0xff] }
 0x1ca   :  { %10956 = vmatpush.bf16.msra.mxu0 %v18024_v22  ;;  %v18019_v22 = vld [vmem:[%s23493_s1 + $0xe00] sm:$0xff]  ;;  %v18080_v34 = vld [vmem:[%s23493_s1 + $0xfe8] sm:$0xff] }
 0x1cb   :  { %10984 = vmatpush.bf16.msra.mxu2 %v18040_v26  ;;  %v18035_v26 = vld [vmem:[%s23493_s1 + $0xe80] sm:$0xff] }
 0x1cc   :  { %10970 = vmatpush.bf16.msra.mxu1 %v18032_v31  ;;  %v18058_v31 = vld [vmem:[%s23493_s1 + $0xf38] sm:$0xff] }
 0x1cd   :  { %10998 = vmatpush.bf16.msra.mxu3 %v18048_v33  ;;  %v18074_v33 = vld [vmem:[%s23493_s1 + $0xfb8] sm:$0xff] }
 0x1ce   :  { %10957 = vmatpush.bf16.msra.mxu0 %v18023_v39  ;;  %v12440_v39 = vld [vmem:[%s23494_s0 + $0xe8] sm:$0xf] }
 0x1cf   :  { %10985 = vmatpush.bf16.msra.mxu2 %v18039_v43  ;;  %v17527_v43 = vld [vmem:[%s23494_s0 + $0x328] sm:$0xf0] }
 0x1d0   :  { %10971 = vmatpush.bf16.msra.mxu1 %v18031_v48  ;;  %v17454_v48 = vld [vmem:[%s23494_s0 + $0xe4] sm:$0xf]  ;;  %v12441_v54 = vor.u32 %v17527_v43, %v12440_v39 }
 0x1d1   :  { %10999 = vmatpush.bf16.msra.mxu3 %v18047_v7  ;;  %v12434_v7 = vld [vmem:[%s23494_s0 + $0x324] sm:$0xf0]  ;;  %v18055_v43 = vld [vmem:[%s23493_s1 + $0xf20] sm:$0xff] }
 0x1d2   :  { %10958 = vmatpush.bf16.msra.mxu0 %v18022_v49  ;;  %v17455_v49 = vld [vmem:[%s23494_s0 + $0xec] sm:$0xf] }
 0x1d3   :  { %10986 = vmatpush.bf16.msra.mxu2 %v18038_v51  ;;  %v12442_v51 = vld [vmem:[%s23494_s0 + $0x32c] sm:$0xf0] }
 0x1d4   :  { %10972 = vmatpush.bf16.msra.mxu1 %v18030_v55  ;;  %v20663_v55 = vpop.f32.mrf.mxu0 }
 0x1d5   :  { %11000 = vmatpush.bf16.msra.mxu3 %v18046_v57  ;;  %v18066_v57 = vld [vmem:[%s23493_s1 + $0xf78] sm:$0xff] }
 0x1d6   :  { %10959 = vmatpush.bf16.msra.mxu0 %v18021_v56  ;;  %v12437_v56 = vor.u32 %v17454_v48, %v12434_v7  ;;  %v18063_v7 = vld [vmem:[%s23493_s1 + $0xf60] sm:$0xff] }
 0x1d7   :  { %10987 = vmatpush.bf16.msra.mxu2 %v18037_v61  ;;  %v12445_v61 = vor.u32 %v17455_v49, %v12442_v51  ;;  %v18054_v49 = vld [vmem:[%s23493_s1 + $0xf18] sm:$0xff] }
 0x1d8   :  { %10973 = vmatpush.bf16.msra.mxu1 %v18029_v62  ;;  %v20671_v62 = vpop.f32.mrf.mxu1  ;;  %v18070_v51 = vld [vmem:[%s23493_s1 + $0xf98] sm:$0xff] }
 0x1d9   :  { %11001 = vmatpush.bf16.msra.mxu3 %v18045_v0  ;;  %v18057_v0 = vld [vmem:[%s23493_s1 + $0xf30] sm:$0xff] }
 0x1da   :  { %10960 = vmatpush.bf16.msra.mxu0 %v18020_v3  ;;  %v18073_v3 = vld [vmem:[%s23493_s1 + $0xfb0] sm:$0xff] }
 0x1db   :  { %10988 = vmatpush.bf16.msra.mxu2 %v18036_v8  ;;  %v18065_v8 = vld [vmem:[%s23493_s1 + $0xf70] sm:$0xff] }
 0x1dc   :  { %10974 = vmatpush.bf16.msra.mxu1 %v18028_v10  ;;  %v18081_v10 = vld [vmem:[%s23493_s1 + $0xff0] sm:$0xff] }
 0x1dd   :  { %11002 = vmatpush.bf16.msra.mxu3 %v18044_v13  ;;  %v20685_v13 = vpop.f32.mrf.mxu2 }
 0x1de   :  { %10961 = vmatpush.bf16.msra.mxu0 %v18019_v22  ;;  %v18056_v22 = vld [vmem:[%s23493_s1 + $0xf28] sm:$0xff]  ;;  %v10739_v37 = vpop.f32.mrf.mxu0 }
 0x1df   :  { %10989 = vmatpush.bf16.msra.mxu2 %v18035_v26  ;;  %v18072_v26 = vld [vmem:[%s23493_s1 + $0xfa8] sm:$0xff]  ;;  %v10740_v39 = vadd.f32 %v10739_v37, %v20595_v41  ;;  %v18079_v41 = vld [vmem:[%s23493_s1 + $0xfe0] sm:$0xff] }
 0x1e0   :  { %10975 = vmatpush.bf16.msra.mxu1 %v18027_v44  ;;  %v18071_v44 = vld [vmem:[%s23493_s1 + $0xfa0] sm:$0xff] }
 0x1e1   :  { %11003 = vmatpush.bf16.msra.mxu3 %v18043_v46  ;;  %10962 = vmatmul.bf16.vlgmr.msra.gmra.mxu0 %v12433_v52  ;;  %v10753_v46 = vpop.f32.mrf.mxu1  ;;  %v18051_v37 = vld [vmem:[%s23493_s1 + $0xf00] sm:$0xff] }
 0x1e2   :  { %11010 = vmatpush.bf16.msrb.mxu0 %v18058_v31  ;;  %10990 = vmatmul.bf16.vlgmr.msra.gmra.mxu2 %v12441_v54  ;;  %v20693_v31 = vpop.f32.mrf.mxu3  ;;  %v10754_v48 = vadd.f32 %v10753_v46, %v10740_v39  ;;  %v18067_v39 = vld [vmem:[%s23493_s1 + $0xf80] sm:$0xff]  ;;  %v12448_v46 = vld [vmem:[%s23494_s0 + $0xf0] sm:$0xf] }
 0x1e3   :  { %11038 = vmatpush.bf16.msrb.mxu2 %v18074_v33  ;;  %10976 = vmatmul.bf16.vlgmr.msra.gmra.mxu1 %v12437_v56  ;;  %v18064_v33 = vld [vmem:[%s23493_s1 + $0xf68] sm:$0xff] }
 0x1e4   :  { %11024 = vmatpush.bf16.msrb.mxu1 %v18066_v57  ;;  %11004 = vmatmul.bf16.vlgmr.msra.gmra.mxu3 %v12445_v61  ;;  %v18062_v57 = vld [vmem:[%s23493_s1 + $0xf58] sm:$0xff] }
 0x1e5   :  { %11052 = vmatpush.bf16.msrb.mxu3 %v18082_v58  ;;  %v10767_v52 = vpop.f32.mrf.mxu2  ;;  %v18078_v58 = vld [vmem:[%s23493_s1 + $0xfd8] sm:$0xff] }
 0x1e6   :  { %11011 = vmatpush.bf16.msrb.mxu0 %v18057_v0  ;;  %v10768_v54 = vadd.f32 %v10767_v52, %v10754_v48  ;;  %v18053_v0 = vld [vmem:[%s23493_s1 + $0xf10] sm:$0xff] }
 0x1e7   :  { %11039 = vmatpush.bf16.msrb.mxu2 %v18073_v3  ;;  %v18069_v3 = vld [vmem:[%s23493_s1 + $0xf90] sm:$0xff] }
 0x1e8   :  { %11025 = vmatpush.bf16.msrb.mxu1 %v18065_v8  ;;  %v18061_v8 = vld [vmem:[%s23493_s1 + $0xf50] sm:$0xff] }
 0x1e9   :  { %11053 = vmatpush.bf16.msrb.mxu3 %v18081_v10  ;;  %v18077_v10 = vld [vmem:[%s23493_s1 + $0xfd0] sm:$0xff] }
 0x1ea   :  { %11012 = vmatpush.bf16.msrb.mxu0 %v18056_v22  ;;  %v10781_v56 = vpop.f32.mrf.mxu3  ;;  %v18052_v22 = vld [vmem:[%s23493_s1 + $0xf08] sm:$0xff]  ;;  %v17528_v48 = vld [vmem:[%s23494_s0 + $0x330] sm:$0xf0] }
 0x1eb   :  { %11040 = vmatpush.bf16.msrb.mxu2 %v18072_v26  ;;  %v20726_v61 = vadd.f32 %v10781_v56, %v10768_v54  ;;  %v18068_v26 = vld [vmem:[%s23493_s1 + $0xf88] sm:$0xff]  ;;  %v17456_v52 = vld [vmem:[%s23494_s0 + $0xf4] sm:$0xf]  ;;  %v12450_v54 = vld [vmem:[%s23494_s0 + $0x334] sm:$0xf0]  ;;  %v12449_v56 = vor.u32 %v17528_v48, %v12448_v46 }
 0x1ec   :  { %11026 = vmatpush.bf16.msrb.mxu1 %v18064_v33  ;;  %v18060_v33 = vld [vmem:[%s23493_s1 + $0xf48] sm:$0xff] }
 0x1ed   :  { %11054 = vmatpush.bf16.msrb.mxu3 %v18080_v34  ;;  %v18076_v34 = vld [vmem:[%s23493_s1 + $0xfc8] sm:$0xff] }
 0x1ee   :  { %11013 = vmatpush.bf16.msrb.mxu0 %v18055_v43  ;;  %v18090_v43 = vld [vmem:[%s23493_s1 + $0x1038] sm:$0xff]  ;;  %v18088_v46 = vld [vmem:[%s23493_s1 + $0x1028] sm:$0xff] }
 0x1ef   :  { %11041 = vmatpush.bf16.msrb.mxu2 %v18071_v44  ;;  %v18106_v44 = vld [vmem:[%s23493_s1 + $0x10b8] sm:$0xff]  ;;  %v18104_v48 = vld [vmem:[%s23493_s1 + $0x10a8] sm:$0xff] }
 0x1f0   :  { %11027 = vmatpush.bf16.msrb.mxu1 %v18063_v7  ;;  %v12456_v7 = vld [vmem:[%s23494_s0 + $0xf8] sm:$0xf] }
 0x1f1   :  { %11055 = vmatpush.bf16.msrb.mxu3 %v18079_v41  ;;  %v17529_v41 = vld [vmem:[%s23494_s0 + $0x338] sm:$0xf0] }
 0x1f2   :  { %11014 = vmatpush.bf16.msrb.mxu0 %v18054_v49  ;;  %v18059_v49 = vld [vmem:[%s23493_s1 + $0xf40] sm:$0xff] }
 0x1f3   :  { %11042 = vmatpush.bf16.msrb.mxu2 %v18070_v51  ;;  %v18075_v51 = vld [vmem:[%s23493_s1 + $0xfc0] sm:$0xff] }
 0x1f4   :  { %11028 = vmatpush.bf16.msrb.mxu1 %v18062_v57  ;;  %v17457_v57 = vld [vmem:[%s23494_s0 + $0xfc] sm:$0xf] }
 0x1f5   :  { %11056 = vmatpush.bf16.msrb.mxu3 %v18078_v58  ;;  %v12458_v58 = vld [vmem:[%s23494_s0 + $0x33c] sm:$0xf0] }
 0x1f6   :  { %11015 = vmatpush.bf16.msrb.mxu0 %v18053_v0  ;;  %v12457_v0 = vor.u32 %v17529_v41, %v12456_v7  ;;  %v20824_v7 = vpop.f32.mrf.mxu3  ;;  %v18096_v41 = vld [vmem:[%s23493_s1 + $0x1068] sm:$0xff] }
 0x1f7   :  { %11043 = vmatpush.bf16.msrb.mxu2 %v18069_v3  ;;  %v20794_v3 = vpop.f32.mrf.mxu0  ;;  %23499 = vst [vmem:[#allocation4_spill] sm:$0xff] %v20824_v7 }
 0x1f8   :  { %11029 = vmatpush.bf16.msrb.mxu1 %v18061_v8  ;;  %v18098_v8 = vld [vmem:[%s23493_s1 + $0x1078] sm:$0xff] }
 0x1f9   :  { %11057 = vmatpush.bf16.msrb.mxu3 %v18077_v10  ;;  %v18114_v10 = vld [vmem:[%s23493_s1 + $0x10f8] sm:$0xff] }
 0x1fa   :  { %11016 = vmatpush.bf16.msrb.mxu0 %v18052_v22  ;;  %v12453_v22 = vor.u32 %v17456_v52, %v12450_v54  ;;  %v18087_v54 = vld [vmem:[%s23493_s1 + $0x1020] sm:$0xff] }
 0x1fb   :  { %11044 = vmatpush.bf16.msrb.mxu2 %v18068_v26  ;;  %v12461_v26 = vor.u32 %v17457_v57, %v12458_v58  ;;  %v18103_v57 = vld [vmem:[%s23493_s1 + $0x10a0] sm:$0xff] }
 0x1fc   :  { %11030 = vmatpush.bf16.msrb.mxu1 %v18060_v33  ;;  %v20802_v33 = vpop.f32.mrf.mxu1 }
 0x1fd   :  { %11058 = vmatpush.bf16.msrb.mxu3 %v18076_v34  ;;  %23497 = vst [vmem:[#allocation2_spill] sm:$0xff] %v20802_v33  ;;  %v18089_v34 = vld [vmem:[%s23493_s1 + $0x1030] sm:$0xff] }
 0x1fe   :  { %11017 = vmatpush.bf16.msrb.mxu0 %v18051_v37  ;;  %v18105_v37 = vld [vmem:[%s23493_s1 + $0x10b0] sm:$0xff] }
 0x1ff   :  { %11045 = vmatpush.bf16.msrb.mxu2 %v18067_v39  ;;  %v18097_v39 = vld [vmem:[%s23493_s1 + $0x1070] sm:$0xff] }
 0x200   :  { %11031 = vmatpush.bf16.msrb.mxu1 %v18059_v49  ;;  %v18112_v49 = vld [vmem:[%s23493_s1 + $0x10e8] sm:$0xff] }
 0x201   :  { %11059 = vmatpush.bf16.msrb.mxu3 %v18075_v51  ;;  %11018 = vmatmul.bf16.vlgmr.msrb.gmra.mxu0 %v12449_v56  ;;  %v10795_v51 = vpop.f32.mrf.mxu0 }
 0x202   :  { %11066 = vmatpush.bf16.msra.mxu0 %v18090_v43  ;;  %11046 = vmatmul.bf16.vlgmr.msrb.gmra.mxu2 %v12457_v0  ;;  %v18113_v43 = vld [vmem:[%s23493_s1 + $0x10f0] sm:$0xff]  ;;  %v10796_v52 = vadd.f32 %v10795_v51, %v20726_v61  ;;  %v18095_v0 = vld [vmem:[%s23493_s1 + $0x1060] sm:$0xff]  ;;  %v18084_v51 = vld [vmem:[%s23493_s1 + $0x1008] sm:$0xff] }
 0x203   :  { %11094 = vmatpush.bf16.msra.mxu2 %v18106_v44  ;;  %11032 = vmatmul.bf16.vlgmr.msrb.gmra.mxu1 %v12453_v22  ;;  %v20816_v44 = vpop.f32.mrf.mxu2  ;;  %v18111_v61 = vld [vmem:[%s23493_s1 + $0x10e0] sm:$0xff] }
 0x204   :  { %11080 = vmatpush.bf16.msra.mxu1 %v18098_v8  ;;  %11060 = vmatmul.bf16.vlgmr.msrb.gmra.mxu3 %v12461_v26  ;;  %23498 = vst [vmem:[#allocation3_spill] sm:$0xff] %v20816_v44  ;;  %v10809_v58 = vpop.f32.mrf.mxu1  ;;  %v18086_v8 = vld [vmem:[%s23493_s1 + $0x1018] sm:$0xff] }
 0x205   :  { %11108 = vmatpush.bf16.msra.mxu3 %v18114_v10  ;;  %v10810_v56 = vadd.f32 %v10809_v58, %v10796_v52  ;;  %v18102_v10 = vld [vmem:[%s23493_s1 + $0x1098] sm:$0xff]  ;;  %v18100_v52 = vld [vmem:[%s23493_s1 + $0x1088] sm:$0xff]  ;;  %v18083_v58 = vld [vmem:[%s23493_s1 + $0x1000] sm:$0xff] }
 0x206   :  { %11067 = vmatpush.bf16.msra.mxu0 %v18089_v34  ;;  %v18094_v34 = vld [vmem:[%s23493_s1 + $0x1058] sm:$0xff] }
 0x207   :  { %11095 = vmatpush.bf16.msra.mxu2 %v18105_v37  ;;  %v18110_v37 = vld [vmem:[%s23493_s1 + $0x10d8] sm:$0xff] }
 0x208   :  { %11081 = vmatpush.bf16.msra.mxu1 %v18097_v39  ;;  %v10837_v39 = vpop.f32.mrf.mxu3 }
 0x209   :  { %11109 = vmatpush.bf16.msra.mxu3 %v18113_v43 }
 0x20a   :  { %11068 = vmatpush.bf16.msra.mxu0 %v18088_v46  ;;  %v18085_v46 = vld [vmem:[%s23493_s1 + $0x1010] sm:$0xff] }
 0x20b   :  { %11096 = vmatpush.bf16.msra.mxu2 %v18104_v48  ;;  %v10823_v22 = vpop.f32.mrf.mxu2  ;;  %v18101_v48 = vld [vmem:[%s23493_s1 + $0x1090] sm:$0xff] }
 0x20c   :  { %11082 = vmatpush.bf16.msra.mxu1 %v18096_v41  ;;  %v10824_v26 = vadd.f32 %v10823_v22, %v10810_v56  ;;  %v18093_v41 = vld [vmem:[%s23493_s1 + $0x1050] sm:$0xff]  ;;  %v18099_v56 = vld [vmem:[%s23493_s1 + $0x1080] sm:$0xff]  ;;  %v12472_v22 = vld [vmem:[%s23494_s0 + $0x108] sm:$0xf]  ;;  %v20933_v33 = vpop.f32.mrf.mxu1 }
 0x20d   :  { %11110 = vmatpush.bf16.msra.mxu3 %v18112_v49  ;;  %v18109_v49 = vld [vmem:[%s23493_s1 + $0x10d0] sm:$0xff]  ;;  %23501 = vst [vmem:[#allocation6_spill] sm:$0xff] %v20933_v33 }
 0x20e   :  { %11069 = vmatpush.bf16.msra.mxu0 %v18087_v54  ;;  %v20857_v43 = vadd.f32 %v10837_v39, %v10824_v26  ;;  %v18092_v54 = vld [vmem:[%s23493_s1 + $0x1048] sm:$0xff]  ;;  %v17458_v39 = vld [vmem:[%s23494_s0 + $0x104] sm:$0xf] }
 0x20f   :  { %11097 = vmatpush.bf16.msra.mxu2 %v18103_v57  ;;  %v18108_v57 = vld [vmem:[%s23493_s1 + $0x10c8] sm:$0xff] }
 0x210   :  { %11083 = vmatpush.bf16.msra.mxu1 %v18095_v0  ;;  %v18122_v0 = vld [vmem:[%s23493_s1 + $0x1138] sm:$0xff]  ;;  %v17531_v26 = vld [vmem:[%s23494_s0 + $0x348] sm:$0xf0] }
 0x211   :  { %11111 = vmatpush.bf16.msra.mxu3 %v18111_v61  ;;  %v18138_v61 = vld [vmem:[%s23493_s1 + $0x11b8] sm:$0xff] }
 0x212   :  { %11070 = vmatpush.bf16.msra.mxu0 %v18086_v8  ;;  %v12464_v8 = vld [vmem:[%s23494_s0 + $0x100] sm:$0xf] }
 0x213   :  { %11098 = vmatpush.bf16.msra.mxu2 %v18102_v10  ;;  %v17530_v10 = vld [vmem:[%s23494_s0 + $0x340] sm:$0xf0] }
 0x214   :  { %11084 = vmatpush.bf16.msra.mxu1 %v18094_v34  ;;  %v18091_v34 = vld [vmem:[%s23493_s1 + $0x1040] sm:$0xff] }
 0x215   :  { %11112 = vmatpush.bf16.msra.mxu3 %v18110_v37  ;;  %v18107_v37 = vld [vmem:[%s23493_s1 + $0x10c0] sm:$0xff] }
 0x216   :  { %11071 = vmatpush.bf16.msra.mxu0 %v18085_v46  ;;  %v12466_v46 = vld [vmem:[%s23494_s0 + $0x344] sm:$0xf0] }
 0x217   :  { %11099 = vmatpush.bf16.msra.mxu2 %v18101_v48  ;;  %v17459_v48 = vld [vmem:[%s23494_s0 + $0x10c] sm:$0xf]  ;;  %v12469_v7 = vor.u32 %v17458_v39, %v12466_v46  ;;  %v18119_v39 = vld [vmem:[%s23493_s1 + $0x1120] sm:$0xff] }
 0x218   :  { %11085 = vmatpush.bf16.msra.mxu1 %v18093_v41  ;;  %v12474_v41 = vld [vmem:[%s23494_s0 + $0x34c] sm:$0xf0]  ;;  %v18135_v46 = vld [vmem:[%s23493_s1 + $0x11a0] sm:$0xff] }
 0x219   :  { %11113 = vmatpush.bf16.msra.mxu3 %v18109_v49  ;;  %v12465_v49 = vor.u32 %v17530_v10, %v12464_v8  ;;  %v12477_v44 = vor.u32 %v17459_v48, %v12474_v41  ;;  %v20947_v8 = vpop.f32.mrf.mxu2  ;;  %v18120_v10 = vld [vmem:[%s23493_s1 + $0x1128] sm:$0xff] }
 0x21a   :  { %11072 = vmatpush.bf16.msra.mxu0 %v18084_v51  ;;  %v12473_v51 = vor.u32 %v17531_v26, %v12472_v22  ;;  %23502 = vst [vmem:[#allocation7_spill] sm:$0xff] %v20947_v8  ;;  %v18136_v22 = vld [vmem:[%s23493_s1 + $0x11a8] sm:$0xff]  ;;  %v20955_v26 = vpop.f32.mrf.mxu3 }
 0x21b   :  { %11100 = vmatpush.bf16.msra.mxu2 %v18100_v52  ;;  %v20925_v52 = vpop.f32.mrf.mxu0  ;;  %23503 = vst [vmem:[#allocation8_spill] sm:$0xff] %v20955_v26 }
 0x21c   :  { %11086 = vmatpush.bf16.msra.mxu1 %v18092_v54  ;;  %23500 = vst [vmem:[#allocation5_spill] sm:$0xff] %v20925_v52  ;;  %v18130_v54 = vld [vmem:[%s23493_s1 + $0x1178] sm:$0xff] }
 0x21d   :  { %11114 = vmatpush.bf16.msra.mxu3 %v18108_v57  ;;  %v18146_v57 = vld [vmem:[%s23493_s1 + $0x11f8] sm:$0xff] }
 0x21e   :  { %11073 = vmatpush.bf16.msra.mxu0 %v18083_v58  ;;  %v18121_v58 = vld [vmem:[%s23493_s1 + $0x1130] sm:$0xff] }
 0x21f   :  { %11101 = vmatpush.bf16.msra.mxu2 %v18099_v56  ;;  %v18137_v56 = vld [vmem:[%s23493_s1 + $0x11b0] sm:$0xff] }
 0x220   :  { %11087 = vmatpush.bf16.msra.mxu1 %v18091_v34  ;;  %v10865_v48 = vpop.f32.mrf.mxu1 }
 0x221   :  { %11115 = vmatpush.bf16.msra.mxu3 %v18107_v37  ;;  %11074 = vmatmul.bf16.vlgmr.msra.gmra.mxu0 %v12465_v49  ;;  %v18127_v49 = vld [vmem:[%s23493_s1 + $0x1160] sm:$0xff] }
 0x222   :  { %11122 = vmatpush.bf16.msrb.mxu0 %v18122_v0  ;;  %11102 = vmatmul.bf16.vlgmr.msra.gmra.mxu2 %v12473_v51  ;;  %v18129_v0 = vld [vmem:[%s23493_s1 + $0x1170] sm:$0xff]  ;;  %v18118_v51 = vld [vmem:[%s23493_s1 + $0x1118] sm:$0xff] }
 0x223   :  { %11150 = vmatpush.bf16.msrb.mxu2 %v18138_v61  ;;  %v18145_v61 = vld [vmem:[%s23493_s1 + $0x11f0] sm:$0xff]  ;;  %11088 = vmatmul.bf16.vlgmr.msra.gmra.mxu1 %v12469_v7  ;;  %v18144_v7 = vld [vmem:[%s23493_s1 + $0x11e8] sm:$0xff]  ;;  %v10851_v34 = vpop.f32.mrf.mxu0 }
 0x224   :  { %11136 = vmatpush.bf16.msrb.mxu1 %v18130_v54  ;;  %11116 = vmatmul.bf16.vlgmr.msra.gmra.mxu3 %v12477_v44  ;;  %v18128_v44 = vld [vmem:[%s23493_s1 + $0x1168] sm:$0xff]  ;;  %v10852_v37 = vadd.f32 %v10851_v34, %v20857_v43  ;;  %v18143_v43 = vld [vmem:[%s23493_s1 + $0x11e0] sm:$0xff]  ;;  %v18134_v54 = vld [vmem:[%s23493_s1 + $0x1198] sm:$0xff] }
 0x225   :  { %11164 = vmatpush.bf16.msrb.mxu3 %v18146_v57  ;;  %v10879_v57 = vpop.f32.mrf.mxu2  ;;  %v18141_v34 = vld [vmem:[%s23493_s1 + $0x11d0] sm:$0xff] }
 0x226   :  { %11123 = vmatpush.bf16.msrb.mxu0 %v18121_v58  ;;  %v10866_v41 = vadd.f32 %v10865_v48, %v10852_v37  ;;  %v18116_v37 = vld [vmem:[%s23493_s1 + $0x1108] sm:$0xff] }
 0x227   :  { %11151 = vmatpush.bf16.msrb.mxu2 %v18137_v56  ;;  %v18126_v56 = vld [vmem:[%s23493_s1 + $0x1158] sm:$0xff]  ;;  %v18140_v48 = vld [vmem:[%s23493_s1 + $0x11c8] sm:$0xff] }
 0x228   :  { %11137 = vmatpush.bf16.msrb.mxu1 %v18129_v0  ;;  %v10880_v58 = vadd.f32 %v10879_v57, %v10866_v41  ;;  %v18142_v0 = vld [vmem:[%s23493_s1 + $0x11d8] sm:$0xff]  ;;  %v18115_v41 = vld [vmem:[%s23493_s1 + $0x1100] sm:$0xff]  ;;  %v17532_v57 = vld [vmem:[%s23494_s0 + $0x350] sm:$0xf0]  ;;  %v21064_v52 = vpop.f32.mrf.mxu1 }
 0x229   :  { %11165 = vmatpush.bf16.msrb.mxu3 %v18145_v61  ;;  %v10893_v61 = vpop.f32.mrf.mxu3  ;;  %23505 = vst [vmem:[#allocation10_spill] sm:$0xff] %v21064_v52 }
 0x22a   :  { %11124 = vmatpush.bf16.msrb.mxu0 %v18120_v10  ;;  %v20988_v10 = vadd.f32 %v10893_v61, %v10880_v58  ;;  %v12488_v58 = vld [vmem:[%s23494_s0 + $0x118] sm:$0xf]  ;;  %v18139_v61 = vld [vmem:[%s23493_s1 + $0x11c0] sm:$0xff] }
 0x22b   :  { %11152 = vmatpush.bf16.msrb.mxu2 %v18136_v22  ;;  %v18117_v22 = vld [vmem:[%s23493_s1 + $0x1110] sm:$0xff]  ;;  %v21056_v26 = vpop.f32.mrf.mxu0 }
 0x22c   :  { %11138 = vmatpush.bf16.msrb.mxu1 %v18128_v44  ;;  %v18133_v44 = vld [vmem:[%s23493_s1 + $0x1190] sm:$0xff]  ;;  %23504 = vst [vmem:[#allocation9_spill] sm:$0xff] %v21056_v26 }
 0x22d   :  { %11166 = vmatpush.bf16.msrb.mxu3 %v18144_v7  ;;  %v18125_v7 = vld [vmem:[%s23493_s1 + $0x1150] sm:$0xff] }
 0x22e   :  { %11125 = vmatpush.bf16.msrb.mxu0 %v18119_v39  ;;  %v18132_v39 = vld [vmem:[%s23493_s1 + $0x1188] sm:$0xff] }
 0x22f   :  { %11153 = vmatpush.bf16.msrb.mxu2 %v18135_v46  ;;  %v18124_v46 = vld [vmem:[%s23493_s1 + $0x1148] sm:$0xff] }
 0x230   :  { %11139 = vmatpush.bf16.msrb.mxu1 %v18127_v49  ;;  %v18131_v49 = vld [vmem:[%s23493_s1 + $0x1180] sm:$0xff] }
 0x231   :  { %11167 = vmatpush.bf16.msrb.mxu3 %v18143_v43  ;;  %v18154_v43 = vld [vmem:[%s23493_s1 + $0x1238] sm:$0xff] }
 0x232   :  { %11126 = vmatpush.bf16.msrb.mxu0 %v18118_v51  ;;  %v18170_v51 = vld [vmem:[%s23493_s1 + $0x12b8] sm:$0xff] }
 0x233   :  { %11154 = vmatpush.bf16.msrb.mxu2 %v18134_v54  ;;  %v12480_v54 = vld [vmem:[%s23494_s0 + $0x110] sm:$0xf] }
 0x234   :  { %11140 = vmatpush.bf16.msrb.mxu1 %v18126_v56  ;;  %v17533_v56 = vld [vmem:[%s23494_s0 + $0x358] sm:$0xf0] }
 0x235   :  { %11168 = vmatpush.bf16.msrb.mxu3 %v18142_v0  ;;  %v18123_v0 = vld [vmem:[%s23493_s1 + $0x1140] sm:$0xff] }
 0x236   :  { %11127 = vmatpush.bf16.msrb.mxu0 %v18117_v22  ;;  %v17460_v22 = vld [vmem:[%s23494_s0 + $0x114] sm:$0xf] }
 0x237   :  { %11155 = vmatpush.bf16.msrb.mxu2 %v18133_v44  ;;  %v12482_v44 = vld [vmem:[%s23494_s0 + $0x354] sm:$0xf0] }
 0x238   :  { %11141 = vmatpush.bf16.msrb.mxu1 %v18125_v7  ;;  %v17461_v7 = vld [vmem:[%s23494_s0 + $0x11c] sm:$0xf]  ;;  %v12485_v8 = vor.u32 %v17460_v22, %v12482_v44  ;;  %v18151_v22 = vld [vmem:[%s23493_s1 + $0x1220] sm:$0xff] }
 0x239   :  { %11169 = vmatpush.bf16.msrb.mxu3 %v18141_v34  ;;  %v12490_v34 = vld [vmem:[%s23494_s0 + $0x35c] sm:$0xf0] }
 0x23a   :  { %11128 = vmatpush.bf16.msrb.mxu0 %v18116_v37  ;;  %v12481_v37 = vor.u32 %v17532_v57, %v12480_v54  ;;  %v12493_v33 = vor.u32 %v17461_v7, %v12490_v34  ;;  %v21078_v54 = vpop.f32.mrf.mxu2  ;;  %v18152_v57 = vld [vmem:[%s23493_s1 + $0x1228] sm:$0xff]  ;;  %v18167_v44 = vld [vmem:[%s23493_s1 + $0x12a0] sm:$0xff] }
 0x23b   :  { %11156 = vmatpush.bf16.msrb.mxu2 %v18132_v39  ;;  %v12489_v39 = vor.u32 %v17533_v56, %v12488_v58  ;;  %23506 = vst [vmem:[#allocation11_spill] sm:$0xff] %v21078_v54  ;;  %v18168_v58 = vld [vmem:[%s23493_s1 + $0x12a8] sm:$0xff]  ;;  %v21086_v56 = vpop.f32.mrf.mxu3 }
 0x23c   :  { %11142 = vmatpush.bf16.msrb.mxu1 %v18124_v46  ;;  %v18162_v46 = vld [vmem:[%s23493_s1 + $0x1278] sm:$0xff]  ;;  %23507 = vst [vmem:[#allocation12_spill] sm:$0xff] %v21086_v56 }
 0x23d   :  { %11170 = vmatpush.bf16.msrb.mxu3 %v18140_v48  ;;  %v18178_v48 = vld [vmem:[%s23493_s1 + $0x12f8] sm:$0xff] }
 0x23e   :  { %11129 = vmatpush.bf16.msrb.mxu0 %v18115_v41  ;;  %v18153_v41 = vld [vmem:[%s23493_s1 + $0x1230] sm:$0xff] }
 0x23f   :  { %11157 = vmatpush.bf16.msrb.mxu2 %v18131_v49  ;;  %v18169_v49 = vld [vmem:[%s23493_s1 + $0x12b0] sm:$0xff] }
 0x240   :  { %11143 = vmatpush.bf16.msrb.mxu1 %v18123_v0  ;;  %v10907_v0 = vpop.f32.mrf.mxu0  ;;  %v10921_v7 = vpop.f32.mrf.mxu1 }
 0x241   :  { %11171 = vmatpush.bf16.msrb.mxu3 %v18139_v61  ;;  %11130 = vmatmul.bf16.vlgmr.msrb.gmra.mxu0 %v12481_v37  ;;  %v10908_v61 = vadd.f32 %v10907_v0, %v20988_v10  ;;  %v18159_v37 = vld [vmem:[%s23493_s1 + $0x1260] sm:$0xff]  ;;  %v18173_v0 = vld [vmem:[%s23493_s1 + $0x12d0] sm:$0xff] }
 0x242   :  { %11178 = vmatpush.bf16.msra.mxu0 %v18154_v43  ;;  %11158 = vmatmul.bf16.vlgmr.msrb.gmra.mxu2 %v12489_v39  ;;  %v18161_v43 = vld [vmem:[%s23493_s1 + $0x1270] sm:$0xff]  ;;  %v18175_v10 = vld [vmem:[%s23493_s1 + $0x12e0] sm:$0xff]  ;;  %v18150_v39 = vld [vmem:[%s23493_s1 + $0x1218] sm:$0xff] }
 0x243   :  { %11206 = vmatpush.bf16.msra.mxu2 %v18170_v51  ;;  %v18177_v51 = vld [vmem:[%s23493_s1 + $0x12f0] sm:$0xff]  ;;  %11144 = vmatmul.bf16.vlgmr.msrb.gmra.mxu1 %v12485_v8  ;;  %v18176_v8 = vld [vmem:[%s23493_s1 + $0x12e8] sm:$0xff]  ;;  %v10922_v34 = vadd.f32 %v10921_v7, %v10908_v61 }
 0x244   :  { %11192 = vmatpush.bf16.msra.mxu1 %v18162_v46  ;;  %11172 = vmatmul.bf16.vlgmr.msrb.gmra.mxu3 %v12493_v33  ;;  %v18160_v33 = vld [vmem:[%s23493_s1 + $0x1268] sm:$0xff]  ;;  %v18166_v46 = vld [vmem:[%s23493_s1 + $0x1298] sm:$0xff] }
 0x245   :  { %11220 = vmatpush.bf16.msra.mxu3 %v18178_v48  ;;  %v10935_v48 = vpop.f32.mrf.mxu2  ;;  %v18148_v61 = vld [vmem:[%s23493_s1 + $0x1208] sm:$0xff] }
 0x246   :  { %11179 = vmatpush.bf16.msra.mxu0 %v18153_v41  ;;  %v10936_v41 = vadd.f32 %v10935_v48, %v10922_v34  ;;  %v18172_v7 = vld [vmem:[%s23493_s1 + $0x12c8] sm:$0xff]  ;;  %v18147_v34 = vld [vmem:[%s23493_s1 + $0x1200] sm:$0xff] }
 0x247   :  { %11207 = vmatpush.bf16.msra.mxu2 %v18169_v49  ;;  %v18158_v49 = vld [vmem:[%s23493_s1 + $0x1258] sm:$0xff]  ;;  %v17534_v48 = vld [vmem:[%s23494_s0 + $0x360] sm:$0xf0] }
 0x248   :  { %11193 = vmatpush.bf16.msra.mxu1 %v18161_v43  ;;  %v18174_v43 = vld [vmem:[%s23493_s1 + $0x12d8] sm:$0xff]  ;;  %v21187_v56 = vpop.f32.mrf.mxu0  ;;  %v21195_v26 = vpop.f32.mrf.mxu1 }
 0x249   :  { %11221 = vmatpush.bf16.msra.mxu3 %v18177_v51  ;;  %v10949_v51 = vpop.f32.mrf.mxu3  ;;  %23508 = vst [vmem:[#allocation13_spill] sm:$0xff] %v21187_v56 }
 0x24a   :  { %11180 = vmatpush.bf16.msra.mxu0 %v18152_v57  ;;  %v21119_v57 = vadd.f32 %v10949_v51, %v10936_v41  ;;  %v12504_v41 = vld [vmem:[%s23494_s0 + $0x128] sm:$0xf]  ;;  %v18171_v51 = vld [vmem:[%s23493_s1 + $0x12c0] sm:$0xff]  ;;  %23509 = vst [vmem:[#allocation14_spill] sm:$0xff] %v21195_v26 }
 0x24b   :  { %11208 = vmatpush.bf16.msra.mxu2 %v18168_v58  ;;  %v18149_v58 = vld [vmem:[%s23493_s1 + $0x1210] sm:$0xff] }
 0x24c   :  { %11194 = vmatpush.bf16.msra.mxu1 %v18160_v33  ;;  %v18165_v33 = vld [vmem:[%s23493_s1 + $0x1290] sm:$0xff] }
 0x24d   :  { %11222 = vmatpush.bf16.msra.mxu3 %v18176_v8  ;;  %v18157_v8 = vld [vmem:[%s23493_s1 + $0x1250] sm:$0xff] }
 0x24e   :  { %11181 = vmatpush.bf16.msra.mxu0 %v18151_v22  ;;  %v18164_v22 = vld [vmem:[%s23493_s1 + $0x1288] sm:$0xff] }
 0x24f   :  { %11209 = vmatpush.bf16.msra.mxu2 %v18167_v44  ;;  %v18156_v44 = vld [vmem:[%s23493_s1 + $0x1248] sm:$0xff] }
 0x250   :  { %11195 = vmatpush.bf16.msra.mxu1 %v18159_v37  ;;  %v18163_v37 = vld [vmem:[%s23493_s1 + $0x1280] sm:$0xff] }
 0x251   :  { %11223 = vmatpush.bf16.msra.mxu3 %v18175_v10  ;;  %v18186_v10 = vld [vmem:[%s23493_s1 + $0x1338] sm:$0xff] }
 0x252   :  { %11182 = vmatpush.bf16.msra.mxu0 %v18150_v39  ;;  %v18202_v39 = vld [vmem:[%s23493_s1 + $0x13b8] sm:$0xff] }
 0x253   :  { %11210 = vmatpush.bf16.msra.mxu2 %v18166_v46  ;;  %v12496_v46 = vld [vmem:[%s23494_s0 + $0x120] sm:$0xf] }
 0x254   :  { %11196 = vmatpush.bf16.msra.mxu1 %v18158_v49  ;;  %v17535_v49 = vld [vmem:[%s23494_s0 + $0x368] sm:$0xf0] }
 0x255   :  { %11224 = vmatpush.bf16.msra.mxu3 %v18174_v43  ;;  %v18155_v43 = vld [vmem:[%s23493_s1 + $0x1240] sm:$0xff] }
 0x256   :  { %11183 = vmatpush.bf16.msra.mxu0 %v18149_v58  ;;  %v17462_v58 = vld [vmem:[%s23494_s0 + $0x124] sm:$0xf] }
 0x257   :  { %11211 = vmatpush.bf16.msra.mxu2 %v18165_v33  ;;  %v12498_v33 = vld [vmem:[%s23494_s0 + $0x364] sm:$0xf0] }
 0x258   :  { %11197 = vmatpush.bf16.msra.mxu1 %v18157_v8  ;;  %v17463_v8 = vld [vmem:[%s23494_s0 + $0x12c] sm:$0xf]  ;;  %v12501_v54 = vor.u32 %v17462_v58, %v12498_v33  ;;  %v18183_v58 = vld [vmem:[%s23493_s1 + $0x1320] sm:$0xff] }
 0x259   :  { %11225 = vmatpush.bf16.msra.mxu3 %v18173_v0  ;;  %v12506_v0 = vld [vmem:[%s23494_s0 + $0x36c] sm:$0xf0]  ;;  %v18199_v33 = vld [vmem:[%s23493_s1 + $0x13a0] sm:$0xff] }
 0x25a   :  { %11184 = vmatpush.bf16.msra.mxu0 %v18148_v61  ;;  %v12497_v61 = vor.u32 %v17534_v48, %v12496_v46  ;;  %v12509_v52 = vor.u32 %v17463_v8, %v12506_v0  ;;  %v21209_v46 = vpop.f32.mrf.mxu2  ;;  %v18184_v48 = vld [vmem:[%s23493_s1 + $0x1328] sm:$0xff] }
 0x25b   :  { %11212 = vmatpush.bf16.msra.mxu2 %v18164_v22  ;;  %v12505_v22 = vor.u32 %v17535_v49, %v12504_v41  ;;  %23510 = vst [vmem:[#allocation15_spill] sm:$0xff] %v21209_v46  ;;  %v18200_v41 = vld [vmem:[%s23493_s1 + $0x13a8] sm:$0xff]  ;;  %v21217_v49 = vpop.f32.mrf.mxu3 }
 0x25c   :  { %11198 = vmatpush.bf16.msra.mxu1 %v18156_v44  ;;  %v18194_v44 = vld [vmem:[%s23493_s1 + $0x1378] sm:$0xff]  ;;  %23511 = vst [vmem:[#allocation16_spill] sm:$0xff] %v21217_v49 }
 0x25d   :  { %11226 = vmatpush.bf16.msra.mxu3 %v18172_v7  ;;  %v18210_v7 = vld [vmem:[%s23493_s1 + $0x13f8] sm:$0xff] }
 0x25e   :  { %11185 = vmatpush.bf16.msra.mxu0 %v18147_v34  ;;  %v18185_v34 = vld [vmem:[%s23493_s1 + $0x1330] sm:$0xff] }
 0x25f   :  { %11213 = vmatpush.bf16.msra.mxu2 %v18163_v37  ;;  %v18201_v37 = vld [vmem:[%s23493_s1 + $0x13b0] sm:$0xff] }
 0x260   :  { %11199 = vmatpush.bf16.msra.mxu1 %v18155_v43  ;;  %v10963_v43 = vpop.f32.mrf.mxu0  ;;  %v10977_v8 = vpop.f32.mrf.mxu1 }
 0x261   :  { %11227 = vmatpush.bf16.msra.mxu3 %v18171_v51  ;;  %11186 = vmatmul.bf16.vlgmr.msra.gmra.mxu0 %v12497_v61  ;;  %v10964_v51 = vadd.f32 %v10963_v43, %v21119_v57  ;;  %v18191_v61 = vld [vmem:[%s23493_s1 + $0x1360] sm:$0xff]  ;;  %v18205_v43 = vld [vmem:[%s23493_s1 + $0x13d0] sm:$0xff] }
 0x262   :  { %11234 = vmatpush.bf16.msrb.mxu0 %v18186_v10  ;;  %11214 = vmatmul.bf16.vlgmr.msra.gmra.mxu2 %v12505_v22  ;;  %v18193_v10 = vld [vmem:[%s23493_s1 + $0x1370] sm:$0xff]  ;;  %v18207_v57 = vld [vmem:[%s23493_s1 + $0x13e0] sm:$0xff]  ;;  %v18182_v22 = vld [vmem:[%s23493_s1 + $0x1318] sm:$0xff] }
 0x263   :  { %11262 = vmatpush.bf16.msrb.mxu2 %v18202_v39  ;;  %v18209_v39 = vld [vmem:[%s23493_s1 + $0x13f0] sm:$0xff]  ;;  %11200 = vmatmul.bf16.vlgmr.msra.gmra.mxu1 %v12501_v54  ;;  %v18208_v54 = vld [vmem:[%s23493_s1 + $0x13e8] sm:$0xff]  ;;  %v10978_v0 = vadd.f32 %v10977_v8, %v10964_v51 }
 0x264   :  { %11248 = vmatpush.bf16.msrb.mxu1 %v18194_v44  ;;  %11228 = vmatmul.bf16.vlgmr.msra.gmra.mxu3 %v12509_v52  ;;  %v18192_v52 = vld [vmem:[%s23493_s1 + $0x1368] sm:$0xff]  ;;  %v18198_v44 = vld [vmem:[%s23493_s1 + $0x1398] sm:$0xff] }
 0x265   :  { %11276 = vmatpush.bf16.msrb.mxu3 %v18210_v7  ;;  %v10991_v7 = vpop.f32.mrf.mxu2  ;;  %v18180_v51 = vld [vmem:[%s23493_s1 + $0x1308] sm:$0xff] }
 0x266   :  { %11235 = vmatpush.bf16.msrb.mxu0 %v18185_v34  ;;  %v10992_v34 = vadd.f32 %v10991_v7, %v10978_v0  ;;  %v18204_v8 = vld [vmem:[%s23493_s1 + $0x13c8] sm:$0xff]  ;;  %v18179_v0 = vld [vmem:[%s23493_s1 + $0x1300] sm:$0xff]  ;;  %v17536_v7 = vld [vmem:[%s23494_s0 + $0x370] sm:$0xf0] }
 0x267   :  { %11263 = vmatpush.bf16.msrb.mxu2 %v18201_v37  ;;  %v18190_v37 = vld [vmem:[%s23493_s1 + $0x1358] sm:$0xff] }
 0x268   :  { %11249 = vmatpush.bf16.msrb.mxu1 %v18193_v10  ;;  %v18206_v10 = vld [vmem:[%s23493_s1 + $0x13d8] sm:$0xff]  ;;  %v21322_v49 = vpop.f32.mrf.mxu0 }
 0x269   :  { %11277 = vmatpush.bf16.msrb.mxu3 %v18209_v39  ;;  %v11005_v39 = vpop.f32.mrf.mxu3 }
 0x26a   :  { %11236 = vmatpush.bf16.msrb.mxu0 %v18184_v48  ;;  %v21250_v48 = vadd.f32 %v11005_v39, %v10992_v34  ;;  %v12520_v34 = vld [vmem:[%s23494_s0 + $0x138] sm:$0xf] }
 0x26b   :  { %11264 = vmatpush.bf16.msrb.mxu2 %v18200_v41  ;;  %v18181_v41 = vld [vmem:[%s23493_s1 + $0x1310] sm:$0xff] }
 0x26c   :  { %11250 = vmatpush.bf16.msrb.mxu1 %v18192_v52  ;;  %v18197_v52 = vld [vmem:[%s23493_s1 + $0x1390] sm:$0xff] }
 0x26d   :  { %11278 = vmatpush.bf16.msrb.mxu3 %v18208_v54  ;;  %v18189_v54 = vld [vmem:[%s23493_s1 + $0x1350] sm:$0xff] }
 0x26e   :  { %11237 = vmatpush.bf16.msrb.mxu0 %v18183_v58  ;;  %v18196_v58 = vld [vmem:[%s23493_s1 + $0x1388] sm:$0xff] }
 0x26f   :  { %11265 = vmatpush.bf16.msrb.mxu2 %v18199_v33  ;;  %v18188_v33 = vld [vmem:[%s23493_s1 + $0x1348] sm:$0xff] }
 0x270   :  { %11251 = vmatpush.bf16.msrb.mxu1 %v18191_v61  ;;  %v18195_v61 = vld [vmem:[%s23493_s1 + $0x1380] sm:$0xff] }
 0x271   :  { %11279 = vmatpush.bf16.msrb.mxu3 %v18207_v57  ;;  %v18218_v57 = vld [vmem:[%s23493_s1 + $0x1438] sm:$0xff] }
 0x272   :  { %11238 = vmatpush.bf16.msrb.mxu0 %v18182_v22  ;;  %v18234_v22 = vld [vmem:[%s23493_s1 + $0x14b8] sm:$0xff] }
 0x273   :  { %11266 = vmatpush.bf16.msrb.mxu2 %v18198_v44  ;;  %v12512_v44 = vld [vmem:[%s23494_s0 + $0x130] sm:$0xf] }
 0x274   :  { %11252 = vmatpush.bf16.msrb.mxu1 %v18190_v37  ;;  %v17537_v37 = vld [vmem:[%s23494_s0 + $0x378] sm:$0xf0] }
 0x275   :  { %11280 = vmatpush.bf16.msrb.mxu3 %v18206_v10  ;;  %v18732_v10 = vld [vmem:[%s23495_s2] ss:$0 sm:$0xff] }
 0x276   :  { %11239 = vmatpush.bf16.msrb.mxu0 %v18181_v41  ;;  %v10182_v39 = vadd.f32 %v18732_v10, %v19475_v12  ;;  %v18187_v41 = vld [vmem:[%s23493_s1 + $0x1340] sm:$0xff]  ;;  %v17465_v12 = vld [vmem:[%s23494_s0 + $0x13c] sm:$0xf]  ;;  %v12521_v10 = vor.u32 %v17537_v37, %v12520_v34  ;;  %v18216_v34 = vld [vmem:[%s23493_s1 + $0x1428] sm:$0xff] }
 0x277   :  { %11267 = vmatpush.bf16.msrb.mxu2 %v18197_v52  ;;  %v18203_v52 = vld [vmem:[%s23493_s1 + $0x13c0] sm:$0xff]  ;;  %v18232_v37 = vld [vmem:[%s23493_s1 + $0x14a8] sm:$0xff] }
 0x278   :  { %11253 = vmatpush.bf16.msrb.mxu1 %v18189_v54  ;;  %v17464_v54 = vld [vmem:[%s23494_s0 + $0x134] sm:$0xf]  ;;  %v10196_v46 = vadd.f32 %v19492_v20, %v10182_v39  ;;  %v21354_v39 = vpop.f32.mrf.mxu3 }
 0x279   :  { %11281 = vmatpush.bf16.msrb.mxu3 %v18205_v43  ;;  %v12514_v43 = vld [vmem:[%s23494_s0 + $0x374] sm:$0xf0]  ;;  %v18225_v20 = vld [vmem:[%s23493_s1 + $0x1470] sm:$0xff] }
 0x27a   :  { %11240 = vmatpush.bf16.msrb.mxu0 %v18180_v51  ;;  %v12522_v51 = vld [vmem:[%s23494_s0 + $0x37c] sm:$0xf0]  ;;  %v12517_v26 = vor.u32 %v17464_v54, %v12514_v43 }
 0x27b   :  { %11268 = vmatpush.bf16.msrb.mxu2 %v18196_v58  ;;  %v12513_v58 = vor.u32 %v17536_v7, %v12512_v44  ;;  %v12525_v56 = vor.u32 %v17465_v12, %v12522_v51  ;;  %v21331_v44 = vpop.f32.mrf.mxu1  ;;  %v21346_v7 = vpop.f32.mrf.mxu2  ;;  %v18231_v54 = vld [vmem:[%s23493_s1 + $0x14a0] sm:$0xff] }
 0x27c   :  { %11254 = vmatpush.bf16.msrb.mxu1 %v18188_v33  ;;  %v18226_v33 = vld [vmem:[%s23493_s1 + $0x1478] sm:$0xff] }
 0x27d   :  { %11282 = vmatpush.bf16.msrb.mxu3 %v18204_v8  ;;  %v18242_v8 = vld [vmem:[%s23493_s1 + $0x14f8] sm:$0xff] }
 0x27e   :  { %11241 = vmatpush.bf16.msrb.mxu0 %v18179_v0  ;;  %v18217_v0 = vld [vmem:[%s23493_s1 + $0x1430] sm:$0xff] }
 0x27f   :  { %11269 = vmatpush.bf16.msrb.mxu2 %v18195_v61  ;;  %v18233_v61 = vld [vmem:[%s23493_s1 + $0x14b0] sm:$0xff] }
 0x280   :  { %11255 = vmatpush.bf16.msrb.mxu1 %v18187_v41 }
 0x281   :  { %11283 = vmatpush.bf16.msrb.mxu3 %v18203_v52  ;;  %11242 = vmatmul.bf16.vlgmr.msrb.gmra.mxu0 %v12513_v58  ;;  %v18215_v52 = vld [vmem:[%s23493_s1 + $0x1420] sm:$0xff]  ;;  %v18214_v58 = vld [vmem:[%s23493_s1 + $0x1418] sm:$0xff] }
 0x282   :  { %11290 = vmatpush.bf16.msra.mxu0 %v18218_v57  ;;  %11270 = vmatmul.bf16.vlgmr.msrb.gmra.mxu2 %v12521_v10  ;;  %v18241_v57 = vld [vmem:[%s23493_s1 + $0x14f0] sm:$0xff] }
 0x283   :  { %11318 = vmatpush.bf16.msra.mxu2 %v18234_v22  ;;  %v10210_v22 = vadd.f32 %v19506_v27, %v10196_v46  ;;  %11256 = vmatmul.bf16.vlgmr.msrb.gmra.mxu1 %v12517_v26  ;;  %v18224_v27 = vld [vmem:[%s23493_s1 + $0x1468] sm:$0xff]  ;;  %v11033_v43 = vpop.f32.mrf.mxu1 }
 0x284   :  { %11304 = vmatpush.bf16.msra.mxu1 %v18226_v33  ;;  %11284 = vmatmul.bf16.vlgmr.msrb.gmra.mxu3 %v12525_v56  ;;  %v18240_v26 = vld [vmem:[%s23493_s1 + $0x14e8] sm:$0xff]  ;;  %v11019_v56 = vpop.f32.mrf.mxu0 }
 0x285   :  { %11332 = vmatpush.bf16.msra.mxu3 %v18242_v8  ;;  %v10224_v46 = vadd.f32 %v19514_v30, %v10210_v22  ;;  %v11020_v41 = vadd.f32 %v11019_v56, %v21250_v48  ;;  %v18223_v30 = vld [vmem:[%s23493_s1 + $0x1460] sm:$0xff]  ;;  %v11047_v10 = vpop.f32.mrf.mxu2  ;;  %v18228_v56 = vld [vmem:[%s23493_s1 + $0x1488] sm:$0xff] }
 0x286   :  { %11291 = vmatpush.bf16.msra.mxu0 %v18217_v0  ;;  %v18239_v48 = vld [vmem:[%s23493_s1 + $0x14e0] sm:$0xff]  ;;  %v18222_v0 = vld [vmem:[%s23493_s1 + $0x1458] sm:$0xff] }
 0x287   :  { %11319 = vmatpush.bf16.msra.mxu2 %v18233_v61  ;;  %v10238_v12 = vadd.f32 %v19615_v9, %v10224_v46  ;;  %v11034_v51 = vadd.f32 %v11033_v43, %v11020_v41  ;;  %v18230_v9 = vld [vmem:[%s23493_s1 + $0x1498] sm:$0xff]  ;;  %v18220_v41 = vld [vmem:[%s23493_s1 + $0x1448] sm:$0xff] }
 0x288   :  { %11305 = vmatpush.bf16.msra.mxu1 %v18225_v20  ;;  %v18238_v61 = vld [vmem:[%s23493_s1 + $0x14d8] sm:$0xff]  ;;  %v11061_v20 = vpop.f32.mrf.mxu3 }
 0x289   :  { %11333 = vmatpush.bf16.msra.mxu3 %v18241_v57  ;;  %v10252_v33 = vadd.f32 %v19623_v15, %v10238_v12  ;;  %v11048_v8 = vadd.f32 %v11047_v10, %v11034_v51  ;;  %v18213_v15 = vld [vmem:[%s23493_s1 + $0x1410] sm:$0xff]  ;;  %v18266_v43 = vld [vmem:[%s23493_s1 + $0x15b8] sm:$0xff]  ;;  %v12528_v12 = vld [vmem:[%s23494_s0 + $0x140] sm:$0xf] }
 0x28a   :  { %11292 = vmatpush.bf16.msra.mxu0 %v18216_v34  ;;  %v18229_v34 = vld [vmem:[%s23493_s1 + $0x1490] sm:$0xff]  ;;  %v17538_v51 = vld [vmem:[%s23494_s0 + $0x380] sm:$0xf0] }
 0x28b   :  { %11320 = vmatpush.bf16.msra.mxu2 %v18232_v37  ;;  %v10266_v57 = vadd.f32 %v19637_v21, %v10252_v33  ;;  %v21391_v22 = vadd.f32 %v11061_v20, %v11048_v8  ;;  %v18221_v37 = vld [vmem:[%s23493_s1 + $0x1450] sm:$0xff]  ;;  %v18235_v10 = vld [vmem:[%s23493_s1 + $0x14c0] sm:$0xff]  ;;  %v12530_v8 = vld [vmem:[%s23494_s0 + $0x384] sm:$0xf0]  ;;  %v12529_v20 = vor.u32 %v17538_v51, %v12528_v12 }
 0x28c   :  { %11306 = vmatpush.bf16.msra.mxu1 %v18224_v27  ;;  %v18237_v21 = vld [vmem:[%s23493_s1 + $0x14d0] sm:$0xff]  ;;  %v17466_v33 = vld [vmem:[%s23494_s0 + $0x144] sm:$0xf]  ;;  %v18272_v12 = vld [vmem:[%s23493_s1 + $0x15e8] sm:$0xff] }
 0x28d   :  { %11334 = vmatpush.bf16.msra.mxu3 %v18240_v26  ;;  %v10280_v27 = vadd.f32 %v19645_v24, %v10266_v57  ;;  %v18212_v26 = vld [vmem:[%s23493_s1 + $0x1408] sm:$0xff] }
 0x28e   :  { %11293 = vmatpush.bf16.msra.mxu0 %v18215_v52  ;;  %v18236_v24 = vld [vmem:[%s23493_s1 + $0x14c8] sm:$0xff]  ;;  %v18211_v52 = vld [vmem:[%s23493_s1 + $0x1400] sm:$0xff] }
 0x28f   :  { %11321 = vmatpush.bf16.msra.mxu2 %v18231_v54  ;;  %v10294_v46 = vadd.f32 %v19746_v5, %v10280_v27  ;;  %v18227_v54 = vld [vmem:[%s23493_s1 + $0x1480] sm:$0xff]  ;;  %v18250_v5 = vld [vmem:[%s23493_s1 + $0x1538] sm:$0xff] }
 0x290   :  { %11307 = vmatpush.bf16.msra.mxu1 %v18223_v30  ;;  %v12536_v30 = vld [vmem:[%s23494_s0 + $0x148] sm:$0xf] }
 0x291   :  { %11335 = vmatpush.bf16.msra.mxu3 %v18239_v48  ;;  %v17539_v48 = vld [vmem:[%s23494_s0 + $0x388] sm:$0xf0] }
 0x292   :  { %11294 = vmatpush.bf16.msra.mxu0 %v18214_v58  ;;  %v10308_v58 = vadd.f32 %v19754_v11, %v10294_v46  ;;  %v17467_v11 = vld [vmem:[%s23494_s0 + $0x14c] sm:$0xf]  ;;  %v12537_v57 = vor.u32 %v17539_v48, %v12536_v30 }
 0x293   :  { %11322 = vmatpush.bf16.msra.mxu2 %v18230_v9  ;;  %v18219_v9 = vld [vmem:[%s23493_s1 + $0x1440] sm:$0xff] }
 0x294   :  { %11308 = vmatpush.bf16.msra.mxu1 %v18222_v0  ;;  %v12538_v0 = vld [vmem:[%s23494_s0 + $0x38c] sm:$0xf0] }
 0x295   :  { %11336 = vmatpush.bf16.msra.mxu3 %v18238_v61  ;;  %v10322_v61 = vadd.f32 %v19768_v18, %v10308_v58  ;;  %v12541_v27 = vor.u32 %v17467_v11, %v12538_v0  ;;  %v18249_v18 = vld [vmem:[%s23493_s1 + $0x1530] sm:$0xff]  ;;  %v18247_v58 = vld [vmem:[%s23493_s1 + $0x1520] sm:$0xff]  ;;  %v18246_v11 = vld [vmem:[%s23493_s1 + $0x1518] sm:$0xff] }
 0x296   :  { %11295 = vmatpush.bf16.msra.mxu0 %v18213_v15  ;;  %v21463_v15 = vpop.f32.mrf.mxu0 }
 0x297   :  { %11323 = vmatpush.bf16.msra.mxu2 %v18229_v34  ;;  %v18258_v34 = vld [vmem:[%s23493_s1 + $0x1578] sm:$0xff]  ;;  %v10336_v46 = vadd.f32 %v19776_v23, %v10322_v61  ;;  %v18248_v23 = vld [vmem:[%s23493_s1 + $0x1528] sm:$0xff] }
 0x298   :  { %11309 = vmatpush.bf16.msra.mxu1 %v18221_v37  ;;  %v18274_v37 = vld [vmem:[%s23493_s1 + $0x15f8] sm:$0xff] }
 0x299   :  { %11337 = vmatpush.bf16.msra.mxu3 %v18237_v21  ;;  %v12533_v21 = vor.u32 %v17466_v33, %v12530_v8 }
 0x29a   :  { %11296 = vmatpush.bf16.msra.mxu0 %v18212_v26  ;;  %v21471_v26 = vpop.f32.mrf.mxu1 }
 0x29b   :  { %11324 = vmatpush.bf16.msra.mxu2 %v18228_v56  ;;  %v18265_v56 = vld [vmem:[%s23493_s1 + $0x15b0] sm:$0xff] }
 0x29c   :  { %11310 = vmatpush.bf16.msra.mxu1 %v18220_v41  ;;  %v18257_v41 = vld [vmem:[%s23493_s1 + $0x1570] sm:$0xff] }
 0x29d   :  { %11338 = vmatpush.bf16.msra.mxu3 %v18236_v24  ;;  %v18273_v24 = vld [vmem:[%s23493_s1 + $0x15f0] sm:$0xff] }
 0x29e   :  { %11297 = vmatpush.bf16.msra.mxu0 %v18211_v52  ;;  %v10350_v52 = vadd.f32 %v19877_v6, %v10336_v46  ;;  %v18256_v6 = vld [vmem:[%s23493_s1 + $0x1568] sm:$0xff]  ;;  %v11075_v51 = vpop.f32.mrf.mxu0 }
 0x29f   :  { %11325 = vmatpush.bf16.msra.mxu2 %v18227_v54  ;;  %v21487_v54 = vpop.f32.mrf.mxu2  ;;  %v11076_v48 = vadd.f32 %v11075_v51, %v21391_v22  ;;  %v18271_v22 = vld [vmem:[%s23493_s1 + $0x15e0] sm:$0xff]  ;;  %v12544_v51 = vld [vmem:[%s23494_s0 + $0x150] sm:$0xf] }
 0x2a0   :  { %11311 = vmatpush.bf16.msra.mxu1 %v18219_v9  ;;  %v10364_v30 = vadd.f32 %v19885_v14, %v10350_v52  ;;  %v18263_v9 = vld [vmem:[%s23493_s1 + $0x15a0] sm:$0xff] }
 0x2a1   :  { %11339 = vmatpush.bf16.msra.mxu3 %v18235_v10  ;;  %11298 = vmatmul.bf16.vlgmr.msra.gmra.mxu0 %v12529_v20  ;;  %v18255_v14 = vld [vmem:[%s23493_s1 + $0x1560] sm:$0xff] }
 0x2a2   :  { %11346 = vmatpush.bf16.msrb.mxu0 %v18250_v5  ;;  %11326 = vmatmul.bf16.vlgmr.msra.gmra.mxu2 %v12537_v57  ;;  %v18264_v5 = vld [vmem:[%s23493_s1 + $0x15a8] sm:$0xff]  ;;  %v11089_v10 = vpop.f32.mrf.mxu1  ;;  %v10378_v33 = vadd.f32 %v19899_v25, %v10364_v30  ;;  %v18262_v25 = vld [vmem:[%s23493_s1 + $0x1598] sm:$0xff]  ;;  %v17540_v30 = vld [vmem:[%s23494_s0 + $0x390] sm:$0xf0] }
 0x2a3   :  { %11374 = vmatpush.bf16.msrb.mxu2 %v18266_v43  ;;  %11312 = vmatmul.bf16.vlgmr.msra.gmra.mxu1 %v12533_v21  ;;  %v21495_v43 = vpop.f32.mrf.mxu3  ;;  %v11090_v8 = vadd.f32 %v11089_v10, %v11076_v48  ;;  %v18254_v57 = vld [vmem:[%s23493_s1 + $0x1558] sm:$0xff]  ;;  %v18251_v10 = vld [vmem:[%s23493_s1 + $0x1540] sm:$0xff] }
 0x2a4   :  { %11360 = vmatpush.bf16.msrb.mxu1 %v18258_v34  ;;  %11340 = vmatmul.bf16.vlgmr.msra.gmra.mxu3 %v12541_v27  ;;  %v10392_v61 = vadd.f32 %v19907_v29, %v10378_v33  ;;  %v18270_v34 = vld [vmem:[%s23493_s1 + $0x15d8] sm:$0xff]  ;;  %v18245_v29 = vld [vmem:[%s23493_s1 + $0x1510] sm:$0xff]  ;;  %v18267_v33 = vld [vmem:[%s23493_s1 + $0x15c0] sm:$0xff] }
 0x2a5   :  { %11388 = vmatpush.bf16.msrb.mxu3 %v18274_v37  ;;  %v12552_v48 = vld [vmem:[%s23494_s0 + $0x158] sm:$0xf] }
 0x2a6   :  { %11347 = vmatpush.bf16.msrb.mxu0 %v18249_v18  ;;  %v10406_v21 = vadd.f32 %v20008_v16, %v10392_v61  ;;  %v18261_v18 = vld [vmem:[%s23493_s1 + $0x1590] sm:$0xff]  ;;  %v21604_v61 = vpop.f32.mrf.mxu0 }
 0x2a7   :  { %11375 = vmatpush.bf16.msrb.mxu2 %v18265_v56  ;;  %v11103_v0 = vpop.f32.mrf.mxu2  ;;  %v18253_v56 = vld [vmem:[%s23493_s1 + $0x1550] sm:$0xff] }
 0x2a8   :  { %11361 = vmatpush.bf16.msrb.mxu1 %v18257_v41  ;;  %v11104_v20 = vadd.f32 %v11103_v0, %v11090_v8  ;;  %v18269_v16 = vld [vmem:[%s23493_s1 + $0x15d0] sm:$0xff]  ;;  %v10420_v46 = vadd.f32 %v20016_v28, %v10406_v21  ;;  %v18244_v41 = vld [vmem:[%s23493_s1 + $0x1508] sm:$0xff] }
 0x2a9   :  { %11389 = vmatpush.bf16.msrb.mxu3 %v18273_v24  ;;  %v18260_v24 = vld [vmem:[%s23493_s1 + $0x1588] sm:$0xff]  ;;  %v17468_v8 = vld [vmem:[%s23494_s0 + $0x154] sm:$0xf] }
 0x2aa   :  { %11348 = vmatpush.bf16.msrb.mxu0 %v18248_v23  ;;  %v10434_v52 = vadd.f32 %v20030_v35, %v10420_v46  ;;  %v18252_v23 = vld [vmem:[%s23493_s1 + $0x1548] sm:$0xff]  ;;  %v18282_v35 = vld [vmem:[%s23493_s1 + $0x1638] sm:$0xff]  ;;  %v21612_v21 = vpop.f32.mrf.mxu1 }
 0x2ab   :  { %11376 = vmatpush.bf16.msrb.mxu2 %v18264_v5  ;;  %v11117_v37 = vpop.f32.mrf.mxu3  ;;  %v18268_v28 = vld [vmem:[%s23493_s1 + $0x15c8] sm:$0xff]  ;;  %v18243_v5 = vld [vmem:[%s23493_s1 + $0x1500] sm:$0xff] }
 0x2ac   :  { %11362 = vmatpush.bf16.msrb.mxu1 %v18256_v6  ;;  %v21532_v27 = vadd.f32 %v11117_v37, %v11104_v20  ;;  %v18259_v6 = vld [vmem:[%s23493_s1 + $0x1580] sm:$0xff]  ;;  %v18290_v20 = vld [vmem:[%s23493_s1 + $0x1678] sm:$0xff] }
 0x2ad   :  { %11390 = vmatpush.bf16.msrb.mxu3 %v18272_v12  ;;  %v18298_v12 = vld [vmem:[%s23493_s1 + $0x16b8] sm:$0xff] }
 0x2ae   :  { %11349 = vmatpush.bf16.msrb.mxu0 %v18247_v58  ;;  %v17541_v58 = vld [vmem:[%s23494_s0 + $0x398] sm:$0xf0] }
 0x2af   :  { %11377 = vmatpush.bf16.msrb.mxu2 %v18263_v9  ;;  %v10448_v9 = vadd.f32 %v20038_v38, %v10434_v52  ;;  %v17469_v38 = vld [vmem:[%s23494_s0 + $0x15c] sm:$0xf]  ;;  %v12553_v0 = vor.u32 %v17541_v58, %v12552_v48 }
 0x2b0   :  { %11363 = vmatpush.bf16.msrb.mxu1 %v18255_v14  ;;  %v12546_v14 = vld [vmem:[%s23494_s0 + $0x394] sm:$0xf0] }
 0x2b1   :  { %11391 = vmatpush.bf16.msrb.mxu3 %v18271_v22  ;;  %v12554_v22 = vld [vmem:[%s23494_s0 + $0x39c] sm:$0xf0]  ;;  %v18278_v58 = vld [vmem:[%s23493_s1 + $0x1618] sm:$0xff] }
 0x2b2   :  { %11350 = vmatpush.bf16.msrb.mxu0 %v18246_v11  ;;  %v10462_v11 = vadd.f32 %v20139_v36, %v10448_v9  ;;  %v12557_v37 = vor.u32 %v17469_v38, %v12554_v22  ;;  %v18281_v36 = vld [vmem:[%s23493_s1 + $0x1630] sm:$0xff] }
 0x2b3   :  { %11378 = vmatpush.bf16.msrb.mxu2 %v18262_v25  ;;  %v12545_v25 = vor.u32 %v17540_v30, %v12544_v51  ;;  %v21636_v52 = vpop.f32.mrf.mxu3 }
 0x2b4   :  { %11364 = vmatpush.bf16.msrb.mxu1 %v18254_v57  ;;  %v18306_v57 = vld [vmem:[%s23493_s1 + $0x16f8] sm:$0xff] }
 0x2b5   :  { %11392 = vmatpush.bf16.msrb.mxu3 %v18270_v34  ;;  %v12549_v34 = vor.u32 %v17468_v8, %v12546_v14  ;;  %v18286_v8 = vld [vmem:[%s23493_s1 + $0x1658] sm:$0xff] }
 0x2b6   :  { %11351 = vmatpush.bf16.msrb.mxu0 %v18245_v29  ;;  %v18297_v29 = vld [vmem:[%s23493_s1 + $0x16b0] sm:$0xff]  ;;  %v18302_v14 = vld [vmem:[%s23493_s1 + $0x16d8] sm:$0xff] }
 0x2b7   :  { %11379 = vmatpush.bf16.msrb.mxu2 %v18261_v18  ;;  %v10476_v18 = vadd.f32 %v20147_v42, %v10462_v11  ;;  %v18280_v42 = vld [vmem:[%s23493_s1 + $0x1628] sm:$0xff] }
 0x2b8   :  { %11365 = vmatpush.bf16.msrb.mxu1 %v18253_v56  ;;  %v18289_v56 = vld [vmem:[%s23493_s1 + $0x1670] sm:$0xff] }
 0x2b9   :  { %11393 = vmatpush.bf16.msrb.mxu3 %v18269_v16  ;;  %v18305_v16 = vld [vmem:[%s23493_s1 + $0x16f0] sm:$0xff]  ;;  %v10490_v46 = vadd.f32 %v20161_v47, %v10476_v18  ;;  %v18288_v47 = vld [vmem:[%s23493_s1 + $0x1668] sm:$0xff]  ;;  %v18291_v18 = vld [vmem:[%s23493_s1 + $0x1680] sm:$0xff] }
 0x2ba   :  { %11352 = vmatpush.bf16.msrb.mxu0 %v18244_v41  ;;  %v21628_v41 = vpop.f32.mrf.mxu2 }
 0x2bb   :  { %11380 = vmatpush.bf16.msrb.mxu2 %v18260_v24  ;;  %v18296_v24 = vld [vmem:[%s23493_s1 + $0x16a8] sm:$0xff] }
 0x2bc   :  { %11366 = vmatpush.bf16.msrb.mxu1 %v18252_v23  ;;  %v18304_v23 = vld [vmem:[%s23493_s1 + $0x16e8] sm:$0xff] }
 0x2bd   :  { %11394 = vmatpush.bf16.msrb.mxu3 %v18268_v28 }
 0x2be   :  { %11353 = vmatpush.bf16.msrb.mxu0 %v18243_v5  ;;  %v11131_v28 = vpop.f32.mrf.mxu0  ;;  %v10504_v5 = vadd.f32 %v20169_v50, %v10490_v46  ;;  %v18287_v50 = vld [vmem:[%s23493_s1 + $0x1660] sm:$0xff] }
 0x2bf   :  { %11381 = vmatpush.bf16.msrb.mxu2 %v18259_v6  ;;  %v11132_v6 = vadd.f32 %v11131_v28, %v21532_v27  ;;  %v18303_v27 = vld [vmem:[%s23493_s1 + $0x16e0] sm:$0xff] }
 0x2c0   :  { %11367 = vmatpush.bf16.msrb.mxu1 %v18251_v10  ;;  %v11145_v51 = vpop.f32.mrf.mxu1  ;;  %v10518_v30 = vadd.f32 %v20270_v53, %v10504_v5  ;;  %v18294_v53 = vld [vmem:[%s23493_s1 + $0x1698] sm:$0xff]  ;;  %v17542_v46 = vld [vmem:[%s23494_s0 + $0x3a0] sm:$0xf0] }
 0x2c1   :  { %11395 = vmatpush.bf16.msrb.mxu3 %v18267_v33  ;;  %11354 = vmatmul.bf16.vlgmr.msrb.gmra.mxu0 %v12545_v25  ;;  %v11146_v48 = vadd.f32 %v11145_v51, %v11132_v6  ;;  %v18293_v25 = vld [vmem:[%s23493_s1 + $0x1690] sm:$0xff]  ;;  %v18299_v28 = vld [vmem:[%s23493_s1 + $0x16c0] sm:$0xff]  ;;  %v12562_v6 = vld [vmem:[%s23494_s0 + $0x3a4] sm:$0xf0] }
 0x2c2   :  { %11402 = vmatpush.bf16.msra.mxu0 %v18282_v35  ;;  %11382 = vmatmul.bf16.vlgmr.msrb.gmra.mxu2 %v12553_v0  ;;  %v18279_v35 = vld [vmem:[%s23493_s1 + $0x1620] sm:$0xff]  ;;  %v10532_v10 = vadd.f32 %v20278_v59, %v10518_v30  ;;  %v18277_v59 = vld [vmem:[%s23493_s1 + $0x1610] sm:$0xff] }
 0x2c3   :  { %11430 = vmatpush.bf16.msra.mxu2 %v18298_v12  ;;  %11368 = vmatmul.bf16.vlgmr.msrb.gmra.mxu1 %v12549_v34  ;;  %v18295_v12 = vld [vmem:[%s23493_s1 + $0x16a0] sm:$0xff]  ;;  %v18285_v0 = vld [vmem:[%s23493_s1 + $0x1650] sm:$0xff]  ;;  %v18292_v34 = vld [vmem:[%s23493_s1 + $0x1688] sm:$0xff] }
 0x2c4   :  { %11416 = vmatpush.bf16.msra.mxu1 %v18290_v20  ;;  %11396 = vmatmul.bf16.vlgmr.msrb.gmra.mxu3 %v12557_v37  ;;  %v10546_v22 = vadd.f32 %v20292_v63, %v10532_v10  ;;  %v18301_v63 = vld [vmem:[%s23493_s1 + $0x16d0] sm:$0xff]  ;;  %v17470_v5 = vld [vmem:[%s23494_s0 + $0x164] sm:$0xf] }
 0x2c5   :  { %11444 = vmatpush.bf16.msra.mxu3 %v18306_v57  ;;  %v11159_v9 = vpop.f32.mrf.mxu2  ;;  %v18276_v57 = vld [vmem:[%s23493_s1 + $0x1608] sm:$0xff]  ;;  %v18329_v10 = vld [vmem:[%s23493_s1 + $0x17b0] sm:$0xff] }
 0x2c6   :  { %11403 = vmatpush.bf16.msra.mxu0 %v18281_v36  ;;  %v11160_v33 = vadd.f32 %v11159_v9, %v11146_v48  ;;  %v10560_v20 = vadd.f32 %v20300_v2, %v10546_v22  ;;  %v18284_v36 = vld [vmem:[%s23493_s1 + $0x1648] sm:$0xff]  ;;  %v21745_v48 = vpop.f32.mrf.mxu0 }
 0x2c7   :  { %11431 = vmatpush.bf16.msra.mxu2 %v18297_v29  ;;  %v11173_v38 = vpop.f32.mrf.mxu3  ;;  %v18300_v2 = vld [vmem:[%s23493_s1 + $0x16c8] sm:$0xff]  ;;  %v18275_v29 = vld [vmem:[%s23493_s1 + $0x1600] sm:$0xff] }
 0x2c8   :  { %11417 = vmatpush.bf16.msra.mxu1 %v18289_v56  ;;  %v21673_v11 = vadd.f32 %v11173_v38, %v11160_v33  ;;  %v10574_v37 = vadd.f32 %v20401_v19, %v10560_v20  ;;  %v18314_v19 = vld [vmem:[%s23493_s1 + $0x1738] sm:$0xff]  ;;  %v21753_v9 = vpop.f32.mrf.mxu1 }
 0x2c9   :  { %11445 = vmatpush.bf16.msra.mxu3 %v18305_v16  ;;  %v18330_v56 = vld [vmem:[%s23493_s1 + $0x17b8] sm:$0xff]  ;;  %v12560_v16 = vld [vmem:[%s23494_s0 + $0x160] sm:$0xf] }
 0x2ca   :  { %11404 = vmatpush.bf16.msra.mxu0 %v18280_v42  ;;  %v12568_v42 = vld [vmem:[%s23494_s0 + $0x168] sm:$0xf]  ;;  %v12561_v51 = vor.u32 %v17542_v46, %v12560_v16  ;;  %v18318_v46 = vld [vmem:[%s23493_s1 + $0x1758] sm:$0xff] }
 0x2cb   :  { %11432 = vmatpush.bf16.msra.mxu2 %v18296_v24  ;;  %v17543_v24 = vld [vmem:[%s23494_s0 + $0x3a8] sm:$0xf0] }
 0x2cc   :  { %11418 = vmatpush.bf16.msra.mxu1 %v18288_v47  ;;  %v10588_v47 = vadd.f32 %v20409_v32, %v10574_v37  ;;  %v17471_v32 = vld [vmem:[%s23494_s0 + $0x16c] sm:$0xf]  ;;  %v12569_v30 = vor.u32 %v17543_v24, %v12568_v42  ;;  %v18327_v37 = vld [vmem:[%s23493_s1 + $0x17a0] sm:$0xff]  ;;  %v18334_v42 = vld [vmem:[%s23493_s1 + $0x17d8] sm:$0xff] }
 0x2cd   :  { %11446 = vmatpush.bf16.msra.mxu3 %v18304_v23  ;;  %v18283_v23 = vld [vmem:[%s23493_s1 + $0x1640] sm:$0xff]  ;;  %v21769_v22 = vpop.f32.mrf.mxu2 }
 0x2ce   :  { %11405 = vmatpush.bf16.msra.mxu0 %v18279_v35  ;;  %v12570_v35 = vld [vmem:[%s23494_s0 + $0x3ac] sm:$0xf0] }
 0x2cf   :  { %11433 = vmatpush.bf16.msra.mxu2 %v18295_v12  ;;  %v10602_v12 = vadd.f32 %v20423_v40, %v10588_v47  ;;  %v18313_v40 = vld [vmem:[%s23493_s1 + $0x1730] sm:$0xff] }
 0x2d0   :  { %11419 = vmatpush.bf16.msra.mxu1 %v18287_v50  ;;  %v18322_v50 = vld [vmem:[%s23493_s1 + $0x1778] sm:$0xff] }
 0x2d1   :  { %11447 = vmatpush.bf16.msra.mxu3 %v18303_v27  ;;  %v18338_v27 = vld [vmem:[%s23493_s1 + $0x17f8] sm:$0xff]  ;;  %v10616_v33 = vadd.f32 %v20431_v45, %v10602_v12  ;;  %v18312_v45 = vld [vmem:[%s23493_s1 + $0x1728] sm:$0xff] }
 0x2d2   :  { %11406 = vmatpush.bf16.msra.mxu0 %v18278_v58  ;;  %v12565_v58 = vor.u32 %v17470_v5, %v12562_v6  ;;  %v18317_v5 = vld [vmem:[%s23493_s1 + $0x1750] sm:$0xff] }
 0x2d3   :  { %11434 = vmatpush.bf16.msra.mxu2 %v18294_v53  ;;  %v12573_v53 = vor.u32 %v17471_v32, %v12570_v35  ;;  %v10630_v38 = vadd.f32 %v20532_v60, %v10616_v33  ;;  %v18320_v60 = vld [vmem:[%s23493_s1 + $0x1768] sm:$0xff] }
 0x2d4   :  { %11420 = vmatpush.bf16.msra.mxu1 %v18286_v8  ;;  %v18321_v8 = vld [vmem:[%s23493_s1 + $0x1770] sm:$0xff]  ;;  %v18308_v32 = vld [vmem:[%s23493_s1 + $0x1708] sm:$0xff] }
 0x2d5   :  { %11448 = vmatpush.bf16.msra.mxu3 %v18302_v14  ;;  %v18337_v14 = vld [vmem:[%s23493_s1 + $0x17f0] sm:$0xff]  ;;  %v10644_v20 = vadd.f32 %v20540_v1, %v10630_v38  ;;  %v18319_v1 = vld [vmem:[%s23493_s1 + $0x1760] sm:$0xff]  ;;  %v18324_v35 = vld [vmem:[%s23493_s1 + $0x1788] sm:$0xff] }
 0x2d6   :  { %11407 = vmatpush.bf16.msra.mxu0 %v18277_v59  ;;  %v18328_v59 = vld [vmem:[%s23493_s1 + $0x17a8] sm:$0xff]  ;;  %v17472_v38 = vld [vmem:[%s23494_s0 + $0x174] sm:$0xf] }
 0x2d7   :  { %11435 = vmatpush.bf16.msra.mxu2 %v18293_v25  ;;  %v21777_v25 = vpop.f32.mrf.mxu3 }
 0x2d8   :  { %11421 = vmatpush.bf16.msra.mxu1 %v18285_v0  ;;  %v18336_v0 = vld [vmem:[%s23493_s1 + $0x17e8] sm:$0xff] }
 0x2d9   :  { %11449 = vmatpush.bf16.msra.mxu3 %v18301_v63 }
 0x2da   :  { %11408 = vmatpush.bf16.msra.mxu0 %v18276_v57 }
 0x2db   :  { %11436 = vmatpush.bf16.msra.mxu2 %v18292_v34  ;;  %v18311_v34 = vld [vmem:[%s23493_s1 + $0x1720] sm:$0xff] }
 0x2dc   :  { %11422 = vmatpush.bf16.msra.mxu1 %v18284_v36 }
 0x2dd   :  { %11450 = vmatpush.bf16.msra.mxu3 %v18300_v2  ;;  %v10658_v2 = vadd.f32 %v20554_v17, %v10644_v20  ;;  %v18326_v17 = vld [vmem:[%s23493_s1 + $0x1798] sm:$0xff] }
 0x2de   :  { %11409 = vmatpush.bf16.msra.mxu0 %v18275_v29  ;;  %v11187_v63 = vpop.f32.mrf.mxu0 }
 0x2df   :  { %11437 = vmatpush.bf16.msra.mxu2 %v18291_v18  ;;  %v11188_v57 = vadd.f32 %v11187_v63, %v21673_v11  ;;  %v18335_v11 = vld [vmem:[%s23493_s1 + $0x17e0] sm:$0xff]  ;;  %v18310_v18 = vld [vmem:[%s23493_s1 + $0x1718] sm:$0xff] }
 0x2e0   :  { %11423 = vmatpush.bf16.msra.mxu1 %v18283_v23  ;;  %v11201_v36 = vpop.f32.mrf.mxu1 }
 0x2e1   :  { %11451 = vmatpush.bf16.msra.mxu3 %v18299_v28  ;;  %11410 = vmatmul.bf16.vlgmr.msra.gmra.mxu0 %v12561_v51  ;;  %v11202_v29 = vadd.f32 %v11201_v36, %v11188_v57  ;;  %v18325_v28 = vld [vmem:[%s23493_s1 + $0x1790] sm:$0xff]  ;;  %v18316_v51 = vld [vmem:[%s23493_s1 + $0x1748] sm:$0xff]  ;;  %v18354_v57 = vld [vmem:[%s23493_s1 + $0x1878] sm:$0xff] }
 0x2e2   :  { %11458 = vmatpush.bf16.msrb.mxu0 %v18314_v19  ;;  %11438 = vmatmul.bf16.vlgmr.msra.gmra.mxu2 %v12569_v30  ;;  %v18307_v30 = vld [vmem:[%s23493_s1 + $0x1700] sm:$0xff] }
 0x2e3   :  { %11486 = vmatpush.bf16.msrb.mxu2 %v18330_v56  ;;  %11424 = vmatmul.bf16.vlgmr.msra.gmra.mxu1 %v12565_v58  ;;  %v10672_v56 = vadd.f32 %v20562_v4, %v10658_v2  ;;  %v18309_v4 = vld [vmem:[%s23493_s1 + $0x1710] sm:$0xff] }
 0x2e4   :  { %11472 = vmatpush.bf16.msrb.mxu1 %v18322_v50  ;;  %11452 = vmatmul.bf16.vlgmr.msra.gmra.mxu3 %v12573_v53  ;;  %v18323_v50 = vld [vmem:[%s23493_s1 + $0x1780] sm:$0xff]  ;;  %v12576_v58 = vld [vmem:[%s23494_s0 + $0x170] sm:$0xf]  ;;  %v17544_v53 = vld [vmem:[%s23494_s0 + $0x3b0] sm:$0xf0] }
 0x2e5   :  { %11500 = vmatpush.bf16.msrb.mxu3 %v18338_v27  ;;  %v11215_v19 = vpop.f32.mrf.mxu2  ;;  %v10686_v47 = vadd.f32 %v20663_v55, %v10672_v56  ;;  %v18333_v55 = vld [vmem:[%s23493_s1 + $0x17d0] sm:$0xff]  ;;  %v18362_v27 = vld [vmem:[%s23493_s1 + $0x18b8] sm:$0xff] }
 0x2e6   :  { %11459 = vmatpush.bf16.msrb.mxu0 %v18313_v40  ;;  %v11216_v16 = vadd.f32 %v11215_v19, %v11202_v29  ;;  %v12584_v40 = vld [vmem:[%s23494_s0 + $0x178] sm:$0xf]  ;;  %v21886_v20 = vpop.f32.mrf.mxu0  ;;  %v18361_v29 = vld [vmem:[%s23493_s1 + $0x18b0] sm:$0xff]  ;;  %v23513_v19 = vld [vmem:[#allocation3_spill] sm:$0xff] }
 0x2e7   :  { %11487 = vmatpush.bf16.msrb.mxu2 %v18329_v10  ;;  %v11229_v24 = vpop.f32.mrf.mxu3  ;;  %v10700_v6 = vadd.f32 %v20671_v62, %v10686_v47  ;;  %v18332_v62 = vld [vmem:[%s23493_s1 + $0x17c8] sm:$0xff]  ;;  %v17545_v10 = vld [vmem:[%s23494_s0 + $0x3b8] sm:$0xf0] }
 0x2e8   :  { %11473 = vmatpush.bf16.msrb.mxu1 %v18321_v8  ;;  %v21814_v23 = vadd.f32 %v11229_v24, %v11216_v16  ;;  %v18315_v8 = vld [vmem:[%s23493_s1 + $0x1740] sm:$0xff]  ;;  %v12585_v63 = vor.u32 %v17545_v10, %v12584_v40  ;;  %v21894_v2 = vpop.f32.mrf.mxu1  ;;  %v18352_v47 = vld [vmem:[%s23493_s1 + $0x1868] sm:$0xff] }
 0x2e9   :  { %11501 = vmatpush.bf16.msrb.mxu3 %v18337_v14  ;;  %v10714_v12 = vadd.f32 %v20685_v13, %v10700_v6  ;;  %v18346_v13 = vld [vmem:[%s23493_s1 + $0x1838] sm:$0xff]  ;;  %v18331_v14 = vld [vmem:[%s23493_s1 + $0x17c0] sm:$0xff] }
 0x2ea   :  { %11460 = vmatpush.bf16.msrb.mxu0 %v18312_v45  ;;  %v12578_v45 = vld [vmem:[%s23494_s0 + $0x3b4] sm:$0xf0] }
 0x2eb   :  { %11488 = vmatpush.bf16.msrb.mxu2 %v18328_v59  ;;  %v10728_v33 = vadd.f32 %v20693_v31, %v10714_v12  ;;  %v17473_v31 = vld [vmem:[%s23494_s0 + $0x17c] sm:$0xf]  ;;  %v12586_v59 = vld [vmem:[%s23494_s0 + $0x3bc] sm:$0xf0] }
 0x2ec   :  { %11474 = vmatpush.bf16.msrb.mxu1 %v18320_v60  ;;  %v12589_v36 = vor.u32 %v17473_v31, %v12586_v59  ;;  %v18341_v59 = vld [vmem:[%s23493_s1 + $0x1810] sm:$0xff] }
 0x2ed   :  { %11502 = vmatpush.bf16.msrb.mxu3 %v18336_v0  ;;  %v10742_v60 = vadd.f32 %v20794_v3, %v10728_v33  ;;  %v12577_v0 = vor.u32 %v17544_v53, %v12576_v58  ;;  %v18345_v3 = vld [vmem:[%s23493_s1 + $0x1830] sm:$0xff]  ;;  %v21910_v16 = vpop.f32.mrf.mxu2  ;;  %v23516_v53 = vld [vmem:[#allocation6_spill] sm:$0xff]  ;;  %v18350_v33 = vld [vmem:[%s23493_s1 + $0x1858] sm:$0xff] }
 0x2ee   :  { %11461 = vmatpush.bf16.msrb.mxu0 %v18311_v34  ;;  %v18370_v34 = vld [vmem:[%s23493_s1 + $0x18f8] sm:$0xff] }
 0x2ef   :  { %11489 = vmatpush.bf16.msrb.mxu2 %v18327_v37  ;;  %v12581_v37 = vor.u32 %v17472_v38, %v12578_v45  ;;  %v21918_v24 = vpop.f32.mrf.mxu3  ;;  %v23517_v38 = vld [vmem:[#allocation7_spill] sm:$0xff] }
 0x2f0   :  { %11475 = vmatpush.bf16.msrb.mxu1 %v18319_v1  ;;  %v23512_v1 = vld [vmem:[#allocation2_spill] sm:$0xff] }
 0x2f1   :  { %11503 = vmatpush.bf16.msrb.mxu3 %v18335_v11  ;;  %v10756_v11 = vadd.f32 %v23512_v1, %v10742_v60  ;;  %v18357_v60 = vld [vmem:[%s23493_s1 + $0x1890] sm:$0xff]  ;;  %v18348_v1 = vld [vmem:[%s23493_s1 + $0x1848] sm:$0xff] }
 0x2f2   :  { %11462 = vmatpush.bf16.msrb.mxu0 %v18310_v18  ;;  %v18353_v18 = vld [vmem:[%s23493_s1 + $0x1870] sm:$0xff] }
 0x2f3   :  { %11490 = vmatpush.bf16.msrb.mxu2 %v18326_v17  ;;  %v18369_v17 = vld [vmem:[%s23493_s1 + $0x18f0] sm:$0xff]  ;;  %v10770_v56 = vadd.f32 %v23513_v19, %v10756_v11  ;;  %v18364_v11 = vld [vmem:[%s23493_s1 + $0x18c8] sm:$0xff]  ;;  %v18378_v19 = vld [vmem:[%s23493_s1 + $0x1938] sm:$0xff] }
 0x2f4   :  { %11476 = vmatpush.bf16.msrb.mxu1 %v18318_v46  ;;  %v18344_v46 = vld [vmem:[%s23493_s1 + $0x1828] sm:$0xff] }
 0x2f5   :  { %11504 = vmatpush.bf16.msrb.mxu3 %v18334_v42  ;;  %v18360_v42 = vld [vmem:[%s23493_s1 + $0x18a8] sm:$0xff] }
 0x2f6   :  { %11463 = vmatpush.bf16.msrb.mxu0 %v18309_v4  ;;  %v18368_v4 = vld [vmem:[%s23493_s1 + $0x18e8] sm:$0xff] }
 0x2f7   :  { %11491 = vmatpush.bf16.msrb.mxu2 %v18325_v28 }
 0x2f8   :  { %11477 = vmatpush.bf16.msrb.mxu1 %v18317_v5  ;;  %v23514_v5 = vld [vmem:[#allocation4_spill] sm:$0xff] }
 0x2f9   :  { %11505 = vmatpush.bf16.msrb.mxu3 %v18333_v55  ;;  %v10784_v55 = vadd.f32 %v23514_v5, %v10770_v56  ;;  %v18394_v56 = vld [vmem:[%s23493_s1 + $0x19b8] sm:$0xff] }
 0x2fa   :  { %11464 = vmatpush.bf16.msrb.mxu0 %v18308_v32  ;;  %v18343_v32 = vld [vmem:[%s23493_s1 + $0x1820] sm:$0xff] }
 0x2fb   :  { %11492 = vmatpush.bf16.msrb.mxu2 %v18324_v35  ;;  %v18359_v35 = vld [vmem:[%s23493_s1 + $0x18a0] sm:$0xff] }
 0x2fc   :  { %11478 = vmatpush.bf16.msrb.mxu1 %v18316_v51  ;;  %v23515_v51 = vld [vmem:[#allocation5_spill] sm:$0xff] }
 0x2fd   :  { %11506 = vmatpush.bf16.msrb.mxu3 %v18332_v62  ;;  %v10798_v62 = vadd.f32 %v23515_v51, %v10784_v55  ;;  %v18347_v55 = vld [vmem:[%s23493_s1 + $0x1840] sm:$0xff]  ;;  %v12602_v51 = vld [vmem:[%s23494_s0 + $0x3cc] sm:$0xf0] }
 0x2fe   :  { %11465 = vmatpush.bf16.msrb.mxu0 %v18307_v30  ;;  %v11243_v28 = vpop.f32.mrf.mxu0 }
 0x2ff   :  { %11493 = vmatpush.bf16.msrb.mxu2 %v18323_v50  ;;  %v11244_v6 = vadd.f32 %v11243_v28, %v21814_v23  ;;  %v18351_v23 = vld [vmem:[%s23493_s1 + $0x1860] sm:$0xff]  ;;  %v10812_v40 = vadd.f32 %v23516_v53, %v10798_v62  ;;  %v23521_v62 = vld [vmem:[#allocation11_spill] sm:$0xff] }
 0x300   :  { %11479 = vmatpush.bf16.msrb.mxu1 %v18315_v8  ;;  %v11257_v12 = vpop.f32.mrf.mxu1  ;;  %v18367_v50 = vld [vmem:[%s23493_s1 + $0x18e0] sm:$0xff]  ;;  %v18366_v8 = vld [vmem:[%s23493_s1 + $0x18d8] sm:$0xff] }
 0x301   :  { %11507 = vmatpush.bf16.msrb.mxu3 %v18331_v14  ;;  %11466 = vmatmul.bf16.vlgmr.msrb.gmra.mxu0 %v12577_v0  ;;  %v11258_v30 = vadd.f32 %v11257_v12, %v11244_v6  ;;  %v10826_v45 = vadd.f32 %v23517_v38, %v10812_v40  ;;  %v18349_v0 = vld [vmem:[%s23493_s1 + $0x1850] sm:$0xff]  ;;  %v23520_v28 = vld [vmem:[#allocation10_spill] sm:$0xff]  ;;  %v17475_v12 = vld [vmem:[%s23494_s0 + $0x18c] sm:$0xf] }
 0x302   :  { %11514 = vmatpush.bf16.msra.mxu0 %v18346_v13  ;;  %11494 = vmatmul.bf16.vlgmr.msrb.gmra.mxu2 %v12585_v63  ;;  %v18342_v13 = vld [vmem:[%s23493_s1 + $0x1818] sm:$0xff]  ;;  %v18365_v63 = vld [vmem:[%s23493_s1 + $0x18d0] sm:$0xff]  ;;  %v18363_v6 = vld [vmem:[%s23493_s1 + $0x18c0] sm:$0xff]  ;;  %v12605_v40 = vor.u32 %v17475_v12, %v12602_v51 }
 0x303   :  { %11542 = vmatpush.bf16.msra.mxu2 %v18362_v27  ;;  %11480 = vmatmul.bf16.vlgmr.msrb.gmra.mxu1 %v12581_v37  ;;  %v18358_v27 = vld [vmem:[%s23493_s1 + $0x1898] sm:$0xff]  ;;  %v18340_v37 = vld [vmem:[%s23493_s1 + $0x1808] sm:$0xff] }
 0x304   :  { %11528 = vmatpush.bf16.msra.mxu1 %v18354_v57  ;;  %11508 = vmatmul.bf16.vlgmr.msrb.gmra.mxu3 %v12589_v36  ;;  %v23518_v57 = vld [vmem:[#allocation8_spill] sm:$0xff]  ;;  %v18356_v36 = vld [vmem:[%s23493_s1 + $0x1888] sm:$0xff]  ;;  %v18382_v12 = vld [vmem:[%s23493_s1 + $0x1958] sm:$0xff] }
 0x305   :  { %11556 = vmatpush.bf16.msra.mxu3 %v18370_v34  ;;  %v11271_v58 = vpop.f32.mrf.mxu2  ;;  %v10840_v34 = vadd.f32 %v23518_v57, %v10826_v45  ;;  %v18385_v45 = vld [vmem:[%s23493_s1 + $0x1970] sm:$0xff]  ;;  %v18376_v57 = vld [vmem:[%s23493_s1 + $0x1928] sm:$0xff]  ;;  %v18398_v51 = vld [vmem:[%s23493_s1 + $0x19d8] sm:$0xff] }
 0x306   :  { %11515 = vmatpush.bf16.msra.mxu0 %v18345_v3  ;;  %v11272_v10 = vadd.f32 %v11271_v58, %v11258_v30  ;;  %v23519_v3 = vld [vmem:[#allocation9_spill] sm:$0xff] }
 0x307   :  { %11543 = vmatpush.bf16.msra.mxu2 %v18361_v29  ;;  %v11285_v14 = vpop.f32.mrf.mxu3  ;;  %v10854_v29 = vadd.f32 %v23519_v3, %v10840_v34  ;;  %v18402_v58 = vld [vmem:[%s23493_s1 + $0x19f8] sm:$0xff]  ;;  %v18392_v34 = vld [vmem:[%s23493_s1 + $0x19a8] sm:$0xff] }
 0x308   :  { %11529 = vmatpush.bf16.msra.mxu1 %v18353_v18  ;;  %v21955_v31 = vadd.f32 %v11285_v14, %v11272_v10  ;;  %v18339_v18 = vld [vmem:[%s23493_s1 + $0x1800] sm:$0xff]  ;;  %v22035_v10 = vpop.f32.mrf.mxu1  ;;  %v23522_v14 = vld [vmem:[#allocation12_spill] sm:$0xff]  ;;  %v18400_v3 = vld [vmem:[%s23493_s1 + $0x19e8] sm:$0xff] }
 0x309   :  { %11557 = vmatpush.bf16.msra.mxu3 %v18369_v17  ;;  %v18355_v17 = vld [vmem:[%s23493_s1 + $0x1880] sm:$0xff]  ;;  %v10868_v5 = vadd.f32 %v23520_v28, %v10854_v29  ;;  %v18374_v28 = vld [vmem:[%s23493_s1 + $0x1918] sm:$0xff] }
 0x30a   :  { %11516 = vmatpush.bf16.msra.mxu0 %v18344_v46  ;;  %v12592_v46 = vld [vmem:[%s23494_s0 + $0x180] sm:$0xf] }
 0x30b   :  { %11544 = vmatpush.bf16.msra.mxu2 %v18360_v42  ;;  %v17546_v42 = vld [vmem:[%s23494_s0 + $0x3c0] sm:$0xf0]  ;;  %v10882_v30 = vadd.f32 %v23521_v62, %v10868_v5  ;;  %v18390_v5 = vld [vmem:[%s23493_s1 + $0x1998] sm:$0xff] }
 0x30c   :  { %11530 = vmatpush.bf16.msra.mxu1 %v18352_v47  ;;  %v12600_v47 = vld [vmem:[%s23494_s0 + $0x188] sm:$0xf] }
 0x30d   :  { %11558 = vmatpush.bf16.msra.mxu3 %v18368_v4  ;;  %v17547_v4 = vld [vmem:[%s23494_s0 + $0x3c8] sm:$0xf0]  ;;  %v10896_v38 = vadd.f32 %v23522_v14, %v10882_v30 }
 0x30e   :  { %11517 = vmatpush.bf16.msra.mxu0 %v18343_v32  ;;  %v17474_v32 = vld [vmem:[%s23494_s0 + $0x184] sm:$0xf]  ;;  %v18380_v14 = vld [vmem:[%s23493_s1 + $0x1948] sm:$0xff] }
 0x30f   :  { %11545 = vmatpush.bf16.msra.mxu2 %v18359_v35  ;;  %v12594_v35 = vld [vmem:[%s23494_s0 + $0x3c4] sm:$0xf0] }
 0x310   :  { %11531 = vmatpush.bf16.msra.mxu1 %v18351_v23  ;;  %v12593_v23 = vor.u32 %v17546_v42, %v12592_v46  ;;  %v12597_v53 = vor.u32 %v17474_v32, %v12594_v35  ;;  %v23525_v46 = vld [vmem:[#allocation15_spill] sm:$0xff] }
 0x311   :  { %11559 = vmatpush.bf16.msra.mxu3 %v18367_v50  ;;  %v12601_v50 = vor.u32 %v17547_v4, %v12600_v47  ;;  %v18399_v4 = vld [vmem:[%s23493_s1 + $0x19e0] sm:$0xff] }
 0x312   :  { %11518 = vmatpush.bf16.msra.mxu0 %v18342_v13  ;;  %v22027_v13 = vpop.f32.mrf.mxu0 }
 0x313   :  { %11546 = vmatpush.bf16.msra.mxu2 %v18358_v27  ;;  %v18386_v27 = vld [vmem:[%s23493_s1 + $0x1978] sm:$0xff] }
 0x314   :  { %11532 = vmatpush.bf16.msra.mxu1 %v18350_v33  ;;  %v18377_v33 = vld [vmem:[%s23493_s1 + $0x1930] sm:$0xff] }
 0x315   :  { %11560 = vmatpush.bf16.msra.mxu3 %v18366_v8  ;;  %v18393_v8 = vld [vmem:[%s23493_s1 + $0x19b0] sm:$0xff] }
 0x316   :  { %11519 = vmatpush.bf16.msra.mxu0 %v18341_v59  ;;  %v18401_v59 = vld [vmem:[%s23493_s1 + $0x19f0] sm:$0xff] }
 0x317   :  { %11547 = vmatpush.bf16.msra.mxu2 %v18357_v60  ;;  %v23523_v60 = vld [vmem:[#allocation13_spill] sm:$0xff] }
 0x318   :  { %11533 = vmatpush.bf16.msra.mxu1 %v18349_v0  ;;  %v10910_v0 = vadd.f32 %v23523_v60, %v10896_v38  ;;  %v18371_v38 = vld [vmem:[%s23493_s1 + $0x1900] sm:$0xff]  ;;  %v12608_v60 = vld [vmem:[%s23494_s0 + $0x190] sm:$0xf] }
 0x319   :  { %11561 = vmatpush.bf16.msra.mxu3 %v18365_v63  ;;  %v22051_v63 = vpop.f32.mrf.mxu2 }
 0x31a   :  { %11520 = vmatpush.bf16.msra.mxu0 %v18340_v37  ;;  %v22059_v37 = vpop.f32.mrf.mxu3 }
 0x31b   :  { %11548 = vmatpush.bf16.msra.mxu2 %v18356_v36  ;;  %v18384_v36 = vld [vmem:[%s23493_s1 + $0x1968] sm:$0xff] }
 0x31c   :  { %11534 = vmatpush.bf16.msra.mxu1 %v18348_v1  ;;  %v23524_v1 = vld [vmem:[#allocation14_spill] sm:$0xff] }
 0x31d   :  { %11562 = vmatpush.bf16.msra.mxu3 %v18364_v11  ;;  %v10924_v11 = vadd.f32 %v23524_v1, %v10910_v0  ;;  %v17548_v0 = vld [vmem:[%s23494_s0 + $0x3d0] sm:$0xf0] }
 0x31e   :  { %11521 = vmatpush.bf16.msra.mxu0 %v18339_v18  ;;  %v11299_v29 = vpop.f32.mrf.mxu0  ;;  %v17476_v1 = vld [vmem:[%s23494_s0 + $0x194] sm:$0xf] }
 0x31f   :  { %11549 = vmatpush.bf16.msra.mxu2 %v18355_v17  ;;  %v11300_v18 = vadd.f32 %v11299_v29, %v21955_v31  ;;  %v18375_v17 = vld [vmem:[%s23493_s1 + $0x1920] sm:$0xff]  ;;  %v10938_v42 = vadd.f32 %v23525_v46, %v10924_v11  ;;  %v12610_v11 = vld [vmem:[%s23494_s0 + $0x3d4] sm:$0xf0] }
 0x320   :  { %11535 = vmatpush.bf16.msra.mxu1 %v18347_v55  ;;  %v18383_v31 = vld [vmem:[%s23493_s1 + $0x1960] sm:$0xff] }
 0x321   :  { %11563 = vmatpush.bf16.msra.mxu3 %v18363_v6  ;;  %11522 = vmatmul.bf16.vlgmr.msra.gmra.mxu0 %v12593_v23  ;;  %v23526_v6 = vld [vmem:[#allocation16_spill] sm:$0xff]  ;;  %v18395_v29 = vld [vmem:[%s23493_s1 + $0x19c0] sm:$0xff] }
 0x322   :  { %11570 = vmatpush.bf16.msrb.mxu0 %v18378_v19  ;;  %11550 = vmatmul.bf16.vlgmr.msra.gmra.mxu2 %v12601_v50  ;;  %v18391_v19 = vld [vmem:[%s23493_s1 + $0x19a0] sm:$0xff]  ;;  %v10952_v32 = vadd.f32 %v23526_v6, %v10938_v42  ;;  %v18373_v50 = vld [vmem:[%s23493_s1 + $0x1910] sm:$0xff]  ;;  %v18418_v42 = vld [vmem:[%s23493_s1 + $0x1a78] sm:$0xff] }
 0x323   :  { %11598 = vmatpush.bf16.msrb.mxu2 %v18394_v56  ;;  %11536 = vmatmul.bf16.vlgmr.msra.gmra.mxu1 %v12597_v53  ;;  %v11313_v56 = vpop.f32.mrf.mxu1  ;;  %v18417_v6 = vld [vmem:[%s23493_s1 + $0x1a70] sm:$0xff] }
 0x324   :  { %11584 = vmatpush.bf16.msrb.mxu1 %v18386_v27  ;;  %11564 = vmatmul.bf16.vlgmr.msra.gmra.mxu3 %v12605_v40  ;;  %v11314_v47 = vadd.f32 %v11313_v56, %v11300_v18  ;;  %v10966_v30 = vadd.f32 %v21322_v49, %v10952_v32  ;;  %v18389_v27 = vld [vmem:[%s23493_s1 + $0x1990] sm:$0xff]  ;;  %v18372_v40 = vld [vmem:[%s23493_s1 + $0x1908] sm:$0xff]  ;;  %v12618_v18 = vld [vmem:[%s23494_s0 + $0x3dc] sm:$0xf0] }
 0x325   :  { %11612 = vmatpush.bf16.msrb.mxu3 %v18402_v58  ;;  %v11327_v55 = vpop.f32.mrf.mxu2  ;;  %v18381_v58 = vld [vmem:[%s23493_s1 + $0x1950] sm:$0xff] }
 0x326   :  { %11571 = vmatpush.bf16.msrb.mxu0 %v18377_v33  ;;  %v11328_v35 = vadd.f32 %v11327_v55, %v11314_v47  ;;  %v18397_v49 = vld [vmem:[%s23493_s1 + $0x19d0] sm:$0xff]  ;;  %v10980_v53 = vadd.f32 %v21331_v44, %v10966_v30  ;;  %v18388_v33 = vld [vmem:[%s23493_s1 + $0x1988] sm:$0xff]  ;;  %v22168_v46 = vpop.f32.mrf.mxu0  ;;  %v18434_v47 = vld [vmem:[%s23493_s1 + $0x1af8] sm:$0xff] }
 0x327   :  { %11599 = vmatpush.bf16.msrb.mxu2 %v18393_v8  ;;  %v11341_v62 = vpop.f32.mrf.mxu3  ;;  %v18396_v44 = vld [vmem:[%s23493_s1 + $0x19c8] sm:$0xff]  ;;  %v18433_v32 = vld [vmem:[%s23493_s1 + $0x1af0] sm:$0xff] }
 0x328   :  { %11585 = vmatpush.bf16.msrb.mxu1 %v18385_v45  ;;  %v22096_v23 = vadd.f32 %v11341_v62, %v11328_v35  ;;  %v10994_v8 = vadd.f32 %v21346_v7, %v10980_v53  ;;  %v18387_v45 = vld [vmem:[%s23493_s1 + $0x1980] sm:$0xff]  ;;  %v18410_v7 = vld [vmem:[%s23493_s1 + $0x1a38] sm:$0xff]  ;;  %v18432_v30 = vld [vmem:[%s23493_s1 + $0x1ae8] sm:$0xff] }
 0x329   :  { %11613 = vmatpush.bf16.msrb.mxu3 %v18401_v59  ;;  %v18426_v59 = vld [vmem:[%s23493_s1 + $0x1ab8] sm:$0xff]  ;;  %v18423_v53 = vld [vmem:[%s23493_s1 + $0x1aa0] sm:$0xff] }
 0x32a   :  { %11572 = vmatpush.bf16.msrb.mxu0 %v18376_v57  ;;  %v12616_v57 = vld [vmem:[%s23494_s0 + $0x198] sm:$0xf] }
 0x32b   :  { %11600 = vmatpush.bf16.msrb.mxu2 %v18392_v34  ;;  %v17549_v34 = vld [vmem:[%s23494_s0 + $0x3d8] sm:$0xf0] }
 0x32c   :  { %11586 = vmatpush.bf16.msrb.mxu1 %v18384_v36  ;;  %v11008_v36 = vadd.f32 %v21354_v39, %v10994_v8  ;;  %v17477_v39 = vld [vmem:[%s23494_s0 + $0x19c] sm:$0xf]  ;;  %v12617_v56 = vor.u32 %v17549_v34, %v12616_v57  ;;  %v18421_v34 = vld [vmem:[%s23493_s1 + $0x1a90] sm:$0xff] }
 0x32d   :  { %11614 = vmatpush.bf16.msrb.mxu3 %v18400_v3  ;;  %v18379_v3 = vld [vmem:[%s23493_s1 + $0x1940] sm:$0xff] }
 0x32e   :  { %11573 = vmatpush.bf16.msrb.mxu0 %v18375_v17  ;;  %v11022_v17 = vadd.f32 %v21463_v15, %v11008_v36  ;;  %v18409_v15 = vld [vmem:[%s23493_s1 + $0x1a30] sm:$0xff] }
 0x32f   :  { %11601 = vmatpush.bf16.msrb.mxu2 %v18391_v19  ;;  %v12609_v19 = vor.u32 %v17548_v0, %v12608_v60  ;;  %v22200_v62 = vpop.f32.mrf.mxu3  ;;  %v18413_v36 = vld [vmem:[%s23493_s1 + $0x1a50] sm:$0xff] }
 0x330   :  { %11587 = vmatpush.bf16.msrb.mxu1 %v18383_v31  ;;  %v12613_v31 = vor.u32 %v17476_v1, %v12610_v11  ;;  %v11036_v55 = vadd.f32 %v21471_v26, %v11022_v17  ;;  %v18408_v26 = vld [vmem:[%s23493_s1 + $0x1a28] sm:$0xff]  ;;  %v18419_v17 = vld [vmem:[%s23493_s1 + $0x1a80] sm:$0xff] }
 0x331   :  { %11615 = vmatpush.bf16.msrb.mxu3 %v18399_v4  ;;  %v12621_v4 = vor.u32 %v17477_v39, %v12618_v18  ;;  %v18420_v1 = vld [vmem:[%s23493_s1 + $0x1a88] sm:$0xff]  ;;  %v18403_v18 = vld [vmem:[%s23493_s1 + $0x1a00] sm:$0xff] }
 0x332   :  { %11574 = vmatpush.bf16.msrb.mxu0 %v18374_v28  ;;  %v22176_v28 = vpop.f32.mrf.mxu1  ;;  %v11050_v35 = vadd.f32 %v21487_v54, %v11036_v55  ;;  %v18416_v54 = vld [vmem:[%s23493_s1 + $0x1a68] sm:$0xff]  ;;  %v17478_v55 = vld [vmem:[%s23494_s0 + $0x1a4] sm:$0xf] }
 0x333   :  { %11602 = vmatpush.bf16.msrb.mxu2 %v18390_v5  ;;  %v18425_v5 = vld [vmem:[%s23493_s1 + $0x1ab0] sm:$0xff]  ;;  %v18412_v39 = vld [vmem:[%s23493_s1 + $0x1a48] sm:$0xff] }
 0x334   :  { %11588 = vmatpush.bf16.msrb.mxu1 %v18382_v12  ;;  %v22192_v12 = vpop.f32.mrf.mxu2 }
 0x335   :  { %11616 = vmatpush.bf16.msrb.mxu3 %v18398_v51  ;;  %v18424_v51 = vld [vmem:[%s23493_s1 + $0x1aa8] sm:$0xff] }
 0x336   :  { %11575 = vmatpush.bf16.msrb.mxu0 %v18373_v50 }
 0x337   :  { %11603 = vmatpush.bf16.msrb.mxu2 %v18389_v27  ;;  %v11064_v27 = vadd.f32 %v21495_v43, %v11050_v35  ;;  %v18415_v43 = vld [vmem:[%s23493_s1 + $0x1a60] sm:$0xff] }
 0x338   :  { %11589 = vmatpush.bf16.msrb.mxu1 %v18381_v58 }
 0x339   :  { %11617 = vmatpush.bf16.msrb.mxu3 %v18397_v49  ;;  %v18407_v49 = vld [vmem:[%s23493_s1 + $0x1a20] sm:$0xff] }
 0x33a   :  { %11576 = vmatpush.bf16.msrb.mxu0 %v18372_v40 }
 0x33b   :  { %11604 = vmatpush.bf16.msrb.mxu2 %v18388_v33  ;;  %v11078_v33 = vadd.f32 %v21604_v61, %v11064_v27  ;;  %v18422_v61 = vld [vmem:[%s23493_s1 + $0x1a98] sm:$0xff] }
 0x33c   :  { %11590 = vmatpush.bf16.msrb.mxu1 %v18380_v14  ;;  %v18406_v14 = vld [vmem:[%s23493_s1 + $0x1a18] sm:$0xff] }
 0x33d   :  { %11618 = vmatpush.bf16.msrb.mxu3 %v18396_v44 }
 0x33e   :  { %11577 = vmatpush.bf16.msrb.mxu0 %v18371_v38  ;;  %v11355_v50 = vpop.f32.mrf.mxu0  ;;  %v11092_v38 = vadd.f32 %v21612_v21, %v11078_v33  ;;  %v18405_v21 = vld [vmem:[%s23493_s1 + $0x1a10] sm:$0xff] }
 0x33f   :  { %11605 = vmatpush.bf16.msrb.mxu2 %v18387_v45  ;;  %v11356_v58 = vadd.f32 %v11355_v50, %v22096_v23  ;;  %v18431_v23 = vld [vmem:[%s23493_s1 + $0x1ae0] sm:$0xff]  ;;  %v18466_v50 = vld [vmem:[%s23493_s1 + $0x1bf8] sm:$0xff]  ;;  %v18449_v33 = vld [vmem:[%s23493_s1 + $0x1b70] sm:$0xff] }
 0x340   :  { %11591 = vmatpush.bf16.msrb.mxu1 %v18379_v3  ;;  %v11369_v40 = vpop.f32.mrf.mxu1  ;;  %v11106_v0 = vadd.f32 %v21628_v41, %v11092_v38  ;;  %v18429_v41 = vld [vmem:[%s23493_s1 + $0x1ad0] sm:$0xff] }
 0x341   :  { %11619 = vmatpush.bf16.msrb.mxu3 %v18395_v29  ;;  %11578 = vmatmul.bf16.vlgmr.msrb.gmra.mxu0 %v12609_v19  ;;  %v11370_v8 = vadd.f32 %v11369_v40, %v11356_v58  ;;  %v18404_v29 = vld [vmem:[%s23493_s1 + $0x1a08] sm:$0xff]  ;;  %v18458_v19 = vld [vmem:[%s23493_s1 + $0x1bb8] sm:$0xff] }
 0x342   :  { %11626 = vmatpush.bf16.msra.mxu0 %v18410_v7  ;;  %11606 = vmatmul.bf16.vlgmr.msrb.gmra.mxu2 %v12617_v56  ;;  %v18414_v7 = vld [vmem:[%s23493_s1 + $0x1a58] sm:$0xff]  ;;  %v11120_v3 = vadd.f32 %v21636_v52, %v11106_v0  ;;  %v18428_v52 = vld [vmem:[%s23493_s1 + $0x1ac8] sm:$0xff]  ;;  %v12624_v56 = vld [vmem:[%s23494_s0 + $0x1a0] sm:$0xf] }
 0x343   :  { %11654 = vmatpush.bf16.msra.mxu2 %v18426_v59  ;;  %11592 = vmatmul.bf16.vlgmr.msrb.gmra.mxu1 %v12613_v31  ;;  %v18430_v59 = vld [vmem:[%s23493_s1 + $0x1ad8] sm:$0xff]  ;;  %v17551_v31 = vld [vmem:[%s23494_s0 + $0x3e8] sm:$0xf0] }
 0x344   :  { %11640 = vmatpush.bf16.msra.mxu1 %v18418_v42  ;;  %11620 = vmatmul.bf16.vlgmr.msrb.gmra.mxu3 %v12621_v4  ;;  %v11134_v11 = vadd.f32 %v21745_v48, %v11120_v3  ;;  %v18442_v48 = vld [vmem:[%s23493_s1 + $0x1b38] sm:$0xff]  ;;  %v17550_v42 = vld [vmem:[%s23494_s0 + $0x3e0] sm:$0xf0] }
 0x345   :  { %11668 = vmatpush.bf16.msra.mxu3 %v18434_v47  ;;  %v11383_v44 = vpop.f32.mrf.mxu2  ;;  %v12632_v47 = vld [vmem:[%s23494_s0 + $0x1a8] sm:$0xf] }
 0x346   :  { %11627 = vmatpush.bf16.msra.mxu0 %v18409_v15  ;;  %v11384_v45 = vadd.f32 %v11383_v44, %v11370_v8  ;;  %v11148_v4 = vadd.f32 %v21753_v9, %v11134_v11  ;;  %v18411_v15 = vld [vmem:[%s23493_s1 + $0x1a40] sm:$0xff]  ;;  %v17479_v9 = vld [vmem:[%s23494_s0 + $0x1ac] sm:$0xf]  ;;  %v18465_v8 = vld [vmem:[%s23493_s1 + $0x1bf0] sm:$0xff] }
 0x347   :  { %11655 = vmatpush.bf16.msra.mxu2 %v18425_v5  ;;  %v11397_v60 = vpop.f32.mrf.mxu3  ;;  %v18427_v5 = vld [vmem:[%s23493_s1 + $0x1ac0] sm:$0xff]  ;;  %v18464_v44 = vld [vmem:[%s23493_s1 + $0x1be8] sm:$0xff]  ;;  %v18462_v11 = vld [vmem:[%s23493_s1 + $0x1bd8] sm:$0xff] }
 0x348   :  { %11641 = vmatpush.bf16.msra.mxu1 %v18417_v6  ;;  %v22237_v57 = vadd.f32 %v11397_v60, %v11384_v45  ;;  %v12626_v6 = vld [vmem:[%s23494_s0 + $0x3e4] sm:$0xf0]  ;;  %v11162_v35 = vadd.f32 %v21769_v22, %v11148_v4  ;;  %v18441_v22 = vld [vmem:[%s23493_s1 + $0x1b30] sm:$0xff]  ;;  %v18455_v60 = vld [vmem:[%s23493_s1 + $0x1ba0] sm:$0xff] }
 0x349   :  { %11669 = vmatpush.bf16.msra.mxu3 %v18433_v32  ;;  %v12634_v32 = vld [vmem:[%s23494_s0 + $0x3ec] sm:$0xf0]  ;;  %v12629_v27 = vor.u32 %v17478_v55, %v12626_v6  ;;  %v18435_v4 = vld [vmem:[%s23493_s1 + $0x1b00] sm:$0xff]  ;;  %v17552_v6 = vld [vmem:[%s23494_s0 + $0x3f0] sm:$0xf0] }
 0x34a   :  { %11628 = vmatpush.bf16.msra.mxu0 %v18408_v26  ;;  %v12625_v26 = vor.u32 %v17550_v42, %v12624_v56  ;;  %v12637_v58 = vor.u32 %v17479_v9, %v12634_v32  ;;  %v11176_v40 = vadd.f32 %v21777_v25, %v11162_v35  ;;  %v18440_v25 = vld [vmem:[%s23493_s1 + $0x1b28] sm:$0xff]  ;;  %v12640_v55 = vld [vmem:[%s23494_s0 + $0x1b0] sm:$0xf]  ;;  %v12648_v9 = vld [vmem:[%s23494_s0 + $0x1b8] sm:$0xf] }
 0x34b   :  { %11656 = vmatpush.bf16.msra.mxu2 %v18424_v51  ;;  %v12633_v51 = vor.u32 %v17551_v31, %v12632_v47  ;;  %v18436_v56 = vld [vmem:[%s23493_s1 + $0x1b08] sm:$0xff]  ;;  %v17553_v32 = vld [vmem:[%s23494_s0 + $0x3f8] sm:$0xf0] }
 0x34c   :  { %11642 = vmatpush.bf16.msra.mxu1 %v18416_v54  ;;  %v22309_v54 = vpop.f32.mrf.mxu0  ;;  %v18452_v42 = vld [vmem:[%s23493_s1 + $0x1b88] sm:$0xff] }
 0x34d   :  { %11670 = vmatpush.bf16.msra.mxu3 %v18432_v30  ;;  %v18450_v30 = vld [vmem:[%s23493_s1 + $0x1b78] sm:$0xff]  ;;  %v18444_v31 = vld [vmem:[%s23493_s1 + $0x1b48] sm:$0xff] }
 0x34e   :  { %11629 = vmatpush.bf16.msra.mxu0 %v18407_v49  ;;  %v22317_v49 = vpop.f32.mrf.mxu1 }
 0x34f   :  { %11657 = vmatpush.bf16.msra.mxu2 %v18423_v53  ;;  %v18457_v53 = vld [vmem:[%s23493_s1 + $0x1bb0] sm:$0xff] }
 0x350   :  { %11643 = vmatpush.bf16.msra.mxu1 %v18415_v43  ;;  %v11190_v43 = vadd.f32 %v21886_v20, %v11176_v40  ;;  %v18448_v20 = vld [vmem:[%s23493_s1 + $0x1b68] sm:$0xff] }
 0x351   :  { %11671 = vmatpush.bf16.msra.mxu3 %v18431_v23  ;;  %v22333_v23 = vpop.f32.mrf.mxu2 }
 0x352   :  { %11630 = vmatpush.bf16.msra.mxu0 %v18406_v14  ;;  %v18456_v14 = vld [vmem:[%s23493_s1 + $0x1ba8] sm:$0xff]  ;;  %v11204_v45 = vadd.f32 %v21894_v2, %v11190_v43  ;;  %v18447_v2 = vld [vmem:[%s23493_s1 + $0x1b60] sm:$0xff] }
 0x353   :  { %11658 = vmatpush.bf16.msra.mxu2 %v18422_v61  ;;  %v22341_v61 = vpop.f32.mrf.mxu3 }
 0x354   :  { %11644 = vmatpush.bf16.msra.mxu1 %v18414_v7 }
 0x355   :  { %11672 = vmatpush.bf16.msra.mxu3 %v18430_v59  ;;  %v18439_v59 = vld [vmem:[%s23493_s1 + $0x1b20] sm:$0xff] }
 0x356   :  { %11631 = vmatpush.bf16.msra.mxu0 %v18405_v21  ;;  %v11218_v21 = vadd.f32 %v21910_v16, %v11204_v45  ;;  %v18454_v16 = vld [vmem:[%s23493_s1 + $0x1b98] sm:$0xff]  ;;  %v18497_v45 = vld [vmem:[%s23493_s1 + $0x1cf0] sm:$0xff] }
 0x357   :  { %11659 = vmatpush.bf16.msra.mxu2 %v18421_v34 }
 0x358   :  { %11645 = vmatpush.bf16.msra.mxu1 %v18413_v36  ;;  %v18438_v36 = vld [vmem:[%s23493_s1 + $0x1b18] sm:$0xff]  ;;  %v11232_v3 = vadd.f32 %v21918_v24, %v11218_v21  ;;  %v18437_v24 = vld [vmem:[%s23493_s1 + $0x1b10] sm:$0xff]  ;;  %v18496_v21 = vld [vmem:[%s23493_s1 + $0x1ce8] sm:$0xff] }
 0x359   :  { %11673 = vmatpush.bf16.msra.mxu3 %v18429_v41 }
 0x35a   :  { %11632 = vmatpush.bf16.msra.mxu0 %v18404_v29 }
 0x35b   :  { %11660 = vmatpush.bf16.msra.mxu2 %v18420_v1  ;;  %v18446_v1 = vld [vmem:[%s23493_s1 + $0x1b58] sm:$0xff] }
 0x35c   :  { %11646 = vmatpush.bf16.msra.mxu1 %v18412_v39 }
 0x35d   :  { %11674 = vmatpush.bf16.msra.mxu3 %v18428_v52  ;;  %v11246_v52 = vadd.f32 %v22027_v13, %v11232_v3  ;;  %v18461_v13 = vld [vmem:[%s23493_s1 + $0x1bd0] sm:$0xff] }
 0x35e   :  { %11633 = vmatpush.bf16.msra.mxu0 %v18403_v18  ;;  %v11411_v38 = vpop.f32.mrf.mxu0 }
 0x35f   :  { %11661 = vmatpush.bf16.msra.mxu2 %v18419_v17  ;;  %v11412_v7 = vadd.f32 %v11411_v38, %v22237_v57  ;;  %v18463_v57 = vld [vmem:[%s23493_s1 + $0x1be0] sm:$0xff]  ;;  %v18453_v17 = vld [vmem:[%s23493_s1 + $0x1b90] sm:$0xff] }
 0x360   :  { %11647 = vmatpush.bf16.msra.mxu1 %v18411_v15  ;;  %v11425_v0 = vpop.f32.mrf.mxu1  ;;  %v18451_v15 = vld [vmem:[%s23493_s1 + $0x1b80] sm:$0xff]  ;;  %v18481_v38 = vld [vmem:[%s23493_s1 + $0x1c70] sm:$0xff] }
 0x361   :  { %11675 = vmatpush.bf16.msra.mxu3 %v18427_v5  ;;  %11634 = vmatmul.bf16.vlgmr.msra.gmra.mxu0 %v12625_v26  ;;  %v11426_v34 = vadd.f32 %v11425_v0, %v11412_v7  ;;  %v18490_v5 = vld [vmem:[%s23493_s1 + $0x1cb8] sm:$0xff]  ;;  %v18443_v26 = vld [vmem:[%s23493_s1 + $0x1b40] sm:$0xff] }
 0x362   :  { %11682 = vmatpush.bf16.msrb.mxu0 %v18442_v48  ;;  %11662 = vmatmul.bf16.vlgmr.msra.gmra.mxu2 %v12633_v51  ;;  %v18445_v48 = vld [vmem:[%s23493_s1 + $0x1b50] sm:$0xff]  ;;  %v18459_v51 = vld [vmem:[%s23493_s1 + $0x1bc0] sm:$0xff] }
 0x363   :  { %11710 = vmatpush.bf16.msrb.mxu2 %v18458_v19  ;;  %11648 = vmatmul.bf16.vlgmr.msra.gmra.mxu1 %v12629_v27  ;;  %v11260_v19 = vadd.f32 %v22035_v10, %v11246_v52  ;;  %v18460_v10 = vld [vmem:[%s23493_s1 + $0x1bc8] sm:$0xff]  ;;  %v12650_v27 = vld [vmem:[%s23494_s0 + $0x3fc] sm:$0xf0] }
 0x364   :  { %11696 = vmatpush.bf16.msrb.mxu1 %v18450_v30  ;;  %11676 = vmatmul.bf16.vlgmr.msra.gmra.mxu3 %v12637_v58  ;;  %v17480_v30 = vld [vmem:[%s23494_s0 + $0x1b4] sm:$0xf] }
 0x365   :  { %11724 = vmatpush.bf16.msrb.mxu3 %v18466_v50  ;;  %v11439_v41 = vpop.f32.mrf.mxu2  ;;  %v11274_v47 = vadd.f32 %v22051_v63, %v11260_v19  ;;  %v18474_v63 = vld [vmem:[%s23493_s1 + $0x1c38] sm:$0xff] }
 0x366   :  { %11683 = vmatpush.bf16.msrb.mxu0 %v18441_v22  ;;  %v11440_v29 = vadd.f32 %v11439_v41, %v11426_v34  ;;  %v12642_v50 = vld [vmem:[%s23494_s0 + $0x3f4] sm:$0xf0]  ;;  %v12641_v22 = vor.u32 %v17552_v6, %v12640_v55  ;;  %v22450_v40 = vpop.f32.mrf.mxu0 }
 0x367   :  { %11711 = vmatpush.bf16.msrb.mxu2 %v18457_v53  ;;  %v11453_v39 = vpop.f32.mrf.mxu3  ;;  %v11288_v35 = vadd.f32 %v22059_v37, %v11274_v47  ;;  %v17481_v37 = vld [vmem:[%s23494_s0 + $0x1bc] sm:$0xf]  ;;  %v12649_v53 = vor.u32 %v17553_v32, %v12648_v9  ;;  %v12645_v43 = vor.u32 %v17480_v30, %v12642_v50  ;;  %v12656_v9 = vld [vmem:[%s23494_s0 + $0x1c0] sm:$0xf]  ;;  %v17554_v32 = vld [vmem:[%s23494_s0 + $0x400] sm:$0xf0] }
 0x368   :  { %11697 = vmatpush.bf16.msrb.mxu1 %v18449_v33  ;;  %v22378_v18 = vadd.f32 %v11453_v39, %v11440_v29  ;;  %v18482_v33 = vld [vmem:[%s23493_s1 + $0x1c78] sm:$0xff]  ;;  %v18475_v30 = vld [vmem:[%s23493_s1 + $0x1c40] sm:$0xff] }
 0x369   :  { %11725 = vmatpush.bf16.msrb.mxu3 %v18465_v8  ;;  %v11302_v58 = vadd.f32 %v22168_v46, %v11288_v35  ;;  %v18498_v8 = vld [vmem:[%s23493_s1 + $0x1cf8] sm:$0xff]  ;;  %v18473_v46 = vld [vmem:[%s23493_s1 + $0x1c30] sm:$0xff]  ;;  %v12664_v35 = vld [vmem:[%s23494_s0 + $0x1c8] sm:$0xf] }
 0x36a   :  { %11684 = vmatpush.bf16.msrb.mxu0 %v18440_v25  ;;  %v12653_v25 = vor.u32 %v17481_v37, %v12650_v27  ;;  %v18506_v55 = vld [vmem:[%s23493_s1 + $0x1d38] sm:$0xff]  ;;  %v18491_v50 = vld [vmem:[%s23493_s1 + $0x1cc0] sm:$0xff]  ;;  %v12658_v27 = vld [vmem:[%s23494_s0 + $0x404] sm:$0xf0] }
 0x36b   :  { %11712 = vmatpush.bf16.msrb.mxu2 %v18456_v14  ;;  %v22458_v14 = vpop.f32.mrf.mxu1  ;;  %v18522_v6 = vld [vmem:[%s23493_s1 + $0x1db8] sm:$0xff]  ;;  %v17482_v37 = vld [vmem:[%s23494_s0 + $0x1c4] sm:$0xf] }
 0x36c   :  { %11698 = vmatpush.bf16.msrb.mxu1 %v18448_v20  ;;  %v18489_v20 = vld [vmem:[%s23493_s1 + $0x1cb0] sm:$0xff] }
 0x36d   :  { %11726 = vmatpush.bf16.msrb.mxu3 %v18464_v44  ;;  %v11316_v44 = vadd.f32 %v22176_v28, %v11302_v58  ;;  %v18472_v28 = vld [vmem:[%s23493_s1 + $0x1c28] sm:$0xff] }
 0x36e   :  { %11685 = vmatpush.bf16.msrb.mxu0 %v18439_v59  ;;  %v22474_v59 = vpop.f32.mrf.mxu2  ;;  %v17483_v58 = vld [vmem:[%s23494_s0 + $0x1cc] sm:$0xf] }
 0x36f   :  { %11713 = vmatpush.bf16.msrb.mxu2 %v18455_v60  ;;  %v11330_v7 = vadd.f32 %v22192_v12, %v11316_v44  ;;  %v18488_v60 = vld [vmem:[%s23493_s1 + $0x1ca8] sm:$0xff]  ;;  %v22482_v0 = vpop.f32.mrf.mxu3  ;;  %v18505_v44 = vld [vmem:[%s23493_s1 + $0x1d30] sm:$0xff] }
 0x370   :  { %11699 = vmatpush.bf16.msrb.mxu1 %v18447_v2  ;;  %v18480_v12 = vld [vmem:[%s23493_s1 + $0x1c68] sm:$0xff] }
 0x371   :  { %11727 = vmatpush.bf16.msrb.mxu3 %v18463_v57  ;;  %v11344_v2 = vadd.f32 %v22200_v62, %v11330_v7  ;;  %v18479_v62 = vld [vmem:[%s23493_s1 + $0x1c60] sm:$0xff]  ;;  %v18513_v7 = vld [vmem:[%s23493_s1 + $0x1d70] sm:$0xff] }
 0x372   :  { %11686 = vmatpush.bf16.msrb.mxu0 %v18438_v36  ;;  %v18471_v36 = vld [vmem:[%s23493_s1 + $0x1c20] sm:$0xff] }
 0x373   :  { %11714 = vmatpush.bf16.msrb.mxu2 %v18454_v16  ;;  %v18487_v16 = vld [vmem:[%s23493_s1 + $0x1ca0] sm:$0xff]  ;;  %v11358_v3 = vadd.f32 %v22309_v54, %v11344_v2  ;;  %v18486_v54 = vld [vmem:[%s23493_s1 + $0x1c98] sm:$0xff]  ;;  %v18528_v2 = vld [vmem:[%s23493_s1 + $0x1de8] sm:$0xff] }
 0x374   :  { %11700 = vmatpush.bf16.msrb.mxu1 %v18446_v1  ;;  %v18495_v1 = vld [vmem:[%s23493_s1 + $0x1ce0] sm:$0xff] }
 0x375   :  { %11728 = vmatpush.bf16.msrb.mxu3 %v18462_v11  ;;  %v18470_v11 = vld [vmem:[%s23493_s1 + $0x1c18] sm:$0xff]  ;;  %v11372_v52 = vadd.f32 %v22317_v49, %v11358_v3  ;;  %v18469_v49 = vld [vmem:[%s23493_s1 + $0x1c10] sm:$0xff]  ;;  %v18519_v3 = vld [vmem:[%s23493_s1 + $0x1da0] sm:$0xff] }
 0x376   :  { %11687 = vmatpush.bf16.msrb.mxu0 %v18437_v24  ;;  %v18478_v24 = vld [vmem:[%s23493_s1 + $0x1c58] sm:$0xff] }
 0x377   :  { %11715 = vmatpush.bf16.msrb.mxu2 %v18453_v17  ;;  %v18494_v17 = vld [vmem:[%s23493_s1 + $0x1cd8] sm:$0xff] }
 0x378   :  { %11701 = vmatpush.bf16.msrb.mxu1 %v18445_v48 }
 0x379   :  { %11729 = vmatpush.bf16.msrb.mxu3 %v18461_v13  ;;  %v11386_v13 = vadd.f32 %v22333_v23, %v11372_v52  ;;  %v18493_v23 = vld [vmem:[%s23493_s1 + $0x1cd0] sm:$0xff]  ;;  %v18518_v52 = vld [vmem:[%s23493_s1 + $0x1d98] sm:$0xff] }
 0x37a   :  { %11688 = vmatpush.bf16.msrb.mxu0 %v18436_v56  ;;  %v18485_v56 = vld [vmem:[%s23493_s1 + $0x1c90] sm:$0xff] }
 0x37b   :  { %11716 = vmatpush.bf16.msrb.mxu2 %v18452_v42  ;;  %v18477_v42 = vld [vmem:[%s23493_s1 + $0x1c50] sm:$0xff]  ;;  %v11400_v47 = vadd.f32 %v22341_v61, %v11386_v13  ;;  %v18492_v61 = vld [vmem:[%s23493_s1 + $0x1cc8] sm:$0xff]  ;;  %v18526_v13 = vld [vmem:[%s23493_s1 + $0x1dd8] sm:$0xff] }
 0x37c   :  { %11702 = vmatpush.bf16.msrb.mxu1 %v18444_v31  ;;  %v18468_v31 = vld [vmem:[%s23493_s1 + $0x1c08] sm:$0xff] }
 0x37d   :  { %11730 = vmatpush.bf16.msrb.mxu3 %v18460_v10  ;;  %v18484_v10 = vld [vmem:[%s23493_s1 + $0x1c88] sm:$0xff] }
 0x37e   :  { %11689 = vmatpush.bf16.msrb.mxu0 %v18435_v4  ;;  %v11467_v34 = vpop.f32.mrf.mxu0  ;;  %v11414_v4 = vadd.f32 %v22450_v40, %v11400_v47  ;;  %v12657_v40 = vor.u32 %v17554_v32, %v12656_v9  ;;  %v18517_v47 = vld [vmem:[%s23493_s1 + $0x1d90] sm:$0xff]  ;;  %v18524_v9 = vld [vmem:[%s23493_s1 + $0x1dc8] sm:$0xff] }
 0x37f   :  { %11717 = vmatpush.bf16.msrb.mxu2 %v18451_v15  ;;  %v11468_v57 = vadd.f32 %v11467_v34, %v22378_v18  ;;  %v18476_v15 = vld [vmem:[%s23493_s1 + $0x1c48] sm:$0xff] }
 0x380   :  { %11703 = vmatpush.bf16.msrb.mxu1 %v18443_v26  ;;  %v11481_v41 = vpop.f32.mrf.mxu1  ;;  %v17555_v26 = vld [vmem:[%s23494_s0 + $0x408] sm:$0xf0] }
 0x381   :  { %11731 = vmatpush.bf16.msrb.mxu3 %v18459_v51  ;;  %11690 = vmatmul.bf16.vlgmr.msrb.gmra.mxu0 %v12641_v22  ;;  %v11482_v29 = vadd.f32 %v11481_v41, %v11468_v57  ;;  %v11428_v51 = vadd.f32 %v22458_v14, %v11414_v4  ;;  %v12666_v22 = vld [vmem:[%s23494_s0 + $0x40c] sm:$0xf0]  ;;  %v12661_v14 = vor.u32 %v17482_v37, %v12658_v27  ;;  %v18512_v34 = vld [vmem:[%s23493_s1 + $0x1d68] sm:$0xff]  ;;  %v18503_v41 = vld [vmem:[%s23493_s1 + $0x1d20] sm:$0xff] }
 0x382   :  { %11738 = vmatpush.bf16.msra.mxu0 %v18474_v63  ;;  %11718 = vmatmul.bf16.vlgmr.msrb.gmra.mxu2 %v12649_v53  ;;  %v18467_v63 = vld [vmem:[%s23493_s1 + $0x1c00] sm:$0xff]  ;;  %v18525_v4 = vld [vmem:[%s23493_s1 + $0x1dd0] sm:$0xff] }
 0x383   :  { %11766 = vmatpush.bf16.msra.mxu2 %v18490_v5  ;;  %11704 = vmatmul.bf16.vlgmr.msrb.gmra.mxu1 %v12645_v43  ;;  %v18483_v5 = vld [vmem:[%s23493_s1 + $0x1c80] sm:$0xff]  ;;  %v11442_v53 = vadd.f32 %v22474_v59, %v11428_v51  ;;  %v18514_v43 = vld [vmem:[%s23493_s1 + $0x1d78] sm:$0xff]  ;;  %v18529_v59 = vld [vmem:[%s23493_s1 + $0x1df0] sm:$0xff] }
 0x384   :  { %11752 = vmatpush.bf16.msra.mxu1 %v18482_v33  ;;  %11732 = vmatmul.bf16.vlgmr.msrb.gmra.mxu3 %v12653_v25  ;;  %v12665_v33 = vor.u32 %v17555_v26, %v12664_v35  ;;  %v18530_v25 = vld [vmem:[%s23493_s1 + $0x1df8] sm:$0xff]  ;;  %v18499_v35 = vld [vmem:[%s23493_s1 + $0x1d00] sm:$0xff]  ;;  %v12672_v37 = vld [vmem:[%s23494_s0 + $0x1d0] sm:$0xf] }
 0x385   :  { %11780 = vmatpush.bf16.msra.mxu3 %v18498_v8  ;;  %v11495_v39 = vpop.f32.mrf.mxu2  ;;  %v18515_v26 = vld [vmem:[%s23493_s1 + $0x1d80] sm:$0xff]  ;;  %v17556_v27 = vld [vmem:[%s23494_s0 + $0x410] sm:$0xf0] }
 0x386   :  { %11739 = vmatpush.bf16.msra.mxu0 %v18473_v46  ;;  %v11496_v18 = vadd.f32 %v11495_v39, %v11482_v29  ;;  %v11469_v8 = vpop.f32.mrf.mxu0  ;;  %v12669_v46 = vor.u32 %v17483_v58, %v12666_v22  ;;  %v18502_v39 = vld [vmem:[%s23493_s1 + $0x1d18] sm:$0xff] }
 0x387   :  { %11767 = vmatpush.bf16.msra.mxu2 %v18489_v20  ;;  %v11509_v48 = vpop.f32.mrf.mxu3  ;;  %v12680_v58 = vld [vmem:[%s23494_s0 + $0x1d8] sm:$0xf]  ;;  %v17557_v22 = vld [vmem:[%s23494_s0 + $0x418] sm:$0xf0] }
 0x388   :  { %11753 = vmatpush.bf16.msra.mxu1 %v18481_v38  ;;  %v22519_v19 = vadd.f32 %v11509_v48, %v11496_v18  ;;  %v11483_v20 = vpop.f32.mrf.mxu1  ;;  %v18521_v38 = vld [vmem:[%s23493_s1 + $0x1db0] sm:$0xff]  ;;  %v18510_v48 = vld [vmem:[%s23493_s1 + $0x1d58] sm:$0xff] }
 0x389   :  { %11781 = vmatpush.bf16.msra.mxu3 %v18497_v45  ;;  %v11456_v45 = vadd.f32 %v22482_v0, %v11442_v53  ;;  %v18504_v0 = vld [vmem:[%s23493_s1 + $0x1d28] sm:$0xff]  ;;  %v18507_v53 = vld [vmem:[%s23493_s1 + $0x1d40] sm:$0xff] }
 0x38a   :  { %11740 = vmatpush.bf16.msra.mxu0 %v18472_v28 }
 0x38b   :  { %11768 = vmatpush.bf16.msra.mxu2 %v18488_v60  ;;  %v11470_v28 = vadd.f32 %v11469_v8, %v11456_v45  ;;  %v12674_v8 = vld [vmem:[%s23494_s0 + $0x414] sm:$0xf0] }
 0x38c   :  { %11754 = vmatpush.bf16.msra.mxu1 %v18480_v12  ;;  %v18520_v12 = vld [vmem:[%s23493_s1 + $0x1da8] sm:$0xff] }
 0x38d   :  { %11782 = vmatpush.bf16.msra.mxu3 %v18496_v21  ;;  %v11497_v60 = vpop.f32.mrf.mxu2 }
 0x38e   :  { %11741 = vmatpush.bf16.msra.mxu0 %v18471_v36  ;;  %v11484_v36 = vadd.f32 %v11483_v20, %v11470_v28  ;;  %v18546_v20 = vld [vmem:[%s23493_s1 + $0x1e78] sm:$0xff]  ;;  %v18545_v28 = vld [vmem:[%s23493_s1 + $0x1e70] sm:$0xff] }
 0x38f   :  { %11769 = vmatpush.bf16.msra.mxu2 %v18487_v16  ;;  %v11511_v21 = vpop.f32.mrf.mxu3 }
 0x390   :  { %11755 = vmatpush.bf16.msra.mxu1 %v18479_v62  ;;  %v11498_v62 = vadd.f32 %v11497_v60, %v11484_v36  ;;  %v18561_v60 = vld [vmem:[%s23493_s1 + $0x1ef0] sm:$0xff]  ;;  %v18535_v36 = vld [vmem:[%s23493_s1 + $0x1e20] sm:$0xff] }
 0x391   :  { %11783 = vmatpush.bf16.msra.mxu3 %v18495_v1 }
 0x392   :  { %11742 = vmatpush.bf16.msra.mxu0 %v18470_v11  ;;  %v18511_v11 = vld [vmem:[%s23493_s1 + $0x1d60] sm:$0xff] }
 0x393   :  { %11770 = vmatpush.bf16.msra.mxu2 %v18486_v54  ;;  %v18527_v54 = vld [vmem:[%s23493_s1 + $0x1de0] sm:$0xff] }
 0x394   :  { %11756 = vmatpush.bf16.msra.mxu1 %v18478_v24  ;;  %v11512_v24 = vadd.f32 %v11511_v21, %v11498_v62  ;;  %v18544_v21 = vld [vmem:[%s23493_s1 + $0x1e68] sm:$0xff]  ;;  %v18559_v62 = vld [vmem:[%s23493_s1 + $0x1ee0] sm:$0xff] }
 0x395   :  { %11784 = vmatpush.bf16.msra.mxu3 %v18494_v17 }
 0x396   :  { %11743 = vmatpush.bf16.msra.mxu0 %v18469_v49 }
 0x397   :  { %11771 = vmatpush.bf16.msra.mxu2 %v18485_v56 }
 0x398   :  { %11757 = vmatpush.bf16.msra.mxu1 %v18477_v42 }
 0x399   :  { %11785 = vmatpush.bf16.msra.mxu3 %v18493_v23  ;;  %v18501_v23 = vld [vmem:[%s23493_s1 + $0x1d10] sm:$0xff] }
 0x39a   :  { %11744 = vmatpush.bf16.msra.mxu0 %v18468_v31 }
 0x39b   :  { %11772 = vmatpush.bf16.msra.mxu2 %v18484_v10  ;;  %v18509_v10 = vld [vmem:[%s23493_s1 + $0x1d50] sm:$0xff] }
 0x39c   :  { %11758 = vmatpush.bf16.msra.mxu1 %v18476_v15 }
 0x39d   :  { %11786 = vmatpush.bf16.msra.mxu3 %v18492_v61  ;;  %v18500_v61 = vld [vmem:[%s23493_s1 + $0x1d08] sm:$0xff] }
 0x39e   :  { %11745 = vmatpush.bf16.msra.mxu0 %v18467_v63  ;;  %v11523_v57 = vpop.f32.mrf.mxu0  ;;  %v18516_v63 = vld [vmem:[%s23493_s1 + $0x1d88] sm:$0xff] }
 0x39f   :  { %11773 = vmatpush.bf16.msra.mxu2 %v18483_v5  ;;  %v11524_v16 = vadd.f32 %v11523_v57, %v22519_v19 }
 0x3a0   :  { %11759 = vmatpush.bf16.msra.mxu1 %v18475_v30  ;;  %v11537_v29 = vpop.f32.mrf.mxu1  ;;  %v18538_v30 = vld [vmem:[%s23493_s1 + $0x1e38] sm:$0xff] }
 0x3a1   :  { %11787 = vmatpush.bf16.msra.mxu3 %v18491_v50  ;;  %11746 = vmatmul.bf16.vlgmr.msra.gmra.mxu0 %v12657_v40  ;;  %v11538_v1 = vadd.f32 %v11537_v29, %v11524_v16  ;;  %v18554_v50 = vld [vmem:[%s23493_s1 + $0x1eb8] sm:$0xff]  ;;  %v18523_v40 = vld [vmem:[%s23493_s1 + $0x1dc0] sm:$0xff] }
 0x3a2   :  { %11794 = vmatpush.bf16.msrb.mxu0 %v18506_v55  ;;  %11774 = vmatmul.bf16.vlgmr.msra.gmra.mxu2 %v12665_v33  ;;  %v17484_v33 = vld [vmem:[%s23494_s0 + $0x1d4] sm:$0xf]  ;;  %v18551_v16 = vld [vmem:[%s23493_s1 + $0x1ea0] sm:$0xff] }
 0x3a3   :  { %11822 = vmatpush.bf16.msrb.mxu2 %v18522_v6  ;;  %11760 = vmatmul.bf16.vlgmr.msra.gmra.mxu1 %v12661_v14  ;;  %v18508_v6 = vld [vmem:[%s23493_s1 + $0x1d48] sm:$0xff]  ;;  %v12673_v14 = vor.u32 %v17556_v27, %v12672_v37  ;;  %v18543_v29 = vld [vmem:[%s23493_s1 + $0x1e60] sm:$0xff] }
 0x3a4   :  { %11808 = vmatpush.bf16.msrb.mxu1 %v18514_v43  ;;  %11788 = vmatmul.bf16.vlgmr.msra.gmra.mxu3 %v12669_v46  ;;  %v17485_v43 = vld [vmem:[%s23494_s0 + $0x1dc] sm:$0xf]  ;;  %v12681_v46 = vor.u32 %v17557_v22, %v12680_v58  ;;  %v18539_v37 = vld [vmem:[%s23493_s1 + $0x1e40] sm:$0xff]  ;;  %v12690_v22 = vld [vmem:[%s23494_s0 + $0x424] sm:$0xf0] }
 0x3a5   :  { %11836 = vmatpush.bf16.msrb.mxu3 %v18530_v25  ;;  %v11551_v18 = vpop.f32.mrf.mxu2  ;;  %v12682_v25 = vld [vmem:[%s23494_s0 + $0x41c] sm:$0xf0]  ;;  %v17486_v58 = vld [vmem:[%s23494_s0 + $0x1e4] sm:$0xf] }
 0x3a6   :  { %11795 = vmatpush.bf16.msrb.mxu0 %v18505_v44  ;;  %v11552_v17 = vadd.f32 %v11551_v18, %v11538_v1  ;;  %v11525_v19 = vpop.f32.mrf.mxu0  ;;  %v18562_v44 = vld [vmem:[%s23493_s1 + $0x1ef8] sm:$0xff]  ;;  %v12685_v45 = vor.u32 %v17485_v43, %v12682_v25  ;;  %v18555_v27 = vld [vmem:[%s23493_s1 + $0x1ec0] sm:$0xff] }
 0x3a7   :  { %11823 = vmatpush.bf16.msrb.mxu2 %v18521_v38  ;;  %v11565_v49 = vpop.f32.mrf.mxu3  ;;  %v11526_v56 = vadd.f32 %v11525_v19, %v11512_v24  ;;  %v12677_v38 = vor.u32 %v17484_v33, %v12674_v8  ;;  %v18534_v1 = vld [vmem:[%s23493_s1 + $0x1e18] sm:$0xff]  ;;  %v18533_v19 = vld [vmem:[%s23493_s1 + $0x1e10] sm:$0xff] }
 0x3a8   :  { %11809 = vmatpush.bf16.msrb.mxu1 %v18513_v7  ;;  %v22647_v42 = vadd.f32 %v11565_v49, %v11552_v17  ;;  %v11539_v31 = vpop.f32.mrf.mxu1  ;;  %v18537_v7 = vld [vmem:[%s23493_s1 + $0x1e30] sm:$0xff]  ;;  %v18558_v18 = vld [vmem:[%s23493_s1 + $0x1ed8] sm:$0xff] }
 0x3a9   :  { %11837 = vmatpush.bf16.msrb.mxu3 %v18529_v59  ;;  %v11540_v15 = vadd.f32 %v11539_v31, %v11526_v56  ;;  %v18553_v59 = vld [vmem:[%s23493_s1 + $0x1eb0] sm:$0xff]  ;;  %v18532_v31 = vld [vmem:[%s23493_s1 + $0x1e08] sm:$0xff]  ;;  %v18578_v43 = vld [vmem:[%s23493_s1 + $0x1f78] sm:$0xff] }
 0x3aa   :  { %11796 = vmatpush.bf16.msrb.mxu0 %v18504_v0  ;;  %v18536_v0 = vld [vmem:[%s23493_s1 + $0x1e28] sm:$0xff]  ;;  %v18549_v49 = vld [vmem:[%s23493_s1 + $0x1e90] sm:$0xff]  ;;  %v18594_v25 = vld [vmem:[%s23493_s1 + $0x1ff8] sm:$0xff] }
 0x3ab   :  { %11824 = vmatpush.bf16.msrb.mxu2 %v18520_v12  ;;  %v18552_v12 = vld [vmem:[%s23493_s1 + $0x1ea8] sm:$0xff] }
 0x3ac   :  { %11810 = vmatpush.bf16.msrb.mxu1 %v18512_v34  ;;  %v18560_v34 = vld [vmem:[%s23493_s1 + $0x1ee8] sm:$0xff] }
 0x3ad   :  { %11838 = vmatpush.bf16.msrb.mxu3 %v18528_v2  ;;  %v11553_v5 = vpop.f32.mrf.mxu2 }
 0x3ae   :  { %11797 = vmatpush.bf16.msrb.mxu0 %v18503_v41  ;;  %v11554_v55 = vadd.f32 %v11553_v5, %v11540_v15 }
 0x3af   :  { %11825 = vmatpush.bf16.msrb.mxu2 %v18519_v3  ;;  %v11567_v32 = vpop.f32.mrf.mxu3 }
 0x3b0   :  { %11811 = vmatpush.bf16.msrb.mxu1 %v18511_v11  ;;  %v22679_v51 = vadd.f32 %v11567_v32, %v11554_v55  ;;  %v18550_v11 = vld [vmem:[%s23493_s1 + $0x1e98] sm:$0xff]  ;;  %v18531_v55 = vld [vmem:[%s23493_s1 + $0x1e00] sm:$0xff] }
 0x3b1   :  { %11839 = vmatpush.bf16.msrb.mxu3 %v18527_v54  ;;  %v18570_v32 = vld [vmem:[%s23493_s1 + $0x1f38] sm:$0xff] }
 0x3b2   :  { %11798 = vmatpush.bf16.msrb.mxu0 %v18502_v39 }
 0x3b3   :  { %11826 = vmatpush.bf16.msrb.mxu2 %v18518_v52  ;;  %v18542_v52 = vld [vmem:[%s23493_s1 + $0x1e58] sm:$0xff] }
 0x3b4   :  { %11812 = vmatpush.bf16.msrb.mxu1 %v18510_v48 }
 0x3b5   :  { %11840 = vmatpush.bf16.msrb.mxu3 %v18526_v13 }
 0x3b6   :  { %11799 = vmatpush.bf16.msrb.mxu0 %v18501_v23  ;;  %v18541_v23 = vld [vmem:[%s23493_s1 + $0x1e50] sm:$0xff] }
 0x3b7   :  { %11827 = vmatpush.bf16.msrb.mxu2 %v18517_v47  ;;  %v18557_v47 = vld [vmem:[%s23493_s1 + $0x1ed0] sm:$0xff] }
 0x3b8   :  { %11813 = vmatpush.bf16.msrb.mxu1 %v18509_v10  ;;  %v18548_v10 = vld [vmem:[%s23493_s1 + $0x1e88] sm:$0xff] }
 0x3b9   :  { %11841 = vmatpush.bf16.msrb.mxu3 %v18525_v4 }
 0x3ba   :  { %11800 = vmatpush.bf16.msrb.mxu0 %v18500_v61  ;;  %v18540_v61 = vld [vmem:[%s23493_s1 + $0x1e48] sm:$0xff] }
 0x3bb   :  { %11828 = vmatpush.bf16.msrb.mxu2 %v18516_v63  ;;  %v18556_v63 = vld [vmem:[%s23493_s1 + $0x1ec8] sm:$0xff] }
 0x3bc   :  { %11814 = vmatpush.bf16.msrb.mxu1 %v18508_v6  ;;  %v18547_v6 = vld [vmem:[%s23493_s1 + $0x1e80] sm:$0xff] }
 0x3bd   :  { %11842 = vmatpush.bf16.msrb.mxu3 %v18524_v9 }
 0x3be   :  { %11801 = vmatpush.bf16.msrb.mxu0 %v18499_v35  ;;  %v11579_v2 = vpop.f32.mrf.mxu0  ;;  %v18586_v35 = vld [vmem:[%s23493_s1 + $0x1fb8] sm:$0xff] }
 0x3bf   :  { %11829 = vmatpush.bf16.msrb.mxu2 %v18515_v26  ;;  %v11580_v57 = vadd.f32 %v11579_v2, %v22647_v42  ;;  %v12688_v26 = vld [vmem:[%s23494_s0 + $0x1e0] sm:$0xf] }
 0x3c0   :  { %11815 = vmatpush.bf16.msrb.mxu1 %v18507_v53  ;;  %v11593_v41 = vpop.f32.mrf.mxu1  ;;  %v17487_v53 = vld [vmem:[%s23494_s0 + $0x1ec] sm:$0xf] }
 0x3c1   :  { %11843 = vmatpush.bf16.msrb.mxu3 %v18523_v40  ;;  %11802 = vmatmul.bf16.vlgmr.msrb.gmra.mxu0 %v12673_v14  ;;  %v11594_v3 = vadd.f32 %v11593_v41, %v11580_v57  ;;  %v12698_v40 = vld [vmem:[%s23494_s0 + $0x42c] sm:$0xf0]  ;;  %v12693_v14 = vor.u32 %v17486_v58, %v12690_v22  ;;  %v18566_v41 = vld [vmem:[%s23493_s1 + $0x1f18] sm:$0xff] }
 0x3c2   :  { %11850 = vmatpush.bf16.msra.mxu0 %v18538_v30  ;;  %11830 = vmatmul.bf16.vlgmr.msrb.gmra.mxu2 %v12681_v46  ;;  %v12696_v30 = vld [vmem:[%s23494_s0 + $0x1e8] sm:$0xf]  ;;  %v12701_v46 = vor.u32 %v17487_v53, %v12698_v40  ;;  %v18610_v53 = vld [vmem:[%s23493_s1 + $0x2078] sm:$0xff] }
 0x3c3   :  { %11878 = vmatpush.bf16.msra.mxu2 %v18554_v50  ;;  %11816 = vmatmul.bf16.vlgmr.msrb.gmra.mxu1 %v12677_v38  ;;  %v17559_v50 = vld [vmem:[%s23494_s0 + $0x428] sm:$0xf0]  ;;  %v18577_v38 = vld [vmem:[%s23493_s1 + $0x1f70] sm:$0xff]  ;;  %v18626_v40 = vld [vmem:[%s23493_s1 + $0x20f8] sm:$0xff] }
 0x3c4   :  { %11864 = vmatpush.bf16.msra.mxu1 %v18546_v20  ;;  %11844 = vmatmul.bf16.vlgmr.msrb.gmra.mxu3 %v12685_v45  ;;  %v12697_v8 = vor.u32 %v17559_v50, %v12696_v30  ;;  %v18569_v20 = vld [vmem:[%s23493_s1 + $0x1f30] sm:$0xff]  ;;  %v12706_v50 = vld [vmem:[%s23494_s0 + $0x434] sm:$0xf0] }
 0x3c5   :  { %11892 = vmatpush.bf16.msra.mxu3 %v18562_v44  ;;  %v11607_v54 = vpop.f32.mrf.mxu2  ;;  %v18585_v44 = vld [vmem:[%s23493_s1 + $0x1fb0] sm:$0xff] }
 0x3c6   :  { %11851 = vmatpush.bf16.msra.mxu0 %v18537_v7  ;;  %v11608_v39 = vadd.f32 %v11607_v54, %v11594_v3  ;;  %v11581_v24 = vpop.f32.mrf.mxu0  ;;  %v18593_v45 = vld [vmem:[%s23493_s1 + $0x1ff0] sm:$0xff]  ;;  %v18568_v7 = vld [vmem:[%s23493_s1 + $0x1f28] sm:$0xff]  ;;  %v18582_v3 = vld [vmem:[%s23493_s1 + $0x1f98] sm:$0xff] }
 0x3c7   :  { %11879 = vmatpush.bf16.msra.mxu2 %v18553_v59  ;;  %v11621_v17 = vpop.f32.mrf.mxu3  ;;  %v11582_v48 = vadd.f32 %v11581_v24, %v22679_v51  ;;  %v17558_v51 = vld [vmem:[%s23494_s0 + $0x420] sm:$0xf0]  ;;  %v18584_v59 = vld [vmem:[%s23493_s1 + $0x1fa8] sm:$0xff]  ;;  %v18565_v24 = vld [vmem:[%s23493_s1 + $0x1f10] sm:$0xff] }
 0x3c8   :  { %11865 = vmatpush.bf16.msra.mxu1 %v18545_v28  ;;  %v22773_v13 = vadd.f32 %v11621_v17, %v11608_v39  ;;  %v11595_v56 = vpop.f32.mrf.mxu1  ;;  %v12689_v33 = vor.u32 %v17558_v51, %v12688_v26  ;;  %v18576_v28 = vld [vmem:[%s23493_s1 + $0x1f68] sm:$0xff]  ;;  %v18581_v17 = vld [vmem:[%s23493_s1 + $0x1f90] sm:$0xff]  ;;  %v18571_v26 = vld [vmem:[%s23493_s1 + $0x1f40] sm:$0xff] }
 0x3c9   :  { %11893 = vmatpush.bf16.msra.mxu3 %v18561_v60  ;;  %v11596_v42 = vadd.f32 %v11595_v56, %v11582_v48  ;;  %v18592_v60 = vld [vmem:[%s23493_s1 + $0x1fe8] sm:$0xff]  ;;  %v18587_v51 = vld [vmem:[%s23493_s1 + $0x1fc0] sm:$0xff]  ;;  %v17488_v30 = vld [vmem:[%s23494_s0 + $0x1f4] sm:$0xf] }
 0x3ca   :  { %11852 = vmatpush.bf16.msra.mxu0 %v18536_v0  ;;  %v18564_v56 = vld [vmem:[%s23493_s1 + $0x1f08] sm:$0xff] }
 0x3cb   :  { %11880 = vmatpush.bf16.msra.mxu2 %v18552_v12 }
 0x3cc   :  { %11866 = vmatpush.bf16.msra.mxu1 %v18544_v21  ;;  %v18567_v21 = vld [vmem:[%s23493_s1 + $0x1f20] sm:$0xff] }
 0x3cd   :  { %11894 = vmatpush.bf16.msra.mxu3 %v18560_v34  ;;  %v11609_v4 = vpop.f32.mrf.mxu2  ;;  %v18583_v34 = vld [vmem:[%s23493_s1 + $0x1fa0] sm:$0xff] }
 0x3ce   :  { %11853 = vmatpush.bf16.msra.mxu0 %v18535_v36  ;;  %v11610_v15 = vadd.f32 %v11609_v4, %v11596_v42  ;;  %v18575_v36 = vld [vmem:[%s23493_s1 + $0x1f60] sm:$0xff]  ;;  %v18580_v42 = vld [vmem:[%s23493_s1 + $0x1f88] sm:$0xff] }
 0x3cf   :  { %11881 = vmatpush.bf16.msra.mxu2 %v18551_v16  ;;  %v11623_v5 = vpop.f32.mrf.mxu3  ;;  %v18591_v16 = vld [vmem:[%s23493_s1 + $0x1fe0] sm:$0xff] }
 0x3d0   :  { %11867 = vmatpush.bf16.msra.mxu1 %v18543_v29  ;;  %v22805_v9 = vadd.f32 %v11623_v5, %v11610_v15  ;;  %v18563_v15 = vld [vmem:[%s23493_s1 + $0x1f00] sm:$0xff]  ;;  %v18602_v5 = vld [vmem:[%s23493_s1 + $0x2038] sm:$0xff] }
 0x3d1   :  { %11895 = vmatpush.bf16.msra.mxu3 %v18559_v62 }
 0x3d2   :  { %11854 = vmatpush.bf16.msra.mxu0 %v18534_v1  ;;  %v18574_v1 = vld [vmem:[%s23493_s1 + $0x1f58] sm:$0xff] }
 0x3d3   :  { %11882 = vmatpush.bf16.msra.mxu2 %v18550_v11  ;;  %v18590_v11 = vld [vmem:[%s23493_s1 + $0x1fd8] sm:$0xff] }
 0x3d4   :  { %11868 = vmatpush.bf16.msra.mxu1 %v18542_v52 }
 0x3d5   :  { %11896 = vmatpush.bf16.msra.mxu3 %v18558_v18 }
 0x3d6   :  { %11855 = vmatpush.bf16.msra.mxu0 %v18533_v19  ;;  %v18573_v19 = vld [vmem:[%s23493_s1 + $0x1f50] sm:$0xff] }
 0x3d7   :  { %11883 = vmatpush.bf16.msra.mxu2 %v18549_v49  ;;  %v18589_v49 = vld [vmem:[%s23493_s1 + $0x1fd0] sm:$0xff] }
 0x3d8   :  { %11869 = vmatpush.bf16.msra.mxu1 %v18541_v23 }
 0x3d9   :  { %11897 = vmatpush.bf16.msra.mxu3 %v18557_v47 }
 0x3da   :  { %11856 = vmatpush.bf16.msra.mxu0 %v18532_v31  ;;  %v18572_v31 = vld [vmem:[%s23493_s1 + $0x1f48] sm:$0xff] }
 0x3db   :  { %11884 = vmatpush.bf16.msra.mxu2 %v18548_v10  ;;  %v18588_v10 = vld [vmem:[%s23493_s1 + $0x1fc8] sm:$0xff] }
 0x3dc   :  { %11870 = vmatpush.bf16.msra.mxu1 %v18540_v61  ;;  %v18579_v61 = vld [vmem:[%s23493_s1 + $0x1f80] sm:$0xff] }
 0x3dd   :  { %11898 = vmatpush.bf16.msra.mxu3 %v18556_v63 }
 0x3de   :  { %11857 = vmatpush.bf16.msra.mxu0 %v18531_v55  ;;  %v11635_v0 = vpop.f32.mrf.mxu0  ;;  %v18618_v55 = vld [vmem:[%s23493_s1 + $0x20b8] sm:$0xff] }
 0x3df   :  { %11885 = vmatpush.bf16.msra.mxu2 %v18547_v6  ;;  %v11636_v12 = vadd.f32 %v11635_v0, %v22773_v13  ;;  %v12704_v6 = vld [vmem:[%s23494_s0 + $0x1f0] sm:$0xf] }
 0x3e0   :  { %11871 = vmatpush.bf16.msra.mxu1 %v18539_v37  ;;  %v11649_v2 = vpop.f32.mrf.mxu1  ;;  %v17489_v37 = vld [vmem:[%s23494_s0 + $0x1fc] sm:$0xf] }
 0x3e1   :  { %11899 = vmatpush.bf16.msra.mxu3 %v18555_v27  ;;  %11858 = vmatmul.bf16.vlgmr.msra.gmra.mxu0 %v12689_v33  ;;  %v11650_v57 = vadd.f32 %v11649_v2, %v11636_v12  ;;  %v12714_v27 = vld [vmem:[%s23494_s0 + $0x43c] sm:$0xf0]  ;;  %v12709_v33 = vor.u32 %v17488_v30, %v12706_v50  ;;  %v18598_v2 = vld [vmem:[%s23493_s1 + $0x2018] sm:$0xff] }
 0x3e2   :  { %11906 = vmatpush.bf16.msrb.mxu0 %v18570_v32  ;;  %11886 = vmatmul.bf16.vlgmr.msra.gmra.mxu2 %v12697_v8  ;;  %v12712_v32 = vld [vmem:[%s23494_s0 + $0x1f8] sm:$0xf]  ;;  %v12717_v8 = vor.u32 %v17489_v37, %v12714_v27 }
 0x3e3   :  { %11934 = vmatpush.bf16.msrb.mxu2 %v18586_v35  ;;  %11872 = vmatmul.bf16.vlgmr.msra.gmra.mxu1 %v12693_v14  ;;  %v17561_v35 = vld [vmem:[%s23494_s0 + $0x438] sm:$0xf0]  ;;  %v18609_v14 = vld [vmem:[%s23493_s1 + $0x2070] sm:$0xff] }
 0x3e4   :  { %11920 = vmatpush.bf16.msrb.mxu1 %v18578_v43  ;;  %11900 = vmatmul.bf16.vlgmr.msra.gmra.mxu3 %v12701_v46  ;;  %v12713_v22 = vor.u32 %v17561_v35, %v12712_v32  ;;  %v18601_v43 = vld [vmem:[%s23493_s1 + $0x2030] sm:$0xff]  ;;  %v17490_v32 = vld [vmem:[%s23494_s0 + $0x204] sm:$0xf]  ;;  %v12722_v35 = vld [vmem:[%s23494_s0 + $0x444] sm:$0xf0] }
 0x3e5   :  { %11948 = vmatpush.bf16.msrb.mxu3 %v18594_v25  ;;  %v11663_v29 = vpop.f32.mrf.mxu2  ;;  %v18617_v25 = vld [vmem:[%s23493_s1 + $0x20b0] sm:$0xff]  ;;  %v18642_v37 = vld [vmem:[%s23493_s1 + $0x2178] sm:$0xff] }
 0x3e6   :  { %11907 = vmatpush.bf16.msrb.mxu0 %v18569_v20  ;;  %v11664_v62 = vadd.f32 %v11663_v29, %v11650_v57  ;;  %v11637_v54 = vpop.f32.mrf.mxu0  ;;  %v18625_v46 = vld [vmem:[%s23493_s1 + $0x20f0] sm:$0xff]  ;;  %v18600_v20 = vld [vmem:[%s23493_s1 + $0x2028] sm:$0xff]  ;;  %v18614_v57 = vld [vmem:[%s23493_s1 + $0x2098] sm:$0xff] }
 0x3e7   :  { %11935 = vmatpush.bf16.msrb.mxu2 %v18585_v44  ;;  %v11677_v39 = vpop.f32.mrf.mxu3  ;;  %v11638_v52 = vadd.f32 %v11637_v54, %v22805_v9  ;;  %v17560_v9 = vld [vmem:[%s23494_s0 + $0x430] sm:$0xf0]  ;;  %v18616_v44 = vld [vmem:[%s23493_s1 + $0x20a8] sm:$0xff]  ;;  %v18658_v27 = vld [vmem:[%s23493_s1 + $0x21f8] sm:$0xff] }
 0x3e8   :  { %11921 = vmatpush.bf16.msrb.mxu1 %v18577_v38  ;;  %v22899_v18 = vadd.f32 %v11677_v39, %v11664_v62  ;;  %v11651_v48 = vpop.f32.mrf.mxu1  ;;  %v12705_v58 = vor.u32 %v17560_v9, %v12704_v6  ;;  %v18608_v38 = vld [vmem:[%s23493_s1 + $0x2068] sm:$0xff]  ;;  %v18597_v54 = vld [vmem:[%s23493_s1 + $0x2010] sm:$0xff]  ;;  %v18603_v6 = vld [vmem:[%s23493_s1 + $0x2040] sm:$0xff] }
 0x3e9   :  { %11949 = vmatpush.bf16.msrb.mxu3 %v18593_v45  ;;  %v11652_v13 = vadd.f32 %v11651_v48, %v11638_v52  ;;  %v18624_v45 = vld [vmem:[%s23493_s1 + $0x20e8] sm:$0xff]  ;;  %v18613_v39 = vld [vmem:[%s23493_s1 + $0x2090] sm:$0xff]  ;;  %v18619_v9 = vld [vmem:[%s23493_s1 + $0x20c0] sm:$0xff] }
 0x3ea   :  { %11908 = vmatpush.bf16.msrb.mxu0 %v18568_v7  ;;  %v18596_v48 = vld [vmem:[%s23493_s1 + $0x2008] sm:$0xff] }
 0x3eb   :  { %11936 = vmatpush.bf16.msrb.mxu2 %v18584_v59 }
 0x3ec   :  { %11922 = vmatpush.bf16.msrb.mxu1 %v18576_v28  ;;  %v18599_v28 = vld [vmem:[%s23493_s1 + $0x2020] sm:$0xff] }
 0x3ed   :  { %11950 = vmatpush.bf16.msrb.mxu3 %v18592_v60  ;;  %v11665_v23 = vpop.f32.mrf.mxu2  ;;  %v18615_v60 = vld [vmem:[%s23493_s1 + $0x20a0] sm:$0xff] }
 0x3ee   :  { %11909 = vmatpush.bf16.msrb.mxu0 %v18567_v21  ;;  %v11666_v47 = vadd.f32 %v11665_v23, %v11652_v13  ;;  %v18607_v21 = vld [vmem:[%s23493_s1 + $0x2060] sm:$0xff]  ;;  %v18612_v13 = vld [vmem:[%s23493_s1 + $0x2088] sm:$0xff] }
 0x3ef   :  { %11937 = vmatpush.bf16.msrb.mxu2 %v18583_v34  ;;  %v11679_v4 = vpop.f32.mrf.mxu3  ;;  %v18623_v34 = vld [vmem:[%s23493_s1 + $0x20e0] sm:$0xff] }
 0x3f0   :  { %11923 = vmatpush.bf16.msrb.mxu1 %v18575_v36  ;;  %v22931_v63 = vadd.f32 %v11679_v4, %v11666_v47  ;;  %v18595_v47 = vld [vmem:[%s23493_s1 + $0x2000] sm:$0xff]  ;;  %v18634_v4 = vld [vmem:[%s23493_s1 + $0x2138] sm:$0xff] }
 0x3f1   :  { %11951 = vmatpush.bf16.msrb.mxu3 %v18591_v16 }
 0x3f2   :  { %11910 = vmatpush.bf16.msrb.mxu0 %v18566_v41  ;;  %v18606_v41 = vld [vmem:[%s23493_s1 + $0x2058] sm:$0xff] }
 0x3f3   :  { %11938 = vmatpush.bf16.msrb.mxu2 %v18582_v3  ;;  %v18622_v3 = vld [vmem:[%s23493_s1 + $0x20d8] sm:$0xff] }
 0x3f4   :  { %11924 = vmatpush.bf16.msrb.mxu1 %v18574_v1 }
 0x3f5   :  { %11952 = vmatpush.bf16.msrb.mxu3 %v18590_v11 }
 0x3f6   :  { %11911 = vmatpush.bf16.msrb.mxu0 %v18565_v24  ;;  %v18605_v24 = vld [vmem:[%s23493_s1 + $0x2050] sm:$0xff] }
 0x3f7   :  { %11939 = vmatpush.bf16.msrb.mxu2 %v18581_v17  ;;  %v18621_v17 = vld [vmem:[%s23493_s1 + $0x20d0] sm:$0xff] }
 0x3f8   :  { %11925 = vmatpush.bf16.msrb.mxu1 %v18573_v19 }
 0x3f9   :  { %11953 = vmatpush.bf16.msrb.mxu3 %v18589_v49 }
 0x3fa   :  { %11912 = vmatpush.bf16.msrb.mxu0 %v18564_v56  ;;  %v18604_v56 = vld [vmem:[%s23493_s1 + $0x2048] sm:$0xff] }
 0x3fb   :  { %11940 = vmatpush.bf16.msrb.mxu2 %v18580_v42  ;;  %v18620_v42 = vld [vmem:[%s23493_s1 + $0x20c8] sm:$0xff] }
 0x3fc   :  { %11926 = vmatpush.bf16.msrb.mxu1 %v18572_v31  ;;  %v18611_v31 = vld [vmem:[%s23493_s1 + $0x2080] sm:$0xff] }
 0x3fd   :  { %11954 = vmatpush.bf16.msrb.mxu3 %v18588_v10 }
 0x3fe   :  { %11913 = vmatpush.bf16.msrb.mxu0 %v18563_v15  ;;  %v11691_v7 = vpop.f32.mrf.mxu0  ;;  %v18650_v15 = vld [vmem:[%s23493_s1 + $0x21b8] sm:$0xff] }
 0x3ff   :  { %11941 = vmatpush.bf16.msrb.mxu2 %v18579_v61  ;;  %v11692_v59 = vadd.f32 %v11691_v7, %v22899_v18  ;;  %v12720_v61 = vld [vmem:[%s23494_s0 + $0x200] sm:$0xf] }
 0x400   :  { %11927 = vmatpush.bf16.msrb.mxu1 %v18571_v26  ;;  %v11705_v0 = vpop.f32.mrf.mxu1  ;;  %v17491_v26 = vld [vmem:[%s23494_s0 + $0x20c] sm:$0xf]  ;;  %v18639_v7 = vld [vmem:[%s23493_s1 + $0x2160] sm:$0xff] }
 0x401   :  { %11955 = vmatpush.bf16.msrb.mxu3 %v18587_v51  ;;  %11914 = vmatmul.bf16.vlgmr.msrb.gmra.mxu0 %v12705_v58  ;;  %v11706_v12 = vadd.f32 %v11705_v0, %v11692_v59  ;;  %v12730_v51 = vld [vmem:[%s23494_s0 + $0x44c] sm:$0xf0]  ;;  %v12725_v58 = vor.u32 %v17490_v32, %v12722_v35  ;;  %v18655_v59 = vld [vmem:[%s23493_s1 + $0x21e0] sm:$0xff]  ;;  %v18638_v0 = vld [vmem:[%s23493_s1 + $0x2158] sm:$0xff] }
 0x402   :  { %11962 = vmatpush.bf16.msra.mxu0 %v18602_v5  ;;  %11942 = vmatmul.bf16.vlgmr.msrb.gmra.mxu2 %v12713_v22  ;;  %v12728_v5 = vld [vmem:[%s23494_s0 + $0x208] sm:$0xf]  ;;  %v12733_v22 = vor.u32 %v17491_v26, %v12730_v51  ;;  %v18663_v26 = vld [vmem:[%s23493_s1 + $0x2220] sm:$0xff] }
 0x403   :  { %11990 = vmatpush.bf16.msra.mxu2 %v18618_v55  ;;  %11928 = vmatmul.bf16.vlgmr.msrb.gmra.mxu1 %v12709_v33  ;;  %v17563_v55 = vld [vmem:[%s23494_s0 + $0x448] sm:$0xf0]  ;;  %v18641_v33 = vld [vmem:[%s23493_s1 + $0x2170] sm:$0xff]  ;;  %v18679_v51 = vld [vmem:[%s23493_s1 + $0x22a0] sm:$0xff] }
 0x404   :  { %11976 = vmatpush.bf16.msra.mxu1 %v18610_v53  ;;  %11956 = vmatmul.bf16.vlgmr.msrb.gmra.mxu3 %v12717_v8  ;;  %v12729_v50 = vor.u32 %v17563_v55, %v12728_v5  ;;  %v18633_v53 = vld [vmem:[%s23493_s1 + $0x2130] sm:$0xff]  ;;  %v18672_v32 = vld [vmem:[%s23493_s1 + $0x2268] sm:$0xff] }
 0x405   :  { %12004 = vmatpush.bf16.msra.mxu3 %v18626_v40  ;;  %v11719_v36 = vpop.f32.mrf.mxu2  ;;  %v18649_v40 = vld [vmem:[%s23493_s1 + $0x21b0] sm:$0xff]  ;;  %v18688_v35 = vld [vmem:[%s23493_s1 + $0x22e8] sm:$0xff] }
 0x406   :  { %11963 = vmatpush.bf16.msra.mxu0 %v18601_v43  ;;  %v11720_v16 = vadd.f32 %v11719_v36, %v11706_v12  ;;  %v11693_v29 = vpop.f32.mrf.mxu0  ;;  %v18657_v8 = vld [vmem:[%s23493_s1 + $0x21f0] sm:$0xff]  ;;  %v18632_v43 = vld [vmem:[%s23493_s1 + $0x2128] sm:$0xff]  ;;  %v18654_v12 = vld [vmem:[%s23493_s1 + $0x21d8] sm:$0xff] }
 0x407   :  { %11991 = vmatpush.bf16.msra.mxu2 %v18617_v25  ;;  %v11733_v62 = vpop.f32.mrf.mxu3  ;;  %v11694_v1 = vadd.f32 %v11693_v29, %v22931_v63  ;;  %v17562_v63 = vld [vmem:[%s23494_s0 + $0x440] sm:$0xf0]  ;;  %v18648_v25 = vld [vmem:[%s23493_s1 + $0x21a8] sm:$0xff]  ;;  %v18637_v36 = vld [vmem:[%s23493_s1 + $0x2150] sm:$0xff] }
 0x408   :  { %11977 = vmatpush.bf16.msra.mxu1 %v18609_v14  ;;  %v23025_v11 = vadd.f32 %v11733_v62, %v11720_v16  ;;  %v11707_v52 = vpop.f32.mrf.mxu1  ;;  %v12721_v30 = vor.u32 %v17562_v63, %v12720_v61  ;;  %v18640_v14 = vld [vmem:[%s23493_s1 + $0x2168] sm:$0xff]  ;;  %v18653_v16 = vld [vmem:[%s23493_s1 + $0x21d0] sm:$0xff] }
 0x409   :  { %12005 = vmatpush.bf16.msra.mxu3 %v18625_v46  ;;  %v11708_v18 = vadd.f32 %v11707_v52, %v11694_v1  ;;  %v18656_v46 = vld [vmem:[%s23493_s1 + $0x21e8] sm:$0xff]  ;;  %v18627_v1 = vld [vmem:[%s23493_s1 + $0x2100] sm:$0xff]  ;;  %v12736_v52 = vld [vmem:[%s23494_s0 + $0x210] sm:$0xf] }
 0x40a   :  { %11964 = vmatpush.bf16.msra.mxu0 %v18600_v20  ;;  %v18636_v29 = vld [vmem:[%s23493_s1 + $0x2148] sm:$0xff]  ;;  %v18665_v61 = vld [vmem:[%s23493_s1 + $0x2230] sm:$0xff] }
 0x40b   :  { %11992 = vmatpush.bf16.msra.mxu2 %v18616_v44  ;;  %v18652_v62 = vld [vmem:[%s23493_s1 + $0x21c8] sm:$0xff]  ;;  %v18681_v63 = vld [vmem:[%s23493_s1 + $0x22b0] sm:$0xff] }
 0x40c   :  { %11978 = vmatpush.bf16.msra.mxu1 %v18608_v38  ;;  %v18631_v38 = vld [vmem:[%s23493_s1 + $0x2120] sm:$0xff]  ;;  %v18673_v5 = vld [vmem:[%s23493_s1 + $0x2270] sm:$0xff] }
 0x40d   :  { %12006 = vmatpush.bf16.msra.mxu3 %v18624_v45  ;;  %v11721_v19 = vpop.f32.mrf.mxu2  ;;  %v18647_v45 = vld [vmem:[%s23493_s1 + $0x21a0] sm:$0xff]  ;;  %v18689_v55 = vld [vmem:[%s23493_s1 + $0x22f0] sm:$0xff] }
 0x40e   :  { %11965 = vmatpush.bf16.msra.mxu0 %v18599_v28  ;;  %v11722_v49 = vadd.f32 %v11721_v19, %v11708_v18  ;;  %v18630_v28 = vld [vmem:[%s23493_s1 + $0x2118] sm:$0xff]  ;;  %v17564_v18 = vld [vmem:[%s23494_s0 + $0x450] sm:$0xf0] }
 0x40f   :  { %11993 = vmatpush.bf16.msra.mxu2 %v18615_v60  ;;  %v11735_v23 = vpop.f32.mrf.mxu3  ;;  %v18646_v60 = vld [vmem:[%s23493_s1 + $0x2198] sm:$0xff]  ;;  %v17492_v19 = vld [vmem:[%s23494_s0 + $0x214] sm:$0xf] }
 0x410   :  { %11979 = vmatpush.bf16.msra.mxu1 %v18607_v21  ;;  %v23057_v10 = vadd.f32 %v11735_v23, %v11722_v49  ;;  %v12738_v49 = vld [vmem:[%s23494_s0 + $0x454] sm:$0xf0]  ;;  %v12737_v23 = vor.u32 %v17564_v18, %v12736_v52  ;;  %v18705_v52 = vld [vmem:[%s23493_s1 + $0x2370] sm:$0xff] }
 0x411   :  { %12007 = vmatpush.bf16.msra.mxu3 %v18623_v34  ;;  %v18721_v18 = vld [vmem:[%s23493_s1 + $0x23f0] sm:$0xff] }
 0x412   :  { %11966 = vmatpush.bf16.msra.mxu0 %v18598_v2  ;;  %v18629_v2 = vld [vmem:[%s23493_s1 + $0x2110] sm:$0xff] }
 0x413   :  { %11994 = vmatpush.bf16.msra.mxu2 %v18614_v57  ;;  %v18645_v57 = vld [vmem:[%s23493_s1 + $0x2190] sm:$0xff] }
 0x414   :  { %11980 = vmatpush.bf16.msra.mxu1 %v18606_v41  ;;  %v18628_v41 = vld [vmem:[%s23493_s1 + $0x2108] sm:$0xff] }
 0x415   :  { %12008 = vmatpush.bf16.msra.mxu3 %v18622_v3  ;;  %v18644_v3 = vld [vmem:[%s23493_s1 + $0x2188] sm:$0xff] }
 0x416   :  { %11967 = vmatpush.bf16.msra.mxu0 %v18597_v54  ;;  %v18666_v54 = vld [vmem:[%s23493_s1 + $0x2238] sm:$0xff] }
 0x417   :  { %11995 = vmatpush.bf16.msra.mxu2 %v18613_v39  ;;  %v18682_v39 = vld [vmem:[%s23493_s1 + $0x22b8] sm:$0xff] }
 0x418   :  { %11981 = vmatpush.bf16.msra.mxu1 %v18605_v24  ;;  %v12744_v24 = vld [vmem:[%s23494_s0 + $0x218] sm:$0xf] }
 0x419   :  { %12009 = vmatpush.bf16.msra.mxu3 %v18621_v17  ;;  %v17565_v17 = vld [vmem:[%s23494_s0 + $0x458] sm:$0xf0] }
 0x41a   :  { %11968 = vmatpush.bf16.msra.mxu0 %v18596_v48  ;;  %v18635_v48 = vld [vmem:[%s23493_s1 + $0x2140] sm:$0xff] }
 0x41b   :  { %11996 = vmatpush.bf16.msra.mxu2 %v18612_v13  ;;  %v18651_v13 = vld [vmem:[%s23493_s1 + $0x21c0] sm:$0xff] }
 0x41c   :  { %11982 = vmatpush.bf16.msra.mxu1 %v18604_v56  ;;  %v17493_v56 = vld [vmem:[%s23494_s0 + $0x21c] sm:$0xf] }
 0x41d   :  { %12010 = vmatpush.bf16.msra.mxu3 %v18620_v42  ;;  %v12746_v42 = vld [vmem:[%s23494_s0 + $0x45c] sm:$0xf0] }
 0x41e   :  { %11969 = vmatpush.bf16.msra.mxu0 %v18595_v47  ;;  %v11747_v20 = vpop.f32.mrf.mxu0  ;;  %v12745_v47 = vor.u32 %v17565_v17, %v12744_v24  ;;  %v18696_v24 = vld [vmem:[%s23493_s1 + $0x2328] sm:$0xff] }
 0x41f   :  { %11997 = vmatpush.bf16.msra.mxu2 %v18611_v31  ;;  %v23126_v44 = vadd.f32 %v11747_v20, %v23025_v11  ;;  %v18643_v11 = vld [vmem:[%s23493_s1 + $0x2180] sm:$0xff]  ;;  %v18674_v31 = vld [vmem:[%s23493_s1 + $0x2278] sm:$0xff]  ;;  %v18712_v17 = vld [vmem:[%s23493_s1 + $0x23a8] sm:$0xff] }
 0x420   :  { %11983 = vmatpush.bf16.msra.mxu1 %v18603_v6  ;;  %v18664_v6 = vld [vmem:[%s23493_s1 + $0x2228] sm:$0xff]  ;;  %v18659_v20 = vld [vmem:[%s23493_s1 + $0x2200] sm:$0xff] }
 0x421   :  { %12011 = vmatpush.bf16.msra.mxu3 %v18619_v9  ;;  %11970 = vmatmul.bf16.vlgmr.msra.gmra.mxu0 %v12721_v30  ;;  %v18680_v9 = vld [vmem:[%s23493_s1 + $0x22a8] sm:$0xff]  ;;  %v18671_v30 = vld [vmem:[%s23493_s1 + $0x2260] sm:$0xff] }
 0x422   :  { %12018 = vmatpush.bf16.msrb.mxu0 %v18634_v4  ;;  %11998 = vmatmul.bf16.vlgmr.msra.gmra.mxu2 %v12729_v50  ;;  %v12741_v4 = vor.u32 %v17492_v19, %v12738_v49  ;;  %v18687_v50 = vld [vmem:[%s23493_s1 + $0x22e0] sm:$0xff] }
 0x423   :  { %12046 = vmatpush.bf16.msrb.mxu2 %v18650_v15  ;;  %11984 = vmatmul.bf16.vlgmr.msra.gmra.mxu1 %v12725_v58  ;;  %v12749_v15 = vor.u32 %v17493_v56, %v12746_v42  ;;  %v18670_v58 = vld [vmem:[%s23493_s1 + $0x2258] sm:$0xff]  ;;  %v18695_v19 = vld [vmem:[%s23493_s1 + $0x2320] sm:$0xff] }
 0x424   :  { %12032 = vmatpush.bf16.msrb.mxu1 %v18642_v37  ;;  %12012 = vmatmul.bf16.vlgmr.msra.gmra.mxu3 %v12733_v22  ;;  %v18662_v37 = vld [vmem:[%s23493_s1 + $0x2218] sm:$0xff]  ;;  %v18711_v49 = vld [vmem:[%s23493_s1 + $0x23a0] sm:$0xff] }
 0x425   :  { %12060 = vmatpush.bf16.msrb.mxu3 %v18658_v27  ;;  %v18678_v27 = vld [vmem:[%s23493_s1 + $0x2298] sm:$0xff]  ;;  %v18703_v56 = vld [vmem:[%s23493_s1 + $0x2360] sm:$0xff] }
 0x426   :  { %12019 = vmatpush.bf16.msrb.mxu0 %v18633_v53  ;;  %v11749_v21 = vpop.f32.mrf.mxu0  ;;  %v18686_v22 = vld [vmem:[%s23493_s1 + $0x22d8] sm:$0xff]  ;;  %v18661_v53 = vld [vmem:[%s23493_s1 + $0x2210] sm:$0xff]  ;;  %v18719_v42 = vld [vmem:[%s23493_s1 + $0x23e0] sm:$0xff] }
 0x427   :  { %12047 = vmatpush.bf16.msrb.mxu2 %v18649_v40  ;;  %v23153_v34 = vadd.f32 %v11749_v21, %v23057_v10  ;;  %v18690_v10 = vld [vmem:[%s23493_s1 + $0x22f8] sm:$0xff]  ;;  %v18677_v40 = vld [vmem:[%s23493_s1 + $0x2290] sm:$0xff]  ;;  %v18683_v21 = vld [vmem:[%s23493_s1 + $0x22c0] sm:$0xff] }
 0x428   :  { %12033 = vmatpush.bf16.msrb.mxu1 %v18641_v33  ;;  %v18669_v33 = vld [vmem:[%s23493_s1 + $0x2250] sm:$0xff] }
 0x429   :  { %12061 = vmatpush.bf16.msrb.mxu3 %v18657_v8  ;;  %v18685_v8 = vld [vmem:[%s23493_s1 + $0x22d0] sm:$0xff] }
 0x42a   :  { %12020 = vmatpush.bf16.msrb.mxu0 %v18632_v43  ;;  %v18660_v43 = vld [vmem:[%s23493_s1 + $0x2208] sm:$0xff] }
 0x42b   :  { %12048 = vmatpush.bf16.msrb.mxu2 %v18648_v25  ;;  %v18676_v25 = vld [vmem:[%s23493_s1 + $0x2288] sm:$0xff] }
 0x42c   :  { %12034 = vmatpush.bf16.msrb.mxu1 %v18640_v14  ;;  %v18668_v14 = vld [vmem:[%s23493_s1 + $0x2248] sm:$0xff] }
 0x42d   :  { %12062 = vmatpush.bf16.msrb.mxu3 %v18656_v46  ;;  %v18684_v46 = vld [vmem:[%s23493_s1 + $0x22c8] sm:$0xff] }
 0x42e   :  { %12021 = vmatpush.bf16.msrb.mxu0 %v18631_v38  ;;  %v18675_v38 = vld [vmem:[%s23493_s1 + $0x2280] sm:$0xff] }
 0x42f   :  { %12049 = vmatpush.bf16.msrb.mxu2 %v18647_v45  ;;  %v18698_v45 = vld [vmem:[%s23493_s1 + $0x2338] sm:$0xff] }
 0x430   :  { %12035 = vmatpush.bf16.msrb.mxu1 %v18639_v7  ;;  %v18714_v7 = vld [vmem:[%s23493_s1 + $0x23b8] sm:$0xff] }
 0x431   :  { %12063 = vmatpush.bf16.msrb.mxu3 %v18655_v59  ;;  %v12752_v59 = vld [vmem:[%s23494_s0 + $0x220] sm:$0xf] }
 0x432   :  { %12022 = vmatpush.bf16.msrb.mxu0 %v18630_v28  ;;  %v17566_v28 = vld [vmem:[%s23494_s0 + $0x460] sm:$0xf0] }
 0x433   :  { %12050 = vmatpush.bf16.msrb.mxu2 %v18646_v60  ;;  %v12760_v60 = vld [vmem:[%s23494_s0 + $0x228] sm:$0xf] }
 0x434   :  { %12036 = vmatpush.bf16.msrb.mxu1 %v18638_v0  ;;  %v17567_v0 = vld [vmem:[%s23494_s0 + $0x468] sm:$0xf0] }
 0x435   :  { %12064 = vmatpush.bf16.msrb.mxu3 %v18654_v12  ;;  %v18667_v12 = vld [vmem:[%s23493_s1 + $0x2240] sm:$0xff] }
 0x436   :  { %12023 = vmatpush.bf16.msrb.mxu0 %v18629_v2  ;;  %v17494_v2 = vld [vmem:[%s23494_s0 + $0x224] sm:$0xf] }
 0x437   :  { %12051 = vmatpush.bf16.msrb.mxu2 %v18645_v57  ;;  %v12754_v57 = vld [vmem:[%s23494_s0 + $0x464] sm:$0xf0] }
 0x438   :  { %12037 = vmatpush.bf16.msrb.mxu1 %v18637_v36  ;;  %v17495_v36 = vld [vmem:[%s23494_s0 + $0x22c] sm:$0xf] }
 0x439   :  { %12065 = vmatpush.bf16.msrb.mxu3 %v18653_v16  ;;  %v12762_v16 = vld [vmem:[%s23494_s0 + $0x46c] sm:$0xf0] }
 0x43a   :  { %12024 = vmatpush.bf16.msrb.mxu0 %v18628_v41  ;;  %v12753_v41 = vor.u32 %v17566_v28, %v12752_v59  ;;  %v11761_v59 = vpop.f32.mrf.mxu1  ;;  %v11775_v28 = vpop.f32.mrf.mxu2 }
 0x43b   :  { %12052 = vmatpush.bf16.msrb.mxu2 %v18644_v3  ;;  %v12761_v3 = vor.u32 %v17567_v0, %v12760_v60  ;;  %v18724_v60 = vld [vmem:[%s23493_s1 + $0x2408] sm:$0xff]  ;;  %v11789_v0 = vpop.f32.mrf.mxu3 }
 0x43c   :  { %12038 = vmatpush.bf16.msrb.mxu1 %v18636_v29  ;;  %v18706_v29 = vld [vmem:[%s23493_s1 + $0x2378] sm:$0xff] }
 0x43d   :  { %12066 = vmatpush.bf16.msrb.mxu3 %v18652_v62  ;;  %v18722_v62 = vld [vmem:[%s23493_s1 + $0x23f8] sm:$0xff] }
 0x43e   :  { %12025 = vmatpush.bf16.msrb.mxu0 %v18627_v1  ;;  %v12757_v1 = vor.u32 %v17494_v2, %v12754_v57  ;;  %v17570_v2 = vld [vmem:[%s23494_s0 + $0x480] sm:$0xf0] }
 0x43f   :  { %12053 = vmatpush.bf16.msrb.mxu2 %v18643_v11  ;;  %v12765_v11 = vor.u32 %v17495_v36, %v12762_v16 }
 0x440   :  { %12039 = vmatpush.bf16.msrb.mxu1 %v18635_v48  ;;  %v18704_v48 = vld [vmem:[%s23493_s1 + $0x2368] sm:$0xff] }
 0x441   :  { %12067 = vmatpush.bf16.msrb.mxu3 %v18651_v13  ;;  %12026 = vmatmul.bf16.vlgmr.msrb.gmra.mxu0 %v12737_v23  ;;  %v18720_v13 = vld [vmem:[%s23493_s1 + $0x23e8] sm:$0xff]  ;;  %v18694_v23 = vld [vmem:[%s23493_s1 + $0x2318] sm:$0xff] }
 0x442   :  { %12074 = vmatpush.bf16.msra.mxu0 %v18666_v54  ;;  %12054 = vmatmul.bf16.vlgmr.msrb.gmra.mxu2 %v12745_v47  ;;  %v18697_v54 = vld [vmem:[%s23493_s1 + $0x2330] sm:$0xff]  ;;  %v18710_v47 = vld [vmem:[%s23493_s1 + $0x2398] sm:$0xff]  ;;  %v11763_v36 = vpop.f32.mrf.mxu1  ;;  %v11777_v16 = vpop.f32.mrf.mxu2 }
 0x443   :  { %12102 = vmatpush.bf16.msra.mxu2 %v18682_v39  ;;  %12040 = vmatmul.bf16.vlgmr.msrb.gmra.mxu1 %v12741_v4  ;;  %v18713_v39 = vld [vmem:[%s23493_s1 + $0x23b0] sm:$0xff] }
 0x444   :  { %12088 = vmatpush.bf16.msra.mxu1 %v18674_v31  ;;  %12068 = vmatmul.bf16.vlgmr.msrb.gmra.mxu3 %v12749_v15  ;;  %v18702_v31 = vld [vmem:[%s23493_s1 + $0x2358] sm:$0xff]  ;;  %v18693_v4 = vld [vmem:[%s23493_s1 + $0x2310] sm:$0xff] }
 0x445   :  { %12116 = vmatpush.bf16.msra.mxu3 %v18690_v10  ;;  %v18718_v10 = vld [vmem:[%s23493_s1 + $0x23d8] sm:$0xff]  ;;  %v18709_v15 = vld [vmem:[%s23493_s1 + $0x2390] sm:$0xff] }
 0x446   :  { %12075 = vmatpush.bf16.msra.mxu0 %v18665_v61  ;;  %v18701_v61 = vld [vmem:[%s23493_s1 + $0x2350] sm:$0xff] }
 0x447   :  { %12103 = vmatpush.bf16.msra.mxu2 %v18681_v63  ;;  %v18717_v63 = vld [vmem:[%s23493_s1 + $0x23d0] sm:$0xff] }
 0x448   :  { %12089 = vmatpush.bf16.msra.mxu1 %v18673_v5  ;;  %v18692_v5 = vld [vmem:[%s23493_s1 + $0x2308] sm:$0xff] }
 0x449   :  { %12117 = vmatpush.bf16.msra.mxu3 %v18689_v55  ;;  %v18708_v55 = vld [vmem:[%s23493_s1 + $0x2388] sm:$0xff] }
 0x44a   :  { %12076 = vmatpush.bf16.msra.mxu0 %v18664_v6  ;;  %v18700_v6 = vld [vmem:[%s23493_s1 + $0x2348] sm:$0xff] }
 0x44b   :  { %12104 = vmatpush.bf16.msra.mxu2 %v18680_v9  ;;  %v18716_v9 = vld [vmem:[%s23493_s1 + $0x23c8] sm:$0xff] }
 0x44c   :  { %12090 = vmatpush.bf16.msra.mxu1 %v18672_v32  ;;  %v18691_v32 = vld [vmem:[%s23493_s1 + $0x2300] sm:$0xff] }
 0x44d   :  { %12118 = vmatpush.bf16.msra.mxu3 %v18688_v35  ;;  %v18707_v35 = vld [vmem:[%s23493_s1 + $0x2380] sm:$0xff] }
 0x44e   :  { %12077 = vmatpush.bf16.msra.mxu0 %v18663_v26  ;;  %v18730_v26 = vld [vmem:[%s23493_s1 + $0x2438] sm:$0xff] }
 0x44f   :  { %12105 = vmatpush.bf16.msra.mxu2 %v18679_v51  ;;  %v12768_v51 = vld [vmem:[%s23494_s0 + $0x230] sm:$0xf] }
 0x450   :  { %12091 = vmatpush.bf16.msra.mxu1 %v18671_v30  ;;  %v17568_v30 = vld [vmem:[%s23494_s0 + $0x470] sm:$0xf0] }
 0x451   :  { %12119 = vmatpush.bf16.msra.mxu3 %v18687_v50  ;;  %v12776_v50 = vld [vmem:[%s23494_s0 + $0x238] sm:$0xf] }
 0x452   :  { %12078 = vmatpush.bf16.msra.mxu0 %v18662_v37  ;;  %v17569_v37 = vld [vmem:[%s23494_s0 + $0x478] sm:$0xf0] }
 0x453   :  { %12106 = vmatpush.bf16.msra.mxu2 %v18678_v27  ;;  %v18699_v27 = vld [vmem:[%s23493_s1 + $0x2340] sm:$0xff] }
 0x454   :  { %12092 = vmatpush.bf16.msra.mxu1 %v18670_v58  ;;  %v18715_v58 = vld [vmem:[%s23493_s1 + $0x23c0] sm:$0xff] }
 0x455   :  { %12120 = vmatpush.bf16.msra.mxu3 %v18686_v22  ;;  %v17496_v22 = vld [vmem:[%s23494_s0 + $0x234] sm:$0xf] }
 0x456   :  { %12079 = vmatpush.bf16.msra.mxu0 %v18661_v53  ;;  %v12770_v53 = vld [vmem:[%s23494_s0 + $0x474] sm:$0xf0] }
 0x457   :  { %12107 = vmatpush.bf16.msra.mxu2 %v18677_v40  ;;  %v17497_v40 = vld [vmem:[%s23494_s0 + $0x23c] sm:$0xf] }
 0x458   :  { %12093 = vmatpush.bf16.msra.mxu1 %v18669_v33  ;;  %v12778_v33 = vld [vmem:[%s23494_s0 + $0x47c] sm:$0xf0] }
 0x459   :  { %12121 = vmatpush.bf16.msra.mxu3 %v18685_v8  ;;  %v12769_v8 = vor.u32 %v17568_v30, %v12768_v51 }
 0x45a   :  { %12080 = vmatpush.bf16.msra.mxu0 %v18660_v43  ;;  %v12777_v43 = vor.u32 %v17569_v37, %v12776_v50 }
 0x45b   :  { %12108 = vmatpush.bf16.msra.mxu2 %v18676_v25  ;;  %v12773_v25 = vor.u32 %v17496_v22, %v12770_v53 }
 0x45c   :  { %12094 = vmatpush.bf16.msra.mxu1 %v18668_v14  ;;  %v12781_v14 = vor.u32 %v17497_v40, %v12778_v33 }
 0x45d   :  { %12122 = vmatpush.bf16.msra.mxu3 %v18684_v46  ;;  %v18729_v46 = vld [vmem:[%s23493_s1 + $0x2430] sm:$0xff] }
 0x45e   :  { %12081 = vmatpush.bf16.msra.mxu0 %v18659_v20  ;;  %v18728_v20 = vld [vmem:[%s23493_s1 + $0x2428] sm:$0xff] }
 0x45f   :  { %12109 = vmatpush.bf16.msra.mxu2 %v18675_v38  ;;  %v18727_v38 = vld [vmem:[%s23493_s1 + $0x2420] sm:$0xff] }
 0x460   :  { %12095 = vmatpush.bf16.msra.mxu1 %v18667_v12  ;;  %v18723_v12 = vld [vmem:[%s23493_s1 + $0x2400] sm:$0xff] }
 0x461   :  { %12123 = vmatpush.bf16.msra.mxu3 %v18683_v21  ;;  %12082 = vmatmul.bf16.vlgmr.msra.gmra.mxu0 %v12753_v41  ;;  %v12784_v21 = vld [vmem:[%s23494_s0 + $0x240] sm:$0xf]  ;;  %v11803_v41 = vpop.f32.mrf.mxu0 }
 0x462   :  { %12130 = vmatpush.bf16.msrb.mxu0 %v18698_v45  ;;  %12110 = vmatmul.bf16.vlgmr.msra.gmra.mxu2 %v12761_v3  ;;  %v18726_v45 = vld [vmem:[%s23493_s1 + $0x2418] sm:$0xff]  ;;  %v12785_v57 = vor.u32 %v17570_v2, %v12784_v21  ;;  %v11791_v3 = vpop.f32.mrf.mxu3 }
 0x463   :  { %12158 = vmatpush.bf16.msrb.mxu2 %v18714_v7  ;;  %12096 = vmatmul.bf16.vlgmr.msra.gmra.mxu1 %v12757_v1  ;;  %v18725_v7 = vld [vmem:[%s23493_s1 + $0x2410] sm:$0xff] }
 0x464   :  { %12144 = vmatpush.bf16.msrb.mxu1 %v18706_v29  ;;  %12124 = vmatmul.bf16.vlgmr.msra.gmra.mxu3 %v12765_v11  ;;  %v11817_v29 = vpop.f32.mrf.mxu1 }
 0x465   :  { %12172 = vmatpush.bf16.msrb.mxu3 %v18722_v62  ;;  %v11831_v62 = vpop.f32.mrf.mxu2 }
 0x466   :  { %12131 = vmatpush.bf16.msrb.mxu0 %v18697_v54 }
 0x467   :  { %12159 = vmatpush.bf16.msrb.mxu2 %v18713_v39 }
 0x468   :  { %12145 = vmatpush.bf16.msrb.mxu1 %v18705_v52 }
 0x469   :  { %12173 = vmatpush.bf16.msrb.mxu3 %v18721_v18  ;;  %v11805_v1 = vpop.f32.mrf.mxu0 }
 0x46a   :  { %12132 = vmatpush.bf16.msrb.mxu0 %v18696_v24  ;;  %v11845_v11 = vpop.f32.mrf.mxu3 }
 0x46b   :  { %12160 = vmatpush.bf16.msrb.mxu2 %v18712_v17 }
 0x46c   :  { %12146 = vmatpush.bf16.msrb.mxu1 %v18704_v48  ;;  %v11819_v54 = vpop.f32.mrf.mxu1 }
 0x46d   :  { %12174 = vmatpush.bf16.msrb.mxu3 %v18720_v13  ;;  %v11833_v39 = vpop.f32.mrf.mxu2 }
 0x46e   :  { %12133 = vmatpush.bf16.msrb.mxu0 %v18695_v19 }
 0x46f   :  { %12161 = vmatpush.bf16.msrb.mxu2 %v18711_v49  ;;  %v11762_v49 = vadd.f32 %v11761_v59, %v23126_v44 }
 0x470   :  { %12147 = vmatpush.bf16.msrb.mxu1 %v18703_v56 }
 0x471   :  { %12175 = vmatpush.bf16.msrb.mxu3 %v18719_v42  ;;  %v11859_v52 = vpop.f32.mrf.mxu0 }
 0x472   :  { %12134 = vmatpush.bf16.msrb.mxu0 %v18694_v23  ;;  %v11847_v18 = vpop.f32.mrf.mxu3  ;;  %v11776_v23 = vadd.f32 %v11775_v28, %v11762_v49 }
 0x473   :  { %12162 = vmatpush.bf16.msrb.mxu2 %v18710_v47 }
 0x474   :  { %12148 = vmatpush.bf16.msrb.mxu1 %v18702_v31  ;;  %v11873_v24 = vpop.f32.mrf.mxu1  ;;  %v11790_v31 = vadd.f32 %v11789_v0, %v11776_v23 }
 0x475   :  { %12176 = vmatpush.bf16.msrb.mxu3 %v18718_v10  ;;  %v11887_v17 = vpop.f32.mrf.mxu2 }
 0x476   :  { %12135 = vmatpush.bf16.msrb.mxu0 %v18693_v4  ;;  %v11764_v4 = vadd.f32 %v11763_v36, %v23153_v34 }
 0x477   :  { %12163 = vmatpush.bf16.msrb.mxu2 %v18709_v15  ;;  %v11804_v15 = vadd.f32 %v11803_v41, %v11790_v31 }
 0x478   :  { %12149 = vmatpush.bf16.msrb.mxu1 %v18701_v61 }
 0x479   :  { %12177 = vmatpush.bf16.msrb.mxu3 %v18717_v63  ;;  %v11861_v48 = vpop.f32.mrf.mxu0  ;;  %v11778_v63 = vadd.f32 %v11777_v16, %v11764_v4 }
 0x47a   :  { %12136 = vmatpush.bf16.msrb.mxu0 %v18692_v5  ;;  %v11901_v13 = vpop.f32.mrf.mxu3 }
 0x47b   :  { %12164 = vmatpush.bf16.msrb.mxu2 %v18708_v55  ;;  %v11818_v55 = vadd.f32 %v11817_v29, %v11804_v15 }
 0x47c   :  { %12150 = vmatpush.bf16.msrb.mxu1 %v18700_v6  ;;  %v11875_v19 = vpop.f32.mrf.mxu1 }
 0x47d   :  { %12178 = vmatpush.bf16.msrb.mxu3 %v18716_v9  ;;  %v11889_v56 = vpop.f32.mrf.mxu2  ;;  %v11792_v9 = vadd.f32 %v11791_v3, %v11778_v63 }
 0x47e   :  { %12137 = vmatpush.bf16.msrb.mxu0 %v18691_v32  ;;  %v11832_v32 = vadd.f32 %v11831_v62, %v11818_v55 }
 0x47f   :  { %12165 = vmatpush.bf16.msrb.mxu2 %v18707_v35  ;;  %v11806_v35 = vadd.f32 %v11805_v1, %v11792_v9 }
 0x480   :  { %12151 = vmatpush.bf16.msrb.mxu1 %v18699_v27  ;;  %v11846_v51 = vadd.f32 %v11845_v11, %v11832_v32 }
 0x481   :  { %12179 = vmatpush.bf16.msrb.mxu3 %v18715_v58  ;;  %12138 = vmatmul.bf16.vlgmr.msrb.gmra.mxu0 %v12769_v8  ;;  %v11915_v42 = vpop.f32.mrf.mxu0  ;;  %v11820_v50 = vadd.f32 %v11819_v54, %v11806_v35 }
 0x482   :  { %12186 = vmatpush.bf16.msra.mxu0 %v18730_v26  ;;  %12166 = vmatmul.bf16.vlgmr.msrb.gmra.mxu2 %v12777_v43  ;;  %v11903_v47 = vpop.f32.mrf.mxu3  ;;  %v11860_v37 = vadd.f32 %v11859_v52, %v11846_v51 }
 0x483   :  { %12152 = vmatmul.bf16.vlgmr.msrb.gmra.mxu1 %v12773_v25  ;;  %v11834_v27 = vadd.f32 %v11833_v39, %v11820_v50 }
 0x484   :  { %12180 = vmatmul.bf16.vlgmr.msrb.gmra.mxu3 %v12781_v14  ;;  %v11929_v10 = vpop.f32.mrf.mxu1  ;;  %v11874_v22 = vadd.f32 %v11873_v24, %v11860_v37 }
 0x485   :  { %v11943_v61 = vpop.f32.mrf.mxu2  ;;  %v11848_v34 = vadd.f32 %v11847_v18, %v11834_v27 }
 0x486   :  { %12187 = vmatpush.bf16.msra.mxu0 %v18729_v46  ;;  %v11888_v40 = vadd.f32 %v11887_v17, %v11874_v22 }
 0x487   :  { %v11862_v8 = vadd.f32 %v11861_v48, %v11848_v34 }
 0x488   :  { %v11902_v25 = vadd.f32 %v11901_v13, %v11888_v40 }
 0x489   :  { %v11917_v5 = vpop.f32.mrf.mxu0  ;;  %v11876_v46 = vadd.f32 %v11875_v19, %v11862_v8 }
 0x48a   :  { %12188 = vmatpush.bf16.msra.mxu0 %v18728_v20  ;;  %v11957_v6 = vpop.f32.mrf.mxu3  ;;  %v11916_v20 = vadd.f32 %v11915_v42, %v11902_v25 }
 0x48c   :  { %v11931_v26 = vpop.f32.mrf.mxu1 }
 0x48d   :  { %v11945_v44 = vpop.f32.mrf.mxu2 }
 0x48e   :  { %12189 = vmatpush.bf16.msra.mxu0 %v18727_v38  ;;  %v11890_v38 = vadd.f32 %v11889_v56, %v11876_v46 }
 0x492   :  { %12190 = vmatpush.bf16.msra.mxu0 %v18726_v45  ;;  %v11959_v58 = vpop.f32.mrf.mxu3 }
 0x496   :  { %12191 = vmatpush.bf16.msra.mxu0 %v18725_v7  ;;  %v11930_v7 = vadd.f32 %v11929_v10, %v11916_v20 }
 0x498   :  { %v11944_v0 = vadd.f32 %v11943_v61, %v11930_v7 }
 0x49a   :  { %12192 = vmatpush.bf16.msra.mxu0 %v18724_v60  ;;  %v11904_v60 = vadd.f32 %v11903_v47, %v11890_v38  ;;  %v11958_v2 = vadd.f32 %v11957_v6, %v11944_v0 }
 0x49e   :  { %12193 = vmatpush.bf16.msra.mxu0 %v18723_v12  ;;  %v11971_v30 = vpop.f32.mrf.mxu0  ;;  %v11918_v12 = vadd.f32 %v11917_v5, %v11904_v60 }
 0x49f   :  { %v11972_v16 = vadd.f32 %v11971_v30, %v11958_v2 }
 0x4a0   :  { %v11985_v53 = vpop.f32.mrf.mxu1  ;;  %v11932_v36 = vadd.f32 %v11931_v26, %v11918_v12 }
 0x4a1   :  { %12194 = vmatmul.bf16.vlgmr.msra.gmra.mxu0 %v12785_v57  ;;  %v11986_v62 = vadd.f32 %v11985_v53, %v11972_v16 }
 0x4a2   :  { %v11946_v3 = vadd.f32 %v11945_v44, %v11932_v36 }
 0x4a4   :  { %v11960_v11 = vadd.f32 %v11959_v58, %v11946_v3 }
 0x4a5   :  { %v11999_v33 = vpop.f32.mrf.mxu2 }
 0x4a6   :  { %v11973_v43 = vpop.f32.mrf.mxu0  ;;  %v12000_v54 = vadd.f32 %v11999_v33, %v11986_v62 }
 0x4a7   :  { %v12013_v14 = vpop.f32.mrf.mxu3  ;;  %v11974_v39 = vadd.f32 %v11973_v43, %v11960_v11 }
 0x4a8   :  { %v11987_v45 = vpop.f32.mrf.mxu1  ;;  %v12014_v18 = vadd.f32 %v12013_v14, %v12000_v54 }
 0x4a9   :  { %v11988_v48 = vadd.f32 %v11987_v45, %v11974_v39 }
 0x4ad   :  { %v12001_v59 = vpop.f32.mrf.mxu2 }
 0x4ae   :  { %v12002_v19 = vadd.f32 %v12001_v59, %v11988_v48 }
 0x4af   :  { %v12015_v21 = vpop.f32.mrf.mxu3 }
 0x4b0   :  { %v12016_v23 = vadd.f32 %v12015_v21, %v12002_v19 }
 0x4be   :  { %v12027_v28 = vpop.f32.mrf.mxu0 }
 0x4bf   :  { %v12028_v13 = vadd.f32 %v12027_v28, %v12014_v18 }
 0x4c0   :  { %v12041_v57 = vpop.f32.mrf.mxu1 }
 0x4c1   :  { %v12042_v56 = vadd.f32 %v12041_v57, %v12028_v13 }
 0x4c5   :  { %v12055_v41 = vpop.f32.mrf.mxu2 }
 0x4c6   :  { %v12029_v29 = vpop.f32.mrf.mxu0  ;;  %v12056_v47 = vadd.f32 %v12055_v41, %v12042_v56 }
 0x4c7   :  { %v12069_v1 = vpop.f32.mrf.mxu3  ;;  %v12030_v10 = vadd.f32 %v12029_v29, %v12016_v23 }
 0x4c8   :  { %v12043_v52 = vpop.f32.mrf.mxu1  ;;  %v12070_v15 = vadd.f32 %v12069_v1, %v12056_v47 }
 0x4c9   :  { %v12044_v63 = vadd.f32 %v12043_v52, %v12030_v10 }
 0x4cd   :  { %v12057_v24 = vpop.f32.mrf.mxu2 }
 0x4ce   :  { %v12058_v55 = vadd.f32 %v12057_v24, %v12044_v63 }
 0x4cf   :  { %v12071_v49 = vpop.f32.mrf.mxu3 }
 0x4d0   :  { %v12072_v26 = vadd.f32 %v12071_v49, %v12058_v55 }
 0x4de   :  { %v12083_v17 = vpop.f32.mrf.mxu0 }
 0x4df   :  { %v12084_v5 = vadd.f32 %v12083_v17, %v12070_v15 }
 0x4e0   :  { %v12097_v42 = vpop.f32.mrf.mxu1 }
 0x4e1   :  { %v12098_v9 = vadd.f32 %v12097_v42, %v12084_v5 }
 0x4e5   :  { %v12111_v31 = vpop.f32.mrf.mxu2 }
 0x4e6   :  { %v12085_v4 = vpop.f32.mrf.mxu0  ;;  %v12112_v51 = vadd.f32 %v12111_v31, %v12098_v9 }
 0x4e7   :  { %v12125_v61 = vpop.f32.mrf.mxu3  ;;  %v12086_v44 = vadd.f32 %v12085_v4, %v12072_v26 }
 0x4e8   :  { %v12099_v6 = vpop.f32.mrf.mxu1  ;;  %v12126_v50 = vadd.f32 %v12125_v61, %v12112_v51 }
 0x4e9   :  { %v12100_v27 = vadd.f32 %v12099_v6, %v12086_v44 }
 0x4ed   :  { %v12113_v32 = vpop.f32.mrf.mxu2 }
 0x4ee   :  { %v12114_v53 = vadd.f32 %v12113_v32, %v12100_v27 }
 0x4ef   :  { %v12127_v30 = vpop.f32.mrf.mxu3 }
 0x4f0   :  { %v12128_v8 = vadd.f32 %v12127_v30, %v12114_v53 }
 0x4fe   :  { %v12139_v35 = vpop.f32.mrf.mxu0 }
 0x4ff   :  { %v12140_v58 = vadd.f32 %v12139_v35, %v12126_v50 }
 0x500   :  { %v12153_v37 = vpop.f32.mrf.mxu1 }
 0x501   :  { %v12154_v40 = vadd.f32 %v12153_v37, %v12140_v58 }
 0x505   :  { %v12167_v22 = vpop.f32.mrf.mxu2 }
 0x506   :  { %v12141_v34 = vpop.f32.mrf.mxu0  ;;  %v12168_v43 = vadd.f32 %v12167_v22, %v12154_v40 }
 0x507   :  { %v12181_v33 = vpop.f32.mrf.mxu3  ;;  %v12142_v25 = vadd.f32 %v12141_v34, %v12128_v8 }
 0x508   :  { %v12155_v14 = vpop.f32.mrf.mxu1  ;;  %v12182_v46 = vadd.f32 %v12181_v33, %v12168_v43 }
 0x509   :  { %v12156_v45 = vadd.f32 %v12155_v14, %v12142_v25 }
 0x50d   :  { %v12169_v20 = vpop.f32.mrf.mxu2 }
 0x50e   :  { %v12170_v59 = vadd.f32 %v12169_v20, %v12156_v45 }
 0x50f   :  { %v12183_v28 = vpop.f32.mrf.mxu3 }
 0x510   :  { %v12184_v60 = vadd.f32 %v12183_v28, %v12170_v59 }
 0x51e   :  { %v12195_v38 = vpop.f32.mrf.mxu0 }
 0x51f   :  { %v12196_v7 = vadd.f32 %v12195_v38, %v12182_v46 }
 0x521   :  { %12200 = vst [vmem:[%s23496_s3] sm:$0xff] %v12196_v7 }
 0x526   :  { %v12197_v0 = vpop.f32.mrf.mxu0 }
 0x527   :  { %v12198_v12 = vadd.f32 %v12197_v0, %v12184_v60 }
 0x529   :  { %12201 = vst [vmem:[%s23496_s3 + $0x8] sm:$0xff] %v12198_v12 }

</bundles_post_ra>
